<compile_context>
chip_gen: v7x
topology: tpu7x:2x2x1
jax: 0.10.0
libtpu: 0.0.40
codegen_flags: <defaults>
</compile_context>

<pallas_src>
import jax
import jax.numpy as jnp
from jax.experimental import pallas as pl
from jax.experimental.pallas import tpu as pltpu

# ----------------------------- model dimensions -----------------------------
NUM_IN = 5440
H1 = 1600
H2 = 400
NUM_OUT = 10

# Padded / tiled dimensions (all (8, 128)-friendly).
KP1 = 5632          # 5440 -> 44 * 128
NP1 = 1792          # 1600 -> 14 * 128
TK1 = 2816          # KP1 // 2  -> 2 K-steps (big tiles: per-step DMA >> overhead)
TN1 = 896           # NP1 // 2  -> 2 N-tiles of layer-1 output
NP2 = 512           # 400 -> 4 * 128
NP3 = 128           # 10  -> 128

NJ = NP1 // TN1     # 2
NK = KP1 // TK1     # 2


def _round_up(x, m):
    return (x + m - 1) // m * m


# ------------------------------ fused kernel --------------------------------
def _fused_kernel(x_ref, w1_ref, b1_ref, w2_ref, b2_ref, w3_ref, b3_ref,
                  o_ref, acc1_ref, acc2_ref):
    """Grid (j, k):  j tiles the 1792-wide layer-1 output, k tiles the
    5632-wide layer-1 reduction.

      acc1 (Mp, TN1)  f32 : layer-1 partial sums for the current j tile.
      acc2 (Mp, NP2)  f32 : layer-2 pre-activation, accumulated across j.

    All matmuls are native bf16 x bf16 -> f32 on the MXU.
    """
    j = pl.program_id(0)
    k = pl.program_id(1)
    nj = pl.num_programs(0)
    nk = pl.num_programs(1)

    @pl.when(jnp.logical_and(j == 0, k == 0))
    def _():
        acc2_ref[...] = jnp.zeros_like(acc2_ref)

    @pl.when(k == 0)
    def _():
        acc1_ref[...] = jnp.zeros_like(acc1_ref)

    # Layer 1 partial product for this (j, k) tile: bf16 x bf16 -> f32.
    acc1_ref[...] += jnp.dot(
        x_ref[...], w1_ref[...], preferred_element_type=jnp.float32
    )

    # Finished one h1 tile: bias + ReLU, then feed it straight into layer 2.
    @pl.when(k == nk - 1)
    def _():
        h1 = jnp.maximum(acc1_ref[...] + b1_ref[...], 0.0)
        acc2_ref[...] += jnp.dot(
            h1.astype(jnp.bfloat16), w2_ref[...],
            preferred_element_type=jnp.float32,
        )

    # Last grid step: finish layer 2 (bias + ReLU) and run layer 3.
    @pl.when(jnp.logical_and(j == nj - 1, k == nk - 1))
    def _():
        h2 = jnp.maximum(acc2_ref[...] + b2_ref[...], 0.0)
        y = jnp.dot(
            h2.astype(jnp.bfloat16), w3_ref[...],
            preferred_element_type=jnp.float32,
        )
        o_ref[...] = y + b3_ref[...]


def _fused_call(xp, w1p, b1p, w2p, b2p, w3p, b3p):
    Mp = xp.shape[0]
    return pl.pallas_call(
        _fused_kernel,
        out_shape=jax.ShapeDtypeStruct((Mp, NP3), jnp.float32),
        grid_spec=pltpu.PrefetchScalarGridSpec(
            num_scalar_prefetch=0,
            grid=(NJ, NK),
            in_specs=[
                pl.BlockSpec((Mp, TK1), lambda j, k: (0, k)),    # x slab (bf16, tiny)
                pl.BlockSpec((TK1, TN1), lambda j, k: (k, j)),   # W1 tile (bf16)
                pl.BlockSpec((1, TN1), lambda j, k: (0, j)),     # b1 tile (f32)
                pl.BlockSpec((TN1, NP2), lambda j, k: (j, 0)),   # W2 slice (bf16)
                pl.BlockSpec((1, NP2), lambda j, k: (0, 0)),     # b2 (f32)
                pl.BlockSpec((NP2, NP3), lambda j, k: (0, 0)),   # W3 (bf16)
                pl.BlockSpec((1, NP3), lambda j, k: (0, 0)),     # b3 (f32)
            ],
            out_specs=pl.BlockSpec((Mp, NP3), lambda j, k: (0, 0)),
            scratch_shapes=[
                pltpu.VMEM((Mp, TN1), jnp.float32),   # acc1
                pltpu.VMEM((Mp, NP2), jnp.float32),   # acc2
            ],
        ),
        compiler_params=pltpu.CompilerParams(
            # Both axes feed shared accumulators / a constant output block.
            dimension_semantics=("arbitrary", "arbitrary"),
            vmem_limit_bytes=32 * 1024 * 1024,
        ),
    )(xp, w1p, b1p, w2p, b2p, w3p, b3p)


# ------------------------------ parameter setup ------------------------------
def init_linear_params(key, in_features, out_features):
    """Deterministic init mimicking PyTorch nn.Linear (uniform +/- 1/sqrt(in)).
    Weight stored transposed (in, out) so the kernel computes y = x @ W_t + b."""
    kw, kb = jax.random.split(key)
    bound = 1.0 / jnp.sqrt(jnp.float32(in_features))
    w_t = jax.random.uniform(
        kw, (in_features, out_features), jnp.float32, -bound, bound
    )
    b = jax.random.uniform(kb, (out_features,), jnp.float32, -bound, bound)
    return w_t, b


def prepare_params(params):
    """One-time padding + bf16 cast of the weights (hoisted out of the forward
    path).  Biases stay f32."""
    (w1, b1), (w2, b2), (w3, b3) = params
    w1p = (
        jnp.zeros((KP1, NP1), jnp.bfloat16)
        .at[:NUM_IN, :H1].set(w1.astype(jnp.bfloat16))
    )
    b1p = jnp.zeros((1, NP1), jnp.float32).at[0, :H1].set(b1)
    w2p = (
        jnp.zeros((NP1, NP2), jnp.bfloat16)
        .at[:H1, :H2].set(w2.astype(jnp.bfloat16))
    )
    b2p = jnp.zeros((1, NP2), jnp.float32).at[0, :H2].set(b2)
    w3p = (
        jnp.zeros((NP2, NP3), jnp.bfloat16)
        .at[:H2, :NUM_OUT].set(w3.astype(jnp.bfloat16))
    )
    b3p = jnp.zeros((1, NP3), jnp.float32).at[0, :NUM_OUT].set(b3)
    return (w1p, b1p, w2p, b2p, w3p, b3p)


# --------------------------------- forward -----------------------------------
@jax.jit
def summary_net_forward(x, prepared):
    """x: (batch, 5440) f32 -> (batch, 10) f32."""
    w1p, b1p, w2p, b2p, w3p, b3p = prepared
    M = x.shape[0]
    Mp = _round_up(max(M, 8), 8)
    # Pad + cast the (tiny) activation directly in bf16 so the kernel's LHS is
    # already MXU-native and the pre-kernel pad writes half the bytes.
    xp = (
        jnp.zeros((Mp, KP1), jnp.bfloat16)
        .at[:M, :NUM_IN].set(x.astype(jnp.bfloat16))
    )
    y = _fused_call(xp, w1p, b1p, w2p, b2p, w3p, b3p)   # (Mp, NP3)
    return y[:M, :NUM_OUT]


# ----------------------------------- main ------------------------------------
if __name__ == "__main__":
    batch = 2

    root = jax.random.PRNGKey(0)
    kx, k1, k2, k3 = jax.random.split(root, 4)

    params = [
        init_linear_params(k1, NUM_IN, H1),
        init_linear_params(k2, H1, H2),
        init_linear_params(k3, H2, NUM_OUT),
    ]
    prepared = prepare_params(params)

    x = jax.random.normal(kx, (batch, NUM_IN), jnp.float32)

    y = summary_net_forward(x, prepared)
    y = jax.block_until_ready(y)

    # Reference in plain JAX with the same bf16 rounding of weights and
    # activations the kernel uses (bf16 x bf16 -> f32 dots), so only the
    # accumulation/tile order differs.
    w1p, b1p, w2p, b2p, w3p, b3p = prepared
    w1b = w1p[:NUM_IN, :H1]
    w2b = w2p[:H1, :H2]
    w3b = w3p[:H2, :NUM_OUT]
    b1f, b2f, b3f = params[0][1], params[1][1], params[2][1]

    xb = x.astype(jnp.bfloat16)
    h1 = jnp.maximum(
        jnp.dot(xb, w1b, preferred_element_type=jnp.float32) + b1f, 0.0)
    h2 = jnp.maximum(
        jnp.dot(h1.astype(jnp.bfloat16), w2b,
                preferred_element_type=jnp.float32) + b2f, 0.0)
    ref = jnp.dot(h2.astype(jnp.bfloat16), w3b,
                  preferred_element_type=jnp.float32) + b3f

    assert y.shape == (batch, NUM_OUT)
    assert jnp.allclose(y, ref, atol=1e-3, rtol=1e-3), (
        float(jnp.max(jnp.abs(y - ref)))
    )

    print("KERNEL_OK")
</pallas_src>

<mosaic_0001>
module attributes {stable_mosaic.version = 11 : i64} {
  func.func @_fused_kernel(%arg0: i32, %arg1: i32, %arg2: memref<8x2816xbf16, #tpu.memory_space<vmem>>, %arg3: memref<2816x896xbf16, #tpu.memory_space<vmem>>, %arg4: memref<1x896xf32, #tpu.memory_space<vmem>>, %arg5: memref<896x512xbf16, #tpu.memory_space<vmem>>, %arg6: memref<1x512xf32, #tpu.memory_space<vmem>>, %arg7: memref<512x128xbf16, #tpu.memory_space<vmem>>, %arg8: memref<1x128xf32, #tpu.memory_space<vmem>>, %arg9: memref<8x128xf32, #tpu.memory_space<vmem>>, %arg10: memref<8x896xf32, #tpu.memory_space<vmem>>, %arg11: memref<8x512xf32, #tpu.memory_space<vmem>>) attributes {dimension_semantics = [#tpu.dimension_semantics<arbitrary>, #tpu.dimension_semantics<arbitrary>], iteration_bounds = array<i64: 2, 2>, scalar_prefetch = 0 : i64, scratch_operands = 2 : i64, tpu.core_type = #tpu.core_type<tc>, window_params = [{transform_indices = @transform_0, window_bounds = array<i64: 8, 2816>}, {transform_indices = @transform_1, window_bounds = array<i64: 2816, 896>}, {transform_indices = @transform_2, window_bounds = array<i64: 1, 896>}, {transform_indices = @transform_3, window_bounds = array<i64: 896, 512>}, {pipeline_mode = #tpu.pipeline_mode<synchronous>, transform_indices = @transform_4, window_bounds = array<i64: 1, 512>}, {pipeline_mode = #tpu.pipeline_mode<synchronous>, transform_indices = @transform_5, window_bounds = array<i64: 512, 128>}, {pipeline_mode = #tpu.pipeline_mode<synchronous>, transform_indices = @transform_6, window_bounds = array<i64: 1, 128>}, {pipeline_mode = #tpu.pipeline_mode<synchronous>, transform_indices = @transform_7, window_bounds = array<i64: 8, 128>}]} {
    %c0_i32 = arith.constant 0 : i32
    %0 = arith.cmpi eq, %arg0, %c0_i32 : i32
    %c0_i32_0 = arith.constant 0 : i32
    %1 = arith.cmpi eq, %arg1, %c0_i32_0 : i32
    %2 = arith.andi %0, %1 : i1
    %3 = arith.extui %2 : i1 to i32
    %c0_i32_1 = arith.constant 0 : i32
    %4 = arith.cmpi ne, %3, %c0_i32_1 : i32
    scf.if %4 {
      %cst_15 = arith.constant 0.000000e+00 : f32
      %22 = vector.broadcast %cst_15 : f32 to vector<8x512xf32>
      %c0_16 = arith.constant 0 : index
      %c0_17 = arith.constant 0 : index
      %23 = vector.load %arg11[%c0_16, %c0_17] : memref<8x512xf32, #tpu.memory_space<vmem>>, vector<8x512xf32>
      tpu.vector_store %arg11[%c0_16, %c0_17], %22 {strides = array<i32>} : memref<8x512xf32, #tpu.memory_space<vmem>>, vector<8x512xf32>,
    } else {
    }
    %c0_i32_2 = arith.constant 0 : i32
    %5 = arith.cmpi eq, %arg1, %c0_i32_2 : i32
    %6 = arith.extui %5 : i1 to i32
    %c0_i32_3 = arith.constant 0 : i32
    %7 = arith.cmpi ne, %6, %c0_i32_3 : i32
    scf.if %7 {
      %cst_15 = arith.constant 0.000000e+00 : f32
      %22 = vector.broadcast %cst_15 : f32 to vector<8x896xf32>
      %c0_16 = arith.constant 0 : index
      %c0_17 = arith.constant 0 : index
      %23 = vector.load %arg10[%c0_16, %c0_17] : memref<8x896xf32, #tpu.memory_space<vmem>>, vector<8x896xf32>
      tpu.vector_store %arg10[%c0_16, %c0_17], %22 {strides = array<i32>} : memref<8x896xf32, #tpu.memory_space<vmem>>, vector<8x896xf32>,
    } else {
    }
    %c0 = arith.constant 0 : index
    %c0_4 = arith.constant 0 : index
    %8 = vector.load %arg10[%c0, %c0_4] : memref<8x896xf32, #tpu.memory_space<vmem>>, vector<8x896xf32>
    %c0_5 = arith.constant 0 : index
    %c0_6 = arith.constant 0 : index
    %9 = vector.load %arg2[%c0_5, %c0_6] : memref<8x2816xbf16, #tpu.memory_space<vmem>>, vector<8x2816xbf16>
    %c0_7 = arith.constant 0 : index
    %c0_8 = arith.constant 0 : index
    %10 = vector.load %arg3[%c0_7, %c0_8] : memref<2816x896xbf16, #tpu.memory_space<vmem>>, vector<2816x896xbf16>
    %cst = arith.constant dense<0.000000e+00> : vector<8x896xf32>
    %11 = tpu.matmul %9, %10, %cst {dimension_numbers = #tpu.dot_dimension_numbers<[1], [0], [0], [1], [0, 0, 1, 1], [], []>} : vector<8x2816xbf16>, vector<2816x896xbf16>, vector<8x896xf32> -> vector<8x896xf32>
    %12 = arith.addf %8, %11 : vector<8x896xf32>
    %c0_9 = arith.constant 0 : index
    %c0_10 = arith.constant 0 : index
    %13 = vector.load %arg10[%c0_9, %c0_10] : memref<8x896xf32, #tpu.memory_space<vmem>>, vector<8x896xf32>
    tpu.vector_store %arg10[%c0_9, %c0_10], %12 {strides = array<i32>} : memref<8x896xf32, #tpu.memory_space<vmem>>, vector<8x896xf32>,
    %c1_i32 = arith.constant 1 : i32
    %14 = arith.cmpi eq, %arg1, %c1_i32 : i32
    %15 = arith.extui %14 : i1 to i32
    %c0_i32_11 = arith.constant 0 : i32
    %16 = arith.cmpi ne, %15, %c0_i32_11 : i32
    scf.if %16 {
      %c0_15 = arith.constant 0 : index
      %c0_16 = arith.constant 0 : index
      %22 = vector.load %arg10[%c0_15, %c0_16] : memref<8x896xf32, #tpu.memory_space<vmem>>, vector<8x896xf32>
      %c0_17 = arith.constant 0 : index
      %c0_18 = arith.constant 0 : index
      %23 = vector.load %arg4[%c0_17, %c0_18] : memref<1x896xf32, #tpu.memory_space<vmem>>, vector<1x896xf32>
      %24 = vector.broadcast %23 : vector<1x896xf32> to vector<8x896xf32>
      %25 = arith.addf %22, %24 : vector<8x896xf32>
      %cst_19 = arith.constant 0.000000e+00 : f32
      %26 = vector.broadcast %cst_19 : f32 to vector<8x896xf32>
      %27 = arith.maximumf %25, %26 : vector<8x896xf32>
      %c0_20 = arith.constant 0 : index
      %c0_21 = arith.constant 0 : index
      %28 = vector.load %arg11[%c0_20, %c0_21] : memref<8x512xf32, #tpu.memory_space<vmem>>, vector<8x512xf32>
      %29 = arith.truncf %27 : vector<8x896xf32> to vector<8x896xbf16>
      %c0_22 = arith.constant 0 : index
      %c0_23 = arith.constant 0 : index
      %30 = vector.load %arg5[%c0_22, %c0_23] : memref<896x512xbf16, #tpu.memory_space<vmem>>, vector<896x512xbf16>
      %cst_24 = arith.constant dense<0.000000e+00> : vector<8x512xf32>
      %31 = tpu.matmul %29, %30, %cst_24 {dimension_numbers = #tpu.dot_dimension_numbers<[1], [0], [0], [1], [0, 0, 1, 1], [], []>} : vector<8x896xbf16>, vector<896x512xbf16>, vector<8x512xf32> -> vector<8x512xf32>
      %32 = arith.addf %28, %31 : vector<8x512xf32>
      %c0_25 = arith.constant 0 : index
      %c0_26 = arith.constant 0 : index
      %33 = vector.load %arg11[%c0_25, %c0_26] : memref<8x512xf32, #tpu.memory_space<vmem>>, vector<8x512xf32>
      tpu.vector_store %arg11[%c0_25, %c0_26], %32 {strides = array<i32>} : memref<8x512xf32, #tpu.memory_space<vmem>>, vector<8x512xf32>,
    } else {
    }
    %c1_i32_12 = arith.constant 1 : i32
    %17 = arith.cmpi eq, %arg0, %c1_i32_12 : i32
    %c1_i32_13 = arith.constant 1 : i32
    %18 = arith.cmpi eq, %arg1, %c1_i32_13 : i32
    %19 = arith.andi %17, %18 : i1
    %20 = arith.extui %19 : i1 to i32
    %c0_i32_14 = arith.constant 0 : i32
    %21 = arith.cmpi ne, %20, %c0_i32_14 : i32
    scf.if %21 {
      %c0_15 = arith.constant 0 : index
      %c0_16 = arith.constant 0 : index
      %22 = vector.load %arg11[%c0_15, %c0_16] : memref<8x512xf32, #tpu.memory_space<vmem>>, vector<8x512xf32>
      %c0_17 = arith.constant 0 : index
      %c0_18 = arith.constant 0 : index
      %23 = vector.load %arg6[%c0_17, %c0_18] : memref<1x512xf32, #tpu.memory_space<vmem>>, vector<1x512xf32>
      %24 = vector.broadcast %23 : vector<1x512xf32> to vector<8x512xf32>
      %25 = arith.addf %22, %24 : vector<8x512xf32>
      %cst_19 = arith.constant 0.000000e+00 : f32
      %26 = vector.broadcast %cst_19 : f32 to vector<8x512xf32>
      %27 = arith.maximumf %25, %26 : vector<8x512xf32>
      %28 = arith.truncf %27 : vector<8x512xf32> to vector<8x512xbf16>
      %c0_20 = arith.constant 0 : index
      %c0_21 = arith.constant 0 : index
      %29 = vector.load %arg7[%c0_20, %c0_21] : memref<512x128xbf16, #tpu.memory_space<vmem>>, vector<512x128xbf16>
      %cst_22 = arith.constant dense<0.000000e+00> : vector<8x128xf32>
      %30 = tpu.matmul %28, %29, %cst_22 {dimension_numbers = #tpu.dot_dimension_numbers<[1], [0], [0], [1], [0, 0, 1, 1], [], []>} : vector<8x512xbf16>, vector<512x128xbf16>, vector<8x128xf32> -> vector<8x128xf32>
      %c0_23 = arith.constant 0 : index
      %c0_24 = arith.constant 0 : index
      %31 = vector.load %arg8[%c0_23, %c0_24] : memref<1x128xf32, #tpu.memory_space<vmem>>, vector<1x128xf32>
      %32 = vector.broadcast %31 : vector<1x128xf32> to vector<8x128xf32>
      %33 = arith.addf %30, %32 : vector<8x128xf32>
      %c0_25 = arith.constant 0 : index
      %c0_26 = arith.constant 0 : index
      %34 = vector.load %arg9[%c0_25, %c0_26] : memref<8x128xf32, #tpu.memory_space<vmem>>, vector<8x128xf32>
      tpu.vector_store %arg9[%c0_25, %c0_26], %33 {strides = array<i32>} : memref<8x128xf32, #tpu.memory_space<vmem>>, vector<8x128xf32>,
    } else {
    }
    return
  }
  func.func @transform_0(%arg0: i32, %arg1: i32) -> (i32, i32) {
    %c0_i32 = arith.constant 0 : i32
    %c0_i32_0 = arith.constant 0 : i32
    return %c0_i32, %arg1 : i32, i32
  }
  func.func @transform_1(%arg0: i32, %arg1: i32) -> (i32, i32) {
    %c0_i32 = arith.constant 0 : i32
    return %arg1, %arg0 : i32, i32
  }
  func.func @transform_2(%arg0: i32, %arg1: i32) -> (i32, i32) {
    %c0_i32 = arith.constant 0 : i32
    %c0_i32_0 = arith.constant 0 : i32
    return %c0_i32, %arg0 : i32, i32
  }
  func.func @transform_3(%arg0: i32, %arg1: i32) -> (i32, i32) {
    %c0_i32 = arith.constant 0 : i32
    %c0_i32_0 = arith.constant 0 : i32
    return %arg0, %c0_i32 : i32, i32
  }
  func.func @transform_4(%arg0: i32, %arg1: i32) -> (i32, i32) {
    %c0_i32 = arith.constant 0 : i32
    %c0_i32_0 = arith.constant 0 : i32
    %c0_i32_1 = arith.constant 0 : i32
    return %c0_i32, %c0_i32_0 : i32, i32
  }
  func.func @transform_5(%arg0: i32, %arg1: i32) -> (i32, i32) {
    %c0_i32 = arith.constant 0 : i32
    %c0_i32_0 = arith.constant 0 : i32
    %c0_i32_1 = arith.constant 0 : i32
    return %c0_i32, %c0_i32_0 : i32, i32
  }
  func.func @transform_6(%arg0: i32, %arg1: i32) -> (i32, i32) {
    %c0_i32 = arith.constant 0 : i32
    %c0_i32_0 = arith.constant 0 : i32
    %c0_i32_1 = arith.constant 0 : i32
    return %c0_i32, %c0_i32_0 : i32, i32
  }
  func.func @transform_7(%arg0: i32, %arg1: i32) -> (i32, i32) {
    %c0_i32 = arith.constant 0 : i32
    %c0_i32_0 = arith.constant 0 : i32
    %c0_i32_1 = arith.constant 0 : i32
    return %c0_i32, %c0_i32_0 : i32, i32
  }
}

</mosaic_0001>

<bundles_post_ra>
// kernel: summary_net_forward.1
= control target key start
LH: loop header
LB: loop body
LE: loop exit
PB: predicated region body
PF: predicated region fallthrough
CT: control target
= control target key end

     0   :  { %s19026_s0 = inlined_call_operand.vmem [shape: bf16[8,5632], index: 0, kind: input, shape index: {}]   ;;  %s19027_s1 = inlined_call_operand.hbm [shape: bf16[5632,1792], index: 1, kind: input, shape index: {}]   ;;  %s19028_s2 = inlined_call_operand.hbm [shape: f32[1,1792], index: 2, kind: input, shape index: {}]   ;;  %s19029_s3 = inlined_call_operand.hbm [shape: bf16[1792,512], index: 3, kind: input, shape index: {}]   ;;  %s19030_s4 = inlined_call_operand.hbm [shape: f32[1,512], index: 4, kind: input, shape index: {}]   ;;  %s19031_s5 = inlined_call_operand.hbm [shape: bf16[512,128], index: 5, kind: input, shape index: {}]   ;;  %s19032_s6 = inlined_call_operand.hbm [shape: f32[1,128], index: 6, kind: input, shape index: {}]   ;;  %s19033_s7 = inlined_call_operand.vmem [shape: f32[8,128], index: 7, kind: output, shape index: {}]  }
   0x1   :  { %19057 = sst [smem:[#allocation29_spill]] %s19026_s0 }
   0x2   :  { %19058 = sst [smem:[#allocation30_spill]] %s19028_s2 }
   0x3   :  { %19059 = sst [smem:[#allocation31_spill]] %s19030_s4 }
   0x4   :  { %19060 = sst [smem:[#allocation32_spill]] %s19033_s7 }
   0x5   :  { %12 = vsyncpa [#allocation5], 0 }
   0x6   :  { %14 = vsyncpa [#allocation5 + $0x1], 0 }
   0x7   :  { %15 = vsyncpa [#allocation7], 0 }
   0x8   :  { %17 = vsyncpa [#allocation7 + $0x1], 0 }
   0x9   :  { %18 = vsyncpa [#allocation10], 0 }
   0xa   :  { %19 = vsyncpa [#allocation13], 0  ;;  %s16846_s24 = smov 0   ;;  %s16848_s25 = smov 0  }
   0xb   :  { %s16850_s26 = smov 0   ;;  %s16852_s27 = smov 0  }
   0xc   :  { %s16854_s28 = smov 0   ;;  %s16856_s29 = smov 0  }
   0xd   :  { %s16858_s30 = smov 0   ;;  %s16860_s8 = smov 0  }
   0xe   :  { %s16862_s9 = smov 0   ;;  %s16864_s10 = smov 0  }
   0xf   :  { %s16866_s11 = smov 0  }
  0x10 LB: > { %19061 = sst [smem:[#allocation18_spill]] %s16752_s25  ;;  %s19034_s12 = sadd.s32 4294967295, %s16788_s11   ;;  %s16788_s11 = sphi %s16866_s11, %s25_s11   ;;  %s16784_s10 = sphi %s16864_s10, %s19120_s10   ;;  %s16780_s9 = sphi %s16862_s9, %s19119_s9   ;;  %s16776_s8 = sphi %s16860_s8, %s19118_s8   ;;  %s16772_s30 = sphi %s16858_s30, %s19117_s30   ;;  %s16768_s29 = sphi %s16856_s29, %s19116_s29   ;;  %s16764_s28 = sphi %s16854_s28, %s19115_s28   ;;  %s16760_s27 = sphi %s16852_s27, %s19114_s27   ;;  %s16756_s26 = sphi %s16850_s26, %s19110_s26   ;;  %s16752_s25 = sphi %s16848_s25, %s19109_s25   ;;  %s16748_s24 = sphi %s16846_s24, %s19108_s24  }
  0x11   : > { %19062 = sst [smem:[#allocation19_spill]] %s16756_s26  ;;  %p85_p0 = scmp.ne.s32.totalorder %s16764_s28, %s16760_s27 }
  0x12   : > { %19063 = sst [smem:[#allocation20_spill]] %s16772_s30  ;;  %p16903_p1 = scmp.eq.s32.totalorder %s19034_s12, 0 }
  0x13   : > { %19064 = sst [smem:[#allocation21_spill]] %s16776_s8  ;;  %p12389_p2 = scmp.ge.s32.totalorder %s16788_s11, 1 }
  0x14   : > { %19065 = sst [smem:[#allocation22_spill]] %s16788_s11  ;;  %p232_p3 = scmp.lt.s32.totalorder %s16788_s11, 5 }
  0x15   : > { %s19066_s13 = scalar_select %p16903_p1, 1, 0 }
  0x16   : > { %p16911_p4 = por %p16903_p1, %p85_p0  ;;  %p16915_p5 = pnand %p12389_p2, %p232_p3 }
  0x17   : > { %19067 = sst [smem:[#allocation23_spill]] %s19066_s13  ;;  %s16790_s16 = smov [#allocation9]  }
  0x18   : > { %s19068_s14 = scalar_select %p16911_p4, 1, 0 }
  0x19   : > { %s19069_s15 = scalar_select %p16915_p5, 1, 0 }
  0x1a   : > { %s245_s17 = sshll.u32 %s16790_s16, 4  ;;  %p14233_p6 = pneg %p16915_p5  ;;  %s246_s17 = int_to_ptr.vmem [resolvable:$true] %s245_s17 }
  0x1b   : > { %s19071_s4 = sld [smem:[#allocation31_spill]] }
  0x1c   : > { %p16923_p7 = pnand %p14233_p6, %p16903_p1 }
  0x1e   : > { %s19070_s18 = scalar_select %p16923_p7, 1, 0 }
  0x1f   : > { %p16935_p9 = pneg %p16923_p7 }
  0x21   : > { %s16512_s21 = scalar_lea.hbm %s19071_s4, 64 }
  0x22   : > { %p16513_p8 = scmp.ne.s32.totalorder %s19071_s4, %s16512_s21  ;;  %p16519_p12 = scmp.lt.u32.totalorder %s16512_s21, %s19071_s4 }
  0x24   : > { %p16515_p10 = pnand %p16935_p9, %p16513_p8 }
  0x26   : > { %p16516_p11 = pneg %p16515_p10 }
  0x28   : > { %p16521_p13 = pnand %p16519_p12, %p16516_p11 }
  0x2a   : > { %16524 = shalt.err (!%p16521_p13)
}
  0x2b   : > { %s16525_s19 = scalar_lea.vmem %s246_s17, 64  ;;  %p16533_p6 = scmp.lt.s32.totalorder %s246_s17, %s246_s17 }
  0x2c   : > { %p16526_p0 = scmp.ne.s32.totalorder %s246_s17, %s16525_s19  ;;  %p16534_p4 = scmp.lt.s32.totalorder %s16525_s19, %s16525_s19 }
  0x2e   : > { %p16528_p2 = pnand %p16526_p0, %p16935_p9  ;;  %p16535_p5 = por %p16534_p4, %p16533_p6 }
  0x30   : > { %p16529_p3 = pneg %p16528_p2 }
  0x32   : > { %p16536_p1 = pnand %p16535_p5, %p16529_p3 }
  0x34   : > { %16539 = shalt.err (!%p16536_p1)
}
  0x35   : > { %14236 = dma.hbm_to_vmem [thread:$0]  (!%p16923_p7), %s19071_s4, 64, %s246_s17, [#allocation10]  }
  0x36   : > { %s34_s12 = sadd.s32 1, %s16780_s9  ;;  %s37_s21 = sadd.s32 1, %s16784_s10 }
  0x37   : > { %p35_p1 = scmp.ge.s32.totalorder %s34_s12, 2  ;;  %s72_s23 = sadd.s32 1, %s16768_s29 }
  0x38   : > { %p79_p4 = scmp.ne.s32.totalorder %s16768_s29, %s16764_s28  ;;  %p80_p5 = scmp.eq.s32.totalorder %s16788_s11, 0 }
  0x39   : > { %s19122_s12 = smov (%p35_p1, %s34_s12), 0  ;;  %s19124_s21 = smov (!%p35_p1, %s37_s21), %s16784_s10 }
  0x3a   : > { %19073 = sst [smem:[#allocation24_spill]] %s19122_s12  ;;  %s67_s16 = ssub.s32 %s16780_s9, %s19122_s12 }
  0x3b   : > { %p39_p8 = scmp.ge.s32.totalorder %s19124_s21, 2  ;;  %s98_s17 = sadd.s32 1, %s16756_s26 }
  0x3c   : > { %p16963_p10 = por %p80_p5, %p79_p4  ;;  %p105_p11 = scmp.ne.s32.totalorder %s16756_s26, %s16752_s25 }
  0x3d   : > { %s19126_s21 = smov (%p39_p8, %s19124_s21), 0  ;;  %p111_p13 = scmp.ne.s32.totalorder %s16752_s25, %s16748_s24 }
  0x3e   : > { %19075 = sst [smem:[#allocation25_spill]] %s19126_s21  ;;  %p16971_p12 = por %p105_p11, %p80_p5 }
  0x3f   : > { %s68_s22 = ssub.s32 %s16784_s10, %s19126_s21  ;;  %p14256_p0 = scmp.lt.s32.totalorder %s16788_s11, 4 }
  0x40   : > { %s69_s4 = sor.u32 %s68_s22, %s67_s16  ;;  %p96_p2 = scmp.eq.s32.totalorder %s68_s22, 0 }
  0x41   : > { %p70_p3 = scmp.eq.s32.totalorder %s69_s4, 0  ;;  %p19077_p6 = scmp.ne.s32.totalorder %s19066_s13, 0 }
  0x42   : > { %s16987_s7 = scalar_select %p96_p2, %s16756_s26, %s98_s17  }
  0x43   : > { %p16982_p1 = por %p111_p13, %p19077_p6  ;;  %p16994_p4 = pnand %p14256_p0, %p16963_p10 }
  0x44   : > { %19080 = sst [smem:[#allocation27_spill]] %s16987_s7  ;;  %s313_s24 = sand.u32 1, %s16788_s11  }
  0x45   : > { %s19078_s12 = scalar_select %p16982_p1, 1, 0 }
  0x46   : > { %s16990_s0 = scalar_select %p70_p3, %s16768_s29, %s72_s23  }
  0x47   : > { %19079 = sst [smem:[#allocation26_spill]] %s19078_s12  ;;  %s315_s21 = sand.u32 1, %s16756_s26  }
  0x48   : > { %19081 = sst [smem:[#allocation28_spill]] %s16990_s0  ;;  %s14210_s30 = smul.u32 7, %s315_s21 }
  0x49   : > { %s19082_s8 = scalar_select %p16994_p4, 1, 0 }
  0x4a   : > { %p17002_p5 = pnand %p14256_p0, %p16971_p12  ;;  %s13918_s16 = smul.u32 112, %s16784_s10 }
  0x4b   : > { %s19084_s2 = sld [smem:[#allocation30_spill]]  ;;  %s317_s19 = scalar_lea.vmem [#allocation6], %s14210_s30 }
  0x4c   : > { %s19083_s4 = scalar_select %p17002_p5, 1, 0 }
  0x4d   : > { %s325_s0 = sshll.u32 %s317_s19, 4  ;;  %s17014_s20 = smul.u32 1792, %s315_s21  ;;  %s17012_s0 = int_to_ptr.vmem [resolvable:$true] %s325_s0 }
  0x4e   : > { %s17016_s7 = scalar_lea.sflag [#allocation7], %s313_s24  ;;  %p19050_p10 = pneg %p17002_p5 }
  0x51   : > { %s17010_s23 = scalar_lea.hbm %s19084_s2, %s13918_s16  ;;  %s16545_s22 = scalar_lea.hbm %s19084_s2, 224 }
  0x52   : > { %s16540_s26 = scalar_lea.hbm %s17010_s23, 112  ;;  %p16546_p13 = scmp.lt.u32.totalorder %s17010_s23, %s19084_s2 }
  0x53   : > { %p16541_p8 = scmp.ne.s32.totalorder %s17010_s23, %s16540_s26  ;;  %p16547_p0 = scmp.lt.u32.totalorder %s16545_s22, %s16540_s26 }
  0x54   : > { %p16549_p3 = scmp.lt.u32.totalorder %s16540_s26, %s17010_s23 }
  0x55   : > { %p16543_p11 = pnand %p19050_p10, %p16541_p8  ;;  %p16548_p2 = por %p16547_p0, %p16546_p13 }
  0x57   : > { %p16544_p12 = pneg %p16543_p11  ;;  %p16550_p6 = por %p16549_p3, %p16548_p2 }
  0x59   : > { %p16551_p1 = pnand %p16550_p6, %p16544_p12 }
  0x5b   : > { %16554 = shalt.err (!%p16551_p1)
}
  0x5c   : > { %s16555_s21 = scalar_lea.vmem %s17012_s0, 112  ;;  %s16791_s24 = smov [#allocation6]  }
  0x5d   : > { %p16556_p8 = scmp.ne.s32.totalorder %s17012_s0, %s16555_s21  ;;  %s16560_s16 = sshll.u32 %s16791_s24, 4  ;;  %s16561_s16 = int_to_ptr.vmem [resolvable:$false] %s16560_s16 }
  0x5e   : > { %s16562_s17 = scalar_lea.vmem %s16561_s16, 224  ;;  %p16563_p7 = scmp.lt.s32.totalorder %s17012_s0, %s16561_s16 }
  0x5f   : > { %p16558_p11 = pnand %p16556_p8, %p19050_p10  ;;  %p16564_p13 = scmp.lt.s32.totalorder %s16562_s17, %s16555_s21 }
  0x61   : > { %p16559_p4 = pneg %p16558_p11  ;;  %p16565_p0 = por %p16564_p13, %p16563_p7 }
  0x63   : > { %p16566_p2 = pnand %p16565_p0, %p16559_p4 }
  0x65   : > { %16569 = shalt.err (!%p16566_p2)
}
  0x66   : > { %14249 = dma.hbm_to_vmem [thread:$0]  (!%p17002_p5), %s17010_s23, 112, %s17012_s0, %s17016_s7  }
  0x67   : > { %s16792_s26 = smov [#allocation11]   ;;  %s336_s30 = scalar_lea.vmem [#allocation8], %s17014_s20 }
  0x68   : > { %s255_s22 = sshll.u32 %s16792_s26, 4  ;;  %s344_s19 = sshll.u32 %s336_s30, 4  ;;  %s256_s22 = int_to_ptr.vmem [resolvable:$true] %s255_s22  ;;  %s17045_s19 = int_to_ptr.vmem [resolvable:$true] %s344_s19 }
  0x69   : > { %s16570_s16 = scalar_lea.hbm %s19031_s5, 4096 }
  0x6a   : > { %p16571_p7 = scmp.ne.s32.totalorder %s19031_s5, %s16570_s16  ;;  %p16577_p12 = scmp.lt.u32.totalorder %s16570_s16, %s19031_s5 }
  0x6c   : > { %p16573_p1 = pnand %p16571_p7, %p16935_p9 }
  0x6e   : > { %p16574_p4 = pneg %p16573_p1 }
  0x70   : > { %p16579_p3 = pnand %p16577_p12, %p16574_p4 }
  0x72   : > { %16582 = shalt.err (!%p16579_p3)
}
  0x73   : > { %s16583_s23 = scalar_lea.vmem %s256_s22, 4096  ;;  %p16591_p13 = scmp.lt.s32.totalorder %s256_s22, %s256_s22 }
  0x74   : > { %p16584_p6 = scmp.ne.s32.totalorder %s256_s22, %s16583_s23  ;;  %p16592_p0 = scmp.lt.s32.totalorder %s16583_s23, %s16583_s23 }
  0x76   : > { %p16586_p8 = pnand %p16584_p6, %p16935_p9  ;;  %p16593_p2 = por %p16592_p0, %p16591_p13 }
  0x78   : > { %p16587_p11 = pneg %p16586_p8 }
  0x7a   : > { %p16594_p10 = pnand %p16593_p2, %p16587_p11 }
  0x7c   : > { %16597 = shalt.err (!%p16594_p10)
}
  0x7d   : > { %s16793_s2 = smov 64   ;;  %s16794_s20 = smov 4  }
  0x7e   : > { %p19085_p7 = scmp.ne.s32.totalorder %s19070_s18, 0  ;;  %s16795_s30 = smov [#allocation12]  }
  0x7f   : > { %s269_s24 = sshll.u32 %s16795_s30, 4  ;;  %s289_s21 = sand.u32 1, %s16768_s29   ;;  %s270_s24 = int_to_ptr.vmem [resolvable:$true] %s269_s24 }
  0x80   : > { %14239 = dma.hbm_to_vmem [thread:$0]  (!%p19085_p7), %s19031_s5, 4096, %s256_s22, [#allocation10], %s16793_s2, %s16793_s2, %s16794_s20  }
  0x81   : > { %s16598_s0 = scalar_lea.hbm %s19032_s6, 16 }
  0x82   : > { %p16599_p10 = scmp.ne.s32.totalorder %s19032_s6, %s16598_s0  ;;  %p16605_p12 = scmp.lt.u32.totalorder %s16598_s0, %s19032_s6 }
  0x84   : > { %p16601_p1 = pnand %p16599_p10, %p16935_p9 }
  0x86   : > { %p16602_p4 = pneg %p16601_p1 }
  0x88   : > { %p16607_p3 = pnand %p16605_p12, %p16602_p4 }
  0x8a   : > { %16610 = shalt.err (!%p16607_p3)
}
  0x8b   : > { %s16611_s22 = scalar_lea.vmem %s270_s24, 16  ;;  %s16618_s2 = scalar_lea.vmem %s270_s24, 32 }
  0x8c   : > { %p16612_p6 = scmp.ne.s32.totalorder %s270_s24, %s16611_s22  ;;  %p16619_p13 = scmp.lt.s32.totalorder %s270_s24, %s270_s24 }
  0x8d   : > { %p16620_p0 = scmp.lt.s32.totalorder %s16618_s2, %s16611_s22 }
  0x8e   : > { %p16614_p8 = pnand %p16612_p6, %p16935_p9 }
  0x8f   : > { %p16621_p2 = por %p16620_p0, %p16619_p13 }
  0x90   : > { %p16615_p11 = pneg %p16614_p8 }
  0x92   : > { %p16622_p5 = pnand %p16621_p2, %p16615_p11 }
  0x94   : > { %16625 = shalt.err (!%p16622_p5)
}
  0x95   : > { %14242 = dma.hbm_to_vmem [thread:$0]  (!%p19085_p7), %s19032_s6, 16, %s270_s24, [#allocation13]  }
  0x96   : > { %s14208_s25 = smul.u32 9856, %s289_s21  ;;  %s17098_s24 = scalar_lea.sflag [#allocation5], %s289_s21 }
  0x97   : > { %s295_s11 = smul.u32 7, %s16784_s10  ;;  %p19086_p5 = scmp.ne.s32.totalorder %s19082_s8, 0 }
  0x98   : > { %s14257_s27 = smul.u32 4928, %s16780_s9  ;;  %s293_s13 = scalar_lea.vmem [#allocation4], %s14208_s25 }
  0x99   : > { %s303_s26 = sshll.u32 %s293_s13, 4  ;;  %s13921_s16 = smul.u32 28672, %s16784_s10  ;;  %s17088_s26 = int_to_ptr.vmem [resolvable:$true] %s303_s26 }
  0x9a   : > { %s300_s30 = sadd.s32 %s14257_s27, %s295_s11  ;;  %p16628_p7 = pneg %p19086_p5 }
  0x9b   : > { %s12394_s18 = sshll.u32 %s300_s30, 6  ;;  %s16631_s20 = scalar_lea.hbm %s19027_s1, 630784 }
  0x9c   : > { %s17094_s23 = scalar_lea.hbm %s19027_s1, %s12394_s18 }
  0x9d   : > { %s16626_s22 = scalar_lea.hbm %s17094_s23, 157696  ;;  %p16632_p4 = scmp.lt.u32.totalorder %s17094_s23, %s19027_s1 }
  0x9e   : > { %p16627_p9 = scmp.ne.s32.totalorder %s17094_s23, %s16626_s22  ;;  %p16633_p12 = scmp.lt.u32.totalorder %s16631_s20, %s16626_s22 }
  0x9f   : > { %p16635_p6 = scmp.lt.u32.totalorder %s16626_s22, %s17094_s23 }
  0xa0   : > { %p16629_p10 = pnand %p16628_p7, %p16627_p9  ;;  %p16634_p3 = por %p16633_p12, %p16632_p4 }
  0xa2   : > { %p16630_p1 = pneg %p16629_p10  ;;  %p16636_p8 = por %p16635_p6, %p16634_p3 }
  0xa4   : > { %p16637_p11 = pnand %p16636_p8, %p16630_p1 }
  0xa6   : > { %16640 = shalt.err (!%p16637_p11)
}
  0xa7   : > { %s16641_s21 = scalar_lea.vmem %s17088_s26, 157696  ;;  %s16796_s27 = smov [#allocation4]  }
  0xa8   : > { %p16642_p13 = scmp.ne.s32.totalorder %s17088_s26, %s16641_s21  ;;  %s16646_s13 = sshll.u32 %s16796_s27, 4  ;;  %s16647_s13 = int_to_ptr.vmem [resolvable:$false] %s16646_s13 }
  0xa9   : > { %s16648_s30 = scalar_lea.vmem %s16647_s13, 315392  ;;  %p16649_p9 = scmp.lt.s32.totalorder %s17088_s26, %s16647_s13 }
  0xaa   : > { %p16644_p0 = pnand %p16642_p13, %p16628_p7  ;;  %p16650_p10 = scmp.lt.s32.totalorder %s16648_s30, %s16641_s21 }
  0xac   : > { %p16645_p2 = pneg %p16644_p0  ;;  %p16651_p4 = por %p16650_p10, %p16649_p9 }
  0xae   : > { %p16652_p12 = pnand %p16651_p4, %p16645_p2 }
  0xb0   : > { %16655 = shalt.err (!%p16652_p12)
}
  0xb1   : > { %s16797_s18 = smov 896   ;;  %s16798_s17 = smov 448  }
  0xb2   : > { %s16799_s0 = smov 28   ;;  %s17131_s12 = scalar_lea.hbm %s19029_s3, %s13921_s16 }
  0xb3   : > { %14246 = dma.hbm_to_vmem [thread:$0]  (!%p19086_p5), %s17094_s23, 157696, %s17088_s26, %s17098_s24, %s16797_s18, %s16798_s17, %s16799_s0  }
  0xb4   : > { %s16656_s20 = scalar_lea.hbm %s17131_s12, 28672  ;;  %p19087_p1 = scmp.ne.s32.totalorder %s19083_s4, 0 }
  0xb5   : > { %p16657_p7 = scmp.ne.s32.totalorder %s17131_s12, %s16656_s20  ;;  %s16661_s8 = scalar_lea.hbm %s19029_s3, 57344 }
  0xb6   : > { %p19088_p3 = pneg %p19087_p1  ;;  %p16662_p5 = scmp.lt.u32.totalorder %s17131_s12, %s19029_s3 }
  0xb7   : > { %p16663_p11 = scmp.lt.u32.totalorder %s16661_s8, %s16656_s20  ;;  %p16665_p0 = scmp.lt.u32.totalorder %s16656_s20, %s17131_s12 }
  0xb8   : > { %p16659_p6 = pnand %p16657_p7, %p19088_p3 }
  0xb9   : > { %p16664_p13 = por %p16663_p11, %p16662_p5 }
  0xba   : > { %p16660_p8 = pneg %p16659_p6 }
  0xbb   : > { %p16666_p2 = por %p16665_p0, %p16664_p13 }
  0xbd   : > { %p16667_p9 = pnand %p16666_p2, %p16660_p8 }
  0xbf   : > { %16670 = shalt.err (!%p16667_p9)
}
  0xc0   : > { %s16671_s16 = scalar_lea.vmem %s17045_s19, 28672  ;;  %p19089_p4 = pmov %p19088_p3 }
  0xc1   : > { %p16672_p10 = scmp.ne.s32.totalorder %s17045_s19, %s16671_s16  ;;  %s16800_s24 = smov [#allocation8]  }
  0xc2   : > { %s16676_s21 = sshll.u32 %s16800_s24, 4  ;;  %s16677_s21 = int_to_ptr.vmem [resolvable:$false] %s16676_s21 }
  0xc3   : > { %p16674_p12 = pnand %p16672_p10, %p19089_p4  ;;  %s16678_s27 = scalar_lea.vmem %s16677_s21, 57344 }
  0xc4   : > { %p16679_p3 = scmp.lt.s32.totalorder %s17045_s19, %s16677_s21  ;;  %p16680_p6 = scmp.lt.s32.totalorder %s16678_s27, %s16671_s16 }
  0xc5   : > { %p16675_p7 = pneg %p16674_p12 }
  0xc6   : > { %p16681_p5 = por %p16680_p6, %p16679_p3 }
  0xc8   : > { %p16682_p11 = pnand %p16681_p5, %p16675_p7 }
  0xca   : > { %16685 = shalt.err (!%p16682_p11)
}
  0xcb   : > { %s16801_s13 = smov 256   ;;  %s16802_s30 = smov 16  }
  0xcc   : > { %14252 = dma.hbm_to_vmem [thread:$0]  (!%p19087_p1), %s17131_s12, 28672, %s17045_s19, %s17016_s7, %s16801_s13, %s16801_s13, %s16802_s30  }
  0xcd   : > { %p19090_p8 = scmp.ne.s32.totalorder %s19069_s15, 0 }
  0xce   : > { %s358_s18 = sand.u32 (!%p19090_p8), 1, %s16764_s28   ;;  %p19091_p13 = scmp.ne.s32.totalorder (!%p19090_p8), %s19068_s14, 0 }
  0xcf   : > { %356 = sbr.rel (%p19090_p8) target bundleno = 2398 (0x95e), region = 48  ;;  %s359_s0 = scalar_lea.sflag (!%p19090_p8), [#allocation5], %s358_s18 }
  0xd0   : > { %s14212_s17 = smul.u32 (!%p19090_p8), 9856, %s358_s18 }
  0xd2   : > { %s17160_s22 = scalar_lea.vmem (!%p19090_p8), [#allocation4], %s14212_s17 }
  0xd6   : > { %16731 = dma.done.wait (%p19091_p13), %s359_s0, 157696  }
  0xd7   : > { %16733 = vsyncadd (%p19091_p13), %s359_s0, 4294809600  ;;  %s19092_s2 = sld [smem:[#allocation22_spill]]  ;;  %s19094_s25 = sld [smem:[#allocation18_spill]] }
  0xd8   : > { %s19095_s4 = sld [smem:[#allocation26_spill]] }
  0xdd   : > { %s19093_s20 = sadd.s32 4294967295, %s19092_s2   ;;  %s369_s19 = sand.u32 1, %s19094_s25  }
  0xde   : > { %s367_s7 = sand.u32 1, %s19093_s20   ;;  %s17169_s15 = smul.u32 7, %s369_s19 }
  0xdf   : > { %s368_s12 = scalar_lea.sflag [#allocation7], %s367_s7  ;;  %p19096_p1 = scmp.ne.s32.totalorder %s19095_s4, 0 }
  0xe0   : > { %s371_s11 = scalar_lea.vmem [#allocation6], %s17169_s15 }
  0xe1   : > { %16735 = dma.done.wait (%p19096_p1), %s368_s12, 28784  }
  0xe2   : > { %16737 = vsyncadd (%p19096_p1), %s368_s12, 4294938512  ;;  %s19097_s8 = sld [smem:[#allocation23_spill]]  ;;  %s14214_s26 = smul.u32 1792, %s369_s19 }
  0xe4   : > { %s17176_s14 = scalar_lea.vmem [#allocation8], %s14214_s26 }
  0xe8   : > { %p19098_p0 = scmp.ne.s32.totalorder %s19097_s8, 0 }
  0xea   : > { %16739 = dma.done.wait (%p19098_p0), [#allocation10], 4160  }
  0xeb   : > { %16741 = vsyncadd (%p19098_p0), [#allocation10], 4294963136 }
  0xec   : > { %16743 = dma.done.wait (%p19098_p0), [#allocation13], 16  }
  0xed   : > { %16745 = vsyncadd (%p19098_p0), [#allocation13], 4294967280  ;;  %s19099_s23 = sld [smem:[#allocation20_spill]]  ;;  %s19100_s16 = sld [smem:[#allocation21_spill]] }
  0xee   : > { %s19101_s30 = sld [smem:[#allocation29_spill]] }
  0xf3   : > { %s433_s24 = smul.u32 22, %s19099_s23  ;;  %p444_p2 = scmp.eq.s32.totalorder %s19100_s16, 0 }
  0xf4   : > { %p445_p9 = scmp.eq.s32.totalorder %s19099_s23, 0 }
  0xf5   : > { %p434_p10 = scmp.lt.s32.totalorder %s433_s24, 43 }
  0xf6   : > { %p446_p4 = pnand %p445_p9, %p444_p2 }
  0xf7   : > { %s19128_s24 = smov (!%p434_p10, %s433_s24), 43  ;;  %v16803_v0 = vmov (!%p446_p4), 0.0  }
  0xf8   : > { %s12402_s21 = sshll.u32 %s19128_s24, 2  ;;  %449 = sbr.rel (%p446_p4) target bundleno = 255 (0xff), region = 76  ;;  %450 = vst [vmem:[#allocation3] sm:$0xff] (!%p446_p4), %v16803_v0  ;;  %451 = vst [vmem:[#allocation3 + $0x8] sm:$0xff] (!%p446_p4), %v16803_v0 }
  0xf9   : > { %s17192_s18 = scalar_lea.vmem %s19101_s30, %s12402_s21  ;;  %452 = vst [vmem:[#allocation3 + $0x10] sm:$0xff] (!%p446_p4), %v16803_v0  ;;  %453 = vst [vmem:[#allocation3 + $0x18] sm:$0xff] (!%p446_p4), %v16803_v0 }
  0xff PF: > { %s19102_s17 = sld [smem:[#allocation20_spill]] }
 0x105   : > { %p12403_p12 = scmp.ne.s32.totalorder %s19102_s17, 0 }
 0x106   : > { %v16804_v1 = vmov (!%p12403_p12), 0.0  }
 0x107   : > { %456 = sbr.rel (%p12403_p12) target bundleno = 270 (0x10e), region = 80  ;;  %457 = vst [vmem:[#allocation2] sm:$0xff] (!%p12403_p12), %v16804_v1  ;;  %458 = vst [vmem:[#allocation2 + $0x8] sm:$0xff] (!%p12403_p12), %v16804_v1 }
 0x108   : > { %459 = vst [vmem:[#allocation2 + $0x10] sm:$0xff] (!%p12403_p12), %v16804_v1  ;;  %460 = vst [vmem:[#allocation2 + $0x18] sm:$0xff] (!%p12403_p12), %v16804_v1 }
 0x109   : > { %461 = vst [vmem:[#allocation2 + $0x20] sm:$0xff] (!%p12403_p12), %v16804_v1  ;;  %462 = vst [vmem:[#allocation2 + $0x28] sm:$0xff] (!%p12403_p12), %v16804_v1 }
 0x10a   : > { %463 = vst [vmem:[#allocation2 + $0x30] sm:$0xff] (!%p12403_p12), %v16804_v1 }
 0x10e PF: > { %v14362_v2 = vld [vmem:[%s17160_s22 + $0x4] ss:$28 sps:$4 sm:$0xff]   ;;  %v14368_v6 = vld [vmem:[%s17160_s22 + $0x3c] ss:$28 sps:$4 sm:$0xff]   ;;  %v14374_v10 = vld [vmem:[%s17160_s22 + $0x74] ss:$28 sps:$4 sm:$0xff]  }
 0x10f   : > { %v14364_v3 = vld [vmem:[%s17160_s22 + $0x384] ss:$28 sps:$4 sm:$0xff]   ;;  %8303 = vmatprep.subr.bf16.mxu0 %v14362_v2  ;;  %v14370_v7 = vld [vmem:[%s17160_s22 + $0x3bc] ss:$28 sps:$4 sm:$0xff]   ;;  %v14376_v11 = vld [vmem:[%s17160_s22 + $0x3f4] ss:$28 sps:$4 sm:$0xff]  }
 0x110   : > { %v14366_v4 = vld [vmem:[%s17160_s22] ss:$28 sps:$4 sm:$0xff]   ;;  %8344 = vmatprep.subr.bf16.mxu1 %v14364_v3  ;;  %v14372_v8 = vld [vmem:[%s17160_s22 + $0x38] ss:$28 sps:$4 sm:$0xff]   ;;  %v14378_v12 = vld [vmem:[%s17160_s22 + $0x70] ss:$28 sps:$4 sm:$0xff]  }
 0x111   : > { %v14367_v5 = vld [vmem:[%s17160_s22 + $0x380] ss:$28 sps:$4 sm:$0xff]   ;;  %8304 = vmatpush1.bf16.msra.mxu0 %v14366_v4  ;;  %v14373_v9 = vld [vmem:[%s17160_s22 + $0x3b8] ss:$28 sps:$4 sm:$0xff]   ;;  %v14379_v13 = vld [vmem:[%s17160_s22 + $0x3f0] ss:$28 sps:$4 sm:$0xff]  }
 0x112   : > { %8345 = vmatpush1.bf16.msra.mxu1 %v14367_v5  ;;  %8305 = vmatprep.subr.bf16.mxu0 %v14368_v6  ;;  %v14380_v14 = vld [vmem:[%s17160_s22 + $0xac] ss:$28 sps:$4 sm:$0xff]   ;;  %v14386_v18 = vld [vmem:[%s17160_s22 + $0xe4] ss:$28 sps:$4 sm:$0xff]   ;;  %v14392_v22 = vld [vmem:[%s17160_s22 + $0x11c] ss:$28 sps:$4 sm:$0xff]  }
 0x113   : > { %8346 = vmatprep.subr.bf16.mxu1 %v14370_v7  ;;  %v14382_v15 = vld [vmem:[%s17160_s22 + $0x42c] ss:$28 sps:$4 sm:$0xff]   ;;  %v14388_v19 = vld [vmem:[%s17160_s22 + $0x464] ss:$28 sps:$4 sm:$0xff]   ;;  %v14394_v23 = vld [vmem:[%s17160_s22 + $0x49c] ss:$28 sps:$4 sm:$0xff]  }
 0x114   : > { %v14384_v16 = vld [vmem:[%s17160_s22 + $0xa8] ss:$28 sps:$4 sm:$0xff]   ;;  %v14390_v20 = vld [vmem:[%s17160_s22 + $0xe0] ss:$28 sps:$4 sm:$0xff]   ;;  %v14396_v24 = vld [vmem:[%s17160_s22 + $0x118] ss:$28 sps:$4 sm:$0xff]  }
 0x115   : > { %8306 = vmatpush1.bf16.msra.mxu0 %v14372_v8  ;;  %v14385_v17 = vld [vmem:[%s17160_s22 + $0x428] ss:$28 sps:$4 sm:$0xff]   ;;  %v14391_v21 = vld [vmem:[%s17160_s22 + $0x460] ss:$28 sps:$4 sm:$0xff]   ;;  %v14397_v25 = vld [vmem:[%s17160_s22 + $0x498] ss:$28 sps:$4 sm:$0xff]  }
 0x116   : > { %8347 = vmatpush1.bf16.msra.mxu1 %v14373_v9  ;;  %8307 = vmatprep.subr.bf16.mxu0 %v14374_v10  ;;  %v14398_v26 = vld [vmem:[%s17160_s22 + $0x154] ss:$28 sps:$4 sm:$0xff]   ;;  %v14404_v30 = vld [vmem:[%s17160_s22 + $0x18c] ss:$28 sps:$4 sm:$0xff]   ;;  %v14410_v34 = vld [vmem:[%s17160_s22 + $0x1c4] ss:$28 sps:$4 sm:$0xff]  }
 0x117   : > { %8348 = vmatprep.subr.bf16.mxu1 %v14376_v11  ;;  %v14400_v27 = vld [vmem:[%s17160_s22 + $0x4d4] ss:$28 sps:$4 sm:$0xff]   ;;  %v14406_v31 = vld [vmem:[%s17160_s22 + $0x50c] ss:$28 sps:$4 sm:$0xff]   ;;  %v14412_v35 = vld [vmem:[%s17160_s22 + $0x544] ss:$28 sps:$4 sm:$0xff]  }
 0x118   : > { %v14402_v28 = vld [vmem:[%s17160_s22 + $0x150] ss:$28 sps:$4 sm:$0xff]   ;;  %v14408_v32 = vld [vmem:[%s17160_s22 + $0x188] ss:$28 sps:$4 sm:$0xff]   ;;  %v14414_v36 = vld [vmem:[%s17160_s22 + $0x1c0] ss:$28 sps:$4 sm:$0xff]  }
 0x119   : > { %8308 = vmatpush1.bf16.msra.mxu0 %v14378_v12  ;;  %v14403_v29 = vld [vmem:[%s17160_s22 + $0x4d0] ss:$28 sps:$4 sm:$0xff]   ;;  %v14409_v33 = vld [vmem:[%s17160_s22 + $0x508] ss:$28 sps:$4 sm:$0xff]   ;;  %v14415_v37 = vld [vmem:[%s17160_s22 + $0x540] ss:$28 sps:$4 sm:$0xff]  }
 0x11a   : > { %8349 = vmatpush1.bf16.msra.mxu1 %v14379_v13  ;;  %8309 = vmatprep.subr.bf16.mxu0 %v14380_v14  ;;  %v14416_v38 = vld [vmem:[%s17160_s22 + $0x1fc] ss:$28 sps:$4 sm:$0xff]   ;;  %v14422_v42 = vld [vmem:[%s17160_s22 + $0x234] ss:$28 sps:$4 sm:$0xff]   ;;  %v14428_v46 = vld [vmem:[%s17160_s22 + $0x26c] ss:$28 sps:$4 sm:$0xff]  }
 0x11b   : > { %8350 = vmatprep.subr.bf16.mxu1 %v14382_v15  ;;  %v14418_v39 = vld [vmem:[%s17160_s22 + $0x57c] ss:$28 sps:$4 sm:$0xff]   ;;  %v14424_v43 = vld [vmem:[%s17160_s22 + $0x5b4] ss:$28 sps:$4 sm:$0xff]   ;;  %v14430_v47 = vld [vmem:[%s17160_s22 + $0x5ec] ss:$28 sps:$4 sm:$0xff]  }
 0x11c   : > { %v14420_v40 = vld [vmem:[%s17160_s22 + $0x1f8] ss:$28 sps:$4 sm:$0xff]   ;;  %v14426_v44 = vld [vmem:[%s17160_s22 + $0x230] ss:$28 sps:$4 sm:$0xff]   ;;  %v14432_v51 = vld [vmem:[%s17160_s22 + $0x268] ss:$28 sps:$4 sm:$0xff]  }
 0x11d   : > { %8310 = vmatpush1.bf16.msra.mxu0 %v14384_v16  ;;  %v14421_v41 = vld [vmem:[%s17160_s22 + $0x578] ss:$28 sps:$4 sm:$0xff]   ;;  %v14427_v45 = vld [vmem:[%s17160_s22 + $0x5b0] ss:$28 sps:$4 sm:$0xff]   ;;  %v14433_v52 = vld [vmem:[%s17160_s22 + $0x5e8] ss:$28 sps:$4 sm:$0xff]  }
 0x11e   : > { %8351 = vmatpush1.bf16.msra.mxu1 %v14385_v17  ;;  %8311 = vmatprep.subr.bf16.mxu0 %v14386_v18  ;;  %v471_v48 = vld [vmem:[%s17192_s18] sm:$0xff]  ;;  %v472_v50 = vld [vmem:[%s17192_s18 + $0x8] sm:$0xff]  ;;  %v14434_v54 = vld [vmem:[%s17160_s22 + $0x2a4] ss:$28 sps:$4 sm:$0xff]   ;;  %s19103_s0 = sld [smem:[#allocation20_spill]] }
 0x11f   : > { %8352 = vmatprep.subr.bf16.mxu1 %v14388_v19  ;;  %v17242_v49 = vcombine.high %v471_v48, %v471_v48  ;;  %v17247_v53 = vcombine.high %v472_v50, %v472_v50  ;;  %v14436_v55 = vld [vmem:[%s17160_s22 + $0x624] ss:$28 sps:$4 sm:$0xff]   ;;  %v14440_v58 = vld [vmem:[%s17160_s22 + $0x2dc] ss:$28 sps:$4 sm:$0xff]   ;;  %v14446_v62 = vld [vmem:[%s17160_s22 + $0x314] ss:$28 sps:$4 sm:$0xff]   ;;  %v17269_v8 = vcombine.low %v471_v48, %v471_v48  ;;  %v17271_v9 = vcombine.low %v472_v50, %v472_v50 }
 0x120   : > { %v14438_v56 = vld [vmem:[%s17160_s22 + $0x2a0] ss:$28 sps:$4 sm:$0xff]   ;;  %v14444_v60 = vld [vmem:[%s17160_s22 + $0x2d8] ss:$28 sps:$4 sm:$0xff]   ;;  %v14450_v0 = vld [vmem:[%s17160_s22 + $0x310] ss:$28 sps:$4 sm:$0xff]  }
 0x121   : > { %8312 = vmatpush1.bf16.msra.mxu0 %v14390_v20  ;;  %8335 = vmatprep.mubr.bf16.mxu0 %v17242_v49  ;;  %v14439_v57 = vld [vmem:[%s17160_s22 + $0x620] ss:$28 sps:$4 sm:$0xff]   ;;  %v14445_v61 = vld [vmem:[%s17160_s22 + $0x658] ss:$28 sps:$4 sm:$0xff]   ;;  %v14451_v1 = vld [vmem:[%s17160_s22 + $0x690] ss:$28 sps:$4 sm:$0xff]  }
 0x122   : > { %8353 = vmatpush1.bf16.msra.mxu1 %v14391_v21  ;;  %8313 = vmatprep.subr.bf16.mxu0 %v14392_v22  ;;  %v14442_v59 = vld [vmem:[%s17160_s22 + $0x65c] ss:$28 sps:$4 sm:$0xff]   ;;  %v14448_v63 = vld [vmem:[%s17160_s22 + $0x694] ss:$28 sps:$4 sm:$0xff]   ;;  %v14452_v2 = vld [vmem:[%s17160_s22 + $0x34c] ss:$28 sps:$4 sm:$0xff]  }
 0x123   : > { %8354 = vmatprep.subr.bf16.mxu1 %v14394_v23  ;;  %8376 = vmatprep.mubr.bf16.mxu1 %v17247_v53  ;;  %v14454_v3 = vld [vmem:[%s17160_s22 + $0x6cc] ss:$28 sps:$4 sm:$0xff]   ;;  %v14464_v6 = vld [vmem:[%s17160_s22 + $0x704] ss:$28 sps:$4 sm:$0xff]   ;;  %v14470_v12 = vld [vmem:[%s17160_s22 + $0x73c] ss:$28 sps:$4 sm:$0xff]  }
 0x124   : > { %v14456_v4 = vld [vmem:[%s17160_s22 + $0x348] ss:$28 sps:$4 sm:$0xff]   ;;  %v14462_v10 = vld [vmem:[%s17160_s22 + $0x700] ss:$28 sps:$4 sm:$0xff]   ;;  %v14468_v14 = vld [vmem:[%s17160_s22 + $0x738] ss:$28 sps:$4 sm:$0xff]  }
 0x125   : > { %8314 = vmatpush1.bf16.msra.mxu0 %v14396_v24  ;;  %v14457_v5 = vld [vmem:[%s17160_s22 + $0x6c8] ss:$28 sps:$4 sm:$0xff]   ;;  %v14465_v11 = vld [vmem:[%s17160_s22 + $0xa80] ss:$28 sps:$4 sm:$0xff]   ;;  %v14471_v15 = vld [vmem:[%s17160_s22 + $0xab8] ss:$28 sps:$4 sm:$0xff]  }
 0x126   : > { %8355 = vmatpush1.bf16.msra.mxu1 %v14397_v25  ;;  %8315 = vmatprep.subr.bf16.mxu0 %v14398_v26  ;;  %v14467_v7 = vld [vmem:[%s17160_s22 + $0xa84] ss:$28 sps:$4 sm:$0xff]   ;;  %v14473_v13 = vld [vmem:[%s17160_s22 + $0xabc] ss:$28 sps:$4 sm:$0xff]   ;;  %v14476_v16 = vld [vmem:[%s17160_s22 + $0x774] ss:$28 sps:$4 sm:$0xff]  }
 0x127   : > { %8356 = vmatprep.subr.bf16.mxu1 %v14400_v27  ;;  %v14479_v17 = vld [vmem:[%s17160_s22 + $0xaf4] ss:$28 sps:$4 sm:$0xff]   ;;  %v14482_v20 = vld [vmem:[%s17160_s22 + $0x7ac] ss:$28 sps:$4 sm:$0xff]   ;;  %v14488_v24 = vld [vmem:[%s17160_s22 + $0x7e4] ss:$28 sps:$4 sm:$0xff]  }
 0x128   : > { %v14474_v18 = vld [vmem:[%s17160_s22 + $0x770] ss:$28 sps:$4 sm:$0xff]   ;;  %v14480_v22 = vld [vmem:[%s17160_s22 + $0x7a8] ss:$28 sps:$4 sm:$0xff]   ;;  %v14486_v26 = vld [vmem:[%s17160_s22 + $0x7e0] ss:$28 sps:$4 sm:$0xff]  }
 0x129   : > { %8316 = vmatpush1.bf16.msra.mxu0 %v14402_v28  ;;  %v14477_v19 = vld [vmem:[%s17160_s22 + $0xaf0] ss:$28 sps:$4 sm:$0xff]   ;;  %v14483_v23 = vld [vmem:[%s17160_s22 + $0xb28] ss:$28 sps:$4 sm:$0xff]   ;;  %v14489_v27 = vld [vmem:[%s17160_s22 + $0xb60] ss:$28 sps:$4 sm:$0xff]  }
 0x12a   : > { %8357 = vmatpush1.bf16.msra.mxu1 %v14403_v29  ;;  %8317 = vmatprep.subr.bf16.mxu0 %v14404_v30  ;;  %v14485_v21 = vld [vmem:[%s17160_s22 + $0xb2c] ss:$28 sps:$4 sm:$0xff]   ;;  %v14491_v25 = vld [vmem:[%s17160_s22 + $0xb64] ss:$28 sps:$4 sm:$0xff]   ;;  %v14494_v28 = vld [vmem:[%s17160_s22 + $0x81c] ss:$28 sps:$4 sm:$0xff]  }
 0x12b   : > { %8358 = vmatprep.subr.bf16.mxu1 %v14406_v31  ;;  %v14497_v29 = vld [vmem:[%s17160_s22 + $0xb9c] ss:$28 sps:$4 sm:$0xff]   ;;  %p10110_p7 = scmp.eq.s32.totalorder %s19103_s0, 1  ;;  %p13658_p3 = scmp.ne.s32.totalorder %s19103_s0, 1 }
 0x12c   : > { %v14492_v30 = vld [vmem:[%s17160_s22 + $0x818] ss:$28 sps:$4 sm:$0xff]  }
 0x12d   : > { %8318 = vmatpush1.bf16.msra.mxu0 %v14408_v32  ;;  %v14495_v31 = vld [vmem:[%s17160_s22 + $0xb98] ss:$28 sps:$4 sm:$0xff]  }
 0x12e   : > { %8359 = vmatpush1.bf16.msra.mxu1 %v14409_v33  ;;  %8319 = vmatprep.subr.bf16.mxu0 %v14410_v34  ;;  %v14500_v32 = vld [vmem:[%s17160_s22 + $0x854] ss:$28 sps:$4 sm:$0xff]   ;;  %v17300_v34 = vld [vmem:[%s17192_s18 + $0x10] sm:$0xff] }
 0x12f   : > { %8360 = vmatprep.subr.bf16.mxu1 %v14412_v35  ;;  %v14503_v33 = vld [vmem:[%s17160_s22 + $0xbd4] ss:$28 sps:$4 sm:$0xff]   ;;  %v17303_v35 = vld [vmem:[%s17192_s18 + $0x18] sm:$0xff]  ;;  %v14518_v48 = vld [vmem:[%s17160_s22 + $0x8fc] ss:$28 sps:$4 sm:$0xff]  }
 0x130   : > { %v14521_v50 = vld [vmem:[%s17160_s22 + $0xc7c] ss:$28 sps:$4 sm:$0xff]  }
 0x131   : > { %8320 = vmatpush1.bf16.msra.mxu0 %v14414_v36  ;;  %v14498_v36 = vld [vmem:[%s17160_s22 + $0x850] ss:$28 sps:$4 sm:$0xff]  }
 0x132   : > { %8361 = vmatpush1.bf16.msra.mxu1 %v14415_v37  ;;  %8321 = vmatprep.subr.bf16.mxu0 %v14416_v38  ;;  %v14501_v37 = vld [vmem:[%s17160_s22 + $0xbd0] ss:$28 sps:$4 sm:$0xff]   ;;  %v17309_v38 = vcombine.high %v17300_v34, %v17300_v34 }
 0x133   : > { %8362 = vmatprep.subr.bf16.mxu1 %v14418_v39  ;;  %v17313_v39 = vcombine.high %v17303_v35, %v17303_v35 }
 0x135   : > { %8322 = vmatpush1.bf16.msra.mxu0 %v14420_v40  ;;  %v14506_v40 = vld [vmem:[%s17160_s22 + $0x88c] ss:$28 sps:$4 sm:$0xff]  }
 0x136   : > { %8363 = vmatpush1.bf16.msra.mxu1 %v14421_v41  ;;  %8323 = vmatprep.subr.bf16.mxu0 %v14422_v42  ;;  %v14509_v41 = vld [vmem:[%s17160_s22 + $0xc0c] ss:$28 sps:$4 sm:$0xff]  }
 0x137   : > { %8364 = vmatprep.subr.bf16.mxu1 %v14424_v43  ;;  %v14504_v42 = vld [vmem:[%s17160_s22 + $0x888] ss:$28 sps:$4 sm:$0xff]  }
 0x138   : > { %v14507_v43 = vld [vmem:[%s17160_s22 + $0xc08] ss:$28 sps:$4 sm:$0xff]  }
 0x139   : > { %8324 = vmatpush1.bf16.msra.mxu0 %v14426_v44  ;;  %v14512_v44 = vld [vmem:[%s17160_s22 + $0x8c4] ss:$28 sps:$4 sm:$0xff]  }
 0x13a   : > { %8365 = vmatpush1.bf16.msra.mxu1 %v14427_v45  ;;  %8325 = vmatprep.subr.bf16.mxu0 %v14428_v46  ;;  %v14515_v45 = vld [vmem:[%s17160_s22 + $0xc44] ss:$28 sps:$4 sm:$0xff]  }
 0x13b   : > { %8366 = vmatprep.subr.bf16.mxu1 %v14430_v47  ;;  %v14510_v46 = vld [vmem:[%s17160_s22 + $0x8c0] ss:$28 sps:$4 sm:$0xff]  }
 0x13c   : > { %v14513_v47 = vld [vmem:[%s17160_s22 + $0xc40] ss:$28 sps:$4 sm:$0xff]  }
 0x13d   : > { %8326 = vmatpush1.bf16.msra.mxu0 %v14432_v51  ;;  %v14516_v51 = vld [vmem:[%s17160_s22 + $0x8f8] ss:$28 sps:$4 sm:$0xff]  }
 0x13e   : > { %8367 = vmatpush1.bf16.msra.mxu1 %v14433_v52  ;;  %8327 = vmatprep.subr.bf16.mxu0 %v14434_v54  ;;  %v14519_v52 = vld [vmem:[%s17160_s22 + $0xc78] ss:$28 sps:$4 sm:$0xff]  }
 0x13f   : > { %8368 = vmatprep.subr.bf16.mxu1 %v14436_v55  ;;  %v14524_v54 = vld [vmem:[%s17160_s22 + $0x934] ss:$28 sps:$4 sm:$0xff]  }
 0x140   : > { %v14527_v55 = vld [vmem:[%s17160_s22 + $0xcb4] ss:$28 sps:$4 sm:$0xff]  }
 0x141   : > { %8328 = vmatpush1.bf16.msra.mxu0 %v14438_v56  ;;  %v14522_v56 = vld [vmem:[%s17160_s22 + $0x930] ss:$28 sps:$4 sm:$0xff]  }
 0x142   : > { %8369 = vmatpush1.bf16.msra.mxu1 %v14439_v57  ;;  %8329 = vmatprep.subr.bf16.mxu0 %v14440_v58  ;;  %v14525_v57 = vld [vmem:[%s17160_s22 + $0xcb0] ss:$28 sps:$4 sm:$0xff]  }
 0x143   : > { %8370 = vmatprep.subr.bf16.mxu1 %v14442_v59  ;;  %v14530_v58 = vld [vmem:[%s17160_s22 + $0x96c] ss:$28 sps:$4 sm:$0xff]  }
 0x144   : > { %v14533_v59 = vld [vmem:[%s17160_s22 + $0xcec] ss:$28 sps:$4 sm:$0xff]  }
 0x145   : > { %8330 = vmatpush1.bf16.msra.mxu0 %v14444_v60  ;;  %v14528_v60 = vld [vmem:[%s17160_s22 + $0x968] ss:$28 sps:$4 sm:$0xff]  }
 0x146   : > { %8371 = vmatpush1.bf16.msra.mxu1 %v14445_v61  ;;  %8331 = vmatprep.subr.bf16.mxu0 %v14446_v62  ;;  %v14531_v61 = vld [vmem:[%s17160_s22 + $0xce8] ss:$28 sps:$4 sm:$0xff]  }
 0x147   : > { %8372 = vmatprep.subr.bf16.mxu1 %v14448_v63  ;;  %v14536_v62 = vld [vmem:[%s17160_s22 + $0x9a4] ss:$28 sps:$4 sm:$0xff]  }
 0x148   : > { %v14539_v63 = vld [vmem:[%s17160_s22 + $0xd24] ss:$28 sps:$4 sm:$0xff]  }
 0x149   : > { %8332 = vmatpush1.bf16.msra.mxu0 %v14450_v0  ;;  %v14534_v0 = vld [vmem:[%s17160_s22 + $0x9a0] ss:$28 sps:$4 sm:$0xff]  }
 0x14a   : > { %8373 = vmatpush1.bf16.msra.mxu1 %v14451_v1  ;;  %8333 = vmatprep.subr.bf16.mxu0 %v14452_v2  ;;  %v14537_v1 = vld [vmem:[%s17160_s22 + $0xd20] ss:$28 sps:$4 sm:$0xff]  }
 0x14b   : > { %8374 = vmatprep.subr.bf16.mxu1 %v14454_v3  ;;  %v14542_v2 = vld [vmem:[%s17160_s22 + $0x9dc] ss:$28 sps:$4 sm:$0xff]  }
 0x14c   : > { %v14545_v3 = vld [vmem:[%s17160_s22 + $0xd5c] ss:$28 sps:$4 sm:$0xff]  }
 0x14d   : > { %8334 = vmatpush1.bf16.msra.mxu0 %v14456_v4  ;;  %v14540_v4 = vld [vmem:[%s17160_s22 + $0x9d8] ss:$28 sps:$4 sm:$0xff]  }
 0x14e   : > { %8375 = vmatpush1.bf16.msra.mxu1 %v14457_v5  ;;  %8385 = vmatprep.subr.bf16.mxu0 %v14464_v6  ;;  %v14543_v5 = vld [vmem:[%s17160_s22 + $0xd58] ss:$28 sps:$4 sm:$0xff]  }
 0x14f   : > { %8426 = vmatprep.subr.bf16.mxu1 %v14467_v7  ;;  %v14548_v6 = vld [vmem:[%s17160_s22 + $0xa14] ss:$28 sps:$4 sm:$0xff]  }
 0x150   : > { %8336 = vmatmul.mubr.bf16.vlgmr.msra.gmra.mrb[0].mxu0 %v17269_v8  ;;  %v14551_v7 = vld [vmem:[%s17160_s22 + $0xd94] ss:$28 sps:$4 sm:$0xff]  }
 0x151   : > { %8377 = vmatmul.mubr.bf16.vlgmr.msra.gmra.mrb[0].mxu1 %v17271_v9  ;;  %8386 = vmatpush1.bf16.msra.mxu0 %v14462_v10  ;;  %v14546_v10 = vld [vmem:[%s17160_s22 + $0xa10] ss:$28 sps:$4 sm:$0xff]  }
 0x152   : > { %8427 = vmatpush1.bf16.msra.mxu1 %v14465_v11  ;;  %8387 = vmatprep.subr.bf16.mxu0 %v14470_v12  ;;  %v14549_v11 = vld [vmem:[%s17160_s22 + $0xd90] ss:$28 sps:$4 sm:$0xff]  }
 0x153   : > { %8428 = vmatprep.subr.bf16.mxu1 %v14473_v13  ;;  %8417 = vmatprep.mubr.bf16.mxu0 %v17309_v38  ;;  %v14554_v12 = vld [vmem:[%s17160_s22 + $0xa4c] ss:$28 sps:$4 sm:$0xff]  }
 0x154   : > { %8458 = vmatprep.mubr.bf16.mxu1 %v17313_v39  ;;  %v14557_v13 = vld [vmem:[%s17160_s22 + $0xdcc] ss:$28 sps:$4 sm:$0xff]  }
 0x155   : > { %8388 = vmatpush1.bf16.msra.mxu0 %v14468_v14  ;;  %v14552_v14 = vld [vmem:[%s17160_s22 + $0xa48] ss:$28 sps:$4 sm:$0xff]  }
 0x156   : > { %8429 = vmatpush1.bf16.msra.mxu1 %v14471_v15  ;;  %8389 = vmatprep.subr.bf16.mxu0 %v14476_v16  ;;  %v14555_v15 = vld [vmem:[%s17160_s22 + $0xdc8] ss:$28 sps:$4 sm:$0xff]  }
 0x157   : > { %8430 = vmatprep.subr.bf16.mxu1 %v14479_v17  ;;  %v14563_v16 = vld [vmem:[%s17160_s22 + $0xe04] ss:$28 sps:$4 sm:$0xff]  }
 0x158   : > { %v14566_v17 = vld [vmem:[%s17160_s22 + $0x1184] ss:$28 sps:$4 sm:$0xff]  }
 0x159   : > { %8390 = vmatpush1.bf16.msra.mxu0 %v14474_v18  ;;  %v17357_v18 = vcombine.low %v17300_v34, %v17300_v34  ;;  %v14582_v34 = vld [vmem:[%s17160_s22 + $0xeac] ss:$28 sps:$4 sm:$0xff]  }
 0x15a   : > { %8431 = vmatpush1.bf16.msra.mxu1 %v14477_v19  ;;  %8391 = vmatprep.subr.bf16.mxu0 %v14482_v20  ;;  %v14561_v19 = vld [vmem:[%s17160_s22 + $0xe00] ss:$28 sps:$4 sm:$0xff]  }
 0x15b   : > { %8432 = vmatprep.subr.bf16.mxu1 %v14485_v21  ;;  %v14564_v20 = vld [vmem:[%s17160_s22 + $0x1180] ss:$28 sps:$4 sm:$0xff]   ;;  %v17363_v21 = vcombine.low %v17303_v35, %v17303_v35  ;;  %v14585_v35 = vld [vmem:[%s17160_s22 + $0x122c] ss:$28 sps:$4 sm:$0xff]  }
 0x15d   : > { %8392 = vmatpush1.bf16.msra.mxu0 %v14480_v22  ;;  %v14570_v22 = vld [vmem:[%s17160_s22 + $0xe3c] ss:$28 sps:$4 sm:$0xff]  }
 0x15e   : > { %8433 = vmatpush1.bf16.msra.mxu1 %v14483_v23  ;;  %8393 = vmatprep.subr.bf16.mxu0 %v14488_v24  ;;  %v14573_v23 = vld [vmem:[%s17160_s22 + $0x11bc] ss:$28 sps:$4 sm:$0xff]   ;;  %v17368_v24 = vld [vmem:[%s17192_s18 + $0x20] sm:$0xff] }
 0x15f   : > { %8434 = vmatprep.subr.bf16.mxu1 %v14491_v25  ;;  %v17371_v25 = vld [vmem:[%s17192_s18 + $0x28] sm:$0xff] }
 0x161   : > { %8394 = vmatpush1.bf16.msra.mxu0 %v14486_v26  ;;  %v17375_v26 = vcombine.high %v17368_v24, %v17368_v24 }
 0x162   : > { %8435 = vmatpush1.bf16.msra.mxu1 %v14489_v27  ;;  %8395 = vmatprep.subr.bf16.mxu0 %v14494_v28  ;;  %v17379_v27 = vcombine.high %v17371_v25, %v17371_v25  ;;  %v14568_v28 = vld [vmem:[%s17160_s22 + $0xe38] ss:$28 sps:$4 sm:$0xff]  }
 0x163   : > { %8436 = vmatprep.subr.bf16.mxu1 %v14497_v29  ;;  %v14571_v29 = vld [vmem:[%s17160_s22 + $0x11b8] ss:$28 sps:$4 sm:$0xff]  }
 0x165   : > { %8396 = vmatpush1.bf16.msra.mxu0 %v14492_v30  ;;  %v14576_v30 = vld [vmem:[%s17160_s22 + $0xe74] ss:$28 sps:$4 sm:$0xff]  }
 0x166   : > { %8437 = vmatpush1.bf16.msra.mxu1 %v14495_v31  ;;  %8397 = vmatprep.subr.bf16.mxu0 %v14500_v32  ;;  %v14579_v31 = vld [vmem:[%s17160_s22 + $0x11f4] ss:$28 sps:$4 sm:$0xff]  }
 0x167   : > { %8438 = vmatprep.subr.bf16.mxu1 %v14503_v33  ;;  %v14574_v32 = vld [vmem:[%s17160_s22 + $0xe70] ss:$28 sps:$4 sm:$0xff]  }
 0x168   : > { %v14577_v33 = vld [vmem:[%s17160_s22 + $0x11f0] ss:$28 sps:$4 sm:$0xff]  }
 0x169   : > { %8398 = vmatpush1.bf16.msra.mxu0 %v14498_v36  ;;  %v14580_v36 = vld [vmem:[%s17160_s22 + $0xea8] ss:$28 sps:$4 sm:$0xff]  }
 0x16a   : > { %8439 = vmatpush1.bf16.msra.mxu1 %v14501_v37  ;;  %8399 = vmatprep.subr.bf16.mxu0 %v14506_v40  ;;  %v14583_v37 = vld [vmem:[%s17160_s22 + $0x1228] ss:$28 sps:$4 sm:$0xff]  }
 0x16b   : > { %8440 = vmatprep.subr.bf16.mxu1 %v14509_v41  ;;  %v14588_v40 = vld [vmem:[%s17160_s22 + $0xee4] ss:$28 sps:$4 sm:$0xff]  }
 0x16c   : > { %v14591_v41 = vld [vmem:[%s17160_s22 + $0x1264] ss:$28 sps:$4 sm:$0xff]  }
 0x16d   : > { %8400 = vmatpush1.bf16.msra.mxu0 %v14504_v42  ;;  %v14586_v42 = vld [vmem:[%s17160_s22 + $0xee0] ss:$28 sps:$4 sm:$0xff]  }
 0x16e   : > { %8441 = vmatpush1.bf16.msra.mxu1 %v14507_v43  ;;  %8401 = vmatprep.subr.bf16.mxu0 %v14512_v44  ;;  %v14589_v43 = vld [vmem:[%s17160_s22 + $0x1260] ss:$28 sps:$4 sm:$0xff]  }
 0x16f   : > { %8442 = vmatprep.subr.bf16.mxu1 %v14515_v45  ;;  %v14594_v44 = vld [vmem:[%s17160_s22 + $0xf1c] ss:$28 sps:$4 sm:$0xff]  }
 0x170   : > { %v14597_v45 = vld [vmem:[%s17160_s22 + $0x129c] ss:$28 sps:$4 sm:$0xff]  }
 0x171   : > { %8402 = vmatpush1.bf16.msra.mxu0 %v14510_v46  ;;  %v14592_v46 = vld [vmem:[%s17160_s22 + $0xf18] ss:$28 sps:$4 sm:$0xff]  }
 0x172   : > { %8443 = vmatpush1.bf16.msra.mxu1 %v14513_v47  ;;  %8403 = vmatprep.subr.bf16.mxu0 %v14518_v48  ;;  %v14595_v47 = vld [vmem:[%s17160_s22 + $0x1298] ss:$28 sps:$4 sm:$0xff]  }
 0x173   : > { %8444 = vmatprep.subr.bf16.mxu1 %v14521_v50  ;;  %v14600_v48 = vld [vmem:[%s17160_s22 + $0xf54] ss:$28 sps:$4 sm:$0xff]  }
 0x174   : > { %v14603_v50 = vld [vmem:[%s17160_s22 + $0x12d4] ss:$28 sps:$4 sm:$0xff]  }
 0x175   : > { %8404 = vmatpush1.bf16.msra.mxu0 %v14516_v51  ;;  %v14598_v51 = vld [vmem:[%s17160_s22 + $0xf50] ss:$28 sps:$4 sm:$0xff]  }
 0x176   : > { %8445 = vmatpush1.bf16.msra.mxu1 %v14519_v52  ;;  %8405 = vmatprep.subr.bf16.mxu0 %v14524_v54  ;;  %v14601_v52 = vld [vmem:[%s17160_s22 + $0x12d0] ss:$28 sps:$4 sm:$0xff]  }
 0x177   : > { %8446 = vmatprep.subr.bf16.mxu1 %v14527_v55  ;;  %v14606_v54 = vld [vmem:[%s17160_s22 + $0xf8c] ss:$28 sps:$4 sm:$0xff]  }
 0x178   : > { %v14609_v55 = vld [vmem:[%s17160_s22 + $0x130c] ss:$28 sps:$4 sm:$0xff]  }
 0x179   : > { %8406 = vmatpush1.bf16.msra.mxu0 %v14522_v56  ;;  %v14604_v56 = vld [vmem:[%s17160_s22 + $0xf88] ss:$28 sps:$4 sm:$0xff]  }
 0x17a   : > { %8447 = vmatpush1.bf16.msra.mxu1 %v14525_v57  ;;  %8407 = vmatprep.subr.bf16.mxu0 %v14530_v58  ;;  %v14607_v57 = vld [vmem:[%s17160_s22 + $0x1308] ss:$28 sps:$4 sm:$0xff]  }
 0x17b   : > { %8448 = vmatprep.subr.bf16.mxu1 %v14533_v59  ;;  %v14612_v58 = vld [vmem:[%s17160_s22 + $0xfc4] ss:$28 sps:$4 sm:$0xff]  }
 0x17c   : > { %v14615_v59 = vld [vmem:[%s17160_s22 + $0x1344] ss:$28 sps:$4 sm:$0xff]  }
 0x17d   : > { %8408 = vmatpush1.bf16.msra.mxu0 %v14528_v60  ;;  %v14610_v60 = vld [vmem:[%s17160_s22 + $0xfc0] ss:$28 sps:$4 sm:$0xff]  }
 0x17e   : > { %8449 = vmatpush1.bf16.msra.mxu1 %v14531_v61  ;;  %8409 = vmatprep.subr.bf16.mxu0 %v14536_v62  ;;  %v14613_v61 = vld [vmem:[%s17160_s22 + $0x1340] ss:$28 sps:$4 sm:$0xff]  }
 0x17f   : > { %8450 = vmatprep.subr.bf16.mxu1 %v14539_v63  ;;  %v14618_v62 = vld [vmem:[%s17160_s22 + $0xffc] ss:$28 sps:$4 sm:$0xff]  }
 0x180   : > { %v14621_v63 = vld [vmem:[%s17160_s22 + $0x137c] ss:$28 sps:$4 sm:$0xff]  }
 0x181   : > { %8410 = vmatpush1.bf16.msra.mxu0 %v14534_v0  ;;  %v14616_v0 = vld [vmem:[%s17160_s22 + $0xff8] ss:$28 sps:$4 sm:$0xff]  }
 0x182   : > { %8451 = vmatpush1.bf16.msra.mxu1 %v14537_v1  ;;  %8411 = vmatprep.subr.bf16.mxu0 %v14542_v2  ;;  %v14619_v1 = vld [vmem:[%s17160_s22 + $0x1378] ss:$28 sps:$4 sm:$0xff]  }
 0x183   : > { %8452 = vmatprep.subr.bf16.mxu1 %v14545_v3  ;;  %v14624_v2 = vld [vmem:[%s17160_s22 + $0x1034] ss:$28 sps:$4 sm:$0xff]  }
 0x184   : > { %v14627_v3 = vld [vmem:[%s17160_s22 + $0x13b4] ss:$28 sps:$4 sm:$0xff]  }
 0x185   : > { %8412 = vmatpush1.bf16.msra.mxu0 %v14540_v4  ;;  %v14622_v4 = vld [vmem:[%s17160_s22 + $0x1030] ss:$28 sps:$4 sm:$0xff]  }
 0x186   : > { %8453 = vmatpush1.bf16.msra.mxu1 %v14543_v5  ;;  %8413 = vmatprep.subr.bf16.mxu0 %v14548_v6  ;;  %v14625_v5 = vld [vmem:[%s17160_s22 + $0x13b0] ss:$28 sps:$4 sm:$0xff]  }
 0x187   : > { %8454 = vmatprep.subr.bf16.mxu1 %v14551_v7  ;;  %v14630_v6 = vld [vmem:[%s17160_s22 + $0x106c] ss:$28 sps:$4 sm:$0xff]  }
 0x188   : > { %v14633_v7 = vld [vmem:[%s17160_s22 + $0x13ec] ss:$28 sps:$4 sm:$0xff]  }
 0x189   : > { %8414 = vmatpush1.bf16.msra.mxu0 %v14546_v10  ;;  %v14628_v10 = vld [vmem:[%s17160_s22 + $0x1068] ss:$28 sps:$4 sm:$0xff]  }
 0x18a   : > { %8455 = vmatpush1.bf16.msra.mxu1 %v14549_v11  ;;  %8415 = vmatprep.subr.bf16.mxu0 %v14554_v12  ;;  %v14631_v11 = vld [vmem:[%s17160_s22 + $0x13e8] ss:$28 sps:$4 sm:$0xff]  }
 0x18b   : > { %8456 = vmatprep.subr.bf16.mxu1 %v14557_v13  ;;  %v14636_v12 = vld [vmem:[%s17160_s22 + $0x10a4] ss:$28 sps:$4 sm:$0xff]  }
 0x18c   : > { %v14639_v13 = vld [vmem:[%s17160_s22 + $0x1424] ss:$28 sps:$4 sm:$0xff]  }
 0x18d   : > { %8416 = vmatpush1.bf16.msra.mxu0 %v14552_v14  ;;  %v14634_v14 = vld [vmem:[%s17160_s22 + $0x10a0] ss:$28 sps:$4 sm:$0xff]  }
 0x18e   : > { %8457 = vmatpush1.bf16.msra.mxu1 %v14555_v15  ;;  %8467 = vmatprep.subr.bf16.mxu0 %v14563_v16  ;;  %v14637_v15 = vld [vmem:[%s17160_s22 + $0x1420] ss:$28 sps:$4 sm:$0xff]  }
 0x18f   : > { %8508 = vmatprep.subr.bf16.mxu1 %v14566_v17  ;;  %v14642_v16 = vld [vmem:[%s17160_s22 + $0x10dc] ss:$28 sps:$4 sm:$0xff]  }
 0x190   : > { %8418 = vmatmul.mubr.bf16.vlgmr.msra.gmra.mrb[4].mxu0 %v17357_v18  ;;  %v14645_v17 = vld [vmem:[%s17160_s22 + $0x145c] ss:$28 sps:$4 sm:$0xff]  }
 0x191   : > { %8459 = vmatmul.mubr.bf16.vlgmr.msra.gmra.mrb[4].mxu1 %v17363_v21  ;;  %8468 = vmatpush1.bf16.msra.mxu0 %v14561_v19  ;;  %v14640_v19 = vld [vmem:[%s17160_s22 + $0x10d8] ss:$28 sps:$4 sm:$0xff]  }
 0x192   : > { %8509 = vmatpush1.bf16.msra.mxu1 %v14564_v20  ;;  %8469 = vmatprep.subr.bf16.mxu0 %v14570_v22  ;;  %v14643_v20 = vld [vmem:[%s17160_s22 + $0x1458] ss:$28 sps:$4 sm:$0xff]  }
 0x193   : > { %8510 = vmatprep.subr.bf16.mxu1 %v14573_v23  ;;  %8499 = vmatprep.mubr.bf16.mxu0 %v17375_v26  ;;  %v14648_v22 = vld [vmem:[%s17160_s22 + $0x1114] ss:$28 sps:$4 sm:$0xff]  }
 0x194   : > { %8540 = vmatprep.mubr.bf16.mxu1 %v17379_v27  ;;  %v14651_v23 = vld [vmem:[%s17160_s22 + $0x1494] ss:$28 sps:$4 sm:$0xff]  }
 0x195   : > { %8470 = vmatpush1.bf16.msra.mxu0 %v14568_v28  ;;  %v14646_v28 = vld [vmem:[%s17160_s22 + $0x1110] ss:$28 sps:$4 sm:$0xff]  }
 0x196   : > { %8511 = vmatpush1.bf16.msra.mxu1 %v14571_v29  ;;  %8471 = vmatprep.subr.bf16.mxu0 %v14576_v30  ;;  %v14649_v29 = vld [vmem:[%s17160_s22 + $0x1490] ss:$28 sps:$4 sm:$0xff]  }
 0x197   : > { %8512 = vmatprep.subr.bf16.mxu1 %v14579_v31  ;;  %v14654_v30 = vld [vmem:[%s17160_s22 + $0x114c] ss:$28 sps:$4 sm:$0xff]  }
 0x198   : > { %v14657_v31 = vld [vmem:[%s17160_s22 + $0x14cc] ss:$28 sps:$4 sm:$0xff]  }
 0x199   : > { %8472 = vmatpush1.bf16.msra.mxu0 %v14574_v32  ;;  %v14652_v32 = vld [vmem:[%s17160_s22 + $0x1148] ss:$28 sps:$4 sm:$0xff]  }
 0x19a   : > { %8513 = vmatpush1.bf16.msra.mxu1 %v14577_v33  ;;  %8473 = vmatprep.subr.bf16.mxu0 %v14582_v34  ;;  %v14655_v33 = vld [vmem:[%s17160_s22 + $0x14c8] ss:$28 sps:$4 sm:$0xff]  }
 0x19b   : > { %8514 = vmatprep.subr.bf16.mxu1 %v14585_v35  ;;  %v14663_v34 = vld [vmem:[%s17160_s22 + $0x1504] ss:$28 sps:$4 sm:$0xff]  }
 0x19c   : > { %v14666_v35 = vld [vmem:[%s17160_s22 + $0x1884] ss:$28 sps:$4 sm:$0xff]  }
 0x19d   : > { %8474 = vmatpush1.bf16.msra.mxu0 %v14580_v36  ;;  %v14661_v36 = vld [vmem:[%s17160_s22 + $0x1500] ss:$28 sps:$4 sm:$0xff]  }
 0x19e   : > { %8515 = vmatpush1.bf16.msra.mxu1 %v14583_v37  ;;  %8475 = vmatprep.subr.bf16.mxu0 %v14588_v40  ;;  %v14664_v37 = vld [vmem:[%s17160_s22 + $0x1880] ss:$28 sps:$4 sm:$0xff]   ;;  %v17449_v40 = vcombine.low %v17368_v24, %v17368_v24 }
 0x19f   : > { %8516 = vmatprep.subr.bf16.mxu1 %v14591_v41  ;;  %v17453_v41 = vcombine.low %v17371_v25, %v17371_v25 }
 0x1a1   : > { %8476 = vmatpush1.bf16.msra.mxu0 %v14586_v42  ;;  %v17456_v42 = vld [vmem:[%s17192_s18 + $0x30] sm:$0xff] }
 0x1a2   : > { %8517 = vmatpush1.bf16.msra.mxu1 %v14589_v43  ;;  %8477 = vmatprep.subr.bf16.mxu0 %v14594_v44  ;;  %v17459_v43 = vld [vmem:[%s17192_s18 + $0x38] sm:$0xff]  ;;  %v14670_v44 = vld [vmem:[%s17160_s22 + $0x153c] ss:$28 sps:$4 sm:$0xff]   ;;  %v17465_v24 = vcombine.high %v17456_v42, %v17456_v42 }
 0x1a3   : > { %8518 = vmatprep.subr.bf16.mxu1 %v14597_v45  ;;  %v14673_v45 = vld [vmem:[%s17160_s22 + $0x18bc] ss:$28 sps:$4 sm:$0xff]   ;;  %v17469_v25 = vcombine.high %v17459_v43, %v17459_v43 }
 0x1a5   : > { %8478 = vmatpush1.bf16.msra.mxu0 %v14592_v46  ;;  %v14668_v46 = vld [vmem:[%s17160_s22 + $0x1538] ss:$28 sps:$4 sm:$0xff]  }
 0x1a6   : > { %8519 = vmatpush1.bf16.msra.mxu1 %v14595_v47  ;;  %8479 = vmatprep.subr.bf16.mxu0 %v14600_v48  ;;  %v14671_v47 = vld [vmem:[%s17160_s22 + $0x18b8] ss:$28 sps:$4 sm:$0xff]  }
 0x1a7   : > { %8520 = vmatprep.subr.bf16.mxu1 %v14603_v50  ;;  %v14676_v48 = vld [vmem:[%s17160_s22 + $0x1574] ss:$28 sps:$4 sm:$0xff]  }
 0x1a8   : > { %v14679_v50 = vld [vmem:[%s17160_s22 + $0x18f4] ss:$28 sps:$4 sm:$0xff]  }
 0x1a9   : > { %8480 = vmatpush1.bf16.msra.mxu0 %v14598_v51  ;;  %v14674_v51 = vld [vmem:[%s17160_s22 + $0x1570] ss:$28 sps:$4 sm:$0xff]  }
 0x1aa   : > { %8521 = vmatpush1.bf16.msra.mxu1 %v14601_v52  ;;  %8481 = vmatprep.subr.bf16.mxu0 %v14606_v54  ;;  %v14677_v52 = vld [vmem:[%s17160_s22 + $0x18f0] ss:$28 sps:$4 sm:$0xff]  }
 0x1ab   : > { %8522 = vmatprep.subr.bf16.mxu1 %v14609_v55  ;;  %v14682_v54 = vld [vmem:[%s17160_s22 + $0x15ac] ss:$28 sps:$4 sm:$0xff]  }
 0x1ac   : > { %v14685_v55 = vld [vmem:[%s17160_s22 + $0x192c] ss:$28 sps:$4 sm:$0xff]  }
 0x1ad   : > { %8482 = vmatpush1.bf16.msra.mxu0 %v14604_v56  ;;  %v14680_v56 = vld [vmem:[%s17160_s22 + $0x15a8] ss:$28 sps:$4 sm:$0xff]  }
 0x1ae   : > { %8523 = vmatpush1.bf16.msra.mxu1 %v14607_v57  ;;  %8483 = vmatprep.subr.bf16.mxu0 %v14612_v58  ;;  %v14683_v57 = vld [vmem:[%s17160_s22 + $0x1928] ss:$28 sps:$4 sm:$0xff]  }
 0x1af   : > { %8524 = vmatprep.subr.bf16.mxu1 %v14615_v59  ;;  %v14688_v58 = vld [vmem:[%s17160_s22 + $0x15e4] ss:$28 sps:$4 sm:$0xff]  }
 0x1b0   : > { %v14691_v59 = vld [vmem:[%s17160_s22 + $0x1964] ss:$28 sps:$4 sm:$0xff]  }
 0x1b1   : > { %8484 = vmatpush1.bf16.msra.mxu0 %v14610_v60  ;;  %v14686_v60 = vld [vmem:[%s17160_s22 + $0x15e0] ss:$28 sps:$4 sm:$0xff]  }
 0x1b2   : > { %8525 = vmatpush1.bf16.msra.mxu1 %v14613_v61  ;;  %8485 = vmatprep.subr.bf16.mxu0 %v14618_v62  ;;  %v14689_v61 = vld [vmem:[%s17160_s22 + $0x1960] ss:$28 sps:$4 sm:$0xff]  }
 0x1b3   : > { %8526 = vmatprep.subr.bf16.mxu1 %v14621_v63  ;;  %v14694_v62 = vld [vmem:[%s17160_s22 + $0x161c] ss:$28 sps:$4 sm:$0xff]  }
 0x1b4   : > { %v14697_v63 = vld [vmem:[%s17160_s22 + $0x199c] ss:$28 sps:$4 sm:$0xff]  }
 0x1b5   : > { %8486 = vmatpush1.bf16.msra.mxu0 %v14616_v0  ;;  %v14692_v0 = vld [vmem:[%s17160_s22 + $0x1618] ss:$28 sps:$4 sm:$0xff]  }
 0x1b6   : > { %8527 = vmatpush1.bf16.msra.mxu1 %v14619_v1  ;;  %8487 = vmatprep.subr.bf16.mxu0 %v14624_v2  ;;  %v14695_v1 = vld [vmem:[%s17160_s22 + $0x1998] ss:$28 sps:$4 sm:$0xff]  }
 0x1b7   : > { %8528 = vmatprep.subr.bf16.mxu1 %v14627_v3  ;;  %v14700_v2 = vld [vmem:[%s17160_s22 + $0x1654] ss:$28 sps:$4 sm:$0xff]  }
 0x1b8   : > { %v14703_v3 = vld [vmem:[%s17160_s22 + $0x19d4] ss:$28 sps:$4 sm:$0xff]  }
 0x1b9   : > { %8488 = vmatpush1.bf16.msra.mxu0 %v14622_v4  ;;  %v14698_v4 = vld [vmem:[%s17160_s22 + $0x1650] ss:$28 sps:$4 sm:$0xff]  }
 0x1ba   : > { %8529 = vmatpush1.bf16.msra.mxu1 %v14625_v5  ;;  %8489 = vmatprep.subr.bf16.mxu0 %v14630_v6  ;;  %v14701_v5 = vld [vmem:[%s17160_s22 + $0x19d0] ss:$28 sps:$4 sm:$0xff]  }
 0x1bb   : > { %8530 = vmatprep.subr.bf16.mxu1 %v14633_v7  ;;  %v14706_v6 = vld [vmem:[%s17160_s22 + $0x168c] ss:$28 sps:$4 sm:$0xff]  }
 0x1bc   : > { %v14709_v7 = vld [vmem:[%s17160_s22 + $0x1a0c] ss:$28 sps:$4 sm:$0xff]  }
 0x1bd   : > { %8490 = vmatpush1.bf16.msra.mxu0 %v14628_v10  ;;  %v14704_v10 = vld [vmem:[%s17160_s22 + $0x1688] ss:$28 sps:$4 sm:$0xff]  }
 0x1be   : > { %8531 = vmatpush1.bf16.msra.mxu1 %v14631_v11  ;;  %8491 = vmatprep.subr.bf16.mxu0 %v14636_v12  ;;  %v14707_v11 = vld [vmem:[%s17160_s22 + $0x1a08] ss:$28 sps:$4 sm:$0xff]  }
 0x1bf   : > { %8532 = vmatprep.subr.bf16.mxu1 %v14639_v13  ;;  %v14712_v12 = vld [vmem:[%s17160_s22 + $0x16c4] ss:$28 sps:$4 sm:$0xff]  }
 0x1c0   : > { %v14715_v13 = vld [vmem:[%s17160_s22 + $0x1a44] ss:$28 sps:$4 sm:$0xff]  }
 0x1c1   : > { %8492 = vmatpush1.bf16.msra.mxu0 %v14634_v14  ;;  %v14710_v14 = vld [vmem:[%s17160_s22 + $0x16c0] ss:$28 sps:$4 sm:$0xff]  }
 0x1c2   : > { %8533 = vmatpush1.bf16.msra.mxu1 %v14637_v15  ;;  %8493 = vmatprep.subr.bf16.mxu0 %v14642_v16  ;;  %v14713_v15 = vld [vmem:[%s17160_s22 + $0x1a40] ss:$28 sps:$4 sm:$0xff]  }
 0x1c3   : > { %8534 = vmatprep.subr.bf16.mxu1 %v14645_v17  ;;  %v14718_v16 = vld [vmem:[%s17160_s22 + $0x16fc] ss:$28 sps:$4 sm:$0xff]  }
 0x1c4   : > { %v14721_v17 = vld [vmem:[%s17160_s22 + $0x1a7c] ss:$28 sps:$4 sm:$0xff]  }
 0x1c5   : > { %8494 = vmatpush1.bf16.msra.mxu0 %v14640_v19  ;;  %v14716_v19 = vld [vmem:[%s17160_s22 + $0x16f8] ss:$28 sps:$4 sm:$0xff]  }
 0x1c6   : > { %8535 = vmatpush1.bf16.msra.mxu1 %v14643_v20  ;;  %8495 = vmatprep.subr.bf16.mxu0 %v14648_v22  ;;  %v14719_v20 = vld [vmem:[%s17160_s22 + $0x1a78] ss:$28 sps:$4 sm:$0xff]  }
 0x1c7   : > { %8536 = vmatprep.subr.bf16.mxu1 %v14651_v23  ;;  %v14724_v22 = vld [vmem:[%s17160_s22 + $0x1734] ss:$28 sps:$4 sm:$0xff]  }
 0x1c8   : > { %v14727_v23 = vld [vmem:[%s17160_s22 + $0x1ab4] ss:$28 sps:$4 sm:$0xff]  }
 0x1c9   : > { %8496 = vmatpush1.bf16.msra.mxu0 %v14646_v28  ;;  %v14722_v28 = vld [vmem:[%s17160_s22 + $0x1730] ss:$28 sps:$4 sm:$0xff]  }
 0x1ca   : > { %8537 = vmatpush1.bf16.msra.mxu1 %v14649_v29  ;;  %8497 = vmatprep.subr.bf16.mxu0 %v14654_v30  ;;  %v14725_v29 = vld [vmem:[%s17160_s22 + $0x1ab0] ss:$28 sps:$4 sm:$0xff]  }
 0x1cb   : > { %8538 = vmatprep.subr.bf16.mxu1 %v14657_v31  ;;  %v14730_v30 = vld [vmem:[%s17160_s22 + $0x176c] ss:$28 sps:$4 sm:$0xff]  }
 0x1cc   : > { %v14733_v31 = vld [vmem:[%s17160_s22 + $0x1aec] ss:$28 sps:$4 sm:$0xff]  }
 0x1cd   : > { %8498 = vmatpush1.bf16.msra.mxu0 %v14652_v32  ;;  %v14728_v32 = vld [vmem:[%s17160_s22 + $0x1768] ss:$28 sps:$4 sm:$0xff]  }
 0x1ce   : > { %8539 = vmatpush1.bf16.msra.mxu1 %v14655_v33  ;;  %8549 = vmatprep.subr.bf16.mxu0 %v14663_v34  ;;  %v14731_v33 = vld [vmem:[%s17160_s22 + $0x1ae8] ss:$28 sps:$4 sm:$0xff]  }
 0x1cf   : > { %8590 = vmatprep.subr.bf16.mxu1 %v14666_v35  ;;  %v14736_v34 = vld [vmem:[%s17160_s22 + $0x17a4] ss:$28 sps:$4 sm:$0xff]  }
 0x1d0   : > { %8500 = vmatmul.mubr.bf16.vlgmr.msra.gmra.mrb[8].mxu0 %v17449_v40  ;;  %v14739_v35 = vld [vmem:[%s17160_s22 + $0x1b24] ss:$28 sps:$4 sm:$0xff]  }
 0x1d1   : > { %8541 = vmatmul.mubr.bf16.vlgmr.msra.gmra.mrb[8].mxu1 %v17453_v41  ;;  %8550 = vmatpush1.bf16.msra.mxu0 %v14661_v36  ;;  %v14734_v36 = vld [vmem:[%s17160_s22 + $0x17a0] ss:$28 sps:$4 sm:$0xff]  }
 0x1d2   : > { %8591 = vmatpush1.bf16.msra.mxu1 %v14664_v37  ;;  %8551 = vmatprep.subr.bf16.mxu0 %v14670_v44  ;;  %v14737_v37 = vld [vmem:[%s17160_s22 + $0x1b20] ss:$28 sps:$4 sm:$0xff]  }
 0x1d3   : > { %8592 = vmatprep.subr.bf16.mxu1 %v14673_v45  ;;  %8581 = vmatprep.mubr.bf16.mxu0 %v17465_v24  ;;  %v14742_v44 = vld [vmem:[%s17160_s22 + $0x17dc] ss:$28 sps:$4 sm:$0xff]  }
 0x1d4   : > { %8622 = vmatprep.mubr.bf16.mxu1 %v17469_v25  ;;  %v14745_v45 = vld [vmem:[%s17160_s22 + $0x1b5c] ss:$28 sps:$4 sm:$0xff]  }
 0x1d5   : > { %8552 = vmatpush1.bf16.msra.mxu0 %v14668_v46  ;;  %v14740_v46 = vld [vmem:[%s17160_s22 + $0x17d8] ss:$28 sps:$4 sm:$0xff]  }
 0x1d6   : > { %8593 = vmatpush1.bf16.msra.mxu1 %v14671_v47  ;;  %8553 = vmatprep.subr.bf16.mxu0 %v14676_v48  ;;  %v14743_v47 = vld [vmem:[%s17160_s22 + $0x1b58] ss:$28 sps:$4 sm:$0xff]  }
 0x1d7   : > { %8594 = vmatprep.subr.bf16.mxu1 %v14679_v50  ;;  %v14748_v48 = vld [vmem:[%s17160_s22 + $0x1814] ss:$28 sps:$4 sm:$0xff]  }
 0x1d8   : > { %v14751_v50 = vld [vmem:[%s17160_s22 + $0x1b94] ss:$28 sps:$4 sm:$0xff]  }
 0x1d9   : > { %8554 = vmatpush1.bf16.msra.mxu0 %v14674_v51  ;;  %v14746_v51 = vld [vmem:[%s17160_s22 + $0x1810] ss:$28 sps:$4 sm:$0xff]  }
 0x1da   : > { %8595 = vmatpush1.bf16.msra.mxu1 %v14677_v52  ;;  %8555 = vmatprep.subr.bf16.mxu0 %v14682_v54  ;;  %v14749_v52 = vld [vmem:[%s17160_s22 + $0x1b90] ss:$28 sps:$4 sm:$0xff]  }
 0x1db   : > { %8596 = vmatprep.subr.bf16.mxu1 %v14685_v55  ;;  %v14754_v54 = vld [vmem:[%s17160_s22 + $0x184c] ss:$28 sps:$4 sm:$0xff]  }
 0x1dc   : > { %v14757_v55 = vld [vmem:[%s17160_s22 + $0x1bcc] ss:$28 sps:$4 sm:$0xff]  }
 0x1dd   : > { %8556 = vmatpush1.bf16.msra.mxu0 %v14680_v56  ;;  %v14752_v56 = vld [vmem:[%s17160_s22 + $0x1848] ss:$28 sps:$4 sm:$0xff]  }
 0x1de   : > { %8597 = vmatpush1.bf16.msra.mxu1 %v14683_v57  ;;  %8557 = vmatprep.subr.bf16.mxu0 %v14688_v58  ;;  %v14755_v57 = vld [vmem:[%s17160_s22 + $0x1bc8] ss:$28 sps:$4 sm:$0xff]  }
 0x1df   : > { %8598 = vmatprep.subr.bf16.mxu1 %v14691_v59  ;;  %v14763_v58 = vld [vmem:[%s17160_s22 + $0x1c04] ss:$28 sps:$4 sm:$0xff]  }
 0x1e0   : > { %v14766_v59 = vld [vmem:[%s17160_s22 + $0x1f84] ss:$28 sps:$4 sm:$0xff]  }
 0x1e1   : > { %8558 = vmatpush1.bf16.msra.mxu0 %v14686_v60  ;;  %v17536_v60 = vld [vmem:[%s17192_s18 + $0x40] sm:$0xff] }
 0x1e2   : > { %8599 = vmatpush1.bf16.msra.mxu1 %v14689_v61  ;;  %8559 = vmatprep.subr.bf16.mxu0 %v14694_v62  ;;  %v17540_v61 = vcombine.low %v17456_v42, %v17456_v42  ;;  %v17544_v62 = vcombine.low %v17459_v43, %v17459_v43  ;;  %v17555_v42 = vcombine.high %v17536_v60, %v17536_v60 }
 0x1e3   : > { %8600 = vmatprep.subr.bf16.mxu1 %v14697_v63  ;;  %v17547_v63 = vld [vmem:[%s17192_s18 + $0x48] sm:$0xff] }
 0x1e4   : > { %v17559_v43 = vcombine.high %v17547_v63, %v17547_v63 }
 0x1e5   : > { %8560 = vmatpush1.bf16.msra.mxu0 %v14692_v0  ;;  %v14761_v0 = vld [vmem:[%s17160_s22 + $0x1c00] ss:$28 sps:$4 sm:$0xff]  }
 0x1e6   : > { %8601 = vmatpush1.bf16.msra.mxu1 %v14695_v1  ;;  %8561 = vmatprep.subr.bf16.mxu0 %v14700_v2  ;;  %v14764_v1 = vld [vmem:[%s17160_s22 + $0x1f80] ss:$28 sps:$4 sm:$0xff]  }
 0x1e7   : > { %8602 = vmatprep.subr.bf16.mxu1 %v14703_v3  ;;  %v14770_v2 = vld [vmem:[%s17160_s22 + $0x1c3c] ss:$28 sps:$4 sm:$0xff]  }
 0x1e8   : > { %v14773_v3 = vld [vmem:[%s17160_s22 + $0x1fbc] ss:$28 sps:$4 sm:$0xff]  }
 0x1e9   : > { %8562 = vmatpush1.bf16.msra.mxu0 %v14698_v4  ;;  %v14768_v4 = vld [vmem:[%s17160_s22 + $0x1c38] ss:$28 sps:$4 sm:$0xff]  }
 0x1ea   : > { %8603 = vmatpush1.bf16.msra.mxu1 %v14701_v5  ;;  %8563 = vmatprep.subr.bf16.mxu0 %v14706_v6  ;;  %v14771_v5 = vld [vmem:[%s17160_s22 + $0x1fb8] ss:$28 sps:$4 sm:$0xff]  }
 0x1eb   : > { %8604 = vmatprep.subr.bf16.mxu1 %v14709_v7  ;;  %v14776_v6 = vld [vmem:[%s17160_s22 + $0x1c74] ss:$28 sps:$4 sm:$0xff]  }
 0x1ec   : > { %v14779_v7 = vld [vmem:[%s17160_s22 + $0x1ff4] ss:$28 sps:$4 sm:$0xff]  }
 0x1ed   : > { %8564 = vmatpush1.bf16.msra.mxu0 %v14704_v10  ;;  %v14774_v10 = vld [vmem:[%s17160_s22 + $0x1c70] ss:$28 sps:$4 sm:$0xff]  }
 0x1ee   : > { %8605 = vmatpush1.bf16.msra.mxu1 %v14707_v11  ;;  %8565 = vmatprep.subr.bf16.mxu0 %v14712_v12  ;;  %v14777_v11 = vld [vmem:[%s17160_s22 + $0x1ff0] ss:$28 sps:$4 sm:$0xff]  }
 0x1ef   : > { %8606 = vmatprep.subr.bf16.mxu1 %v14715_v13  ;;  %v14782_v12 = vld [vmem:[%s17160_s22 + $0x1cac] ss:$28 sps:$4 sm:$0xff]  }
 0x1f0   : > { %v14785_v13 = vld [vmem:[%s17160_s22 + $0x202c] ss:$28 sps:$4 sm:$0xff]  }
 0x1f1   : > { %8566 = vmatpush1.bf16.msra.mxu0 %v14710_v14  ;;  %v14780_v14 = vld [vmem:[%s17160_s22 + $0x1ca8] ss:$28 sps:$4 sm:$0xff]  }
 0x1f2   : > { %8607 = vmatpush1.bf16.msra.mxu1 %v14713_v15  ;;  %8567 = vmatprep.subr.bf16.mxu0 %v14718_v16  ;;  %v14783_v15 = vld [vmem:[%s17160_s22 + $0x2028] ss:$28 sps:$4 sm:$0xff]  }
 0x1f3   : > { %8608 = vmatprep.subr.bf16.mxu1 %v14721_v17  ;;  %v14788_v16 = vld [vmem:[%s17160_s22 + $0x1ce4] ss:$28 sps:$4 sm:$0xff]  }
 0x1f4   : > { %v14791_v17 = vld [vmem:[%s17160_s22 + $0x2064] ss:$28 sps:$4 sm:$0xff]  }
 0x1f5   : > { %8568 = vmatpush1.bf16.msra.mxu0 %v14716_v19  ;;  %v14786_v19 = vld [vmem:[%s17160_s22 + $0x1ce0] ss:$28 sps:$4 sm:$0xff]  }
 0x1f6   : > { %8609 = vmatpush1.bf16.msra.mxu1 %v14719_v20  ;;  %8569 = vmatprep.subr.bf16.mxu0 %v14724_v22  ;;  %v14789_v20 = vld [vmem:[%s17160_s22 + $0x2060] ss:$28 sps:$4 sm:$0xff]  }
 0x1f7   : > { %8610 = vmatprep.subr.bf16.mxu1 %v14727_v23  ;;  %v14794_v22 = vld [vmem:[%s17160_s22 + $0x1d1c] ss:$28 sps:$4 sm:$0xff]  }
 0x1f8   : > { %v14797_v23 = vld [vmem:[%s17160_s22 + $0x209c] ss:$28 sps:$4 sm:$0xff]  }
 0x1f9   : > { %8570 = vmatpush1.bf16.msra.mxu0 %v14722_v28  ;;  %v14792_v28 = vld [vmem:[%s17160_s22 + $0x1d18] ss:$28 sps:$4 sm:$0xff]  }
 0x1fa   : > { %8611 = vmatpush1.bf16.msra.mxu1 %v14725_v29  ;;  %8571 = vmatprep.subr.bf16.mxu0 %v14730_v30  ;;  %v14795_v29 = vld [vmem:[%s17160_s22 + $0x2098] ss:$28 sps:$4 sm:$0xff]  }
 0x1fb   : > { %8612 = vmatprep.subr.bf16.mxu1 %v14733_v31  ;;  %v14800_v30 = vld [vmem:[%s17160_s22 + $0x1d54] ss:$28 sps:$4 sm:$0xff]  }
 0x1fc   : > { %v14803_v31 = vld [vmem:[%s17160_s22 + $0x20d4] ss:$28 sps:$4 sm:$0xff]  }
 0x1fd   : > { %8572 = vmatpush1.bf16.msra.mxu0 %v14728_v32 }
 0x1fe   : > { %8613 = vmatpush1.bf16.msra.mxu1 %v14731_v33  ;;  %8573 = vmatprep.subr.bf16.mxu0 %v14736_v34  ;;  %v14798_v34 = vld [vmem:[%s17160_s22 + $0x1d50] ss:$28 sps:$4 sm:$0xff]  }
 0x1ff   : > { %8614 = vmatprep.subr.bf16.mxu1 %v14739_v35  ;;  %v14801_v35 = vld [vmem:[%s17160_s22 + $0x20d0] ss:$28 sps:$4 sm:$0xff]  }
 0x201   : > { %8574 = vmatpush1.bf16.msra.mxu0 %v14734_v36 }
 0x202   : > { %8615 = vmatpush1.bf16.msra.mxu1 %v14737_v37  ;;  %8575 = vmatprep.subr.bf16.mxu0 %v14742_v44 }
 0x203   : > { %8616 = vmatprep.subr.bf16.mxu1 %v14745_v45 }
 0x205   : > { %8576 = vmatpush1.bf16.msra.mxu0 %v14740_v46 }
 0x206   : > { %8617 = vmatpush1.bf16.msra.mxu1 %v14743_v47  ;;  %8577 = vmatprep.subr.bf16.mxu0 %v14748_v48 }
 0x207   : > { %8618 = vmatprep.subr.bf16.mxu1 %v14751_v50  ;;  %v14806_v50 = vld [vmem:[%s17160_s22 + $0x1d8c] ss:$28 sps:$4 sm:$0xff]  }
 0x209   : > { %8578 = vmatpush1.bf16.msra.mxu0 %v14746_v51  ;;  %v14809_v51 = vld [vmem:[%s17160_s22 + $0x210c] ss:$28 sps:$4 sm:$0xff]  }
 0x20a   : > { %8619 = vmatpush1.bf16.msra.mxu1 %v14749_v52  ;;  %8579 = vmatprep.subr.bf16.mxu0 %v14754_v54  ;;  %v14804_v54 = vld [vmem:[%s17160_s22 + $0x1d88] ss:$28 sps:$4 sm:$0xff]  }
 0x20b   : > { %8620 = vmatprep.subr.bf16.mxu1 %v14757_v55  ;;  %v14807_v55 = vld [vmem:[%s17160_s22 + $0x2108] ss:$28 sps:$4 sm:$0xff]  }
 0x20d   : > { %8580 = vmatpush1.bf16.msra.mxu0 %v14752_v56  ;;  %v14812_v56 = vld [vmem:[%s17160_s22 + $0x1dc4] ss:$28 sps:$4 sm:$0xff]  }
 0x20e   : > { %8621 = vmatpush1.bf16.msra.mxu1 %v14755_v57  ;;  %8631 = vmatprep.subr.bf16.mxu0 %v14763_v58  ;;  %v14815_v57 = vld [vmem:[%s17160_s22 + $0x2144] ss:$28 sps:$4 sm:$0xff]  }
 0x20f   : > { %8672 = vmatprep.subr.bf16.mxu1 %v14766_v59  ;;  %v14810_v58 = vld [vmem:[%s17160_s22 + $0x1dc0] ss:$28 sps:$4 sm:$0xff]  }
 0x210   : > { %8582 = vmatmul.mubr.bf16.vlgmr.msra.gmra.mrb[12].mxu0 %v17540_v61  ;;  %v14813_v59 = vld [vmem:[%s17160_s22 + $0x2140] ss:$28 sps:$4 sm:$0xff]  }
 0x211   : > { %8623 = vmatmul.mubr.bf16.vlgmr.msra.gmra.mrb[12].mxu1 %v17544_v62  ;;  %8632 = vmatpush1.bf16.msra.mxu0 %v14761_v0  ;;  %v14818_v0 = vld [vmem:[%s17160_s22 + $0x1dfc] ss:$28 sps:$4 sm:$0xff]  }
 0x212   : > { %8673 = vmatpush1.bf16.msra.mxu1 %v14764_v1  ;;  %8633 = vmatprep.subr.bf16.mxu0 %v14770_v2  ;;  %v14821_v1 = vld [vmem:[%s17160_s22 + $0x217c] ss:$28 sps:$4 sm:$0xff]  }
 0x213   : > { %8674 = vmatprep.subr.bf16.mxu1 %v14773_v3  ;;  %8663 = vmatprep.mubr.bf16.mxu0 %v17555_v42  ;;  %v14816_v2 = vld [vmem:[%s17160_s22 + $0x1df8] ss:$28 sps:$4 sm:$0xff]  }
 0x214   : > { %8704 = vmatprep.mubr.bf16.mxu1 %v17559_v43  ;;  %v14819_v3 = vld [vmem:[%s17160_s22 + $0x2178] ss:$28 sps:$4 sm:$0xff]  }
 0x215   : > { %8634 = vmatpush1.bf16.msra.mxu0 %v14768_v4  ;;  %v14824_v4 = vld [vmem:[%s17160_s22 + $0x1e34] ss:$28 sps:$4 sm:$0xff]  }
 0x216   : > { %8675 = vmatpush1.bf16.msra.mxu1 %v14771_v5  ;;  %8635 = vmatprep.subr.bf16.mxu0 %v14776_v6  ;;  %v14827_v5 = vld [vmem:[%s17160_s22 + $0x21b4] ss:$28 sps:$4 sm:$0xff]  }
 0x217   : > { %8676 = vmatprep.subr.bf16.mxu1 %v14779_v7  ;;  %v14822_v6 = vld [vmem:[%s17160_s22 + $0x1e30] ss:$28 sps:$4 sm:$0xff]  }
 0x218   : > { %v14825_v7 = vld [vmem:[%s17160_s22 + $0x21b0] ss:$28 sps:$4 sm:$0xff]  }
 0x219   : > { %8636 = vmatpush1.bf16.msra.mxu0 %v14774_v10  ;;  %v14830_v10 = vld [vmem:[%s17160_s22 + $0x1e6c] ss:$28 sps:$4 sm:$0xff]  }
 0x21a   : > { %8677 = vmatpush1.bf16.msra.mxu1 %v14777_v11  ;;  %8637 = vmatprep.subr.bf16.mxu0 %v14782_v12  ;;  %v14833_v11 = vld [vmem:[%s17160_s22 + $0x21ec] ss:$28 sps:$4 sm:$0xff]  }
 0x21b   : > { %8678 = vmatprep.subr.bf16.mxu1 %v14785_v13  ;;  %v14828_v12 = vld [vmem:[%s17160_s22 + $0x1e68] ss:$28 sps:$4 sm:$0xff]  }
 0x21c   : > { %v14831_v13 = vld [vmem:[%s17160_s22 + $0x21e8] ss:$28 sps:$4 sm:$0xff]  }
 0x21d   : > { %8638 = vmatpush1.bf16.msra.mxu0 %v14780_v14  ;;  %v14836_v14 = vld [vmem:[%s17160_s22 + $0x1ea4] ss:$28 sps:$4 sm:$0xff]  }
 0x21e   : > { %8679 = vmatpush1.bf16.msra.mxu1 %v14783_v15  ;;  %8639 = vmatprep.subr.bf16.mxu0 %v14788_v16  ;;  %v14839_v15 = vld [vmem:[%s17160_s22 + $0x2224] ss:$28 sps:$4 sm:$0xff]  }
 0x21f   : > { %8680 = vmatprep.subr.bf16.mxu1 %v14791_v17  ;;  %v14834_v16 = vld [vmem:[%s17160_s22 + $0x1ea0] ss:$28 sps:$4 sm:$0xff]  }
 0x220   : > { %v14837_v17 = vld [vmem:[%s17160_s22 + $0x2220] ss:$28 sps:$4 sm:$0xff]  }
 0x221   : > { %8640 = vmatpush1.bf16.msra.mxu0 %v14786_v19  ;;  %v14842_v19 = vld [vmem:[%s17160_s22 + $0x1edc] ss:$28 sps:$4 sm:$0xff]  }
 0x222   : > { %8681 = vmatpush1.bf16.msra.mxu1 %v14789_v20  ;;  %8641 = vmatprep.subr.bf16.mxu0 %v14794_v22  ;;  %v14845_v20 = vld [vmem:[%s17160_s22 + $0x225c] ss:$28 sps:$4 sm:$0xff]  }
 0x223   : > { %8682 = vmatprep.subr.bf16.mxu1 %v14797_v23  ;;  %v8337_v32 = vpop.f32.mrb[0].mxu0  ;;  %v14840_v22 = vld [vmem:[%s17160_s22 + $0x1ed8] ss:$28 sps:$4 sm:$0xff]  }
 0x224   : > { %v8378_v33 = vpop.f32.mrb[0].mxu1  ;;  %v8339_v37 = vpop.f32.mrb[1].mxu0  ;;  %v14843_v23 = vld [vmem:[%s17160_s22 + $0x2258] ss:$28 sps:$4 sm:$0xff]  }
 0x225   : > { %v17587_v36 = vadd.f32 %v8378_v33, %v8337_v32  ;;  %v8380_v44 = vpop.f32.mrb[1].mxu1  ;;  %v8341_v46 = vpop.f32.mrb[2].mxu0  ;;  %8642 = vmatpush1.bf16.msra.mxu0 %v14792_v28  ;;  %v14848_v28 = vld [vmem:[%s17160_s22 + $0x1f14] ss:$28 sps:$4 sm:$0xff]   ;;  %v14854_v32 = vld [vmem:[%s17160_s22 + $0x1f4c] ss:$28 sps:$4 sm:$0xff]  }
 0x226   : > { %v17589_v45 = vadd.f32 %v8380_v44, %v8339_v37  ;;  %8683 = vmatpush1.bf16.msra.mxu1 %v14795_v29  ;;  %v8382_v47 = vpop.f32.mrb[2].mxu1  ;;  %v8342_v48 = vpop.f32.mrb[3].mxu0  ;;  %8643 = vmatprep.subr.bf16.mxu0 %v14800_v30  ;;  %v14851_v29 = vld [vmem:[%s17160_s22 + $0x2294] ss:$28 sps:$4 sm:$0xff]   ;;  %v14857_v33 = vld [vmem:[%s17160_s22 + $0x22cc] ss:$28 sps:$4 sm:$0xff]  }
 0x227   : > { %8684 = vmatprep.subr.bf16.mxu1 %v14803_v31  ;;  %v8383_v52 = vpop.f32.mrb[3].mxu1  ;;  %v14846_v30 = vld [vmem:[%s17160_s22 + $0x1f10] ss:$28 sps:$4 sm:$0xff]   ;;  %v14863_v37 = vld [vmem:[%s17160_s22 + $0x2304] ss:$28 sps:$4 sm:$0xff]   ;;  %v17630_v46 = vld [vmem:[%s17192_s18 + $0x50] sm:$0xff] }
 0x228   : > { %v14849_v31 = vld [vmem:[%s17160_s22 + $0x2290] ss:$28 sps:$4 sm:$0xff]   ;;  %v14861_v47 = vld [vmem:[%s17160_s22 + $0x2300] ss:$28 sps:$4 sm:$0xff]   ;;  %v14864_v48 = vld [vmem:[%s17160_s22 + $0x8] ss:$28 sps:$4 sm:$0xff]  }
 0x229   : > { %8644 = vmatpush1.bf16.msra.mxu0 %v14798_v34  ;;  %v14852_v34 = vld [vmem:[%s17160_s22 + $0x1f48] ss:$28 sps:$4 sm:$0xff]   ;;  %v14870_v52 = vld [vmem:[%s17160_s22 + $0x233c] ss:$28 sps:$4 sm:$0xff]  }
 0x22a   : > { %8685 = vmatpush1.bf16.msra.mxu1 %v14801_v35  ;;  %8645 = vmatprep.subr.bf16.mxu0 %v14806_v50  ;;  %v14855_v35 = vld [vmem:[%s17160_s22 + $0x22c8] ss:$28 sps:$4 sm:$0xff]   ;;  %v17636_v50 = vcombine.low %v17536_v60, %v17536_v60  ;;  %v14868_v60 = vld [vmem:[%s17160_s22 + $0x2338] ss:$28 sps:$4 sm:$0xff]  }
 0x22b   : > { %8686 = vmatprep.subr.bf16.mxu1 %v14809_v51  ;;  %v14866_v44 = vld [vmem:[%s17160_s22 + $0xc] ss:$28 sps:$4 sm:$0xff]   ;;  %v17640_v51 = vcombine.low %v17547_v63, %v17547_v63  ;;  %v14871_v63 = vld [vmem:[%s17160_s22 + $0x40] ss:$28 sps:$4 sm:$0xff]  }
 0x22d   : > { %8646 = vmatpush1.bf16.msra.mxu0 %v14804_v54  ;;  %v14873_v54 = vld [vmem:[%s17160_s22 + $0x44] ss:$28 sps:$4 sm:$0xff]  }
 0x22e   : > { %8687 = vmatpush1.bf16.msra.mxu1 %v14807_v55  ;;  %8647 = vmatprep.subr.bf16.mxu0 %v14812_v56  ;;  %v17646_v55 = vcombine.high %v17630_v46, %v17630_v46  ;;  %v14876_v56 = vld [vmem:[%s17160_s22 + $0x2374] ss:$28 sps:$4 sm:$0xff]  }
 0x22f   : > { %8688 = vmatprep.subr.bf16.mxu1 %v14815_v57  ;;  %v14879_v57 = vld [vmem:[%s17160_s22 + $0x7c] ss:$28 sps:$4 sm:$0xff]  }
 0x231   : > { %8648 = vmatpush1.bf16.msra.mxu0 %v14810_v58  ;;  %v14874_v58 = vld [vmem:[%s17160_s22 + $0x2370] ss:$28 sps:$4 sm:$0xff]  }
 0x232   : > { %8689 = vmatpush1.bf16.msra.mxu1 %v14813_v59  ;;  %8649 = vmatprep.subr.bf16.mxu0 %v14818_v0  ;;  %v14877_v59 = vld [vmem:[%s17160_s22 + $0x78] ss:$28 sps:$4 sm:$0xff]   ;;  %v14882_v0 = vld [vmem:[%s17160_s22 + $0x23ac] ss:$28 sps:$4 sm:$0xff]  }
 0x233   : > { %8690 = vmatprep.subr.bf16.mxu1 %v14821_v1  ;;  %v14885_v1 = vld [vmem:[%s17160_s22 + $0xb4] ss:$28 sps:$4 sm:$0xff]  }
 0x235   : > { %8650 = vmatpush1.bf16.msra.mxu0 %v14816_v2  ;;  %v14880_v2 = vld [vmem:[%s17160_s22 + $0x23a8] ss:$28 sps:$4 sm:$0xff]  }
 0x236   : > { %8691 = vmatpush1.bf16.msra.mxu1 %v14819_v3  ;;  %8651 = vmatprep.subr.bf16.mxu0 %v14824_v4  ;;  %v14883_v3 = vld [vmem:[%s17160_s22 + $0xb0] ss:$28 sps:$4 sm:$0xff]   ;;  %v14888_v4 = vld [vmem:[%s17160_s22 + $0x23e4] ss:$28 sps:$4 sm:$0xff]  }
 0x237   : > { %8692 = vmatprep.subr.bf16.mxu1 %v14827_v5  ;;  %v14891_v5 = vld [vmem:[%s17160_s22 + $0xec] ss:$28 sps:$4 sm:$0xff]  }
 0x239   : > { %8652 = vmatpush1.bf16.msra.mxu0 %v14822_v6  ;;  %v14886_v6 = vld [vmem:[%s17160_s22 + $0x23e0] ss:$28 sps:$4 sm:$0xff]  }
 0x23a   : > { %8693 = vmatpush1.bf16.msra.mxu1 %v14825_v7  ;;  %8653 = vmatprep.subr.bf16.mxu0 %v14830_v10  ;;  %v14889_v7 = vld [vmem:[%s17160_s22 + $0xe8] ss:$28 sps:$4 sm:$0xff]   ;;  %v14894_v10 = vld [vmem:[%s17160_s22 + $0x241c] ss:$28 sps:$4 sm:$0xff]  }
 0x23b   : > { %8694 = vmatprep.subr.bf16.mxu1 %v14833_v11  ;;  %v14897_v11 = vld [vmem:[%s17160_s22 + $0x124] ss:$28 sps:$4 sm:$0xff]  }
 0x23d   : > { %8654 = vmatpush1.bf16.msra.mxu0 %v14828_v12  ;;  %v14892_v12 = vld [vmem:[%s17160_s22 + $0x2418] ss:$28 sps:$4 sm:$0xff]  }
 0x23e   : > { %8695 = vmatpush1.bf16.msra.mxu1 %v14831_v13  ;;  %8655 = vmatprep.subr.bf16.mxu0 %v14836_v14  ;;  %v14895_v13 = vld [vmem:[%s17160_s22 + $0x120] ss:$28 sps:$4 sm:$0xff]   ;;  %v14900_v14 = vld [vmem:[%s17160_s22 + $0x2454] ss:$28 sps:$4 sm:$0xff]  }
 0x23f   : > { %8696 = vmatprep.subr.bf16.mxu1 %v14839_v15  ;;  %v14903_v15 = vld [vmem:[%s17160_s22 + $0x15c] ss:$28 sps:$4 sm:$0xff]  }
 0x241   : > { %8656 = vmatpush1.bf16.msra.mxu0 %v14834_v16 }
 0x242   : > { %8697 = vmatpush1.bf16.msra.mxu1 %v14837_v17  ;;  %8657 = vmatprep.subr.bf16.mxu0 %v14842_v19  ;;  %v14898_v19 = vld [vmem:[%s17160_s22 + $0x2450] ss:$28 sps:$4 sm:$0xff]  }
 0x243   : > { %8698 = vmatprep.subr.bf16.mxu1 %v14845_v20  ;;  %v14901_v20 = vld [vmem:[%s17160_s22 + $0x158] ss:$28 sps:$4 sm:$0xff]  }
 0x245   : > { %8658 = vmatpush1.bf16.msra.mxu0 %v14840_v22 }
 0x246   : > { %8699 = vmatpush1.bf16.msra.mxu1 %v14843_v23  ;;  %8659 = vmatprep.subr.bf16.mxu0 %v14848_v28 }
 0x247   : > { %8700 = vmatprep.subr.bf16.mxu1 %v14851_v29 }
 0x249   : > { %8660 = vmatpush1.bf16.msra.mxu0 %v14846_v30 }
 0x24a   : > { %8701 = vmatpush1.bf16.msra.mxu1 %v14849_v31  ;;  %8661 = vmatprep.subr.bf16.mxu0 %v14854_v32 }
 0x24b   : > { %8702 = vmatprep.subr.bf16.mxu1 %v14857_v33 }
 0x24d   : > { %8662 = vmatpush1.bf16.msra.mxu0 %v14852_v34  ;;  %v14909_v34 = vld [vmem:[%s17160_s22 + $0x194] ss:$28 sps:$4 sm:$0xff]  }
 0x24e   : > { %8703 = vmatpush1.bf16.msra.mxu1 %v14855_v35  ;;  %8713 = vmatprep.subr.bf16.mxu0 %v14863_v37 }
 0x24f   : > { %8754 = vmatprep.subr.bf16.mxu1 %v14866_v44  ;;  %v14907_v44 = vld [vmem:[%s17160_s22 + $0x190] ss:$28 sps:$4 sm:$0xff]  }
 0x250   : > { %8664 = vmatmul.mubr.bf16.vlgmr.msra.gmra.mrb[16].mxu0 %v17636_v50 }
 0x251   : > { %8705 = vmatmul.mubr.bf16.vlgmr.msra.gmra.mrb[16].mxu1 %v17640_v51  ;;  %8714 = vmatpush1.bf16.msra.mxu0 %v14861_v47  ;;  %v14912_v47 = vld [vmem:[%s17160_s22 + $0x24c4] ss:$28 sps:$4 sm:$0xff]  }
 0x252   : > { %8755 = vmatpush1.bf16.msra.mxu1 %v14864_v48  ;;  %8715 = vmatprep.subr.bf16.mxu0 %v14870_v52  ;;  %v14915_v48 = vld [vmem:[%s17160_s22 + $0x1cc] ss:$28 sps:$4 sm:$0xff]   ;;  %v14910_v52 = vld [vmem:[%s17160_s22 + $0x24c0] ss:$28 sps:$4 sm:$0xff]  }
 0x253   : > { %8756 = vmatprep.subr.bf16.mxu1 %v14873_v54  ;;  %8745 = vmatprep.mubr.bf16.mxu0 %v17646_v55  ;;  %v14913_v54 = vld [vmem:[%s17160_s22 + $0x1c8] ss:$28 sps:$4 sm:$0xff]  }
 0x254   : > { %8786 = vmatprep.mubr.bf16.mxu1 %v17242_v49 }
 0x255   : > { %8716 = vmatpush1.bf16.msra.mxu0 %v14868_v60  ;;  %v14918_v60 = vld [vmem:[%s17160_s22 + $0x24fc] ss:$28 sps:$4 sm:$0xff]  }
 0x256   : > { %8757 = vmatpush1.bf16.msra.mxu1 %v14871_v63  ;;  %8717 = vmatprep.subr.bf16.mxu0 %v14876_v56  ;;  %v14921_v63 = vld [vmem:[%s17160_s22 + $0x204] ss:$28 sps:$4 sm:$0xff]   ;;  %v14916_v56 = vld [vmem:[%s17160_s22 + $0x24f8] ss:$28 sps:$4 sm:$0xff]  }
 0x257   : > { %8758 = vmatprep.subr.bf16.mxu1 %v14879_v57  ;;  %v14919_v57 = vld [vmem:[%s17160_s22 + $0x200] ss:$28 sps:$4 sm:$0xff]  }
 0x259   : > { %8718 = vmatpush1.bf16.msra.mxu0 %v14874_v58  ;;  %v14924_v58 = vld [vmem:[%s17160_s22 + $0x2534] ss:$28 sps:$4 sm:$0xff]  }
 0x25a   : > { %8759 = vmatpush1.bf16.msra.mxu1 %v14877_v59  ;;  %8719 = vmatprep.subr.bf16.mxu0 %v14882_v0  ;;  %v14927_v59 = vld [vmem:[%s17160_s22 + $0x23c] ss:$28 sps:$4 sm:$0xff]   ;;  %v14922_v0 = vld [vmem:[%s17160_s22 + $0x2530] ss:$28 sps:$4 sm:$0xff]  }
 0x25b   : > { %8760 = vmatprep.subr.bf16.mxu1 %v14885_v1  ;;  %v14925_v1 = vld [vmem:[%s17160_s22 + $0x238] ss:$28 sps:$4 sm:$0xff]  }
 0x25d   : > { %8720 = vmatpush1.bf16.msra.mxu0 %v14880_v2  ;;  %v14930_v2 = vld [vmem:[%s17160_s22 + $0x256c] ss:$28 sps:$4 sm:$0xff]  }
 0x25e   : > { %8761 = vmatpush1.bf16.msra.mxu1 %v14883_v3  ;;  %8721 = vmatprep.subr.bf16.mxu0 %v14888_v4  ;;  %v14933_v3 = vld [vmem:[%s17160_s22 + $0x274] ss:$28 sps:$4 sm:$0xff]   ;;  %v14928_v4 = vld [vmem:[%s17160_s22 + $0x2568] ss:$28 sps:$4 sm:$0xff]  }
 0x25f   : > { %8762 = vmatprep.subr.bf16.mxu1 %v14891_v5  ;;  %v14931_v5 = vld [vmem:[%s17160_s22 + $0x270] ss:$28 sps:$4 sm:$0xff]  }
 0x261   : > { %8722 = vmatpush1.bf16.msra.mxu0 %v14886_v6  ;;  %v14936_v6 = vld [vmem:[%s17160_s22 + $0x25a4] ss:$28 sps:$4 sm:$0xff]  }
 0x262   : > { %8763 = vmatpush1.bf16.msra.mxu1 %v14889_v7  ;;  %8723 = vmatprep.subr.bf16.mxu0 %v14894_v10  ;;  %v14939_v7 = vld [vmem:[%s17160_s22 + $0x2ac] ss:$28 sps:$4 sm:$0xff]   ;;  %v14934_v10 = vld [vmem:[%s17160_s22 + $0x25a0] ss:$28 sps:$4 sm:$0xff]  }
 0x263   : > { %8764 = vmatprep.subr.bf16.mxu1 %v14897_v11  ;;  %v8419_v16 = vpop.f32.mrb[4].mxu0  ;;  %v14937_v11 = vld [vmem:[%s17160_s22 + $0x2a8] ss:$28 sps:$4 sm:$0xff]  }
 0x264   : > { %v8460_v17 = vpop.f32.mrb[4].mxu1  ;;  %v8420_v22 = vadd.f32 %v8419_v16, %v17587_v36  ;;  %v8421_v23 = vpop.f32.mrb[5].mxu0  ;;  %v14906_v36 = vld [vmem:[%s17160_s22 + $0x248c] ss:$28 sps:$4 sm:$0xff]   ;;  %v14948_v16 = vld [vmem:[%s17160_s22 + $0x2614] ss:$28 sps:$4 sm:$0xff]  }
 0x265   : > { %v8462_v28 = vpop.f32.mrb[5].mxu1  ;;  %v8422_v29 = vadd.f32 %v8421_v23, %v17589_v45  ;;  %v8423_v30 = vpop.f32.mrb[6].mxu0  ;;  %8724 = vmatpush1.bf16.msra.mxu0 %v14892_v12  ;;  %v14904_v45 = vld [vmem:[%s17160_s22 + $0x2488] ss:$28 sps:$4 sm:$0xff]   ;;  %v14942_v12 = vld [vmem:[%s17160_s22 + $0x25dc] ss:$28 sps:$4 sm:$0xff]  }
 0x266   : > { %8765 = vmatpush1.bf16.msra.mxu1 %v14895_v13  ;;  %v8464_v31 = vpop.f32.mrb[6].mxu1  ;;  %v17676_v32 = vadd.f32 %v8460_v17, %v8420_v22  ;;  %v8424_v33 = vpop.f32.mrb[7].mxu0  ;;  %8725 = vmatprep.subr.bf16.mxu0 %v14900_v14  ;;  %v14945_v13 = vld [vmem:[%s17160_s22 + $0x2e4] ss:$28 sps:$4 sm:$0xff]   ;;  %v14940_v14 = vld [vmem:[%s17160_s22 + $0x25d8] ss:$28 sps:$4 sm:$0xff]  }
 0x267   : > { %8766 = vmatprep.subr.bf16.mxu1 %v14903_v15  ;;  %v8465_v35 = vpop.f32.mrb[7].mxu1  ;;  %v17680_v37 = vadd.f32 %v8462_v28, %v8422_v29  ;;  %v14943_v15 = vld [vmem:[%s17160_s22 + $0x2e0] ss:$28 sps:$4 sm:$0xff]   ;;  %v14954_v22 = vld [vmem:[%s17160_s22 + $0x264c] ss:$28 sps:$4 sm:$0xff]  }
 0x268   : > { %v14951_v17 = vld [vmem:[%s17160_s22 + $0x31c] ss:$28 sps:$4 sm:$0xff]   ;;  %v14957_v23 = vld [vmem:[%s17160_s22 + $0x354] ss:$28 sps:$4 sm:$0xff]   ;;  %v14952_v28 = vld [vmem:[%s17160_s22 + $0x2648] ss:$28 sps:$4 sm:$0xff]  }
 0x269   : > { %8726 = vmatpush1.bf16.msra.mxu0 %v14898_v19  ;;  %v14946_v19 = vld [vmem:[%s17160_s22 + $0x2610] ss:$28 sps:$4 sm:$0xff]   ;;  %v14960_v33 = vld [vmem:[%s17160_s22 + $0x388] ss:$28 sps:$4 sm:$0xff]  }
 0x26a   : > { %8767 = vmatpush1.bf16.msra.mxu1 %v14901_v20  ;;  %8727 = vmatprep.subr.bf16.mxu0 %v14906_v36  ;;  %v14949_v20 = vld [vmem:[%s17160_s22 + $0x318] ss:$28 sps:$4 sm:$0xff]   ;;  %v14955_v29 = vld [vmem:[%s17160_s22 + $0x350] ss:$28 sps:$4 sm:$0xff]   ;;  %v14963_v36 = vld [vmem:[%s17160_s22 + $0x708] ss:$28 sps:$4 sm:$0xff]  }
 0x26b   : > { %8768 = vmatprep.subr.bf16.mxu1 %v14909_v34  ;;  %v14962_v30 = vld [vmem:[%s17160_s22 + $0x38c] ss:$28 sps:$4 sm:$0xff]   ;;  %v17722_v34 = vcombine.low %v17630_v46, %v17630_v46  ;;  %v14968_v35 = vld [vmem:[%s17160_s22 + $0x3c4] ss:$28 sps:$4 sm:$0xff]  }
 0x26c   : > { %v14965_v31 = vld [vmem:[%s17160_s22 + $0x70c] ss:$28 sps:$4 sm:$0xff]   ;;  %v14969_v46 = vld [vmem:[%s17160_s22 + $0x740] ss:$28 sps:$4 sm:$0xff]  }
 0x26d   : > { %8728 = vmatpush1.bf16.msra.mxu0 %v14904_v45  ;;  %v14971_v45 = vld [vmem:[%s17160_s22 + $0x744] ss:$28 sps:$4 sm:$0xff]  }
 0x26e   : > { %8769 = vmatpush1.bf16.msra.mxu1 %v14907_v44  ;;  %8729 = vmatprep.subr.bf16.mxu0 %v14912_v47  ;;  %v14966_v44 = vld [vmem:[%s17160_s22 + $0x3c0] ss:$28 sps:$4 sm:$0xff]  }
 0x26f   : > { %8770 = vmatprep.subr.bf16.mxu1 %v14915_v48  ;;  %v14974_v47 = vld [vmem:[%s17160_s22 + $0x3fc] ss:$28 sps:$4 sm:$0xff]  }
 0x270   : > { %v14977_v48 = vld [vmem:[%s17160_s22 + $0x77c] ss:$28 sps:$4 sm:$0xff]  }
 0x271   : > { %8730 = vmatpush1.bf16.msra.mxu0 %v14910_v52  ;;  %v14972_v52 = vld [vmem:[%s17160_s22 + $0x3f8] ss:$28 sps:$4 sm:$0xff]  }
 0x272   : > { %8771 = vmatpush1.bf16.msra.mxu1 %v14913_v54  ;;  %8731 = vmatprep.subr.bf16.mxu0 %v14918_v60  ;;  %v14975_v54 = vld [vmem:[%s17160_s22 + $0x778] ss:$28 sps:$4 sm:$0xff]  }
 0x273   : > { %8772 = vmatprep.subr.bf16.mxu1 %v14921_v63  ;;  %v14980_v60 = vld [vmem:[%s17160_s22 + $0x434] ss:$28 sps:$4 sm:$0xff]  }
 0x274   : > { %v14983_v63 = vld [vmem:[%s17160_s22 + $0x7b4] ss:$28 sps:$4 sm:$0xff]  }
 0x275   : > { %8732 = vmatpush1.bf16.msra.mxu0 %v14916_v56  ;;  %v14978_v56 = vld [vmem:[%s17160_s22 + $0x430] ss:$28 sps:$4 sm:$0xff]  }
 0x276   : > { %8773 = vmatpush1.bf16.msra.mxu1 %v14919_v57  ;;  %8733 = vmatprep.subr.bf16.mxu0 %v14924_v58  ;;  %v14981_v57 = vld [vmem:[%s17160_s22 + $0x7b0] ss:$28 sps:$4 sm:$0xff]  }
 0x277   : > { %8774 = vmatprep.subr.bf16.mxu1 %v14927_v59  ;;  %v14986_v58 = vld [vmem:[%s17160_s22 + $0x46c] ss:$28 sps:$4 sm:$0xff]  }
 0x278   : > { %v14989_v59 = vld [vmem:[%s17160_s22 + $0x7ec] ss:$28 sps:$4 sm:$0xff]  }
 0x279   : > { %8734 = vmatpush1.bf16.msra.mxu0 %v14922_v0  ;;  %v14984_v0 = vld [vmem:[%s17160_s22 + $0x468] ss:$28 sps:$4 sm:$0xff]  }
 0x27a   : > { %8775 = vmatpush1.bf16.msra.mxu1 %v14925_v1  ;;  %8735 = vmatprep.subr.bf16.mxu0 %v14930_v2  ;;  %v14987_v1 = vld [vmem:[%s17160_s22 + $0x7e8] ss:$28 sps:$4 sm:$0xff]  }
 0x27b   : > { %8776 = vmatprep.subr.bf16.mxu1 %v14933_v3  ;;  %v14992_v2 = vld [vmem:[%s17160_s22 + $0x4a4] ss:$28 sps:$4 sm:$0xff]  }
 0x27c   : > { %v14995_v3 = vld [vmem:[%s17160_s22 + $0x824] ss:$28 sps:$4 sm:$0xff]  }
 0x27d   : > { %8736 = vmatpush1.bf16.msra.mxu0 %v14928_v4  ;;  %v14990_v4 = vld [vmem:[%s17160_s22 + $0x4a0] ss:$28 sps:$4 sm:$0xff]  }
 0x27e   : > { %8777 = vmatpush1.bf16.msra.mxu1 %v14931_v5  ;;  %8737 = vmatprep.subr.bf16.mxu0 %v14936_v6  ;;  %v14993_v5 = vld [vmem:[%s17160_s22 + $0x820] ss:$28 sps:$4 sm:$0xff]  }
 0x27f   : > { %8778 = vmatprep.subr.bf16.mxu1 %v14939_v7  ;;  %v14998_v6 = vld [vmem:[%s17160_s22 + $0x4dc] ss:$28 sps:$4 sm:$0xff]  }
 0x280   : > { %v15001_v7 = vld [vmem:[%s17160_s22 + $0x85c] ss:$28 sps:$4 sm:$0xff]  }
 0x281   : > { %8738 = vmatpush1.bf16.msra.mxu0 %v14934_v10 }
 0x282   : > { %8779 = vmatpush1.bf16.msra.mxu1 %v14937_v11  ;;  %8739 = vmatprep.subr.bf16.mxu0 %v14942_v12  ;;  %v14996_v12 = vld [vmem:[%s17160_s22 + $0x4d8] ss:$28 sps:$4 sm:$0xff]  }
 0x283   : > { %8780 = vmatprep.subr.bf16.mxu1 %v14945_v13  ;;  %v14999_v13 = vld [vmem:[%s17160_s22 + $0x858] ss:$28 sps:$4 sm:$0xff]  }
 0x285   : > { %8740 = vmatpush1.bf16.msra.mxu0 %v14940_v14 }
 0x286   : > { %8781 = vmatpush1.bf16.msra.mxu1 %v14943_v15  ;;  %8741 = vmatprep.subr.bf16.mxu0 %v14948_v16 }
 0x287   : > { %8782 = vmatprep.subr.bf16.mxu1 %v14951_v17 }
 0x289   : > { %8742 = vmatpush1.bf16.msra.mxu0 %v14946_v19 }
 0x28a   : > { %8783 = vmatpush1.bf16.msra.mxu1 %v14949_v20  ;;  %8743 = vmatprep.subr.bf16.mxu0 %v14954_v22 }
 0x28b   : > { %8784 = vmatprep.subr.bf16.mxu1 %v14957_v23 }
 0x28d   : > { %8744 = vmatpush1.bf16.msra.mxu0 %v14952_v28  ;;  %v15007_v28 = vld [vmem:[%s17160_s22 + $0x894] ss:$28 sps:$4 sm:$0xff]  }
 0x28e   : > { %8785 = vmatpush1.bf16.msra.mxu1 %v14955_v29  ;;  %8795 = vmatprep.subr.bf16.mxu0 %v14962_v30 }
 0x28f   : > { %8836 = vmatprep.subr.bf16.mxu1 %v14965_v31  ;;  %v15005_v31 = vld [vmem:[%s17160_s22 + $0x890] ss:$28 sps:$4 sm:$0xff]  }
 0x290   : > { %8746 = vmatmul.mubr.bf16.vlgmr.msra.gmra.mrb[20].mxu0 %v17722_v34 }
 0x291   : > { %8787 = vmatmul.mubr.bf16.vlgmr.msra.gmra.mrb[20].mxu1 %v17269_v8  ;;  %8796 = vmatpush1.bf16.msra.mxu0 %v14960_v33  ;;  %v15010_v33 = vld [vmem:[%s17160_s22 + $0x54c] ss:$28 sps:$4 sm:$0xff]  }
 0x292   : > { %8837 = vmatpush1.bf16.msra.mxu1 %v14963_v36  ;;  %8797 = vmatprep.subr.bf16.mxu0 %v14968_v35  ;;  %v15013_v36 = vld [vmem:[%s17160_s22 + $0x8cc] ss:$28 sps:$4 sm:$0xff]  }
 0x293   : > { %8838 = vmatprep.subr.bf16.mxu1 %v14971_v45  ;;  %8827 = vmatprep.mubr.bf16.mxu0 %v17247_v53  ;;  %v15008_v35 = vld [vmem:[%s17160_s22 + $0x548] ss:$28 sps:$4 sm:$0xff]  }
 0x294   : > { %8868 = vmatprep.mubr.bf16.mxu1 %v17309_v38  ;;  %v15011_v45 = vld [vmem:[%s17160_s22 + $0x8c8] ss:$28 sps:$4 sm:$0xff]  }
 0x295   : > { %8798 = vmatpush1.bf16.msra.mxu0 %v14966_v44  ;;  %v15016_v44 = vld [vmem:[%s17160_s22 + $0x584] ss:$28 sps:$4 sm:$0xff]  }
 0x296   : > { %8839 = vmatpush1.bf16.msra.mxu1 %v14969_v46  ;;  %8799 = vmatprep.subr.bf16.mxu0 %v14974_v47  ;;  %v15019_v46 = vld [vmem:[%s17160_s22 + $0x904] ss:$28 sps:$4 sm:$0xff]  }
 0x297   : > { %8840 = vmatprep.subr.bf16.mxu1 %v14977_v48  ;;  %v15014_v47 = vld [vmem:[%s17160_s22 + $0x580] ss:$28 sps:$4 sm:$0xff]  }
 0x298   : > { %v15017_v48 = vld [vmem:[%s17160_s22 + $0x900] ss:$28 sps:$4 sm:$0xff]  }
 0x299   : > { %8800 = vmatpush1.bf16.msra.mxu0 %v14972_v52  ;;  %v15022_v52 = vld [vmem:[%s17160_s22 + $0x5bc] ss:$28 sps:$4 sm:$0xff]  }
 0x29a   : > { %8841 = vmatpush1.bf16.msra.mxu1 %v14975_v54  ;;  %8801 = vmatprep.subr.bf16.mxu0 %v14980_v60  ;;  %v15025_v54 = vld [vmem:[%s17160_s22 + $0x93c] ss:$28 sps:$4 sm:$0xff]  }
 0x29b   : > { %8842 = vmatprep.subr.bf16.mxu1 %v14983_v63  ;;  %v15020_v60 = vld [vmem:[%s17160_s22 + $0x5b8] ss:$28 sps:$4 sm:$0xff]  }
 0x29c   : > { %v15023_v63 = vld [vmem:[%s17160_s22 + $0x938] ss:$28 sps:$4 sm:$0xff]  }
 0x29d   : > { %8802 = vmatpush1.bf16.msra.mxu0 %v14978_v56  ;;  %v15028_v56 = vld [vmem:[%s17160_s22 + $0x5f4] ss:$28 sps:$4 sm:$0xff]  }
 0x29e   : > { %8843 = vmatpush1.bf16.msra.mxu1 %v14981_v57  ;;  %8803 = vmatprep.subr.bf16.mxu0 %v14986_v58  ;;  %v15031_v57 = vld [vmem:[%s17160_s22 + $0x974] ss:$28 sps:$4 sm:$0xff]  }
 0x29f   : > { %8844 = vmatprep.subr.bf16.mxu1 %v14989_v59  ;;  %v15026_v58 = vld [vmem:[%s17160_s22 + $0x5f0] ss:$28 sps:$4 sm:$0xff]  }
 0x2a0   : > { %v15029_v59 = vld [vmem:[%s17160_s22 + $0x970] ss:$28 sps:$4 sm:$0xff]  }
 0x2a1   : > { %8804 = vmatpush1.bf16.msra.mxu0 %v14984_v0  ;;  %v15034_v0 = vld [vmem:[%s17160_s22 + $0x62c] ss:$28 sps:$4 sm:$0xff]  }
 0x2a2   : > { %8845 = vmatpush1.bf16.msra.mxu1 %v14987_v1  ;;  %8805 = vmatprep.subr.bf16.mxu0 %v14992_v2  ;;  %v15037_v1 = vld [vmem:[%s17160_s22 + $0x9ac] ss:$28 sps:$4 sm:$0xff]  }
 0x2a3   : > { %8846 = vmatprep.subr.bf16.mxu1 %v14995_v3  ;;  %v8501_v10 = vpop.f32.mrb[8].mxu0  ;;  %v15032_v2 = vld [vmem:[%s17160_s22 + $0x628] ss:$28 sps:$4 sm:$0xff]  }
 0x2a4   : > { %v8542_v11 = vpop.f32.mrb[8].mxu1  ;;  %v8502_v14 = vadd.f32 %v8501_v10, %v17676_v32  ;;  %v8503_v15 = vpop.f32.mrb[9].mxu0  ;;  %v15004_v32 = vld [vmem:[%s17160_s22 + $0x514] ss:$28 sps:$4 sm:$0xff]   ;;  %v15035_v3 = vld [vmem:[%s17160_s22 + $0x9a8] ss:$28 sps:$4 sm:$0xff]  }
 0x2a5   : > { %v8544_v16 = vpop.f32.mrb[9].mxu1  ;;  %v8504_v17 = vadd.f32 %v8503_v15, %v17680_v37  ;;  %v8505_v19 = vpop.f32.mrb[10].mxu0  ;;  %8806 = vmatpush1.bf16.msra.mxu0 %v14990_v4  ;;  %v15002_v37 = vld [vmem:[%s17160_s22 + $0x510] ss:$28 sps:$4 sm:$0xff]   ;;  %v15040_v4 = vld [vmem:[%s17160_s22 + $0x664] ss:$28 sps:$4 sm:$0xff]  }
 0x2a6   : > { %8847 = vmatpush1.bf16.msra.mxu1 %v14993_v5  ;;  %v8546_v20 = vpop.f32.mrb[10].mxu1  ;;  %v17754_v22 = vadd.f32 %v8542_v11, %v8502_v14  ;;  %v8506_v23 = vpop.f32.mrb[11].mxu0  ;;  %8807 = vmatprep.subr.bf16.mxu0 %v14998_v6  ;;  %v15043_v5 = vld [vmem:[%s17160_s22 + $0x9e4] ss:$28 sps:$4 sm:$0xff]   ;;  %v15046_v10 = vld [vmem:[%s17160_s22 + $0x69c] ss:$28 sps:$4 sm:$0xff]  }
 0x2a7   : > { %8848 = vmatprep.subr.bf16.mxu1 %v15001_v7  ;;  %v8547_v29 = vpop.f32.mrb[11].mxu1  ;;  %v17758_v30 = vadd.f32 %v8544_v16, %v8504_v17  ;;  %v15038_v6 = vld [vmem:[%s17160_s22 + $0x660] ss:$28 sps:$4 sm:$0xff]   ;;  %v15052_v14 = vld [vmem:[%s17160_s22 + $0x6d4] ss:$28 sps:$4 sm:$0xff]  }
 0x2a8   : > { %v15041_v7 = vld [vmem:[%s17160_s22 + $0x9e0] ss:$28 sps:$4 sm:$0xff]   ;;  %v15055_v15 = vld [vmem:[%s17160_s22 + $0xa54] ss:$28 sps:$4 sm:$0xff]   ;;  %v15058_v19 = vld [vmem:[%s17160_s22 + $0xa8c] ss:$28 sps:$4 sm:$0xff]  }
 0x2a9   : > { %8808 = vmatpush1.bf16.msra.mxu0 %v14996_v12  ;;  %v15049_v11 = vld [vmem:[%s17160_s22 + $0xa1c] ss:$28 sps:$4 sm:$0xff]   ;;  %v15050_v16 = vld [vmem:[%s17160_s22 + $0x6d0] ss:$28 sps:$4 sm:$0xff]   ;;  %v15056_v23 = vld [vmem:[%s17160_s22 + $0xa88] ss:$28 sps:$4 sm:$0xff]  }
 0x2aa   : > { %8849 = vmatpush1.bf16.msra.mxu1 %v14999_v13  ;;  %8809 = vmatprep.subr.bf16.mxu0 %v15004_v32  ;;  %v15044_v12 = vld [vmem:[%s17160_s22 + $0x698] ss:$28 sps:$4 sm:$0xff]   ;;  %v15053_v17 = vld [vmem:[%s17160_s22 + $0xa50] ss:$28 sps:$4 sm:$0xff]   ;;  %v15059_v32 = vld [vmem:[%s17160_s22 + $0xe08] ss:$28 sps:$4 sm:$0xff]  }
 0x2ab   : > { %8850 = vmatprep.subr.bf16.mxu1 %v15007_v28  ;;  %v15047_v13 = vld [vmem:[%s17160_s22 + $0xa18] ss:$28 sps:$4 sm:$0xff]   ;;  %v15061_v20 = vld [vmem:[%s17160_s22 + $0xe0c] ss:$28 sps:$4 sm:$0xff]   ;;  %v15064_v28 = vld [vmem:[%s17160_s22 + $0xac4] ss:$28 sps:$4 sm:$0xff]  }
 0x2ac   : > { %v15067_v29 = vld [vmem:[%s17160_s22 + $0xe44] ss:$28 sps:$4 sm:$0xff]  }
 0x2ad   : > { %8810 = vmatpush1.bf16.msra.mxu0 %v15002_v37  ;;  %v15062_v37 = vld [vmem:[%s17160_s22 + $0xac0] ss:$28 sps:$4 sm:$0xff]  }
 0x2ae   : > { %8851 = vmatpush1.bf16.msra.mxu1 %v15005_v31  ;;  %8811 = vmatprep.subr.bf16.mxu0 %v15010_v33  ;;  %v15065_v31 = vld [vmem:[%s17160_s22 + $0xe40] ss:$28 sps:$4 sm:$0xff]  }
 0x2af   : > { %8852 = vmatprep.subr.bf16.mxu1 %v15013_v36  ;;  %v15070_v33 = vld [vmem:[%s17160_s22 + $0xafc] ss:$28 sps:$4 sm:$0xff]  }
 0x2b0   : > { %v15073_v36 = vld [vmem:[%s17160_s22 + $0xe7c] ss:$28 sps:$4 sm:$0xff]  }
 0x2b1   : > { %8812 = vmatpush1.bf16.msra.mxu0 %v15008_v35  ;;  %v15068_v35 = vld [vmem:[%s17160_s22 + $0xaf8] ss:$28 sps:$4 sm:$0xff]  }
 0x2b2   : > { %8853 = vmatpush1.bf16.msra.mxu1 %v15011_v45  ;;  %8813 = vmatprep.subr.bf16.mxu0 %v15016_v44  ;;  %v15071_v45 = vld [vmem:[%s17160_s22 + $0xe78] ss:$28 sps:$4 sm:$0xff]  }
 0x2b3   : > { %8854 = vmatprep.subr.bf16.mxu1 %v15019_v46  ;;  %v15076_v44 = vld [vmem:[%s17160_s22 + $0xb34] ss:$28 sps:$4 sm:$0xff]  }
 0x2b4   : > { %v15079_v46 = vld [vmem:[%s17160_s22 + $0xeb4] ss:$28 sps:$4 sm:$0xff]  }
 0x2b5   : > { %8814 = vmatpush1.bf16.msra.mxu0 %v15014_v47  ;;  %v15074_v47 = vld [vmem:[%s17160_s22 + $0xb30] ss:$28 sps:$4 sm:$0xff]  }
 0x2b6   : > { %8855 = vmatpush1.bf16.msra.mxu1 %v15017_v48  ;;  %8815 = vmatprep.subr.bf16.mxu0 %v15022_v52  ;;  %v15077_v48 = vld [vmem:[%s17160_s22 + $0xeb0] ss:$28 sps:$4 sm:$0xff]  }
 0x2b7   : > { %8856 = vmatprep.subr.bf16.mxu1 %v15025_v54  ;;  %v15082_v52 = vld [vmem:[%s17160_s22 + $0xb6c] ss:$28 sps:$4 sm:$0xff]  }
 0x2b8   : > { %v15085_v54 = vld [vmem:[%s17160_s22 + $0xeec] ss:$28 sps:$4 sm:$0xff]  }
 0x2b9   : > { %8816 = vmatpush1.bf16.msra.mxu0 %v15020_v60  ;;  %v15080_v60 = vld [vmem:[%s17160_s22 + $0xb68] ss:$28 sps:$4 sm:$0xff]  }
 0x2ba   : > { %8857 = vmatpush1.bf16.msra.mxu1 %v15023_v63  ;;  %8817 = vmatprep.subr.bf16.mxu0 %v15028_v56  ;;  %v15083_v63 = vld [vmem:[%s17160_s22 + $0xee8] ss:$28 sps:$4 sm:$0xff]  }
 0x2bb   : > { %8858 = vmatprep.subr.bf16.mxu1 %v15031_v57  ;;  %v15088_v56 = vld [vmem:[%s17160_s22 + $0xba4] ss:$28 sps:$4 sm:$0xff]  }
 0x2bc   : > { %v15091_v57 = vld [vmem:[%s17160_s22 + $0xf24] ss:$28 sps:$4 sm:$0xff]  }
 0x2bd   : > { %8818 = vmatpush1.bf16.msra.mxu0 %v15026_v58  ;;  %v15086_v58 = vld [vmem:[%s17160_s22 + $0xba0] ss:$28 sps:$4 sm:$0xff]  }
 0x2be   : > { %8859 = vmatpush1.bf16.msra.mxu1 %v15029_v59  ;;  %8819 = vmatprep.subr.bf16.mxu0 %v15034_v0  ;;  %v15089_v59 = vld [vmem:[%s17160_s22 + $0xf20] ss:$28 sps:$4 sm:$0xff]  }
 0x2bf   : > { %8860 = vmatprep.subr.bf16.mxu1 %v15037_v1  ;;  %v15094_v0 = vld [vmem:[%s17160_s22 + $0xbdc] ss:$28 sps:$4 sm:$0xff]  }
 0x2c0   : > { %v15097_v1 = vld [vmem:[%s17160_s22 + $0xf5c] ss:$28 sps:$4 sm:$0xff]  }
 0x2c1   : > { %8820 = vmatpush1.bf16.msra.mxu0 %v15032_v2 }
 0x2c2   : > { %8861 = vmatpush1.bf16.msra.mxu1 %v15035_v3  ;;  %8821 = vmatprep.subr.bf16.mxu0 %v15040_v4  ;;  %v15092_v4 = vld [vmem:[%s17160_s22 + $0xbd8] ss:$28 sps:$4 sm:$0xff]  }
 0x2c3   : > { %8862 = vmatprep.subr.bf16.mxu1 %v15043_v5  ;;  %v15095_v5 = vld [vmem:[%s17160_s22 + $0xf58] ss:$28 sps:$4 sm:$0xff]  }
 0x2c5   : > { %8822 = vmatpush1.bf16.msra.mxu0 %v15038_v6 }
 0x2c6   : > { %8863 = vmatpush1.bf16.msra.mxu1 %v15041_v7  ;;  %8823 = vmatprep.subr.bf16.mxu0 %v15046_v10 }
 0x2c7   : > { %8864 = vmatprep.subr.bf16.mxu1 %v15049_v11  ;;  %v15100_v11 = vld [vmem:[%s17160_s22 + $0xc14] ss:$28 sps:$4 sm:$0xff]  }
 0x2c9   : > { %8824 = vmatpush1.bf16.msra.mxu0 %v15044_v12 }
 0x2ca   : > { %8865 = vmatpush1.bf16.msra.mxu1 %v15047_v13  ;;  %8825 = vmatprep.subr.bf16.mxu0 %v15052_v14 }
 0x2cb   : > { %8866 = vmatprep.subr.bf16.mxu1 %v15055_v15 }
 0x2cd   : > { %8826 = vmatpush1.bf16.msra.mxu0 %v15050_v16 }
 0x2ce   : > { %8867 = vmatpush1.bf16.msra.mxu1 %v15053_v17  ;;  %8877 = vmatprep.subr.bf16.mxu0 %v15058_v19 }
 0x2cf   : > { %8918 = vmatprep.subr.bf16.mxu1 %v15061_v20  ;;  %v15101_v20 = vld [vmem:[%s17160_s22 + $0xf90] ss:$28 sps:$4 sm:$0xff]  }
 0x2d0   : > { %8828 = vmatmul.mubr.bf16.vlgmr.msra.gmra.mrb[24].mxu0 %v17271_v9 }
 0x2d1   : > { %8869 = vmatmul.mubr.bf16.vlgmr.msra.gmra.mrb[24].mxu1 %v17357_v18  ;;  %8878 = vmatpush1.bf16.msra.mxu0 %v15056_v23  ;;  %v15106_v23 = vld [vmem:[%s17160_s22 + $0xc4c] ss:$28 sps:$4 sm:$0xff]  }
 0x2d2   : > { %8919 = vmatpush1.bf16.msra.mxu1 %v15059_v32  ;;  %8879 = vmatprep.subr.bf16.mxu0 %v15064_v28  ;;  %v15109_v32 = vld [vmem:[%s17160_s22 + $0xfcc] ss:$28 sps:$4 sm:$0xff]  }
 0x2d3   : > { %8920 = vmatprep.subr.bf16.mxu1 %v15067_v29  ;;  %8909 = vmatprep.mubr.bf16.mxu0 %v17313_v39  ;;  %v15104_v28 = vld [vmem:[%s17160_s22 + $0xc48] ss:$28 sps:$4 sm:$0xff]  }
 0x2d4   : > { %8950 = vmatprep.mubr.bf16.mxu1 %v17375_v26  ;;  %v15107_v29 = vld [vmem:[%s17160_s22 + $0xfc8] ss:$28 sps:$4 sm:$0xff]  }
 0x2d5   : > { %8880 = vmatpush1.bf16.msra.mxu0 %v15062_v37  ;;  %v15112_v37 = vld [vmem:[%s17160_s22 + $0xc84] ss:$28 sps:$4 sm:$0xff]  }
 0x2d6   : > { %8921 = vmatpush1.bf16.msra.mxu1 %v15065_v31  ;;  %8881 = vmatprep.subr.bf16.mxu0 %v15070_v33  ;;  %v15115_v31 = vld [vmem:[%s17160_s22 + $0x1004] ss:$28 sps:$4 sm:$0xff]  }
 0x2d7   : > { %8922 = vmatprep.subr.bf16.mxu1 %v15073_v36  ;;  %v15110_v33 = vld [vmem:[%s17160_s22 + $0xc80] ss:$28 sps:$4 sm:$0xff]  }
 0x2d8   : > { %v15113_v36 = vld [vmem:[%s17160_s22 + $0x1000] ss:$28 sps:$4 sm:$0xff]  }
 0x2d9   : > { %8882 = vmatpush1.bf16.msra.mxu0 %v15068_v35  ;;  %v15118_v35 = vld [vmem:[%s17160_s22 + $0xcbc] ss:$28 sps:$4 sm:$0xff]  }
 0x2da   : > { %8923 = vmatpush1.bf16.msra.mxu1 %v15071_v45  ;;  %8883 = vmatprep.subr.bf16.mxu0 %v15076_v44  ;;  %v15121_v45 = vld [vmem:[%s17160_s22 + $0x103c] ss:$28 sps:$4 sm:$0xff]  }
 0x2db   : > { %8924 = vmatprep.subr.bf16.mxu1 %v15079_v46  ;;  %v15116_v44 = vld [vmem:[%s17160_s22 + $0xcb8] ss:$28 sps:$4 sm:$0xff]  }
 0x2dc   : > { %v15119_v46 = vld [vmem:[%s17160_s22 + $0x1038] ss:$28 sps:$4 sm:$0xff]  }
 0x2dd   : > { %8884 = vmatpush1.bf16.msra.mxu0 %v15074_v47  ;;  %v15124_v47 = vld [vmem:[%s17160_s22 + $0xcf4] ss:$28 sps:$4 sm:$0xff]  }
 0x2de   : > { %8925 = vmatpush1.bf16.msra.mxu1 %v15077_v48  ;;  %8885 = vmatprep.subr.bf16.mxu0 %v15082_v52  ;;  %v15127_v48 = vld [vmem:[%s17160_s22 + $0x1074] ss:$28 sps:$4 sm:$0xff]  }
 0x2df   : > { %8926 = vmatprep.subr.bf16.mxu1 %v15085_v54  ;;  %v15122_v52 = vld [vmem:[%s17160_s22 + $0xcf0] ss:$28 sps:$4 sm:$0xff]  }
 0x2e0   : > { %v15125_v54 = vld [vmem:[%s17160_s22 + $0x1070] ss:$28 sps:$4 sm:$0xff]  }
 0x2e1   : > { %8886 = vmatpush1.bf16.msra.mxu0 %v15080_v60  ;;  %v15130_v60 = vld [vmem:[%s17160_s22 + $0xd2c] ss:$28 sps:$4 sm:$0xff]  }
 0x2e2   : > { %8927 = vmatpush1.bf16.msra.mxu1 %v15083_v63  ;;  %8887 = vmatprep.subr.bf16.mxu0 %v15088_v56  ;;  %v15133_v63 = vld [vmem:[%s17160_s22 + $0x10ac] ss:$28 sps:$4 sm:$0xff]  }
 0x2e3   : > { %8928 = vmatprep.subr.bf16.mxu1 %v15091_v57  ;;  %v8583_v2 = vpop.f32.mrb[12].mxu0  ;;  %v15128_v56 = vld [vmem:[%s17160_s22 + $0xd28] ss:$28 sps:$4 sm:$0xff]  }
 0x2e4   : > { %v8624_v3 = vpop.f32.mrb[12].mxu1  ;;  %v8584_v6 = vadd.f32 %v8583_v2, %v17754_v22  ;;  %v8585_v7 = vpop.f32.mrb[13].mxu0  ;;  %v15103_v22 = vld [vmem:[%s17160_s22 + $0xf94] ss:$28 sps:$4 sm:$0xff]   ;;  %v15131_v57 = vld [vmem:[%s17160_s22 + $0x10a8] ss:$28 sps:$4 sm:$0xff]  }
 0x2e5   : > { %v8626_v10 = vpop.f32.mrb[13].mxu1  ;;  %v8586_v12 = vadd.f32 %v8585_v7, %v17758_v30  ;;  %v8587_v13 = vpop.f32.mrb[14].mxu0  ;;  %8888 = vmatpush1.bf16.msra.mxu0 %v15086_v58  ;;  %v15098_v30 = vld [vmem:[%s17160_s22 + $0xc10] ss:$28 sps:$4 sm:$0xff]   ;;  %v15136_v58 = vld [vmem:[%s17160_s22 + $0xd64] ss:$28 sps:$4 sm:$0xff]  }
 0x2e6   : > { %8929 = vmatpush1.bf16.msra.mxu1 %v15089_v59  ;;  %v8628_v14 = vpop.f32.mrb[14].mxu1  ;;  %v17829_v15 = vadd.f32 %v8624_v3, %v8584_v6  ;;  %v8588_v16 = vpop.f32.mrb[15].mxu0  ;;  %8889 = vmatprep.subr.bf16.mxu0 %v15094_v0  ;;  %v15139_v59 = vld [vmem:[%s17160_s22 + $0x10e4] ss:$28 sps:$4 sm:$0xff]   ;;  %v15142_v2 = vld [vmem:[%s17160_s22 + $0xd9c] ss:$28 sps:$4 sm:$0xff]  }
 0x2e7   : > { %8930 = vmatprep.subr.bf16.mxu1 %v15097_v1  ;;  %v8629_v17 = vpop.f32.mrb[15].mxu1  ;;  %v17832_v19 = vadd.f32 %v8626_v10, %v8586_v12  ;;  %v15134_v0 = vld [vmem:[%s17160_s22 + $0xd60] ss:$28 sps:$4 sm:$0xff]   ;;  %v15148_v6 = vld [vmem:[%s17160_s22 + $0xdd4] ss:$28 sps:$4 sm:$0xff]  }
 0x2e8   : > { %v15137_v1 = vld [vmem:[%s17160_s22 + $0x10e0] ss:$28 sps:$4 sm:$0xff]   ;;  %v15151_v7 = vld [vmem:[%s17160_s22 + $0x1154] ss:$28 sps:$4 sm:$0xff]   ;;  %v15154_v12 = vld [vmem:[%s17160_s22 + $0x118c] ss:$28 sps:$4 sm:$0xff]  }
 0x2e9   : > { %8890 = vmatpush1.bf16.msra.mxu0 %v15092_v4  ;;  %v15145_v3 = vld [vmem:[%s17160_s22 + $0x111c] ss:$28 sps:$4 sm:$0xff]   ;;  %v15146_v10 = vld [vmem:[%s17160_s22 + $0xdd0] ss:$28 sps:$4 sm:$0xff]   ;;  %v15152_v14 = vld [vmem:[%s17160_s22 + $0x1188] ss:$28 sps:$4 sm:$0xff]  }
 0x2ea   : > { %8931 = vmatpush1.bf16.msra.mxu1 %v15095_v5  ;;  %8891 = vmatprep.subr.bf16.mxu0 %v15100_v11  ;;  %v15140_v4 = vld [vmem:[%s17160_s22 + $0xd98] ss:$28 sps:$4 sm:$0xff]   ;;  %v15149_v11 = vld [vmem:[%s17160_s22 + $0x1150] ss:$28 sps:$4 sm:$0xff]   ;;  %v15155_v16 = vld [vmem:[%s17160_s22 + $0x1508] ss:$28 sps:$4 sm:$0xff]  }
 0x2eb   : > { %8932 = vmatprep.subr.bf16.mxu1 %v15103_v22  ;;  %v15143_v5 = vld [vmem:[%s17160_s22 + $0x1118] ss:$28 sps:$4 sm:$0xff]   ;;  %v15157_v13 = vld [vmem:[%s17160_s22 + $0x150c] ss:$28 sps:$4 sm:$0xff]   ;;  %v15160_v22 = vld [vmem:[%s17160_s22 + $0x11c4] ss:$28 sps:$4 sm:$0xff]  }
 0x2ec   : > { %v15163_v17 = vld [vmem:[%s17160_s22 + $0x1544] ss:$28 sps:$4 sm:$0xff]  }
 0x2ed   : > { %8892 = vmatpush1.bf16.msra.mxu0 %v15098_v30  ;;  %v15158_v30 = vld [vmem:[%s17160_s22 + $0x11c0] ss:$28 sps:$4 sm:$0xff]  }
 0x2ee   : > { %8933 = vmatpush1.bf16.msra.mxu1 %v15101_v20  ;;  %8893 = vmatprep.subr.bf16.mxu0 %v15106_v23  ;;  %v15161_v20 = vld [vmem:[%s17160_s22 + $0x1540] ss:$28 sps:$4 sm:$0xff]  }
 0x2ef   : > { %8934 = vmatprep.subr.bf16.mxu1 %v15109_v32  ;;  %v15166_v23 = vld [vmem:[%s17160_s22 + $0x11fc] ss:$28 sps:$4 sm:$0xff]  }
 0x2f0   : > { %v15169_v32 = vld [vmem:[%s17160_s22 + $0x157c] ss:$28 sps:$4 sm:$0xff]  }
 0x2f1   : > { %8894 = vmatpush1.bf16.msra.mxu0 %v15104_v28  ;;  %v15164_v28 = vld [vmem:[%s17160_s22 + $0x11f8] ss:$28 sps:$4 sm:$0xff]  }
 0x2f2   : > { %8935 = vmatpush1.bf16.msra.mxu1 %v15107_v29  ;;  %8895 = vmatprep.subr.bf16.mxu0 %v15112_v37  ;;  %v15167_v29 = vld [vmem:[%s17160_s22 + $0x1578] ss:$28 sps:$4 sm:$0xff]  }
 0x2f3   : > { %8936 = vmatprep.subr.bf16.mxu1 %v15115_v31  ;;  %v15172_v37 = vld [vmem:[%s17160_s22 + $0x1234] ss:$28 sps:$4 sm:$0xff]  }
 0x2f4   : > { %v15175_v31 = vld [vmem:[%s17160_s22 + $0x15b4] ss:$28 sps:$4 sm:$0xff]  }
 0x2f5   : > { %8896 = vmatpush1.bf16.msra.mxu0 %v15110_v33  ;;  %v15170_v33 = vld [vmem:[%s17160_s22 + $0x1230] ss:$28 sps:$4 sm:$0xff]  }
 0x2f6   : > { %8937 = vmatpush1.bf16.msra.mxu1 %v15113_v36  ;;  %8897 = vmatprep.subr.bf16.mxu0 %v15118_v35  ;;  %v15173_v36 = vld [vmem:[%s17160_s22 + $0x15b0] ss:$28 sps:$4 sm:$0xff]  }
 0x2f7   : > { %8938 = vmatprep.subr.bf16.mxu1 %v15121_v45  ;;  %v15178_v35 = vld [vmem:[%s17160_s22 + $0x126c] ss:$28 sps:$4 sm:$0xff]  }
 0x2f8   : > { %v15181_v45 = vld [vmem:[%s17160_s22 + $0x15ec] ss:$28 sps:$4 sm:$0xff]  }
 0x2f9   : > { %8898 = vmatpush1.bf16.msra.mxu0 %v15116_v44  ;;  %v15176_v44 = vld [vmem:[%s17160_s22 + $0x1268] ss:$28 sps:$4 sm:$0xff]  }
 0x2fa   : > { %8939 = vmatpush1.bf16.msra.mxu1 %v15119_v46  ;;  %8899 = vmatprep.subr.bf16.mxu0 %v15124_v47  ;;  %v15179_v46 = vld [vmem:[%s17160_s22 + $0x15e8] ss:$28 sps:$4 sm:$0xff]  }
 0x2fb   : > { %8940 = vmatprep.subr.bf16.mxu1 %v15127_v48  ;;  %v15184_v47 = vld [vmem:[%s17160_s22 + $0x12a4] ss:$28 sps:$4 sm:$0xff]  }
 0x2fc   : > { %v15187_v48 = vld [vmem:[%s17160_s22 + $0x1624] ss:$28 sps:$4 sm:$0xff]  }
 0x2fd   : > { %8900 = vmatpush1.bf16.msra.mxu0 %v15122_v52  ;;  %v15182_v52 = vld [vmem:[%s17160_s22 + $0x12a0] ss:$28 sps:$4 sm:$0xff]  }
 0x2fe   : > { %8941 = vmatpush1.bf16.msra.mxu1 %v15125_v54  ;;  %8901 = vmatprep.subr.bf16.mxu0 %v15130_v60  ;;  %v15185_v54 = vld [vmem:[%s17160_s22 + $0x1620] ss:$28 sps:$4 sm:$0xff]  }
 0x2ff   : > { %8942 = vmatprep.subr.bf16.mxu1 %v15133_v63  ;;  %v15190_v60 = vld [vmem:[%s17160_s22 + $0x12dc] ss:$28 sps:$4 sm:$0xff]  }
 0x300   : > { %v15193_v63 = vld [vmem:[%s17160_s22 + $0x165c] ss:$28 sps:$4 sm:$0xff]  }
 0x301   : > { %8902 = vmatpush1.bf16.msra.mxu0 %v15128_v56 }
 0x302   : > { %8943 = vmatpush1.bf16.msra.mxu1 %v15131_v57  ;;  %8903 = vmatprep.subr.bf16.mxu0 %v15136_v58  ;;  %v15188_v58 = vld [vmem:[%s17160_s22 + $0x12d8] ss:$28 sps:$4 sm:$0xff]  }
 0x303   : > { %8944 = vmatprep.subr.bf16.mxu1 %v15139_v59  ;;  %v15191_v59 = vld [vmem:[%s17160_s22 + $0x1658] ss:$28 sps:$4 sm:$0xff]  }
 0x305   : > { %8904 = vmatpush1.bf16.msra.mxu0 %v15134_v0 }
 0x306   : > { %8945 = vmatpush1.bf16.msra.mxu1 %v15137_v1  ;;  %8905 = vmatprep.subr.bf16.mxu0 %v15142_v2 }
 0x307   : > { %8946 = vmatprep.subr.bf16.mxu1 %v15145_v3 }
 0x309   : > { %8906 = vmatpush1.bf16.msra.mxu0 %v15140_v4 }
 0x30a   : > { %8947 = vmatpush1.bf16.msra.mxu1 %v15143_v5  ;;  %8907 = vmatprep.subr.bf16.mxu0 %v15148_v6 }
 0x30b   : > { %8948 = vmatprep.subr.bf16.mxu1 %v15151_v7 }
 0x30d   : > { %8908 = vmatpush1.bf16.msra.mxu0 %v15146_v10  ;;  %v15199_v10 = vld [vmem:[%s17160_s22 + $0x1694] ss:$28 sps:$4 sm:$0xff]  }
 0x30e   : > { %8949 = vmatpush1.bf16.msra.mxu1 %v15149_v11  ;;  %8959 = vmatprep.subr.bf16.mxu0 %v15154_v12 }
 0x30f   : > { %9000 = vmatprep.subr.bf16.mxu1 %v15157_v13  ;;  %v15197_v13 = vld [vmem:[%s17160_s22 + $0x1690] ss:$28 sps:$4 sm:$0xff]  }
 0x310   : > { %8910 = vmatmul.mubr.bf16.vlgmr.msra.gmra.mrb[28].mxu0 %v17363_v21 }
 0x311   : > { %8951 = vmatmul.mubr.bf16.vlgmr.msra.gmra.mrb[28].mxu1 %v17449_v40  ;;  %8960 = vmatpush1.bf16.msra.mxu0 %v15152_v14  ;;  %v15202_v14 = vld [vmem:[%s17160_s22 + $0x134c] ss:$28 sps:$4 sm:$0xff]  }
 0x312   : > { %9001 = vmatpush1.bf16.msra.mxu1 %v15155_v16  ;;  %8961 = vmatprep.subr.bf16.mxu0 %v15160_v22  ;;  %v15205_v16 = vld [vmem:[%s17160_s22 + $0x16cc] ss:$28 sps:$4 sm:$0xff]  }
 0x313   : > { %9002 = vmatprep.subr.bf16.mxu1 %v15163_v17  ;;  %8991 = vmatprep.mubr.bf16.mxu0 %v17379_v27  ;;  %v15200_v22 = vld [vmem:[%s17160_s22 + $0x1348] ss:$28 sps:$4 sm:$0xff]  }
 0x314   : > { %9032 = vmatprep.mubr.bf16.mxu1 %v17465_v24  ;;  %v15203_v17 = vld [vmem:[%s17160_s22 + $0x16c8] ss:$28 sps:$4 sm:$0xff]  }
 0x315   : > { %8962 = vmatpush1.bf16.msra.mxu0 %v15158_v30  ;;  %v15208_v30 = vld [vmem:[%s17160_s22 + $0x1384] ss:$28 sps:$4 sm:$0xff]  }
 0x316   : > { %9003 = vmatpush1.bf16.msra.mxu1 %v15161_v20  ;;  %8963 = vmatprep.subr.bf16.mxu0 %v15166_v23  ;;  %v15211_v20 = vld [vmem:[%s17160_s22 + $0x1704] ss:$28 sps:$4 sm:$0xff]  }
 0x317   : > { %9004 = vmatprep.subr.bf16.mxu1 %v15169_v32  ;;  %v15206_v23 = vld [vmem:[%s17160_s22 + $0x1380] ss:$28 sps:$4 sm:$0xff]  }
 0x318   : > { %v15209_v32 = vld [vmem:[%s17160_s22 + $0x1700] ss:$28 sps:$4 sm:$0xff]  }
 0x319   : > { %8964 = vmatpush1.bf16.msra.mxu0 %v15164_v28  ;;  %v15214_v28 = vld [vmem:[%s17160_s22 + $0x13bc] ss:$28 sps:$4 sm:$0xff]  }
 0x31a   : > { %9005 = vmatpush1.bf16.msra.mxu1 %v15167_v29  ;;  %8965 = vmatprep.subr.bf16.mxu0 %v15172_v37  ;;  %v15217_v29 = vld [vmem:[%s17160_s22 + $0x173c] ss:$28 sps:$4 sm:$0xff]  }
 0x31b   : > { %9006 = vmatprep.subr.bf16.mxu1 %v15175_v31  ;;  %v15212_v37 = vld [vmem:[%s17160_s22 + $0x13b8] ss:$28 sps:$4 sm:$0xff]  }
 0x31c   : > { %v15215_v31 = vld [vmem:[%s17160_s22 + $0x1738] ss:$28 sps:$4 sm:$0xff]  }
 0x31d   : > { %8966 = vmatpush1.bf16.msra.mxu0 %v15170_v33  ;;  %v15220_v33 = vld [vmem:[%s17160_s22 + $0x13f4] ss:$28 sps:$4 sm:$0xff]  }
 0x31e   : > { %9007 = vmatpush1.bf16.msra.mxu1 %v15173_v36  ;;  %8967 = vmatprep.subr.bf16.mxu0 %v15178_v35  ;;  %v15223_v36 = vld [vmem:[%s17160_s22 + $0x1774] ss:$28 sps:$4 sm:$0xff]  }
 0x31f   : > { %9008 = vmatprep.subr.bf16.mxu1 %v15181_v45  ;;  %v15218_v35 = vld [vmem:[%s17160_s22 + $0x13f0] ss:$28 sps:$4 sm:$0xff]  }
 0x320   : > { %v15221_v45 = vld [vmem:[%s17160_s22 + $0x1770] ss:$28 sps:$4 sm:$0xff]  }
 0x321   : > { %8968 = vmatpush1.bf16.msra.mxu0 %v15176_v44  ;;  %v15226_v44 = vld [vmem:[%s17160_s22 + $0x142c] ss:$28 sps:$4 sm:$0xff]  }
 0x322   : > { %9009 = vmatpush1.bf16.msra.mxu1 %v15179_v46  ;;  %8969 = vmatprep.subr.bf16.mxu0 %v15184_v47  ;;  %v15229_v46 = vld [vmem:[%s17160_s22 + $0x17ac] ss:$28 sps:$4 sm:$0xff]  }
 0x323   : > { %9010 = vmatprep.subr.bf16.mxu1 %v15187_v48  ;;  %v8665_v56 = vpop.f32.mrb[16].mxu0  ;;  %v15224_v47 = vld [vmem:[%s17160_s22 + $0x1428] ss:$28 sps:$4 sm:$0xff]  }
 0x324   : > { %v8706_v57 = vpop.f32.mrb[16].mxu1  ;;  %v8666_v0 = vadd.f32 %v8665_v56, %v17829_v15  ;;  %v8667_v1 = vpop.f32.mrb[17].mxu0  ;;  %v15196_v15 = vld [vmem:[%s17160_s22 + $0x1314] ss:$28 sps:$4 sm:$0xff]   ;;  %v15227_v48 = vld [vmem:[%s17160_s22 + $0x17a8] ss:$28 sps:$4 sm:$0xff]  }
 0x325   : > { %v8708_v2 = vpop.f32.mrb[17].mxu1  ;;  %v8668_v3 = vadd.f32 %v8667_v1, %v17832_v19  ;;  %v8669_v4 = vpop.f32.mrb[18].mxu0  ;;  %8970 = vmatpush1.bf16.msra.mxu0 %v15182_v52  ;;  %v15194_v19 = vld [vmem:[%s17160_s22 + $0x1310] ss:$28 sps:$4 sm:$0xff]   ;;  %v15232_v52 = vld [vmem:[%s17160_s22 + $0x1464] ss:$28 sps:$4 sm:$0xff]  }
 0x326   : > { %9011 = vmatpush1.bf16.msra.mxu1 %v15185_v54  ;;  %v8710_v5 = vpop.f32.mrb[18].mxu1  ;;  %v17902_v6 = vadd.f32 %v8706_v57, %v8666_v0  ;;  %v8670_v7 = vpop.f32.mrb[19].mxu0  ;;  %8971 = vmatprep.subr.bf16.mxu0 %v15190_v60  ;;  %v15235_v54 = vld [vmem:[%s17160_s22 + $0x17e4] ss:$28 sps:$4 sm:$0xff]   ;;  %v15238_v56 = vld [vmem:[%s17160_s22 + $0x149c] ss:$28 sps:$4 sm:$0xff]  }
 0x327   : > { %9012 = vmatprep.subr.bf16.mxu1 %v15193_v63  ;;  %v8711_v11 = vpop.f32.mrb[19].mxu1  ;;  %v17906_v12 = vadd.f32 %v8708_v2, %v8668_v3  ;;  %v15230_v60 = vld [vmem:[%s17160_s22 + $0x1460] ss:$28 sps:$4 sm:$0xff]   ;;  %v15244_v0 = vld [vmem:[%s17160_s22 + $0x14d4] ss:$28 sps:$4 sm:$0xff]  }
 0x328   : > { %v15233_v63 = vld [vmem:[%s17160_s22 + $0x17e0] ss:$28 sps:$4 sm:$0xff]   ;;  %v15247_v1 = vld [vmem:[%s17160_s22 + $0x1854] ss:$28 sps:$4 sm:$0xff]   ;;  %v15250_v4 = vld [vmem:[%s17160_s22 + $0x188c] ss:$28 sps:$4 sm:$0xff]  }
 0x329   : > { %8972 = vmatpush1.bf16.msra.mxu0 %v15188_v58  ;;  %v15241_v57 = vld [vmem:[%s17160_s22 + $0x181c] ss:$28 sps:$4 sm:$0xff]   ;;  %v15242_v2 = vld [vmem:[%s17160_s22 + $0x14d0] ss:$28 sps:$4 sm:$0xff]   ;;  %v15248_v7 = vld [vmem:[%s17160_s22 + $0x1888] ss:$28 sps:$4 sm:$0xff]  }
 0x32a   : > { %9013 = vmatpush1.bf16.msra.mxu1 %v15191_v59  ;;  %8973 = vmatprep.subr.bf16.mxu0 %v15196_v15  ;;  %v15236_v58 = vld [vmem:[%s17160_s22 + $0x1498] ss:$28 sps:$4 sm:$0xff]   ;;  %v15245_v3 = vld [vmem:[%s17160_s22 + $0x1850] ss:$28 sps:$4 sm:$0xff]   ;;  %v15251_v15 = vld [vmem:[%s17160_s22 + $0x1c08] ss:$28 sps:$4 sm:$0xff]  }
 0x32b   : > { %9014 = vmatprep.subr.bf16.mxu1 %v15199_v10  ;;  %v15239_v59 = vld [vmem:[%s17160_s22 + $0x1818] ss:$28 sps:$4 sm:$0xff]   ;;  %v15253_v5 = vld [vmem:[%s17160_s22 + $0x1c0c] ss:$28 sps:$4 sm:$0xff]   ;;  %v15256_v10 = vld [vmem:[%s17160_s22 + $0x18c4] ss:$28 sps:$4 sm:$0xff]  }
 0x32c   : > { %v15259_v11 = vld [vmem:[%s17160_s22 + $0x1c44] ss:$28 sps:$4 sm:$0xff]  }
 0x32d   : > { %8974 = vmatpush1.bf16.msra.mxu0 %v15194_v19  ;;  %v15254_v19 = vld [vmem:[%s17160_s22 + $0x18c0] ss:$28 sps:$4 sm:$0xff]  }
 0x32e   : > { %9015 = vmatpush1.bf16.msra.mxu1 %v15197_v13  ;;  %8975 = vmatprep.subr.bf16.mxu0 %v15202_v14  ;;  %v15257_v13 = vld [vmem:[%s17160_s22 + $0x1c40] ss:$28 sps:$4 sm:$0xff]  }
 0x32f   : > { %9016 = vmatprep.subr.bf16.mxu1 %v15205_v16  ;;  %v15262_v14 = vld [vmem:[%s17160_s22 + $0x18fc] ss:$28 sps:$4 sm:$0xff]  }
 0x330   : > { %v15265_v16 = vld [vmem:[%s17160_s22 + $0x1c7c] ss:$28 sps:$4 sm:$0xff]  }
 0x331   : > { %8976 = vmatpush1.bf16.msra.mxu0 %v15200_v22  ;;  %v15260_v22 = vld [vmem:[%s17160_s22 + $0x18f8] ss:$28 sps:$4 sm:$0xff]  }
 0x332   : > { %9017 = vmatpush1.bf16.msra.mxu1 %v15203_v17  ;;  %8977 = vmatprep.subr.bf16.mxu0 %v15208_v30  ;;  %v15263_v17 = vld [vmem:[%s17160_s22 + $0x1c78] ss:$28 sps:$4 sm:$0xff]  }
 0x333   : > { %9018 = vmatprep.subr.bf16.mxu1 %v15211_v20  ;;  %v15268_v30 = vld [vmem:[%s17160_s22 + $0x1934] ss:$28 sps:$4 sm:$0xff]  }
 0x334   : > { %v15271_v20 = vld [vmem:[%s17160_s22 + $0x1cb4] ss:$28 sps:$4 sm:$0xff]  }
 0x335   : > { %8978 = vmatpush1.bf16.msra.mxu0 %v15206_v23  ;;  %v15266_v23 = vld [vmem:[%s17160_s22 + $0x1930] ss:$28 sps:$4 sm:$0xff]  }
 0x336   : > { %9019 = vmatpush1.bf16.msra.mxu1 %v15209_v32  ;;  %8979 = vmatprep.subr.bf16.mxu0 %v15214_v28  ;;  %v15269_v32 = vld [vmem:[%s17160_s22 + $0x1cb0] ss:$28 sps:$4 sm:$0xff]  }
 0x337   : > { %9020 = vmatprep.subr.bf16.mxu1 %v15217_v29  ;;  %v15274_v28 = vld [vmem:[%s17160_s22 + $0x196c] ss:$28 sps:$4 sm:$0xff]  }
 0x338   : > { %v15277_v29 = vld [vmem:[%s17160_s22 + $0x1cec] ss:$28 sps:$4 sm:$0xff]  }
 0x339   : > { %8980 = vmatpush1.bf16.msra.mxu0 %v15212_v37  ;;  %v15272_v37 = vld [vmem:[%s17160_s22 + $0x1968] ss:$28 sps:$4 sm:$0xff]  }
 0x33a   : > { %9021 = vmatpush1.bf16.msra.mxu1 %v15215_v31  ;;  %8981 = vmatprep.subr.bf16.mxu0 %v15220_v33  ;;  %v15275_v31 = vld [vmem:[%s17160_s22 + $0x1ce8] ss:$28 sps:$4 sm:$0xff]  }
 0x33b   : > { %9022 = vmatprep.subr.bf16.mxu1 %v15223_v36  ;;  %v15280_v33 = vld [vmem:[%s17160_s22 + $0x19a4] ss:$28 sps:$4 sm:$0xff]  }
 0x33c   : > { %v15283_v36 = vld [vmem:[%s17160_s22 + $0x1d24] ss:$28 sps:$4 sm:$0xff]  }
 0x33d   : > { %8982 = vmatpush1.bf16.msra.mxu0 %v15218_v35  ;;  %v15278_v35 = vld [vmem:[%s17160_s22 + $0x19a0] ss:$28 sps:$4 sm:$0xff]  }
 0x33e   : > { %9023 = vmatpush1.bf16.msra.mxu1 %v15221_v45  ;;  %8983 = vmatprep.subr.bf16.mxu0 %v15226_v44  ;;  %v15281_v45 = vld [vmem:[%s17160_s22 + $0x1d20] ss:$28 sps:$4 sm:$0xff]   ;;  %v464_v44 = vld [vmem:[#allocation2] sm:$0xff] }
 0x33f   : > { %9024 = vmatprep.subr.bf16.mxu1 %v15229_v46  ;;  %v465_v46 = vld [vmem:[#allocation2 + $0x8] sm:$0xff] }
 0x341   : > { %8984 = vmatpush1.bf16.msra.mxu0 %v15224_v47  ;;  %v15286_v47 = vld [vmem:[%s17160_s22 + $0x19dc] ss:$28 sps:$4 sm:$0xff]  }
 0x342   : > { %9025 = vmatpush1.bf16.msra.mxu1 %v15227_v48  ;;  %8985 = vmatprep.subr.bf16.mxu0 %v15232_v52  ;;  %v15289_v48 = vld [vmem:[%s17160_s22 + $0x1d5c] ss:$28 sps:$4 sm:$0xff]  }
 0x343   : > { %9026 = vmatprep.subr.bf16.mxu1 %v15235_v54  ;;  %v15284_v54 = vld [vmem:[%s17160_s22 + $0x19d8] ss:$28 sps:$4 sm:$0xff]  }
 0x345   : > { %8986 = vmatpush1.bf16.msra.mxu0 %v15230_v60  ;;  %v15287_v60 = vld [vmem:[%s17160_s22 + $0x1d58] ss:$28 sps:$4 sm:$0xff]  }
 0x346   : > { %9027 = vmatpush1.bf16.msra.mxu1 %v15233_v63  ;;  %8987 = vmatprep.subr.bf16.mxu0 %v15238_v56 }
 0x347   : > { %9028 = vmatprep.subr.bf16.mxu1 %v15241_v57 }
 0x349   : > { %8988 = vmatpush1.bf16.msra.mxu0 %v15236_v58 }
 0x34a   : > { %9029 = vmatpush1.bf16.msra.mxu1 %v15239_v59  ;;  %8989 = vmatprep.subr.bf16.mxu0 %v15244_v0 }
 0x34b   : > { %9030 = vmatprep.subr.bf16.mxu1 %v15247_v1 }
 0x34d   : > { %8990 = vmatpush1.bf16.msra.mxu0 %v15242_v2 }
 0x34e   : > { %9031 = vmatpush1.bf16.msra.mxu1 %v15245_v3  ;;  %9041 = vmatprep.subr.bf16.mxu0 %v15250_v4  ;;  %v15292_v4 = vld [vmem:[%s17160_s22 + $0x1a14] ss:$28 sps:$4 sm:$0xff]  }
 0x34f   : > { %9082 = vmatprep.subr.bf16.mxu1 %v15253_v5 }
 0x350   : > { %8992 = vmatmul.mubr.bf16.vlgmr.msra.gmra.mrb[32].mxu0 %v17453_v41 }
 0x351   : > { %9033 = vmatmul.mubr.bf16.vlgmr.msra.gmra.mrb[32].mxu1 %v17540_v61  ;;  %9042 = vmatpush1.bf16.msra.mxu0 %v15248_v7 }
 0x352   : > { %9083 = vmatpush1.bf16.msra.mxu1 %v15251_v15  ;;  %9043 = vmatprep.subr.bf16.mxu0 %v15256_v10  ;;  %v15293_v15 = vld [vmem:[%s17160_s22 + $0x1d90] ss:$28 sps:$4 sm:$0xff]  }
 0x353   : > { %9084 = vmatprep.subr.bf16.mxu1 %v15259_v11  ;;  %9073 = vmatprep.mubr.bf16.mxu0 %v17469_v25  ;;  %v15298_v10 = vld [vmem:[%s17160_s22 + $0x1a4c] ss:$28 sps:$4 sm:$0xff]  }
 0x354   : > { %9114 = vmatprep.mubr.bf16.mxu1 %v17555_v42  ;;  %v15301_v11 = vld [vmem:[%s17160_s22 + $0x1dcc] ss:$28 sps:$4 sm:$0xff]  }
 0x355   : > { %9044 = vmatpush1.bf16.msra.mxu0 %v15254_v19  ;;  %v15296_v19 = vld [vmem:[%s17160_s22 + $0x1a48] ss:$28 sps:$4 sm:$0xff]  }
 0x356   : > { %9085 = vmatpush1.bf16.msra.mxu1 %v15257_v13  ;;  %9045 = vmatprep.subr.bf16.mxu0 %v15262_v14  ;;  %v15299_v13 = vld [vmem:[%s17160_s22 + $0x1dc8] ss:$28 sps:$4 sm:$0xff]  }
 0x357   : > { %9086 = vmatprep.subr.bf16.mxu1 %v15265_v16  ;;  %v15304_v14 = vld [vmem:[%s17160_s22 + $0x1a84] ss:$28 sps:$4 sm:$0xff]  }
 0x358   : > { %v15307_v16 = vld [vmem:[%s17160_s22 + $0x1e04] ss:$28 sps:$4 sm:$0xff]  }
 0x359   : > { %9046 = vmatpush1.bf16.msra.mxu0 %v15260_v22  ;;  %v15302_v22 = vld [vmem:[%s17160_s22 + $0x1a80] ss:$28 sps:$4 sm:$0xff]  }
 0x35a   : > { %9087 = vmatpush1.bf16.msra.mxu1 %v15263_v17  ;;  %9047 = vmatprep.subr.bf16.mxu0 %v15268_v30  ;;  %v15305_v17 = vld [vmem:[%s17160_s22 + $0x1e00] ss:$28 sps:$4 sm:$0xff]  }
 0x35b   : > { %9088 = vmatprep.subr.bf16.mxu1 %v15271_v20  ;;  %v15310_v30 = vld [vmem:[%s17160_s22 + $0x1abc] ss:$28 sps:$4 sm:$0xff]  }
 0x35c   : > { %v15313_v20 = vld [vmem:[%s17160_s22 + $0x1e3c] ss:$28 sps:$4 sm:$0xff]  }
 0x35d   : > { %9048 = vmatpush1.bf16.msra.mxu0 %v15266_v23  ;;  %v15308_v23 = vld [vmem:[%s17160_s22 + $0x1ab8] ss:$28 sps:$4 sm:$0xff]  }
 0x35e   : > { %9089 = vmatpush1.bf16.msra.mxu1 %v15269_v32  ;;  %9049 = vmatprep.subr.bf16.mxu0 %v15274_v28  ;;  %v15311_v32 = vld [vmem:[%s17160_s22 + $0x1e38] ss:$28 sps:$4 sm:$0xff]  }
 0x35f   : > { %9090 = vmatprep.subr.bf16.mxu1 %v15277_v29  ;;  %v15316_v28 = vld [vmem:[%s17160_s22 + $0x1af4] ss:$28 sps:$4 sm:$0xff]  }
 0x360   : > { %v15319_v29 = vld [vmem:[%s17160_s22 + $0x1e74] ss:$28 sps:$4 sm:$0xff]  }
 0x361   : > { %9050 = vmatpush1.bf16.msra.mxu0 %v15272_v37  ;;  %v15314_v37 = vld [vmem:[%s17160_s22 + $0x1af0] ss:$28 sps:$4 sm:$0xff]  }
 0x362   : > { %9091 = vmatpush1.bf16.msra.mxu1 %v15275_v31  ;;  %9051 = vmatprep.subr.bf16.mxu0 %v15280_v33  ;;  %v15317_v31 = vld [vmem:[%s17160_s22 + $0x1e70] ss:$28 sps:$4 sm:$0xff]  }
 0x363   : > { %9092 = vmatprep.subr.bf16.mxu1 %v15283_v36  ;;  %v8747_v52 = vpop.f32.mrb[20].mxu0  ;;  %v15322_v33 = vld [vmem:[%s17160_s22 + $0x1b2c] ss:$28 sps:$4 sm:$0xff]  }
 0x364   : > { %v17974_v63 = vpop.f32.mrb[20].mxu1  ;;  %v8748_v56 = vadd.f32 %v8747_v52, %v17902_v6  ;;  %v8749_v57 = vpop.f32.mrb[21].mxu0  ;;  %v15295_v6 = vld [vmem:[%s17160_s22 + $0x1d94] ss:$28 sps:$4 sm:$0xff]   ;;  %v15325_v36 = vld [vmem:[%s17160_s22 + $0x1eac] ss:$28 sps:$4 sm:$0xff]  }
 0x365   : > { %v17977_v58 = vpop.f32.mrb[21].mxu1  ;;  %v8750_v59 = vadd.f32 %v8749_v57, %v17906_v12  ;;  %v8751_v0 = vpop.f32.mrb[22].mxu0  ;;  %9052 = vmatpush1.bf16.msra.mxu0 %v15278_v35  ;;  %v15290_v12 = vld [vmem:[%s17160_s22 + $0x1a10] ss:$28 sps:$4 sm:$0xff]   ;;  %v15320_v35 = vld [vmem:[%s17160_s22 + $0x1b28] ss:$28 sps:$4 sm:$0xff]  }
 0x366   : > { %9093 = vmatpush1.bf16.msra.mxu1 %v15281_v45  ;;  %v8792_v1 = vpop.f32.mrb[22].mxu1  ;;  %v10096_v2 = vadd.f32 %v8748_v56, %v464_v44  ;;  %v8752_v3 = vpop.f32.mrb[23].mxu0  ;;  %9053 = vmatprep.subr.bf16.mxu0 %v15286_v47  ;;  %v15323_v45 = vld [vmem:[%s17160_s22 + $0x1ea8] ss:$28 sps:$4 sm:$0xff]   ;;  %v15326_v47 = vld [vmem:[%s17160_s22 + $0x1b60] ss:$28 sps:$4 sm:$0xff]  }
 0x367   : > { %9094 = vmatprep.subr.bf16.mxu1 %v15289_v48  ;;  %v8793_v5 = vpop.f32.mrb[23].mxu1  ;;  %v10097_v7 = vadd.f32 %v8750_v59, %v465_v46  ;;  %v15328_v44 = vld [vmem:[%s17160_s22 + $0x1b64] ss:$28 sps:$4 sm:$0xff]   ;;  %v15334_v52 = vld [vmem:[%s17160_s22 + $0x1b9c] ss:$28 sps:$4 sm:$0xff]  }
 0x368   : > { %10103 = vst [vmem:[#allocation2] sm:$0xff] %v10096_v2  ;;  %v15331_v46 = vld [vmem:[%s17160_s22 + $0x1ee4] ss:$28 sps:$4 sm:$0xff]   ;;  %v15335_v56 = vld [vmem:[%s17160_s22 + $0x1f18] ss:$28 sps:$4 sm:$0xff]  }
 0x369   : > { %10104 = vst [vmem:[#allocation2 + $0x8] sm:$0xff] %v10097_v7  ;;  %9054 = vmatpush1.bf16.msra.mxu0 %v15284_v54  ;;  %v15329_v48 = vld [vmem:[%s17160_s22 + $0x1ee0] ss:$28 sps:$4 sm:$0xff]   ;;  %v15340_v57 = vld [vmem:[%s17160_s22 + $0x1bd4] ss:$28 sps:$4 sm:$0xff]  }
 0x36a   : > { %9095 = vmatpush1.bf16.msra.mxu1 %v15287_v60  ;;  %9055 = vmatprep.subr.bf16.mxu0 %v15292_v4  ;;  %v15337_v54 = vld [vmem:[%s17160_s22 + $0x1f1c] ss:$28 sps:$4 sm:$0xff]   ;;  %v15343_v59 = vld [vmem:[%s17160_s22 + $0x1f54] ss:$28 sps:$4 sm:$0xff]   ;;  %v15346_v2 = vld [vmem:[%s17160_s22 + $0x1f8c] ss:$28 sps:$4 sm:$0xff]  }
 0x36b   : > { %9096 = vmatprep.subr.bf16.mxu1 %v15295_v6  ;;  %v15332_v60 = vld [vmem:[%s17160_s22 + $0x1b98] ss:$28 sps:$4 sm:$0xff]   ;;  %v15338_v0 = vld [vmem:[%s17160_s22 + $0x1bd0] ss:$28 sps:$4 sm:$0xff]   ;;  %v15344_v4 = vld [vmem:[%s17160_s22 + $0x1f88] ss:$28 sps:$4 sm:$0xff]  }
 0x36c   : > { %v15341_v1 = vld [vmem:[%s17160_s22 + $0x1f50] ss:$28 sps:$4 sm:$0xff]   ;;  %v15347_v6 = vld [vmem:[%s17160_s22 + $0x2308] ss:$28 sps:$4 sm:$0xff]  }
 0x36d   : > { %9056 = vmatpush1.bf16.msra.mxu0 %v15290_v12  ;;  %v15349_v3 = vld [vmem:[%s17160_s22 + $0x230c] ss:$28 sps:$4 sm:$0xff]   ;;  %v15352_v5 = vld [vmem:[%s17160_s22 + $0x1fc4] ss:$28 sps:$4 sm:$0xff]  }
 0x36e   : > { %9097 = vmatpush1.bf16.msra.mxu1 %v15293_v15  ;;  %9057 = vmatprep.subr.bf16.mxu0 %v15298_v10  ;;  %v15355_v7 = vld [vmem:[%s17160_s22 + $0x2344] ss:$28 sps:$4 sm:$0xff]   ;;  %v15358_v10 = vld [vmem:[%s17160_s22 + $0x1ffc] ss:$28 sps:$4 sm:$0xff]  }
 0x36f   : > { %9098 = vmatprep.subr.bf16.mxu1 %v15301_v11  ;;  %v15350_v12 = vld [vmem:[%s17160_s22 + $0x1fc0] ss:$28 sps:$4 sm:$0xff]  }
 0x370   : > { %v15353_v15 = vld [vmem:[%s17160_s22 + $0x2340] ss:$28 sps:$4 sm:$0xff]  }
 0x371   : > { %9058 = vmatpush1.bf16.msra.mxu0 %v15296_v19  ;;  %v15361_v11 = vld [vmem:[%s17160_s22 + $0x237c] ss:$28 sps:$4 sm:$0xff]  }
 0x372   : > { %9099 = vmatpush1.bf16.msra.mxu1 %v15299_v13  ;;  %9059 = vmatprep.subr.bf16.mxu0 %v15304_v14  ;;  %v15356_v19 = vld [vmem:[%s17160_s22 + $0x1ff8] ss:$28 sps:$4 sm:$0xff]  }
 0x373   : > { %9100 = vmatprep.subr.bf16.mxu1 %v15307_v16  ;;  %v15359_v13 = vld [vmem:[%s17160_s22 + $0x2378] ss:$28 sps:$4 sm:$0xff]  }
 0x374   : > { %v15364_v14 = vld [vmem:[%s17160_s22 + $0x2034] ss:$28 sps:$4 sm:$0xff]  }
 0x375   : > { %9060 = vmatpush1.bf16.msra.mxu0 %v15302_v22  ;;  %v15367_v16 = vld [vmem:[%s17160_s22 + $0x23b4] ss:$28 sps:$4 sm:$0xff]  }
 0x376   : > { %9101 = vmatpush1.bf16.msra.mxu1 %v15305_v17  ;;  %9061 = vmatprep.subr.bf16.mxu0 %v15310_v30  ;;  %v15362_v22 = vld [vmem:[%s17160_s22 + $0x2030] ss:$28 sps:$4 sm:$0xff]  }
 0x377   : > { %9102 = vmatprep.subr.bf16.mxu1 %v15313_v20  ;;  %v15365_v17 = vld [vmem:[%s17160_s22 + $0x23b0] ss:$28 sps:$4 sm:$0xff]  }
 0x378   : > { %v15370_v30 = vld [vmem:[%s17160_s22 + $0x206c] ss:$28 sps:$4 sm:$0xff]  }
 0x379   : > { %9062 = vmatpush1.bf16.msra.mxu0 %v15308_v23  ;;  %v15373_v20 = vld [vmem:[%s17160_s22 + $0x23ec] ss:$28 sps:$4 sm:$0xff]  }
 0x37a   : > { %9103 = vmatpush1.bf16.msra.mxu1 %v15311_v32  ;;  %9063 = vmatprep.subr.bf16.mxu0 %v15316_v28  ;;  %v15368_v23 = vld [vmem:[%s17160_s22 + $0x2068] ss:$28 sps:$4 sm:$0xff]  }
 0x37b   : > { %9104 = vmatprep.subr.bf16.mxu1 %v15319_v29  ;;  %v15371_v32 = vld [vmem:[%s17160_s22 + $0x23e8] ss:$28 sps:$4 sm:$0xff]  }
 0x37c   : > { %v15376_v28 = vld [vmem:[%s17160_s22 + $0x20a4] ss:$28 sps:$4 sm:$0xff]  }
 0x37d   : > { %9064 = vmatpush1.bf16.msra.mxu0 %v15314_v37  ;;  %v15379_v29 = vld [vmem:[%s17160_s22 + $0x2424] ss:$28 sps:$4 sm:$0xff]  }
 0x37e   : > { %9105 = vmatpush1.bf16.msra.mxu1 %v15317_v31  ;;  %9065 = vmatprep.subr.bf16.mxu0 %v15322_v33  ;;  %v15374_v37 = vld [vmem:[%s17160_s22 + $0x20a0] ss:$28 sps:$4 sm:$0xff]  }
 0x37f   : > { %9106 = vmatprep.subr.bf16.mxu1 %v15325_v36  ;;  %v15377_v31 = vld [vmem:[%s17160_s22 + $0x2420] ss:$28 sps:$4 sm:$0xff]  }
 0x380   : > { %v15382_v33 = vld [vmem:[%s17160_s22 + $0x20dc] ss:$28 sps:$4 sm:$0xff]  }
 0x381   : > { %9066 = vmatpush1.bf16.msra.mxu0 %v15320_v35  ;;  %v15385_v36 = vld [vmem:[%s17160_s22 + $0x245c] ss:$28 sps:$4 sm:$0xff]  }
 0x382   : > { %9107 = vmatpush1.bf16.msra.mxu1 %v15323_v45  ;;  %9067 = vmatprep.subr.bf16.mxu0 %v15328_v44  ;;  %v15380_v44 = vld [vmem:[%s17160_s22 + $0x20d8] ss:$28 sps:$4 sm:$0xff]  }
 0x383   : > { %9108 = vmatprep.subr.bf16.mxu1 %v15331_v46  ;;  %v15383_v46 = vld [vmem:[%s17160_s22 + $0x2458] ss:$28 sps:$4 sm:$0xff]  }
 0x385   : > { %9068 = vmatpush1.bf16.msra.mxu0 %v15326_v47 }
 0x386   : > { %9109 = vmatpush1.bf16.msra.mxu1 %v15329_v48  ;;  %9069 = vmatprep.subr.bf16.mxu0 %v15334_v52 }
 0x387   : > { %9110 = vmatprep.subr.bf16.mxu1 %v15337_v54 }
 0x389   : > { %9070 = vmatpush1.bf16.msra.mxu0 %v15332_v60 }
 0x38a   : > { %9111 = vmatpush1.bf16.msra.mxu1 %v15335_v56  ;;  %9071 = vmatprep.subr.bf16.mxu0 %v15340_v57 }
 0x38b   : > { %9112 = vmatprep.subr.bf16.mxu1 %v15343_v59 }
 0x38d   : > { %9072 = vmatpush1.bf16.msra.mxu0 %v15338_v0  ;;  %v15391_v0 = vld [vmem:[%s17160_s22 + $0x2494] ss:$28 sps:$4 sm:$0xff]  }
 0x38e   : > { %9113 = vmatpush1.bf16.msra.mxu1 %v15341_v1  ;;  %9123 = vmatprep.subr.bf16.mxu0 %v15346_v2 }
 0x38f   : > { %9164 = vmatprep.subr.bf16.mxu1 %v15349_v3  ;;  %v15389_v3 = vld [vmem:[%s17160_s22 + $0x2490] ss:$28 sps:$4 sm:$0xff]  }
 0x390   : > { %9074 = vmatmul.mubr.bf16.vlgmr.msra.gmra.mrb[36].mxu0 %v17544_v62 }
 0x391   : > { %9115 = vmatmul.mubr.bf16.vlgmr.msra.gmra.mrb[36].mxu1 %v17636_v50  ;;  %9124 = vmatpush1.bf16.msra.mxu0 %v15344_v4  ;;  %v15394_v4 = vld [vmem:[%s17160_s22 + $0x214c] ss:$28 sps:$4 sm:$0xff]  }
 0x392   : > { %9165 = vmatpush1.bf16.msra.mxu1 %v15347_v6  ;;  %9125 = vmatprep.subr.bf16.mxu0 %v15352_v5  ;;  %v15397_v6 = vld [vmem:[%s17160_s22 + $0x24cc] ss:$28 sps:$4 sm:$0xff]  }
 0x393   : > { %9166 = vmatprep.subr.bf16.mxu1 %v15355_v7  ;;  %9155 = vmatprep.mubr.bf16.mxu0 %v17559_v43  ;;  %v15392_v5 = vld [vmem:[%s17160_s22 + $0x2148] ss:$28 sps:$4 sm:$0xff]  }
 0x394   : > { %9196 = vmatprep.mubr.bf16.mxu1 %v17646_v55  ;;  %v15395_v7 = vld [vmem:[%s17160_s22 + $0x24c8] ss:$28 sps:$4 sm:$0xff]  }
 0x395   : > { %9126 = vmatpush1.bf16.msra.mxu0 %v15350_v12  ;;  %v15400_v12 = vld [vmem:[%s17160_s22 + $0x2184] ss:$28 sps:$4 sm:$0xff]  }
 0x396   : > { %9167 = vmatpush1.bf16.msra.mxu1 %v15353_v15  ;;  %9127 = vmatprep.subr.bf16.mxu0 %v15358_v10  ;;  %v15403_v15 = vld [vmem:[%s17160_s22 + $0x2504] ss:$28 sps:$4 sm:$0xff]  }
 0x397   : > { %9168 = vmatprep.subr.bf16.mxu1 %v15361_v11  ;;  %v15398_v10 = vld [vmem:[%s17160_s22 + $0x2180] ss:$28 sps:$4 sm:$0xff]  }
 0x398   : > { %v15401_v11 = vld [vmem:[%s17160_s22 + $0x2500] ss:$28 sps:$4 sm:$0xff]  }
 0x399   : > { %9128 = vmatpush1.bf16.msra.mxu0 %v15356_v19  ;;  %v15406_v19 = vld [vmem:[%s17160_s22 + $0x21bc] ss:$28 sps:$4 sm:$0xff]  }
 0x39a   : > { %9169 = vmatpush1.bf16.msra.mxu1 %v15359_v13  ;;  %9129 = vmatprep.subr.bf16.mxu0 %v15364_v14  ;;  %v15409_v13 = vld [vmem:[%s17160_s22 + $0x253c] ss:$28 sps:$4 sm:$0xff]  }
 0x39b   : > { %9170 = vmatprep.subr.bf16.mxu1 %v15367_v16  ;;  %v15404_v14 = vld [vmem:[%s17160_s22 + $0x21b8] ss:$28 sps:$4 sm:$0xff]  }
 0x39c   : > { %v15407_v16 = vld [vmem:[%s17160_s22 + $0x2538] ss:$28 sps:$4 sm:$0xff]  }
 0x39d   : > { %9130 = vmatpush1.bf16.msra.mxu0 %v15362_v22  ;;  %v15412_v22 = vld [vmem:[%s17160_s22 + $0x21f4] ss:$28 sps:$4 sm:$0xff]  }
 0x39e   : > { %9171 = vmatpush1.bf16.msra.mxu1 %v15365_v17  ;;  %9131 = vmatprep.subr.bf16.mxu0 %v15370_v30  ;;  %v15415_v17 = vld [vmem:[%s17160_s22 + $0x2574] ss:$28 sps:$4 sm:$0xff]  }
 0x39f   : > { %9172 = vmatprep.subr.bf16.mxu1 %v15373_v20  ;;  %v15410_v30 = vld [vmem:[%s17160_s22 + $0x21f0] ss:$28 sps:$4 sm:$0xff]  }
 0x3a0   : > { %v15413_v20 = vld [vmem:[%s17160_s22 + $0x2570] ss:$28 sps:$4 sm:$0xff]  }
 0x3a1   : > { %9132 = vmatpush1.bf16.msra.mxu0 %v15368_v23  ;;  %v15418_v23 = vld [vmem:[%s17160_s22 + $0x222c] ss:$28 sps:$4 sm:$0xff]  }
 0x3a2   : > { %9173 = vmatpush1.bf16.msra.mxu1 %v15371_v32  ;;  %9133 = vmatprep.subr.bf16.mxu0 %v15376_v28  ;;  %v15421_v32 = vld [vmem:[%s17160_s22 + $0x25ac] ss:$28 sps:$4 sm:$0xff]  }
 0x3a3   : > { %9174 = vmatprep.subr.bf16.mxu1 %v15379_v29  ;;  %v8829_v35 = vpop.f32.mrb[24].mxu0  ;;  %v15416_v28 = vld [vmem:[%s17160_s22 + $0x2228] ss:$28 sps:$4 sm:$0xff]  }
 0x3a4   : > { %v8870_v45 = vpop.f32.mrb[24].mxu1  ;;  %v8830_v47 = vadd.f32 %v8829_v35, %v17974_v63  ;;  %v8831_v48 = vpop.f32.mrb[25].mxu0  ;;  %v15388_v63 = vld [vmem:[%s17160_s22 + $0x2114] ss:$28 sps:$4 sm:$0xff]   ;;  %v15419_v29 = vld [vmem:[%s17160_s22 + $0x25a8] ss:$28 sps:$4 sm:$0xff]  }
 0x3a5   : > { %v8872_v52 = vpop.f32.mrb[25].mxu1  ;;  %v8832_v54 = vadd.f32 %v8831_v48, %v17977_v58  ;;  %v8833_v60 = vpop.f32.mrb[26].mxu0  ;;  %9134 = vmatpush1.bf16.msra.mxu0 %v15374_v37  ;;  %v15386_v58 = vld [vmem:[%s17160_s22 + $0x2110] ss:$28 sps:$4 sm:$0xff]   ;;  %v15424_v37 = vld [vmem:[%s17160_s22 + $0x2264] ss:$28 sps:$4 sm:$0xff]  }
 0x3a6   : > { %9175 = vmatpush1.bf16.msra.mxu1 %v15377_v31  ;;  %v8874_v56 = vpop.f32.mrb[26].mxu1  ;;  %v18050_v57 = vadd.f32 %v8870_v45, %v8830_v47  ;;  %v8834_v59 = vpop.f32.mrb[27].mxu0  ;;  %9135 = vmatprep.subr.bf16.mxu0 %v15382_v33  ;;  %v15427_v31 = vld [vmem:[%s17160_s22 + $0x25e4] ss:$28 sps:$4 sm:$0xff]   ;;  %v15430_v35 = vld [vmem:[%s17160_s22 + $0x229c] ss:$28 sps:$4 sm:$0xff]  }
 0x3a7   : > { %9176 = vmatprep.subr.bf16.mxu1 %v15385_v36  ;;  %v8875_v1 = vpop.f32.mrb[27].mxu1  ;;  %v18054_v2 = vadd.f32 %v8872_v52, %v8832_v54  ;;  %v15422_v33 = vld [vmem:[%s17160_s22 + $0x2260] ss:$28 sps:$4 sm:$0xff]   ;;  %v15436_v47 = vld [vmem:[%s17160_s22 + $0x22d4] ss:$28 sps:$4 sm:$0xff]  }
 0x3a8   : > { %v15425_v36 = vld [vmem:[%s17160_s22 + $0x25e0] ss:$28 sps:$4 sm:$0xff]   ;;  %v15439_v48 = vld [vmem:[%s17160_s22 + $0x2654] ss:$28 sps:$4 sm:$0xff]   ;;  %v15451_v1 = vld [vmem:[%s17160_s22 + $0x3cc] ss:$28 sps:$4 sm:$0xff]  }
 0x3a9   : > { %9136 = vmatpush1.bf16.msra.mxu0 %v15380_v44  ;;  %v15433_v45 = vld [vmem:[%s17160_s22 + $0x261c] ss:$28 sps:$4 sm:$0xff]   ;;  %v15434_v52 = vld [vmem:[%s17160_s22 + $0x22d0] ss:$28 sps:$4 sm:$0xff]  }
 0x3aa   : > { %9177 = vmatpush1.bf16.msra.mxu1 %v15383_v46  ;;  %9137 = vmatprep.subr.bf16.mxu0 %v15388_v63  ;;  %v15428_v44 = vld [vmem:[%s17160_s22 + $0x2298] ss:$28 sps:$4 sm:$0xff]   ;;  %v15437_v54 = vld [vmem:[%s17160_s22 + $0x2650] ss:$28 sps:$4 sm:$0xff]  }
 0x3ab   : > { %9178 = vmatprep.subr.bf16.mxu1 %v15391_v0  ;;  %v15431_v46 = vld [vmem:[%s17160_s22 + $0x2618] ss:$28 sps:$4 sm:$0xff]   ;;  %v15440_v59 = vld [vmem:[%s17160_s22 + $0x10] ss:$28 sps:$4 sm:$0xff]  }
 0x3ac   : > { %v15442_v60 = vld [vmem:[%s17160_s22 + $0x14] ss:$28 sps:$4 sm:$0xff]   ;;  %v15448_v0 = vld [vmem:[%s17160_s22 + $0x4c] ss:$28 sps:$4 sm:$0xff]  }
 0x3ad   : > { %9138 = vmatpush1.bf16.msra.mxu0 %v15386_v58  ;;  %v15445_v56 = vld [vmem:[%s17160_s22 + $0x394] ss:$28 sps:$4 sm:$0xff]   ;;  %v15446_v58 = vld [vmem:[%s17160_s22 + $0x48] ss:$28 sps:$4 sm:$0xff]  }
 0x3ae   : > { %9179 = vmatpush1.bf16.msra.mxu1 %v15389_v3  ;;  %9139 = vmatprep.subr.bf16.mxu0 %v15394_v4  ;;  %v15443_v63 = vld [vmem:[%s17160_s22 + $0x390] ss:$28 sps:$4 sm:$0xff]   ;;  %v15449_v3 = vld [vmem:[%s17160_s22 + $0x3c8] ss:$28 sps:$4 sm:$0xff]  }
 0x3af   : > { %9180 = vmatprep.subr.bf16.mxu1 %v15397_v6  ;;  %v15454_v4 = vld [vmem:[%s17160_s22 + $0x84] ss:$28 sps:$4 sm:$0xff]  }
 0x3b0   : > { %v15457_v6 = vld [vmem:[%s17160_s22 + $0x404] ss:$28 sps:$4 sm:$0xff]  }
 0x3b1   : > { %9140 = vmatpush1.bf16.msra.mxu0 %v15392_v5  ;;  %v15452_v5 = vld [vmem:[%s17160_s22 + $0x80] ss:$28 sps:$4 sm:$0xff]  }
 0x3b2   : > { %9181 = vmatpush1.bf16.msra.mxu1 %v15395_v7  ;;  %9141 = vmatprep.subr.bf16.mxu0 %v15400_v12  ;;  %v15455_v7 = vld [vmem:[%s17160_s22 + $0x400] ss:$28 sps:$4 sm:$0xff]  }
 0x3b3   : > { %9182 = vmatprep.subr.bf16.mxu1 %v15403_v15  ;;  %v15460_v12 = vld [vmem:[%s17160_s22 + $0xbc] ss:$28 sps:$4 sm:$0xff]  }
 0x3b4   : > { %v15463_v15 = vld [vmem:[%s17160_s22 + $0x43c] ss:$28 sps:$4 sm:$0xff]  }
 0x3b5   : > { %9142 = vmatpush1.bf16.msra.mxu0 %v15398_v10  ;;  %v15458_v10 = vld [vmem:[%s17160_s22 + $0xb8] ss:$28 sps:$4 sm:$0xff]  }
 0x3b6   : > { %9183 = vmatpush1.bf16.msra.mxu1 %v15401_v11  ;;  %9143 = vmatprep.subr.bf16.mxu0 %v15406_v19  ;;  %v15461_v11 = vld [vmem:[%s17160_s22 + $0x438] ss:$28 sps:$4 sm:$0xff]  }
 0x3b7   : > { %9184 = vmatprep.subr.bf16.mxu1 %v15409_v13  ;;  %v15466_v19 = vld [vmem:[%s17160_s22 + $0xf4] ss:$28 sps:$4 sm:$0xff]  }
 0x3b8   : > { %v15469_v13 = vld [vmem:[%s17160_s22 + $0x474] ss:$28 sps:$4 sm:$0xff]  }
 0x3b9   : > { %9144 = vmatpush1.bf16.msra.mxu0 %v15404_v14  ;;  %v15464_v14 = vld [vmem:[%s17160_s22 + $0xf0] ss:$28 sps:$4 sm:$0xff]  }
 0x3ba   : > { %9185 = vmatpush1.bf16.msra.mxu1 %v15407_v16  ;;  %9145 = vmatprep.subr.bf16.mxu0 %v15412_v22  ;;  %v15467_v16 = vld [vmem:[%s17160_s22 + $0x470] ss:$28 sps:$4 sm:$0xff]  }
 0x3bb   : > { %9186 = vmatprep.subr.bf16.mxu1 %v15415_v17  ;;  %v15472_v22 = vld [vmem:[%s17160_s22 + $0x12c] ss:$28 sps:$4 sm:$0xff]  }
 0x3bc   : > { %v15475_v17 = vld [vmem:[%s17160_s22 + $0x4ac] ss:$28 sps:$4 sm:$0xff]  }
 0x3bd   : > { %9146 = vmatpush1.bf16.msra.mxu0 %v15410_v30  ;;  %v15470_v30 = vld [vmem:[%s17160_s22 + $0x128] ss:$28 sps:$4 sm:$0xff]  }
 0x3be   : > { %9187 = vmatpush1.bf16.msra.mxu1 %v15413_v20  ;;  %9147 = vmatprep.subr.bf16.mxu0 %v15418_v23  ;;  %v15473_v20 = vld [vmem:[%s17160_s22 + $0x4a8] ss:$28 sps:$4 sm:$0xff]  }
 0x3bf   : > { %9188 = vmatprep.subr.bf16.mxu1 %v15421_v32  ;;  %v15478_v23 = vld [vmem:[%s17160_s22 + $0x164] ss:$28 sps:$4 sm:$0xff]  }
 0x3c0   : > { %v15481_v32 = vld [vmem:[%s17160_s22 + $0x4e4] ss:$28 sps:$4 sm:$0xff]  }
 0x3c1   : > { %9148 = vmatpush1.bf16.msra.mxu0 %v15416_v28 }
 0x3c2   : > { %9189 = vmatpush1.bf16.msra.mxu1 %v15419_v29  ;;  %9149 = vmatprep.subr.bf16.mxu0 %v15424_v37  ;;  %v15476_v37 = vld [vmem:[%s17160_s22 + $0x160] ss:$28 sps:$4 sm:$0xff]  }
 0x3c3   : > { %9190 = vmatprep.subr.bf16.mxu1 %v15427_v31  ;;  %v15479_v31 = vld [vmem:[%s17160_s22 + $0x4e0] ss:$28 sps:$4 sm:$0xff]  }
 0x3c5   : > { %9150 = vmatpush1.bf16.msra.mxu0 %v15422_v33 }
 0x3c6   : > { %9191 = vmatpush1.bf16.msra.mxu1 %v15425_v36  ;;  %9151 = vmatprep.subr.bf16.mxu0 %v15430_v35 }
 0x3c7   : > { %9192 = vmatprep.subr.bf16.mxu1 %v15433_v45 }
 0x3c9   : > { %9152 = vmatpush1.bf16.msra.mxu0 %v15428_v44 }
 0x3ca   : > { %9193 = vmatpush1.bf16.msra.mxu1 %v15431_v46  ;;  %9153 = vmatprep.subr.bf16.mxu0 %v15436_v47 }
 0x3cb   : > { %9194 = vmatprep.subr.bf16.mxu1 %v15439_v48 }
 0x3cd   : > { %9154 = vmatpush1.bf16.msra.mxu0 %v15434_v52  ;;  %v15487_v52 = vld [vmem:[%s17160_s22 + $0x51c] ss:$28 sps:$4 sm:$0xff]  }
 0x3ce   : > { %9195 = vmatpush1.bf16.msra.mxu1 %v15437_v54  ;;  %9205 = vmatprep.subr.bf16.mxu0 %v15442_v60 }
 0x3cf   : > { %9246 = vmatprep.subr.bf16.mxu1 %v15445_v56  ;;  %v15485_v56 = vld [vmem:[%s17160_s22 + $0x518] ss:$28 sps:$4 sm:$0xff]  }
 0x3d0   : > { %9156 = vmatmul.mubr.bf16.vlgmr.msra.gmra.mrb[40].mxu0 %v17640_v51 }
 0x3d1   : > { %9197 = vmatmul.mubr.bf16.vlgmr.msra.gmra.mrb[40].mxu1 %v17722_v34  ;;  %9206 = vmatpush1.bf16.msra.mxu0 %v15440_v59  ;;  %v15490_v59 = vld [vmem:[%s17160_s22 + $0x1d4] ss:$28 sps:$4 sm:$0xff]  }
 0x3d2   : > { %9247 = vmatpush1.bf16.msra.mxu1 %v15443_v63  ;;  %9207 = vmatprep.subr.bf16.mxu0 %v15448_v0  ;;  %v15493_v63 = vld [vmem:[%s17160_s22 + $0x554] ss:$28 sps:$4 sm:$0xff]  }
 0x3d3   : > { %9248 = vmatprep.subr.bf16.mxu1 %v15451_v1  ;;  %9237 = vmatprep.mubr.bf16.mxu0 %v17242_v49  ;;  %v15488_v0 = vld [vmem:[%s17160_s22 + $0x1d0] ss:$28 sps:$4 sm:$0xff]  }
 0x3d4   : > { %9278 = vmatprep.mubr.bf16.mxu1 %v17247_v53  ;;  %v15491_v1 = vld [vmem:[%s17160_s22 + $0x550] ss:$28 sps:$4 sm:$0xff]  }
 0x3d5   : > { %9208 = vmatpush1.bf16.msra.mxu0 %v15446_v58  ;;  %v15496_v58 = vld [vmem:[%s17160_s22 + $0x20c] ss:$28 sps:$4 sm:$0xff]  }
 0x3d6   : > { %9249 = vmatpush1.bf16.msra.mxu1 %v15449_v3  ;;  %9209 = vmatprep.subr.bf16.mxu0 %v15454_v4  ;;  %v15499_v3 = vld [vmem:[%s17160_s22 + $0x58c] ss:$28 sps:$4 sm:$0xff]  }
 0x3d7   : > { %9250 = vmatprep.subr.bf16.mxu1 %v15457_v6  ;;  %v15494_v4 = vld [vmem:[%s17160_s22 + $0x208] ss:$28 sps:$4 sm:$0xff]  }
 0x3d8   : > { %v15497_v6 = vld [vmem:[%s17160_s22 + $0x588] ss:$28 sps:$4 sm:$0xff]  }
 0x3d9   : > { %9210 = vmatpush1.bf16.msra.mxu0 %v15452_v5  ;;  %v15502_v5 = vld [vmem:[%s17160_s22 + $0x244] ss:$28 sps:$4 sm:$0xff]  }
 0x3da   : > { %9251 = vmatpush1.bf16.msra.mxu1 %v15455_v7  ;;  %9211 = vmatprep.subr.bf16.mxu0 %v15460_v12  ;;  %v15505_v7 = vld [vmem:[%s17160_s22 + $0x5c4] ss:$28 sps:$4 sm:$0xff]  }
 0x3db   : > { %9252 = vmatprep.subr.bf16.mxu1 %v15463_v15  ;;  %v15500_v12 = vld [vmem:[%s17160_s22 + $0x240] ss:$28 sps:$4 sm:$0xff]  }
 0x3dc   : > { %v15503_v15 = vld [vmem:[%s17160_s22 + $0x5c0] ss:$28 sps:$4 sm:$0xff]  }
 0x3dd   : > { %9212 = vmatpush1.bf16.msra.mxu0 %v15458_v10  ;;  %v15508_v10 = vld [vmem:[%s17160_s22 + $0x27c] ss:$28 sps:$4 sm:$0xff]  }
 0x3de   : > { %9253 = vmatpush1.bf16.msra.mxu1 %v15461_v11  ;;  %9213 = vmatprep.subr.bf16.mxu0 %v15466_v19  ;;  %v15511_v11 = vld [vmem:[%s17160_s22 + $0x5fc] ss:$28 sps:$4 sm:$0xff]  }
 0x3df   : > { %9254 = vmatprep.subr.bf16.mxu1 %v15469_v13  ;;  %v15506_v19 = vld [vmem:[%s17160_s22 + $0x278] ss:$28 sps:$4 sm:$0xff]  }
 0x3e0   : > { %v15509_v13 = vld [vmem:[%s17160_s22 + $0x5f8] ss:$28 sps:$4 sm:$0xff]  }
 0x3e1   : > { %9214 = vmatpush1.bf16.msra.mxu0 %v15464_v14  ;;  %v15514_v14 = vld [vmem:[%s17160_s22 + $0x2b4] ss:$28 sps:$4 sm:$0xff]  }
 0x3e2   : > { %9255 = vmatpush1.bf16.msra.mxu1 %v15467_v16  ;;  %9215 = vmatprep.subr.bf16.mxu0 %v15472_v22  ;;  %v15517_v16 = vld [vmem:[%s17160_s22 + $0x634] ss:$28 sps:$4 sm:$0xff]  }
 0x3e3   : > { %9256 = vmatprep.subr.bf16.mxu1 %v15475_v17  ;;  %v8911_v28 = vpop.f32.mrb[28].mxu0  ;;  %v15512_v22 = vld [vmem:[%s17160_s22 + $0x2b0] ss:$28 sps:$4 sm:$0xff]  }
 0x3e4   : > { %v8952_v29 = vpop.f32.mrb[28].mxu1  ;;  %v8912_v33 = vadd.f32 %v8911_v28, %v18050_v57  ;;  %v8913_v36 = vpop.f32.mrb[29].mxu0  ;;  %v15484_v57 = vld [vmem:[%s17160_s22 + $0x19c] ss:$28 sps:$4 sm:$0xff]   ;;  %v15515_v17 = vld [vmem:[%s17160_s22 + $0x630] ss:$28 sps:$4 sm:$0xff]  }
 0x3e5   : > { %v8954_v35 = vpop.f32.mrb[29].mxu1  ;;  %v8914_v45 = vadd.f32 %v8913_v36, %v18054_v2  ;;  %v8915_v44 = vpop.f32.mrb[30].mxu0  ;;  %9216 = vmatpush1.bf16.msra.mxu0 %v15470_v30  ;;  %v15482_v2 = vld [vmem:[%s17160_s22 + $0x198] ss:$28 sps:$4 sm:$0xff]   ;;  %v15520_v30 = vld [vmem:[%s17160_s22 + $0x2ec] ss:$28 sps:$4 sm:$0xff]  }
 0x3e6   : > { %9257 = vmatpush1.bf16.msra.mxu1 %v15473_v20  ;;  %v8956_v46 = vpop.f32.mrb[30].mxu1  ;;  %v18124_v47 = vadd.f32 %v8952_v29, %v8912_v33  ;;  %v8916_v48 = vpop.f32.mrb[31].mxu0  ;;  %9217 = vmatprep.subr.bf16.mxu0 %v15478_v23  ;;  %v15523_v20 = vld [vmem:[%s17160_s22 + $0x66c] ss:$28 sps:$4 sm:$0xff]   ;;  %v15526_v28 = vld [vmem:[%s17160_s22 + $0x324] ss:$28 sps:$4 sm:$0xff]  }
 0x3e7   : > { %9258 = vmatprep.subr.bf16.mxu1 %v15481_v32  ;;  %v8957_v54 = vpop.f32.mrb[31].mxu1  ;;  %v18128_v60 = vadd.f32 %v8954_v35, %v8914_v45  ;;  %v15518_v23 = vld [vmem:[%s17160_s22 + $0x2e8] ss:$28 sps:$4 sm:$0xff]   ;;  %v15532_v33 = vld [vmem:[%s17160_s22 + $0x35c] ss:$28 sps:$4 sm:$0xff]  }
 0x3e8   : > { %v15521_v32 = vld [vmem:[%s17160_s22 + $0x668] ss:$28 sps:$4 sm:$0xff]   ;;  %v15535_v36 = vld [vmem:[%s17160_s22 + $0x6dc] ss:$28 sps:$4 sm:$0xff]   ;;  %v15538_v44 = vld [vmem:[%s17160_s22 + $0x714] ss:$28 sps:$4 sm:$0xff]  }
 0x3e9   : > { %9218 = vmatpush1.bf16.msra.mxu0 %v15476_v37  ;;  %v15529_v29 = vld [vmem:[%s17160_s22 + $0x6a4] ss:$28 sps:$4 sm:$0xff]   ;;  %v15530_v35 = vld [vmem:[%s17160_s22 + $0x358] ss:$28 sps:$4 sm:$0xff]   ;;  %v15536_v48 = vld [vmem:[%s17160_s22 + $0x710] ss:$28 sps:$4 sm:$0xff]  }
 0x3ea   : > { %9259 = vmatpush1.bf16.msra.mxu1 %v15479_v31  ;;  %9219 = vmatprep.subr.bf16.mxu0 %v15484_v57  ;;  %v15524_v37 = vld [vmem:[%s17160_s22 + $0x320] ss:$28 sps:$4 sm:$0xff]   ;;  %v15533_v45 = vld [vmem:[%s17160_s22 + $0x6d8] ss:$28 sps:$4 sm:$0xff]   ;;  %v15539_v57 = vld [vmem:[%s17160_s22 + $0xa90] ss:$28 sps:$4 sm:$0xff]  }
 0x3eb   : > { %9260 = vmatprep.subr.bf16.mxu1 %v15487_v52  ;;  %v15527_v31 = vld [vmem:[%s17160_s22 + $0x6a0] ss:$28 sps:$4 sm:$0xff]   ;;  %v15541_v46 = vld [vmem:[%s17160_s22 + $0xa94] ss:$28 sps:$4 sm:$0xff]   ;;  %v15544_v52 = vld [vmem:[%s17160_s22 + $0x74c] ss:$28 sps:$4 sm:$0xff]  }
 0x3ec   : > { %v15547_v54 = vld [vmem:[%s17160_s22 + $0xacc] ss:$28 sps:$4 sm:$0xff]  }
 0x3ed   : > { %9220 = vmatpush1.bf16.msra.mxu0 %v15482_v2  ;;  %v15542_v2 = vld [vmem:[%s17160_s22 + $0x748] ss:$28 sps:$4 sm:$0xff]  }
 0x3ee   : > { %9261 = vmatpush1.bf16.msra.mxu1 %v15485_v56  ;;  %9221 = vmatprep.subr.bf16.mxu0 %v15490_v59  ;;  %v15545_v56 = vld [vmem:[%s17160_s22 + $0xac8] ss:$28 sps:$4 sm:$0xff]  }
 0x3ef   : > { %9262 = vmatprep.subr.bf16.mxu1 %v15493_v63  ;;  %v15550_v59 = vld [vmem:[%s17160_s22 + $0x784] ss:$28 sps:$4 sm:$0xff]  }
 0x3f0   : > { %v15553_v63 = vld [vmem:[%s17160_s22 + $0xb04] ss:$28 sps:$4 sm:$0xff]  }
 0x3f1   : > { %9222 = vmatpush1.bf16.msra.mxu0 %v15488_v0  ;;  %v15548_v0 = vld [vmem:[%s17160_s22 + $0x780] ss:$28 sps:$4 sm:$0xff]  }
 0x3f2   : > { %9263 = vmatpush1.bf16.msra.mxu1 %v15491_v1  ;;  %9223 = vmatprep.subr.bf16.mxu0 %v15496_v58  ;;  %v15551_v1 = vld [vmem:[%s17160_s22 + $0xb00] ss:$28 sps:$4 sm:$0xff]  }
 0x3f3   : > { %9264 = vmatprep.subr.bf16.mxu1 %v15499_v3  ;;  %v15556_v58 = vld [vmem:[%s17160_s22 + $0x7bc] ss:$28 sps:$4 sm:$0xff]  }
 0x3f4   : > { %v15559_v3 = vld [vmem:[%s17160_s22 + $0xb3c] ss:$28 sps:$4 sm:$0xff]  }
 0x3f5   : > { %9224 = vmatpush1.bf16.msra.mxu0 %v15494_v4  ;;  %v15554_v4 = vld [vmem:[%s17160_s22 + $0x7b8] ss:$28 sps:$4 sm:$0xff]  }
 0x3f6   : > { %9265 = vmatpush1.bf16.msra.mxu1 %v15497_v6  ;;  %9225 = vmatprep.subr.bf16.mxu0 %v15502_v5  ;;  %v15557_v6 = vld [vmem:[%s17160_s22 + $0xb38] ss:$28 sps:$4 sm:$0xff]  }
 0x3f7   : > { %9266 = vmatprep.subr.bf16.mxu1 %v15505_v7  ;;  %v15562_v5 = vld [vmem:[%s17160_s22 + $0x7f4] ss:$28 sps:$4 sm:$0xff]  }
 0x3f8   : > { %v15565_v7 = vld [vmem:[%s17160_s22 + $0xb74] ss:$28 sps:$4 sm:$0xff]  }
 0x3f9   : > { %9226 = vmatpush1.bf16.msra.mxu0 %v15500_v12  ;;  %v15560_v12 = vld [vmem:[%s17160_s22 + $0x7f0] ss:$28 sps:$4 sm:$0xff]  }
 0x3fa   : > { %9267 = vmatpush1.bf16.msra.mxu1 %v15503_v15  ;;  %9227 = vmatprep.subr.bf16.mxu0 %v15508_v10  ;;  %v15563_v15 = vld [vmem:[%s17160_s22 + $0xb70] ss:$28 sps:$4 sm:$0xff]  }
 0x3fb   : > { %9268 = vmatprep.subr.bf16.mxu1 %v15511_v11  ;;  %v15568_v10 = vld [vmem:[%s17160_s22 + $0x82c] ss:$28 sps:$4 sm:$0xff]  }
 0x3fc   : > { %v15571_v11 = vld [vmem:[%s17160_s22 + $0xbac] ss:$28 sps:$4 sm:$0xff]  }
 0x3fd   : > { %9228 = vmatpush1.bf16.msra.mxu0 %v15506_v19  ;;  %v15566_v19 = vld [vmem:[%s17160_s22 + $0x828] ss:$28 sps:$4 sm:$0xff]  }
 0x3fe   : > { %9269 = vmatpush1.bf16.msra.mxu1 %v15509_v13  ;;  %9229 = vmatprep.subr.bf16.mxu0 %v15514_v14  ;;  %v15569_v13 = vld [vmem:[%s17160_s22 + $0xba8] ss:$28 sps:$4 sm:$0xff]  }
 0x3ff   : > { %9270 = vmatprep.subr.bf16.mxu1 %v15517_v16  ;;  %v15574_v14 = vld [vmem:[%s17160_s22 + $0x864] ss:$28 sps:$4 sm:$0xff]  }
 0x400   : > { %v15577_v16 = vld [vmem:[%s17160_s22 + $0xbe4] ss:$28 sps:$4 sm:$0xff]  }
 0x401   : > { %9230 = vmatpush1.bf16.msra.mxu0 %v15512_v22 }
 0x402   : > { %9271 = vmatpush1.bf16.msra.mxu1 %v15515_v17  ;;  %9231 = vmatprep.subr.bf16.mxu0 %v15520_v30 }
 0x403   : > { %9272 = vmatprep.subr.bf16.mxu1 %v15523_v20 }
 0x405   : > { %9232 = vmatpush1.bf16.msra.mxu0 %v15518_v23 }
 0x406   : > { %9273 = vmatpush1.bf16.msra.mxu1 %v15521_v32  ;;  %9233 = vmatprep.subr.bf16.mxu0 %v15526_v28 }
 0x407   : > { %9274 = vmatprep.subr.bf16.mxu1 %v15529_v29  ;;  %v15572_v29 = vld [vmem:[%s17160_s22 + $0x860] ss:$28 sps:$4 sm:$0xff]  }
 0x409   : > { %9234 = vmatpush1.bf16.msra.mxu0 %v15524_v37  ;;  %v15575_v37 = vld [vmem:[%s17160_s22 + $0xbe0] ss:$28 sps:$4 sm:$0xff]  }
 0x40a   : > { %9275 = vmatpush1.bf16.msra.mxu1 %v15527_v31  ;;  %9235 = vmatprep.subr.bf16.mxu0 %v15532_v33 }
 0x40b   : > { %9276 = vmatprep.subr.bf16.mxu1 %v15535_v36 }
 0x40d   : > { %9236 = vmatpush1.bf16.msra.mxu0 %v15530_v35  ;;  %v15583_v35 = vld [vmem:[%s17160_s22 + $0xc1c] ss:$28 sps:$4 sm:$0xff]  }
 0x40e   : > { %9277 = vmatpush1.bf16.msra.mxu1 %v15533_v45  ;;  %9287 = vmatprep.subr.bf16.mxu0 %v15538_v44  ;;  %v15578_v44 = vld [vmem:[%s17160_s22 + $0x898] ss:$28 sps:$4 sm:$0xff]  }
 0x40f   : > { %9328 = vmatprep.subr.bf16.mxu1 %v15541_v46  ;;  %v15581_v46 = vld [vmem:[%s17160_s22 + $0xc18] ss:$28 sps:$4 sm:$0xff]  }
 0x410   : > { %9238 = vmatmul.mubr.bf16.vlgmr.msra.gmra.mrb[44].mxu0 %v17269_v8 }
 0x411   : > { %9279 = vmatmul.mubr.bf16.vlgmr.msra.gmra.mrb[44].mxu1 %v17271_v9  ;;  %9288 = vmatpush1.bf16.msra.mxu0 %v15536_v48  ;;  %v15586_v48 = vld [vmem:[%s17160_s22 + $0x8d4] ss:$28 sps:$4 sm:$0xff]  }
 0x412   : > { %9329 = vmatpush1.bf16.msra.mxu1 %v15539_v57  ;;  %9289 = vmatprep.subr.bf16.mxu0 %v15544_v52  ;;  %v15589_v57 = vld [vmem:[%s17160_s22 + $0xc54] ss:$28 sps:$4 sm:$0xff]  }
 0x413   : > { %9330 = vmatprep.subr.bf16.mxu1 %v15547_v54  ;;  %9319 = vmatprep.mubr.bf16.mxu0 %v17309_v38  ;;  %v15584_v52 = vld [vmem:[%s17160_s22 + $0x8d0] ss:$28 sps:$4 sm:$0xff]  }
 0x414   : > { %9360 = vmatprep.mubr.bf16.mxu1 %v17313_v39  ;;  %v15587_v54 = vld [vmem:[%s17160_s22 + $0xc50] ss:$28 sps:$4 sm:$0xff]  }
 0x415   : > { %9290 = vmatpush1.bf16.msra.mxu0 %v15542_v2  ;;  %v15592_v2 = vld [vmem:[%s17160_s22 + $0x90c] ss:$28 sps:$4 sm:$0xff]  }
 0x416   : > { %9331 = vmatpush1.bf16.msra.mxu1 %v15545_v56  ;;  %9291 = vmatprep.subr.bf16.mxu0 %v15550_v59  ;;  %v15595_v56 = vld [vmem:[%s17160_s22 + $0xc8c] ss:$28 sps:$4 sm:$0xff]  }
 0x417   : > { %9332 = vmatprep.subr.bf16.mxu1 %v15553_v63  ;;  %v15590_v59 = vld [vmem:[%s17160_s22 + $0x908] ss:$28 sps:$4 sm:$0xff]  }
 0x418   : > { %v15593_v63 = vld [vmem:[%s17160_s22 + $0xc88] ss:$28 sps:$4 sm:$0xff]  }
 0x419   : > { %9292 = vmatpush1.bf16.msra.mxu0 %v15548_v0  ;;  %v15598_v0 = vld [vmem:[%s17160_s22 + $0x944] ss:$28 sps:$4 sm:$0xff]  }
 0x41a   : > { %9333 = vmatpush1.bf16.msra.mxu1 %v15551_v1  ;;  %9293 = vmatprep.subr.bf16.mxu0 %v15556_v58  ;;  %v15601_v1 = vld [vmem:[%s17160_s22 + $0xcc4] ss:$28 sps:$4 sm:$0xff]  }
 0x41b   : > { %9334 = vmatprep.subr.bf16.mxu1 %v15559_v3  ;;  %v15596_v58 = vld [vmem:[%s17160_s22 + $0x940] ss:$28 sps:$4 sm:$0xff]  }
 0x41c   : > { %v15599_v3 = vld [vmem:[%s17160_s22 + $0xcc0] ss:$28 sps:$4 sm:$0xff]  }
 0x41d   : > { %9294 = vmatpush1.bf16.msra.mxu0 %v15554_v4  ;;  %v15604_v4 = vld [vmem:[%s17160_s22 + $0x97c] ss:$28 sps:$4 sm:$0xff]  }
 0x41e   : > { %9335 = vmatpush1.bf16.msra.mxu1 %v15557_v6  ;;  %9295 = vmatprep.subr.bf16.mxu0 %v15562_v5  ;;  %v15607_v6 = vld [vmem:[%s17160_s22 + $0xcfc] ss:$28 sps:$4 sm:$0xff]  }
 0x41f   : > { %9336 = vmatprep.subr.bf16.mxu1 %v15565_v7  ;;  %v15602_v5 = vld [vmem:[%s17160_s22 + $0x978] ss:$28 sps:$4 sm:$0xff]  }
 0x420   : > { %v15605_v7 = vld [vmem:[%s17160_s22 + $0xcf8] ss:$28 sps:$4 sm:$0xff]  }
 0x421   : > { %9296 = vmatpush1.bf16.msra.mxu0 %v15560_v12  ;;  %v15610_v12 = vld [vmem:[%s17160_s22 + $0x9b4] ss:$28 sps:$4 sm:$0xff]  }
 0x422   : > { %9337 = vmatpush1.bf16.msra.mxu1 %v15563_v15  ;;  %9297 = vmatprep.subr.bf16.mxu0 %v15568_v10  ;;  %v15613_v15 = vld [vmem:[%s17160_s22 + $0xd34] ss:$28 sps:$4 sm:$0xff]  }
 0x423   : > { %9338 = vmatprep.subr.bf16.mxu1 %v15571_v11  ;;  %v8993_v22 = vpop.f32.mrb[32].mxu0  ;;  %v15608_v10 = vld [vmem:[%s17160_s22 + $0x9b0] ss:$28 sps:$4 sm:$0xff]  }
 0x424   : > { %v9034_v17 = vpop.f32.mrb[32].mxu1  ;;  %v8994_v30 = vadd.f32 %v8993_v22, %v18124_v47  ;;  %v8995_v20 = vpop.f32.mrb[33].mxu0  ;;  %v15580_v47 = vld [vmem:[%s17160_s22 + $0x89c] ss:$28 sps:$4 sm:$0xff]   ;;  %v15611_v11 = vld [vmem:[%s17160_s22 + $0xd30] ss:$28 sps:$4 sm:$0xff]  }
 0x425   : > { %v9036_v23 = vpop.f32.mrb[33].mxu1  ;;  %v8996_v32 = vadd.f32 %v8995_v20, %v18128_v60  ;;  %v8997_v28 = vpop.f32.mrb[34].mxu0  ;;  %9298 = vmatpush1.bf16.msra.mxu0 %v15566_v19  ;;  %v15616_v19 = vld [vmem:[%s17160_s22 + $0x9ec] ss:$28 sps:$4 sm:$0xff]   ;;  %v15622_v22 = vld [vmem:[%s17160_s22 + $0xa24] ss:$28 sps:$4 sm:$0xff]  }
 0x426   : > { %9339 = vmatpush1.bf16.msra.mxu1 %v15569_v13  ;;  %v9038_v31 = vpop.f32.mrb[34].mxu1  ;;  %v18198_v33 = vadd.f32 %v9034_v17, %v8994_v30  ;;  %v8998_v36 = vpop.f32.mrb[35].mxu0  ;;  %9299 = vmatprep.subr.bf16.mxu0 %v15574_v14  ;;  %v15619_v13 = vld [vmem:[%s17160_s22 + $0xd6c] ss:$28 sps:$4 sm:$0xff]   ;;  %v15625_v17 = vld [vmem:[%s17160_s22 + $0xda4] ss:$28 sps:$4 sm:$0xff]  }
 0x427   : > { %9340 = vmatprep.subr.bf16.mxu1 %v15577_v16  ;;  %v9039_v60 = vpop.f32.mrb[35].mxu1  ;;  %v18202_v45 = vadd.f32 %v9036_v23, %v8996_v32  ;;  %v15614_v14 = vld [vmem:[%s17160_s22 + $0x9e8] ss:$28 sps:$4 sm:$0xff]   ;;  %v15620_v30 = vld [vmem:[%s17160_s22 + $0xa20] ss:$28 sps:$4 sm:$0xff]  }
 0x428   : > { %v15617_v16 = vld [vmem:[%s17160_s22 + $0xd68] ss:$28 sps:$4 sm:$0xff]   ;;  %v15623_v20 = vld [vmem:[%s17160_s22 + $0xda0] ss:$28 sps:$4 sm:$0xff]   ;;  %v15626_v28 = vld [vmem:[%s17160_s22 + $0xa58] ss:$28 sps:$4 sm:$0xff]  }
 0x429   : > { %9300 = vmatpush1.bf16.msra.mxu0 %v15572_v29  ;;  %v15628_v23 = vld [vmem:[%s17160_s22 + $0xa5c] ss:$28 sps:$4 sm:$0xff]   ;;  %v15637_v31 = vld [vmem:[%s17160_s22 + $0x1194] ss:$28 sps:$4 sm:$0xff]   ;;  %v15643_v60 = vld [vmem:[%s17160_s22 + $0x11cc] ss:$28 sps:$4 sm:$0xff]  }
 0x42a   : > { %9341 = vmatpush1.bf16.msra.mxu1 %v15575_v37  ;;  %9301 = vmatprep.subr.bf16.mxu0 %v15580_v47  ;;  %v15631_v32 = vld [vmem:[%s17160_s22 + $0xddc] ss:$28 sps:$4 sm:$0xff]   ;;  %v15634_v37 = vld [vmem:[%s17160_s22 + $0xe14] ss:$28 sps:$4 sm:$0xff]  }
 0x42b   : > { %9342 = vmatprep.subr.bf16.mxu1 %v15583_v35  ;;  %v15629_v29 = vld [vmem:[%s17160_s22 + $0xdd8] ss:$28 sps:$4 sm:$0xff]   ;;  %v15632_v36 = vld [vmem:[%s17160_s22 + $0xe10] ss:$28 sps:$4 sm:$0xff]  }
 0x42c   : > { %v15635_v47 = vld [vmem:[%s17160_s22 + $0x1190] ss:$28 sps:$4 sm:$0xff]  }
 0x42d   : > { %9302 = vmatpush1.bf16.msra.mxu0 %v15578_v44  ;;  %v15640_v35 = vld [vmem:[%s17160_s22 + $0xe4c] ss:$28 sps:$4 sm:$0xff]  }
 0x42e   : > { %9343 = vmatpush1.bf16.msra.mxu1 %v15581_v46  ;;  %9303 = vmatprep.subr.bf16.mxu0 %v15586_v48  ;;  %v15638_v44 = vld [vmem:[%s17160_s22 + $0xe48] ss:$28 sps:$4 sm:$0xff]  }
 0x42f   : > { %9344 = vmatprep.subr.bf16.mxu1 %v15589_v57  ;;  %v15641_v46 = vld [vmem:[%s17160_s22 + $0x11c8] ss:$28 sps:$4 sm:$0xff]  }
 0x430   : > { %v15646_v48 = vld [vmem:[%s17160_s22 + $0xe84] ss:$28 sps:$4 sm:$0xff]  }
 0x431   : > { %9304 = vmatpush1.bf16.msra.mxu0 %v15584_v52  ;;  %v15649_v57 = vld [vmem:[%s17160_s22 + $0x1204] ss:$28 sps:$4 sm:$0xff]  }
 0x432   : > { %9345 = vmatpush1.bf16.msra.mxu1 %v15587_v54  ;;  %9305 = vmatprep.subr.bf16.mxu0 %v15592_v2  ;;  %v15644_v52 = vld [vmem:[%s17160_s22 + $0xe80] ss:$28 sps:$4 sm:$0xff]  }
 0x433   : > { %9346 = vmatprep.subr.bf16.mxu1 %v15595_v56  ;;  %v15647_v54 = vld [vmem:[%s17160_s22 + $0x1200] ss:$28 sps:$4 sm:$0xff]  }
 0x434   : > { %v15652_v2 = vld [vmem:[%s17160_s22 + $0xebc] ss:$28 sps:$4 sm:$0xff]  }
 0x435   : > { %9306 = vmatpush1.bf16.msra.mxu0 %v15590_v59  ;;  %v15655_v56 = vld [vmem:[%s17160_s22 + $0x123c] ss:$28 sps:$4 sm:$0xff]  }
 0x436   : > { %9347 = vmatpush1.bf16.msra.mxu1 %v15593_v63  ;;  %9307 = vmatprep.subr.bf16.mxu0 %v15598_v0  ;;  %v15650_v59 = vld [vmem:[%s17160_s22 + $0xeb8] ss:$28 sps:$4 sm:$0xff]  }
 0x437   : > { %9348 = vmatprep.subr.bf16.mxu1 %v15601_v1  ;;  %v15653_v63 = vld [vmem:[%s17160_s22 + $0x1238] ss:$28 sps:$4 sm:$0xff]  }
 0x438   : > { %v15658_v0 = vld [vmem:[%s17160_s22 + $0xef4] ss:$28 sps:$4 sm:$0xff]  }
 0x439   : > { %9308 = vmatpush1.bf16.msra.mxu0 %v15596_v58  ;;  %v15661_v1 = vld [vmem:[%s17160_s22 + $0x1274] ss:$28 sps:$4 sm:$0xff]  }
 0x43a   : > { %9349 = vmatpush1.bf16.msra.mxu1 %v15599_v3  ;;  %9309 = vmatprep.subr.bf16.mxu0 %v15604_v4  ;;  %v15656_v58 = vld [vmem:[%s17160_s22 + $0xef0] ss:$28 sps:$4 sm:$0xff]  }
 0x43b   : > { %9350 = vmatprep.subr.bf16.mxu1 %v15607_v6  ;;  %v15659_v3 = vld [vmem:[%s17160_s22 + $0x1270] ss:$28 sps:$4 sm:$0xff]  }
 0x43c   : > { %v15664_v4 = vld [vmem:[%s17160_s22 + $0xf2c] ss:$28 sps:$4 sm:$0xff]  }
 0x43d   : > { %9310 = vmatpush1.bf16.msra.mxu0 %v15602_v5  ;;  %v15667_v6 = vld [vmem:[%s17160_s22 + $0x12ac] ss:$28 sps:$4 sm:$0xff]  }
 0x43e   : > { %9351 = vmatpush1.bf16.msra.mxu1 %v15605_v7  ;;  %9311 = vmatprep.subr.bf16.mxu0 %v15610_v12  ;;  %v15662_v5 = vld [vmem:[%s17160_s22 + $0xf28] ss:$28 sps:$4 sm:$0xff]  }
 0x43f   : > { %9352 = vmatprep.subr.bf16.mxu1 %v15613_v15  ;;  %v15665_v7 = vld [vmem:[%s17160_s22 + $0x12a8] ss:$28 sps:$4 sm:$0xff]  }
 0x440   : > { %v15670_v12 = vld [vmem:[%s17160_s22 + $0xf64] ss:$28 sps:$4 sm:$0xff]  }
 0x441   : > { %9312 = vmatpush1.bf16.msra.mxu0 %v15608_v10  ;;  %v15673_v15 = vld [vmem:[%s17160_s22 + $0x12e4] ss:$28 sps:$4 sm:$0xff]  }
 0x442   : > { %9353 = vmatpush1.bf16.msra.mxu1 %v15611_v11  ;;  %9313 = vmatprep.subr.bf16.mxu0 %v15616_v19 }
 0x443   : > { %9354 = vmatprep.subr.bf16.mxu1 %v15619_v13 }
 0x445   : > { %9314 = vmatpush1.bf16.msra.mxu0 %v15614_v14 }
 0x446   : > { %9355 = vmatpush1.bf16.msra.mxu1 %v15617_v16  ;;  %9315 = vmatprep.subr.bf16.mxu0 %v15622_v22 }
 0x447   : > { %9356 = vmatprep.subr.bf16.mxu1 %v15625_v17  ;;  %v15668_v17 = vld [vmem:[%s17160_s22 + $0xf60] ss:$28 sps:$4 sm:$0xff]  }
 0x449   : > { %9316 = vmatpush1.bf16.msra.mxu0 %v15620_v30  ;;  %v15671_v30 = vld [vmem:[%s17160_s22 + $0x12e0] ss:$28 sps:$4 sm:$0xff]  }
 0x44a   : > { %9357 = vmatpush1.bf16.msra.mxu1 %v15623_v20  ;;  %9317 = vmatprep.subr.bf16.mxu0 %v15628_v23 }
 0x44b   : > { %9358 = vmatprep.subr.bf16.mxu1 %v15631_v32 }
 0x44d   : > { %9318 = vmatpush1.bf16.msra.mxu0 %v15626_v28  ;;  %v15679_v28 = vld [vmem:[%s17160_s22 + $0x131c] ss:$28 sps:$4 sm:$0xff]  }
 0x44e   : > { %9359 = vmatpush1.bf16.msra.mxu1 %v15629_v29  ;;  %9369 = vmatprep.subr.bf16.mxu0 %v15634_v37  ;;  %v15674_v37 = vld [vmem:[%s17160_s22 + $0xf98] ss:$28 sps:$4 sm:$0xff]  }
 0x44f   : > { %9410 = vmatprep.subr.bf16.mxu1 %v15637_v31  ;;  %v15677_v31 = vld [vmem:[%s17160_s22 + $0x1318] ss:$28 sps:$4 sm:$0xff]  }
 0x450   : > { %9320 = vmatmul.mubr.bf16.vlgmr.msra.gmra.mrb[48].mxu0 %v17357_v18 }
 0x451   : > { %9361 = vmatmul.mubr.bf16.vlgmr.msra.gmra.mrb[48].mxu1 %v17363_v21  ;;  %9370 = vmatpush1.bf16.msra.mxu0 %v15632_v36  ;;  %v15682_v36 = vld [vmem:[%s17160_s22 + $0xfd4] ss:$28 sps:$4 sm:$0xff]  }
 0x452   : > { %9411 = vmatpush1.bf16.msra.mxu1 %v15635_v47  ;;  %9371 = vmatprep.subr.bf16.mxu0 %v15640_v35  ;;  %v15685_v47 = vld [vmem:[%s17160_s22 + $0x1354] ss:$28 sps:$4 sm:$0xff]  }
 0x453   : > { %9412 = vmatprep.subr.bf16.mxu1 %v15643_v60  ;;  %9401 = vmatprep.mubr.bf16.mxu0 %v17375_v26  ;;  %v15680_v35 = vld [vmem:[%s17160_s22 + $0xfd0] ss:$28 sps:$4 sm:$0xff]  }
 0x454   : > { %9442 = vmatprep.mubr.bf16.mxu1 %v17379_v27  ;;  %v15683_v60 = vld [vmem:[%s17160_s22 + $0x1350] ss:$28 sps:$4 sm:$0xff]  }
 0x455   : > { %9372 = vmatpush1.bf16.msra.mxu0 %v15638_v44  ;;  %v15688_v44 = vld [vmem:[%s17160_s22 + $0x100c] ss:$28 sps:$4 sm:$0xff]  }
 0x456   : > { %9413 = vmatpush1.bf16.msra.mxu1 %v15641_v46  ;;  %9373 = vmatprep.subr.bf16.mxu0 %v15646_v48  ;;  %v15691_v46 = vld [vmem:[%s17160_s22 + $0x138c] ss:$28 sps:$4 sm:$0xff]  }
 0x457   : > { %9414 = vmatprep.subr.bf16.mxu1 %v15649_v57  ;;  %v15686_v48 = vld [vmem:[%s17160_s22 + $0x1008] ss:$28 sps:$4 sm:$0xff]  }
 0x458   : > { %v15689_v57 = vld [vmem:[%s17160_s22 + $0x1388] ss:$28 sps:$4 sm:$0xff]  }
 0x459   : > { %9374 = vmatpush1.bf16.msra.mxu0 %v15644_v52  ;;  %v15694_v52 = vld [vmem:[%s17160_s22 + $0x1044] ss:$28 sps:$4 sm:$0xff]  }
 0x45a   : > { %9415 = vmatpush1.bf16.msra.mxu1 %v15647_v54  ;;  %9375 = vmatprep.subr.bf16.mxu0 %v15652_v2  ;;  %v15697_v54 = vld [vmem:[%s17160_s22 + $0x13c4] ss:$28 sps:$4 sm:$0xff]  }
 0x45b   : > { %9416 = vmatprep.subr.bf16.mxu1 %v15655_v56  ;;  %v15692_v2 = vld [vmem:[%s17160_s22 + $0x1040] ss:$28 sps:$4 sm:$0xff]  }
 0x45c   : > { %v15695_v56 = vld [vmem:[%s17160_s22 + $0x13c0] ss:$28 sps:$4 sm:$0xff]  }
 0x45d   : > { %9376 = vmatpush1.bf16.msra.mxu0 %v15650_v59  ;;  %v15700_v59 = vld [vmem:[%s17160_s22 + $0x107c] ss:$28 sps:$4 sm:$0xff]  }
 0x45e   : > { %9417 = vmatpush1.bf16.msra.mxu1 %v15653_v63  ;;  %9377 = vmatprep.subr.bf16.mxu0 %v15658_v0  ;;  %v15703_v63 = vld [vmem:[%s17160_s22 + $0x13fc] ss:$28 sps:$4 sm:$0xff]  }
 0x45f   : > { %9418 = vmatprep.subr.bf16.mxu1 %v15661_v1  ;;  %v15698_v0 = vld [vmem:[%s17160_s22 + $0x1078] ss:$28 sps:$4 sm:$0xff]  }
 0x460   : > { %v15701_v1 = vld [vmem:[%s17160_s22 + $0x13f8] ss:$28 sps:$4 sm:$0xff]  }
 0x461   : > { %9378 = vmatpush1.bf16.msra.mxu0 %v15656_v58  ;;  %v15706_v58 = vld [vmem:[%s17160_s22 + $0x10b4] ss:$28 sps:$4 sm:$0xff]  }
 0x462   : > { %9419 = vmatpush1.bf16.msra.mxu1 %v15659_v3  ;;  %9379 = vmatprep.subr.bf16.mxu0 %v15664_v4  ;;  %v15709_v3 = vld [vmem:[%s17160_s22 + $0x1434] ss:$28 sps:$4 sm:$0xff]  }
 0x463   : > { %9420 = vmatprep.subr.bf16.mxu1 %v15667_v6  ;;  %v9075_v10 = vpop.f32.mrb[36].mxu0  ;;  %v15704_v4 = vld [vmem:[%s17160_s22 + $0x10b0] ss:$28 sps:$4 sm:$0xff]  }
 0x464   : > { %v9116_v11 = vpop.f32.mrb[36].mxu1  ;;  %v9076_v19 = vadd.f32 %v9075_v10, %v18198_v33  ;;  %v9077_v13 = vpop.f32.mrb[37].mxu0  ;;  %v15676_v33 = vld [vmem:[%s17160_s22 + $0xf9c] ss:$28 sps:$4 sm:$0xff]   ;;  %v15707_v6 = vld [vmem:[%s17160_s22 + $0x1430] ss:$28 sps:$4 sm:$0xff]  }
 0x465   : > { %v9118_v14 = vpop.f32.mrb[37].mxu1  ;;  %v9078_v16 = vadd.f32 %v9077_v13, %v18202_v45  ;;  %v9079_v22 = vpop.f32.mrb[38].mxu0  ;;  %9380 = vmatpush1.bf16.msra.mxu0 %v15662_v5  ;;  %v15712_v5 = vld [vmem:[%s17160_s22 + $0x10ec] ss:$28 sps:$4 sm:$0xff]   ;;  %v15718_v10 = vld [vmem:[%s17160_s22 + $0x1124] ss:$28 sps:$4 sm:$0xff]  }
 0x466   : > { %9421 = vmatpush1.bf16.msra.mxu1 %v15665_v7  ;;  %v9120_v20 = vpop.f32.mrb[38].mxu1  ;;  %v18272_v23 = vadd.f32 %v9116_v11, %v9076_v19  ;;  %v9080_v32 = vpop.f32.mrb[39].mxu0  ;;  %9381 = vmatprep.subr.bf16.mxu0 %v15670_v12  ;;  %v15715_v7 = vld [vmem:[%s17160_s22 + $0x146c] ss:$28 sps:$4 sm:$0xff]   ;;  %v15721_v11 = vld [vmem:[%s17160_s22 + $0x14a4] ss:$28 sps:$4 sm:$0xff]  }
 0x467   : > { %9422 = vmatprep.subr.bf16.mxu1 %v15673_v15  ;;  %v9121_v45 = vpop.f32.mrb[39].mxu1  ;;  %v18276_v29 = vadd.f32 %v9118_v14, %v9078_v16  ;;  %v15710_v12 = vld [vmem:[%s17160_s22 + $0x10e8] ss:$28 sps:$4 sm:$0xff]   ;;  %v15716_v19 = vld [vmem:[%s17160_s22 + $0x1120] ss:$28 sps:$4 sm:$0xff]  }
 0x468   : > { %v15713_v15 = vld [vmem:[%s17160_s22 + $0x1468] ss:$28 sps:$4 sm:$0xff]   ;;  %v15719_v13 = vld [vmem:[%s17160_s22 + $0x14a0] ss:$28 sps:$4 sm:$0xff]   ;;  %v15722_v22 = vld [vmem:[%s17160_s22 + $0x1158] ss:$28 sps:$4 sm:$0xff]  }
 0x469   : > { %9382 = vmatpush1.bf16.msra.mxu0 %v15668_v17  ;;  %v15724_v14 = vld [vmem:[%s17160_s22 + $0x115c] ss:$28 sps:$4 sm:$0xff]   ;;  %v15733_v20 = vld [vmem:[%s17160_s22 + $0x1894] ss:$28 sps:$4 sm:$0xff]   ;;  %v15739_v45 = vld [vmem:[%s17160_s22 + $0x18cc] ss:$28 sps:$4 sm:$0xff]  }
 0x46a   : > { %9423 = vmatpush1.bf16.msra.mxu1 %v15671_v30  ;;  %9383 = vmatprep.subr.bf16.mxu0 %v15676_v33  ;;  %v15727_v16 = vld [vmem:[%s17160_s22 + $0x14dc] ss:$28 sps:$4 sm:$0xff]   ;;  %v15730_v30 = vld [vmem:[%s17160_s22 + $0x1514] ss:$28 sps:$4 sm:$0xff]  }
 0x46b   : > { %9424 = vmatprep.subr.bf16.mxu1 %v15679_v28  ;;  %v15725_v17 = vld [vmem:[%s17160_s22 + $0x14d8] ss:$28 sps:$4 sm:$0xff]   ;;  %v15728_v32 = vld [vmem:[%s17160_s22 + $0x1510] ss:$28 sps:$4 sm:$0xff]  }
 0x46c   : > { %v15731_v33 = vld [vmem:[%s17160_s22 + $0x1890] ss:$28 sps:$4 sm:$0xff]  }
 0x46d   : > { %9384 = vmatpush1.bf16.msra.mxu0 %v15674_v37  ;;  %v15736_v28 = vld [vmem:[%s17160_s22 + $0x154c] ss:$28 sps:$4 sm:$0xff]  }
 0x46e   : > { %9425 = vmatpush1.bf16.msra.mxu1 %v15677_v31  ;;  %9385 = vmatprep.subr.bf16.mxu0 %v15682_v36  ;;  %v15734_v37 = vld [vmem:[%s17160_s22 + $0x1548] ss:$28 sps:$4 sm:$0xff]  }
 0x46f   : > { %9426 = vmatprep.subr.bf16.mxu1 %v15685_v47  ;;  %v15737_v31 = vld [vmem:[%s17160_s22 + $0x18c8] ss:$28 sps:$4 sm:$0xff]  }
 0x470   : > { %v15742_v36 = vld [vmem:[%s17160_s22 + $0x1584] ss:$28 sps:$4 sm:$0xff]  }
 0x471   : > { %9386 = vmatpush1.bf16.msra.mxu0 %v15680_v35  ;;  %v15745_v47 = vld [vmem:[%s17160_s22 + $0x1904] ss:$28 sps:$4 sm:$0xff]  }
 0x472   : > { %9427 = vmatpush1.bf16.msra.mxu1 %v15683_v60  ;;  %9387 = vmatprep.subr.bf16.mxu0 %v15688_v44  ;;  %v15740_v35 = vld [vmem:[%s17160_s22 + $0x1580] ss:$28 sps:$4 sm:$0xff]  }
 0x473   : > { %9428 = vmatprep.subr.bf16.mxu1 %v15691_v46  ;;  %v15743_v60 = vld [vmem:[%s17160_s22 + $0x1900] ss:$28 sps:$4 sm:$0xff]  }
 0x474   : > { %v15748_v44 = vld [vmem:[%s17160_s22 + $0x15bc] ss:$28 sps:$4 sm:$0xff]  }
 0x475   : > { %9388 = vmatpush1.bf16.msra.mxu0 %v15686_v48  ;;  %v15751_v46 = vld [vmem:[%s17160_s22 + $0x193c] ss:$28 sps:$4 sm:$0xff]  }
 0x476   : > { %9429 = vmatpush1.bf16.msra.mxu1 %v15689_v57  ;;  %9389 = vmatprep.subr.bf16.mxu0 %v15694_v52  ;;  %v15746_v48 = vld [vmem:[%s17160_s22 + $0x15b8] ss:$28 sps:$4 sm:$0xff]  }
 0x477   : > { %9430 = vmatprep.subr.bf16.mxu1 %v15697_v54  ;;  %v15749_v57 = vld [vmem:[%s17160_s22 + $0x1938] ss:$28 sps:$4 sm:$0xff]  }
 0x478   : > { %v15754_v52 = vld [vmem:[%s17160_s22 + $0x15f4] ss:$28 sps:$4 sm:$0xff]  }
 0x479   : > { %9390 = vmatpush1.bf16.msra.mxu0 %v15692_v2  ;;  %v15757_v54 = vld [vmem:[%s17160_s22 + $0x1974] ss:$28 sps:$4 sm:$0xff]  }
 0x47a   : > { %9431 = vmatpush1.bf16.msra.mxu1 %v15695_v56  ;;  %9391 = vmatprep.subr.bf16.mxu0 %v15700_v59  ;;  %v15752_v2 = vld [vmem:[%s17160_s22 + $0x15f0] ss:$28 sps:$4 sm:$0xff]  }
 0x47b   : > { %9432 = vmatprep.subr.bf16.mxu1 %v15703_v63  ;;  %v15755_v56 = vld [vmem:[%s17160_s22 + $0x1970] ss:$28 sps:$4 sm:$0xff]  }
 0x47c   : > { %v15760_v59 = vld [vmem:[%s17160_s22 + $0x162c] ss:$28 sps:$4 sm:$0xff]  }
 0x47d   : > { %9392 = vmatpush1.bf16.msra.mxu0 %v15698_v0  ;;  %v15763_v63 = vld [vmem:[%s17160_s22 + $0x19ac] ss:$28 sps:$4 sm:$0xff]  }
 0x47e   : > { %9433 = vmatpush1.bf16.msra.mxu1 %v15701_v1  ;;  %9393 = vmatprep.subr.bf16.mxu0 %v15706_v58  ;;  %v15758_v0 = vld [vmem:[%s17160_s22 + $0x1628] ss:$28 sps:$4 sm:$0xff]  }
 0x47f   : > { %9434 = vmatprep.subr.bf16.mxu1 %v15709_v3  ;;  %v15761_v1 = vld [vmem:[%s17160_s22 + $0x19a8] ss:$28 sps:$4 sm:$0xff]  }
 0x480   : > { %v15766_v58 = vld [vmem:[%s17160_s22 + $0x1664] ss:$28 sps:$4 sm:$0xff]  }
 0x481   : > { %9394 = vmatpush1.bf16.msra.mxu0 %v15704_v4  ;;  %v15769_v3 = vld [vmem:[%s17160_s22 + $0x19e4] ss:$28 sps:$4 sm:$0xff]  }
 0x482   : > { %9435 = vmatpush1.bf16.msra.mxu1 %v15707_v6  ;;  %9395 = vmatprep.subr.bf16.mxu0 %v15712_v5 }
 0x483   : > { %9436 = vmatprep.subr.bf16.mxu1 %v15715_v7 }
 0x485   : > { %9396 = vmatpush1.bf16.msra.mxu0 %v15710_v12 }
 0x486   : > { %9437 = vmatpush1.bf16.msra.mxu1 %v15713_v15  ;;  %9397 = vmatprep.subr.bf16.mxu0 %v15718_v10  ;;  %v15764_v15 = vld [vmem:[%s17160_s22 + $0x1660] ss:$28 sps:$4 sm:$0xff]  }
 0x487   : > { %9438 = vmatprep.subr.bf16.mxu1 %v15721_v11 }
 0x489   : > { %9398 = vmatpush1.bf16.msra.mxu0 %v15716_v19  ;;  %v466_v19 = vld [vmem:[#allocation2 + $0x10] sm:$0xff] }
 0x48a   : > { %9439 = vmatpush1.bf16.msra.mxu1 %v15719_v13  ;;  %9399 = vmatprep.subr.bf16.mxu0 %v15724_v14  ;;  %v467_v13 = vld [vmem:[#allocation2 + $0x18] sm:$0xff] }
 0x48b   : > { %9440 = vmatprep.subr.bf16.mxu1 %v15727_v16  ;;  %v15767_v14 = vld [vmem:[%s17160_s22 + $0x19e0] ss:$28 sps:$4 sm:$0xff]  }
 0x48d   : > { %9400 = vmatpush1.bf16.msra.mxu0 %v15722_v22 }
 0x48e   : > { %9441 = vmatpush1.bf16.msra.mxu1 %v15725_v17  ;;  %9451 = vmatprep.subr.bf16.mxu0 %v15730_v30  ;;  %v15775_v30 = vld [vmem:[%s17160_s22 + $0x1a1c] ss:$28 sps:$4 sm:$0xff]  }
 0x48f   : > { %9492 = vmatprep.subr.bf16.mxu1 %v15733_v20 }
 0x490   : > { %9402 = vmatmul.mubr.bf16.vlgmr.msra.gmra.mrb[52].mxu0 %v17449_v40 }
 0x491   : > { %9443 = vmatmul.mubr.bf16.vlgmr.msra.gmra.mrb[52].mxu1 %v17453_v41  ;;  %9452 = vmatpush1.bf16.msra.mxu0 %v15728_v32 }
 0x492   : > { %9493 = vmatpush1.bf16.msra.mxu1 %v15731_v33  ;;  %9453 = vmatprep.subr.bf16.mxu0 %v15736_v28  ;;  %v15770_v28 = vld [vmem:[%s17160_s22 + $0x1698] ss:$28 sps:$4 sm:$0xff]  }
 0x493   : > { %9494 = vmatprep.subr.bf16.mxu1 %v15739_v45  ;;  %9483 = vmatprep.mubr.bf16.mxu0 %v17465_v24  ;;  %v15773_v45 = vld [vmem:[%s17160_s22 + $0x1a18] ss:$28 sps:$4 sm:$0xff]  }
 0x494   : > { %9524 = vmatprep.mubr.bf16.mxu1 %v17469_v25 }
 0x495   : > { %9454 = vmatpush1.bf16.msra.mxu0 %v15734_v37  ;;  %v15778_v37 = vld [vmem:[%s17160_s22 + $0x16d4] ss:$28 sps:$4 sm:$0xff]  }
 0x496   : > { %9495 = vmatpush1.bf16.msra.mxu1 %v15737_v31  ;;  %9455 = vmatprep.subr.bf16.mxu0 %v15742_v36  ;;  %v15781_v31 = vld [vmem:[%s17160_s22 + $0x1a54] ss:$28 sps:$4 sm:$0xff]  }
 0x497   : > { %9496 = vmatprep.subr.bf16.mxu1 %v15745_v47  ;;  %v15776_v36 = vld [vmem:[%s17160_s22 + $0x16d0] ss:$28 sps:$4 sm:$0xff]  }
 0x498   : > { %v15779_v47 = vld [vmem:[%s17160_s22 + $0x1a50] ss:$28 sps:$4 sm:$0xff]  }
 0x499   : > { %9456 = vmatpush1.bf16.msra.mxu0 %v15740_v35  ;;  %v15784_v35 = vld [vmem:[%s17160_s22 + $0x170c] ss:$28 sps:$4 sm:$0xff]  }
 0x49a   : > { %9497 = vmatpush1.bf16.msra.mxu1 %v15743_v60  ;;  %9457 = vmatprep.subr.bf16.mxu0 %v15748_v44  ;;  %v15787_v60 = vld [vmem:[%s17160_s22 + $0x1a8c] ss:$28 sps:$4 sm:$0xff]  }
 0x49b   : > { %9498 = vmatprep.subr.bf16.mxu1 %v15751_v46  ;;  %v15782_v44 = vld [vmem:[%s17160_s22 + $0x1708] ss:$28 sps:$4 sm:$0xff]  }
 0x49c   : > { %v15785_v46 = vld [vmem:[%s17160_s22 + $0x1a88] ss:$28 sps:$4 sm:$0xff]  }
 0x49d   : > { %9458 = vmatpush1.bf16.msra.mxu0 %v15746_v48  ;;  %v15790_v48 = vld [vmem:[%s17160_s22 + $0x1744] ss:$28 sps:$4 sm:$0xff]  }
 0x49e   : > { %9499 = vmatpush1.bf16.msra.mxu1 %v15749_v57  ;;  %9459 = vmatprep.subr.bf16.mxu0 %v15754_v52  ;;  %v15793_v57 = vld [vmem:[%s17160_s22 + $0x1ac4] ss:$28 sps:$4 sm:$0xff]  }
 0x49f   : > { %9500 = vmatprep.subr.bf16.mxu1 %v15757_v54  ;;  %v15788_v52 = vld [vmem:[%s17160_s22 + $0x1740] ss:$28 sps:$4 sm:$0xff]  }
 0x4a0   : > { %v15791_v54 = vld [vmem:[%s17160_s22 + $0x1ac0] ss:$28 sps:$4 sm:$0xff]  }
 0x4a1   : > { %9460 = vmatpush1.bf16.msra.mxu0 %v15752_v2  ;;  %v15796_v2 = vld [vmem:[%s17160_s22 + $0x177c] ss:$28 sps:$4 sm:$0xff]  }
 0x4a2   : > { %9501 = vmatpush1.bf16.msra.mxu1 %v15755_v56  ;;  %9461 = vmatprep.subr.bf16.mxu0 %v15760_v59  ;;  %v15799_v56 = vld [vmem:[%s17160_s22 + $0x1afc] ss:$28 sps:$4 sm:$0xff]  }
 0x4a3   : > { %9502 = vmatprep.subr.bf16.mxu1 %v15763_v63  ;;  %v9157_v4 = vpop.f32.mrb[40].mxu0  ;;  %v15794_v59 = vld [vmem:[%s17160_s22 + $0x1778] ss:$28 sps:$4 sm:$0xff]  }
 0x4a4   : > { %v9198_v6 = vpop.f32.mrb[40].mxu1  ;;  %v9158_v5 = vadd.f32 %v9157_v4, %v18272_v23  ;;  %v9159_v7 = vpop.f32.mrb[41].mxu0  ;;  %v15772_v23 = vld [vmem:[%s17160_s22 + $0x169c] ss:$28 sps:$4 sm:$0xff]   ;;  %v15808_v4 = vld [vmem:[%s17160_s22 + $0x17ec] ss:$28 sps:$4 sm:$0xff]  }
 0x4a5   : > { %v9200_v12 = vpop.f32.mrb[41].mxu1  ;;  %v9160_v10 = vadd.f32 %v9159_v7, %v18276_v29  ;;  %v9161_v11 = vpop.f32.mrb[42].mxu0  ;;  %9462 = vmatpush1.bf16.msra.mxu0 %v15758_v0  ;;  %v15797_v63 = vld [vmem:[%s17160_s22 + $0x1af8] ss:$28 sps:$4 sm:$0xff]   ;;  %v15809_v7 = vld [vmem:[%s17160_s22 + $0x1b68] ss:$28 sps:$4 sm:$0xff]  }
 0x4a6   : > { %9503 = vmatpush1.bf16.msra.mxu1 %v15761_v1  ;;  %v9202_v16 = vpop.f32.mrb[42].mxu1  ;;  %v9199_v22 = vadd.f32 %v9198_v6, %v9158_v5  ;;  %v9162_v17 = vpop.f32.mrb[43].mxu0  ;;  %9463 = vmatprep.subr.bf16.mxu0 %v15766_v58  ;;  %v15802_v0 = vld [vmem:[%s17160_s22 + $0x17b4] ss:$28 sps:$4 sm:$0xff]   ;;  %v15811_v6 = vld [vmem:[%s17160_s22 + $0x1b6c] ss:$28 sps:$4 sm:$0xff]  }
 0x4a7   : > { %9504 = vmatprep.subr.bf16.mxu1 %v15769_v3  ;;  %v9203_v20 = vpop.f32.mrb[43].mxu1  ;;  %v9201_v29 = vadd.f32 %v9200_v12, %v9160_v10  ;;  %v15805_v1 = vld [vmem:[%s17160_s22 + $0x1b34] ss:$28 sps:$4 sm:$0xff]   ;;  %v15806_v5 = vld [vmem:[%s17160_s22 + $0x17e8] ss:$28 sps:$4 sm:$0xff]  }
 0x4a8   : > { %v10098_v32 = vadd.f32 %v9199_v22, %v466_v19  ;;  %v15800_v58 = vld [vmem:[%s17160_s22 + $0x17b0] ss:$28 sps:$4 sm:$0xff]   ;;  %v15814_v12 = vld [vmem:[%s17160_s22 + $0x1824] ss:$28 sps:$4 sm:$0xff]   ;;  %v15820_v19 = vld [vmem:[%s17160_s22 + $0x185c] ss:$28 sps:$4 sm:$0xff]  }
 0x4a9   : > { %v10099_v33 = vadd.f32 %v9201_v29, %v467_v13  ;;  %9464 = vmatpush1.bf16.msra.mxu0 %v15764_v15  ;;  %v15803_v3 = vld [vmem:[%s17160_s22 + $0x1b30] ss:$28 sps:$4 sm:$0xff]   ;;  %v15817_v15 = vld [vmem:[%s17160_s22 + $0x1ba4] ss:$28 sps:$4 sm:$0xff]   ;;  %v15823_v13 = vld [vmem:[%s17160_s22 + $0x1bdc] ss:$28 sps:$4 sm:$0xff]  }
 0x4aa   : > { %9505 = vmatpush1.bf16.msra.mxu1 %v15767_v14  ;;  %10105 = vst [vmem:[#allocation2 + $0x10] sm:$0xff] %v10098_v32  ;;  %9465 = vmatprep.subr.bf16.mxu0 %v15772_v23  ;;  %v15812_v10 = vld [vmem:[%s17160_s22 + $0x1820] ss:$28 sps:$4 sm:$0xff]   ;;  %v15818_v14 = vld [vmem:[%s17160_s22 + $0x1858] ss:$28 sps:$4 sm:$0xff]  }
 0x4ab   : > { %9506 = vmatprep.subr.bf16.mxu1 %v15775_v30  ;;  %10106 = vst [vmem:[#allocation2 + $0x18] sm:$0xff] %v10099_v33  ;;  %v15815_v11 = vld [vmem:[%s17160_s22 + $0x1ba0] ss:$28 sps:$4 sm:$0xff]   ;;  %v15821_v16 = vld [vmem:[%s17160_s22 + $0x1bd8] ss:$28 sps:$4 sm:$0xff]  }
 0x4ac   : > { %v15826_v22 = vld [vmem:[%s17160_s22 + $0x1c14] ss:$28 sps:$4 sm:$0xff]   ;;  %v15832_v20 = vld [vmem:[%s17160_s22 + $0x1c4c] ss:$28 sps:$4 sm:$0xff]  }
 0x4ad   : > { %9466 = vmatpush1.bf16.msra.mxu0 %v15770_v28  ;;  %v15829_v17 = vld [vmem:[%s17160_s22 + $0x1f94] ss:$28 sps:$4 sm:$0xff]   ;;  %v15835_v29 = vld [vmem:[%s17160_s22 + $0x1fcc] ss:$28 sps:$4 sm:$0xff]   ;;  %v15838_v28 = vld [vmem:[%s17160_s22 + $0x1c84] ss:$28 sps:$4 sm:$0xff]  }
 0x4ae   : > { %9507 = vmatpush1.bf16.msra.mxu1 %v15773_v45  ;;  %9467 = vmatprep.subr.bf16.mxu0 %v15778_v37  ;;  %v15824_v23 = vld [vmem:[%s17160_s22 + $0x1c10] ss:$28 sps:$4 sm:$0xff]   ;;  %v15830_v32 = vld [vmem:[%s17160_s22 + $0x1c48] ss:$28 sps:$4 sm:$0xff]   ;;  %v15836_v37 = vld [vmem:[%s17160_s22 + $0x1c80] ss:$28 sps:$4 sm:$0xff]  }
 0x4af   : > { %9508 = vmatprep.subr.bf16.mxu1 %v15781_v31  ;;  %v15827_v30 = vld [vmem:[%s17160_s22 + $0x1f90] ss:$28 sps:$4 sm:$0xff]   ;;  %v15833_v33 = vld [vmem:[%s17160_s22 + $0x1fc8] ss:$28 sps:$4 sm:$0xff]   ;;  %v15839_v31 = vld [vmem:[%s17160_s22 + $0x2000] ss:$28 sps:$4 sm:$0xff]  }
 0x4b0   : > { %v15841_v45 = vld [vmem:[%s17160_s22 + $0x2004] ss:$28 sps:$4 sm:$0xff]  }
 0x4b1   : > { %9468 = vmatpush1.bf16.msra.mxu0 %v15776_v36  ;;  %v15844_v36 = vld [vmem:[%s17160_s22 + $0x1cbc] ss:$28 sps:$4 sm:$0xff]  }
 0x4b2   : > { %9509 = vmatpush1.bf16.msra.mxu1 %v15779_v47  ;;  %9469 = vmatprep.subr.bf16.mxu0 %v15784_v35  ;;  %v15847_v47 = vld [vmem:[%s17160_s22 + $0x203c] ss:$28 sps:$4 sm:$0xff]  }
 0x4b3   : > { %9510 = vmatprep.subr.bf16.mxu1 %v15787_v60  ;;  %v15842_v35 = vld [vmem:[%s17160_s22 + $0x1cb8] ss:$28 sps:$4 sm:$0xff]  }
 0x4b4   : > { %v15845_v60 = vld [vmem:[%s17160_s22 + $0x2038] ss:$28 sps:$4 sm:$0xff]  }
 0x4b5   : > { %9470 = vmatpush1.bf16.msra.mxu0 %v15782_v44  ;;  %v15850_v44 = vld [vmem:[%s17160_s22 + $0x1cf4] ss:$28 sps:$4 sm:$0xff]  }
 0x4b6   : > { %9511 = vmatpush1.bf16.msra.mxu1 %v15785_v46  ;;  %9471 = vmatprep.subr.bf16.mxu0 %v15790_v48  ;;  %v15853_v46 = vld [vmem:[%s17160_s22 + $0x2074] ss:$28 sps:$4 sm:$0xff]  }
 0x4b7   : > { %9512 = vmatprep.subr.bf16.mxu1 %v15793_v57  ;;  %v15848_v48 = vld [vmem:[%s17160_s22 + $0x1cf0] ss:$28 sps:$4 sm:$0xff]  }
 0x4b8   : > { %v15851_v57 = vld [vmem:[%s17160_s22 + $0x2070] ss:$28 sps:$4 sm:$0xff]  }
 0x4b9   : > { %9472 = vmatpush1.bf16.msra.mxu0 %v15788_v52  ;;  %v15856_v52 = vld [vmem:[%s17160_s22 + $0x1d2c] ss:$28 sps:$4 sm:$0xff]  }
 0x4ba   : > { %9513 = vmatpush1.bf16.msra.mxu1 %v15791_v54  ;;  %9473 = vmatprep.subr.bf16.mxu0 %v15796_v2  ;;  %v15859_v54 = vld [vmem:[%s17160_s22 + $0x20ac] ss:$28 sps:$4 sm:$0xff]  }
 0x4bb   : > { %9514 = vmatprep.subr.bf16.mxu1 %v15799_v56  ;;  %v15854_v2 = vld [vmem:[%s17160_s22 + $0x1d28] ss:$28 sps:$4 sm:$0xff]  }
 0x4bc   : > { %v15857_v56 = vld [vmem:[%s17160_s22 + $0x20a8] ss:$28 sps:$4 sm:$0xff]  }
 0x4bd   : > { %9474 = vmatpush1.bf16.msra.mxu0 %v15794_v59  ;;  %v15862_v59 = vld [vmem:[%s17160_s22 + $0x1d64] ss:$28 sps:$4 sm:$0xff]  }
 0x4be   : > { %9515 = vmatpush1.bf16.msra.mxu1 %v15797_v63  ;;  %9475 = vmatprep.subr.bf16.mxu0 %v15802_v0  ;;  %v15865_v63 = vld [vmem:[%s17160_s22 + $0x20e4] ss:$28 sps:$4 sm:$0xff]  }
 0x4bf   : > { %9516 = vmatprep.subr.bf16.mxu1 %v15805_v1 }
 0x4c1   : > { %9476 = vmatpush1.bf16.msra.mxu0 %v15800_v58 }
 0x4c2   : > { %9517 = vmatpush1.bf16.msra.mxu1 %v15803_v3  ;;  %9477 = vmatprep.subr.bf16.mxu0 %v15808_v4 }
 0x4c3   : > { %9518 = vmatprep.subr.bf16.mxu1 %v15811_v6 }
 0x4c5   : > { %9478 = vmatpush1.bf16.msra.mxu0 %v15806_v5 }
 0x4c6   : > { %9519 = vmatpush1.bf16.msra.mxu1 %v15809_v7  ;;  %9479 = vmatprep.subr.bf16.mxu0 %v15814_v12  ;;  %v15860_v7 = vld [vmem:[%s17160_s22 + $0x1d60] ss:$28 sps:$4 sm:$0xff]  }
 0x4c7   : > { %9520 = vmatprep.subr.bf16.mxu1 %v15817_v15  ;;  %v15863_v12 = vld [vmem:[%s17160_s22 + $0x20e0] ss:$28 sps:$4 sm:$0xff]  }
 0x4c9   : > { %9480 = vmatpush1.bf16.msra.mxu0 %v15812_v10 }
 0x4ca   : > { %9521 = vmatpush1.bf16.msra.mxu1 %v15815_v11  ;;  %9481 = vmatprep.subr.bf16.mxu0 %v15820_v19  ;;  %v15868_v11 = vld [vmem:[%s17160_s22 + $0x1d9c] ss:$28 sps:$4 sm:$0xff]  }
 0x4cb   : > { %9522 = vmatprep.subr.bf16.mxu1 %v15823_v13  ;;  %v15871_v19 = vld [vmem:[%s17160_s22 + $0x211c] ss:$28 sps:$4 sm:$0xff]  }
 0x4cd   : > { %9482 = vmatpush1.bf16.msra.mxu0 %v15818_v14  ;;  %v15866_v14 = vld [vmem:[%s17160_s22 + $0x1d98] ss:$28 sps:$4 sm:$0xff]  }
 0x4ce   : > { %9523 = vmatpush1.bf16.msra.mxu1 %v15821_v16  ;;  %9533 = vmatprep.subr.bf16.mxu0 %v15826_v22  ;;  %v15869_v16 = vld [vmem:[%s17160_s22 + $0x2118] ss:$28 sps:$4 sm:$0xff]  }
 0x4cf   : > { %9574 = vmatprep.subr.bf16.mxu1 %v15829_v17  ;;  %v15874_v22 = vld [vmem:[%s17160_s22 + $0x1dd4] ss:$28 sps:$4 sm:$0xff]  }
 0x4d0   : > { %9484 = vmatmul.mubr.bf16.vlgmr.msra.gmra.mrb[56].mxu0 %v17540_v61  ;;  %v15877_v17 = vld [vmem:[%s17160_s22 + $0x2154] ss:$28 sps:$4 sm:$0xff]  }
 0x4d1   : > { %9525 = vmatmul.mubr.bf16.vlgmr.msra.gmra.mrb[56].mxu1 %v17544_v62  ;;  %9534 = vmatpush1.bf16.msra.mxu0 %v15824_v23  ;;  %v15872_v23 = vld [vmem:[%s17160_s22 + $0x1dd0] ss:$28 sps:$4 sm:$0xff]  }
 0x4d2   : > { %9575 = vmatpush1.bf16.msra.mxu1 %v15827_v30  ;;  %9535 = vmatprep.subr.bf16.mxu0 %v15832_v20  ;;  %v15875_v30 = vld [vmem:[%s17160_s22 + $0x2150] ss:$28 sps:$4 sm:$0xff]  }
 0x4d3   : > { %9576 = vmatprep.subr.bf16.mxu1 %v15835_v29  ;;  %9565 = vmatprep.mubr.bf16.mxu0 %v17555_v42  ;;  %v15880_v20 = vld [vmem:[%s17160_s22 + $0x1e0c] ss:$28 sps:$4 sm:$0xff]  }
 0x4d4   : > { %9606 = vmatprep.mubr.bf16.mxu1 %v17559_v43  ;;  %v15883_v29 = vld [vmem:[%s17160_s22 + $0x218c] ss:$28 sps:$4 sm:$0xff]  }
 0x4d5   : > { %9536 = vmatpush1.bf16.msra.mxu0 %v15830_v32  ;;  %v15878_v32 = vld [vmem:[%s17160_s22 + $0x1e08] ss:$28 sps:$4 sm:$0xff]  }
 0x4d6   : > { %9577 = vmatpush1.bf16.msra.mxu1 %v15833_v33  ;;  %9537 = vmatprep.subr.bf16.mxu0 %v15838_v28  ;;  %v15881_v33 = vld [vmem:[%s17160_s22 + $0x2188] ss:$28 sps:$4 sm:$0xff]  }
 0x4d7   : > { %9578 = vmatprep.subr.bf16.mxu1 %v15841_v45  ;;  %v15886_v28 = vld [vmem:[%s17160_s22 + $0x1e44] ss:$28 sps:$4 sm:$0xff]  }
 0x4d8   : > { %v15889_v45 = vld [vmem:[%s17160_s22 + $0x21c4] ss:$28 sps:$4 sm:$0xff]  }
 0x4d9   : > { %9538 = vmatpush1.bf16.msra.mxu0 %v15836_v37  ;;  %v15884_v37 = vld [vmem:[%s17160_s22 + $0x1e40] ss:$28 sps:$4 sm:$0xff]  }
 0x4da   : > { %9579 = vmatpush1.bf16.msra.mxu1 %v15839_v31  ;;  %9539 = vmatprep.subr.bf16.mxu0 %v15844_v36  ;;  %v15887_v31 = vld [vmem:[%s17160_s22 + $0x21c0] ss:$28 sps:$4 sm:$0xff]  }
 0x4db   : > { %9580 = vmatprep.subr.bf16.mxu1 %v15847_v47  ;;  %v15892_v36 = vld [vmem:[%s17160_s22 + $0x1e7c] ss:$28 sps:$4 sm:$0xff]  }
 0x4dc   : > { %v15895_v47 = vld [vmem:[%s17160_s22 + $0x21fc] ss:$28 sps:$4 sm:$0xff]  }
 0x4dd   : > { %9540 = vmatpush1.bf16.msra.mxu0 %v15842_v35  ;;  %v15890_v35 = vld [vmem:[%s17160_s22 + $0x1e78] ss:$28 sps:$4 sm:$0xff]  }
 0x4de   : > { %9581 = vmatpush1.bf16.msra.mxu1 %v15845_v60  ;;  %9541 = vmatprep.subr.bf16.mxu0 %v15850_v44  ;;  %v15893_v60 = vld [vmem:[%s17160_s22 + $0x21f8] ss:$28 sps:$4 sm:$0xff]  }
 0x4df   : > { %9582 = vmatprep.subr.bf16.mxu1 %v15853_v46  ;;  %v15898_v44 = vld [vmem:[%s17160_s22 + $0x1eb4] ss:$28 sps:$4 sm:$0xff]  }
 0x4e0   : > { %v15901_v46 = vld [vmem:[%s17160_s22 + $0x2234] ss:$28 sps:$4 sm:$0xff]  }
 0x4e1   : > { %9542 = vmatpush1.bf16.msra.mxu0 %v15848_v48  ;;  %v15896_v48 = vld [vmem:[%s17160_s22 + $0x1eb0] ss:$28 sps:$4 sm:$0xff]  }
 0x4e2   : > { %9583 = vmatpush1.bf16.msra.mxu1 %v15851_v57  ;;  %9543 = vmatprep.subr.bf16.mxu0 %v15856_v52  ;;  %v15899_v57 = vld [vmem:[%s17160_s22 + $0x2230] ss:$28 sps:$4 sm:$0xff]  }
 0x4e3   : > { %9584 = vmatprep.subr.bf16.mxu1 %v15859_v54  ;;  %v9239_v0 = vpop.f32.mrb[44].mxu0  ;;  %v15904_v52 = vld [vmem:[%s17160_s22 + $0x1eec] ss:$28 sps:$4 sm:$0xff]  }
 0x4e4   : > { %v9280_v1 = vpop.f32.mrb[44].mxu1  ;;  %v9241_v3 = vpop.f32.mrb[45].mxu0  ;;  %v15907_v54 = vld [vmem:[%s17160_s22 + $0x226c] ss:$28 sps:$4 sm:$0xff]  }
 0x4e5   : > { %v18412_v58 = vadd.f32 %v9280_v1, %v9239_v0  ;;  %v9282_v4 = vpop.f32.mrb[45].mxu1  ;;  %v9243_v5 = vpop.f32.mrb[46].mxu0  ;;  %9544 = vmatpush1.bf16.msra.mxu0 %v15854_v2  ;;  %v15902_v2 = vld [vmem:[%s17160_s22 + $0x1ee8] ss:$28 sps:$4 sm:$0xff]   ;;  %v15908_v0 = vld [vmem:[%s17160_s22 + $0x1f20] ss:$28 sps:$4 sm:$0xff]  }
 0x4e6   : > { %v18414_v6 = vadd.f32 %v9282_v4, %v9241_v3  ;;  %9585 = vmatpush1.bf16.msra.mxu1 %v15857_v56  ;;  %v9284_v15 = vpop.f32.mrb[46].mxu1  ;;  %v9244_v10 = vpop.f32.mrb[47].mxu0  ;;  %9545 = vmatprep.subr.bf16.mxu0 %v15862_v59  ;;  %v15905_v56 = vld [vmem:[%s17160_s22 + $0x2268] ss:$28 sps:$4 sm:$0xff]   ;;  %v15911_v1 = vld [vmem:[%s17160_s22 + $0x22a0] ss:$28 sps:$4 sm:$0xff]  }
 0x4e7   : > { %9586 = vmatprep.subr.bf16.mxu1 %v15865_v63  ;;  %v9285_v13 = vpop.f32.mrb[47].mxu1  ;;  %v15910_v59 = vld [vmem:[%s17160_s22 + $0x1f24] ss:$28 sps:$4 sm:$0xff]   ;;  %v15916_v3 = vld [vmem:[%s17160_s22 + $0x1f5c] ss:$28 sps:$4 sm:$0xff]  }
 0x4e8   : > { %v15913_v63 = vld [vmem:[%s17160_s22 + $0x22a4] ss:$28 sps:$4 sm:$0xff]   ;;  %v15919_v4 = vld [vmem:[%s17160_s22 + $0x22dc] ss:$28 sps:$4 sm:$0xff]   ;;  %v15920_v10 = vld [vmem:[%s17160_s22 + $0x2310] ss:$28 sps:$4 sm:$0xff]  }
 0x4e9   : > { %9546 = vmatpush1.bf16.msra.mxu0 %v15860_v7  ;;  %v15914_v5 = vld [vmem:[%s17160_s22 + $0x1f58] ss:$28 sps:$4 sm:$0xff]   ;;  %v15928_v13 = vld [vmem:[%s17160_s22 + $0x210] ss:$28 sps:$4 sm:$0xff]  }
 0x4ea   : > { %9587 = vmatpush1.bf16.msra.mxu1 %v15863_v12  ;;  %9547 = vmatprep.subr.bf16.mxu0 %v15868_v11  ;;  %v15917_v7 = vld [vmem:[%s17160_s22 + $0x22d8] ss:$28 sps:$4 sm:$0xff]  }
 0x4eb   : > { %9588 = vmatprep.subr.bf16.mxu1 %v15871_v19  ;;  %v15922_v12 = vld [vmem:[%s17160_s22 + $0x2314] ss:$28 sps:$4 sm:$0xff]   ;;  %v15927_v19 = vld [vmem:[%s17160_s22 + $0x234c] ss:$28 sps:$4 sm:$0xff]  }
 0x4ec   : > { %v15923_v15 = vld [vmem:[%s17160_s22 + $0x1d8] ss:$28 sps:$4 sm:$0xff]  }
 0x4ed   : > { %9548 = vmatpush1.bf16.msra.mxu0 %v15866_v14  ;;  %v15924_v11 = vld [vmem:[%s17160_s22 + $0x18] ss:$28 sps:$4 sm:$0xff]   ;;  %v15925_v14 = vld [vmem:[%s17160_s22 + $0x2348] ss:$28 sps:$4 sm:$0xff]  }
 0x4ee   : > { %9589 = vmatpush1.bf16.msra.mxu1 %v15869_v16  ;;  %9549 = vmatprep.subr.bf16.mxu0 %v15874_v22  ;;  %v15929_v16 = vld [vmem:[%s17160_s22 + $0x50] ss:$28 sps:$4 sm:$0xff]   ;;  %v15932_v22 = vld [vmem:[%s17160_s22 + $0x2384] ss:$28 sps:$4 sm:$0xff]  }
 0x4ef   : > { %9590 = vmatprep.subr.bf16.mxu1 %v15877_v17  ;;  %v15933_v17 = vld [vmem:[%s17160_s22 + $0x248] ss:$28 sps:$4 sm:$0xff]  }
 0x4f1   : > { %9550 = vmatpush1.bf16.msra.mxu0 %v15872_v23  ;;  %v15930_v23 = vld [vmem:[%s17160_s22 + $0x2380] ss:$28 sps:$4 sm:$0xff]  }
 0x4f2   : > { %9591 = vmatpush1.bf16.msra.mxu1 %v15875_v30  ;;  %9551 = vmatprep.subr.bf16.mxu0 %v15880_v20  ;;  %v15934_v30 = vld [vmem:[%s17160_s22 + $0x88] ss:$28 sps:$4 sm:$0xff]   ;;  %v15937_v20 = vld [vmem:[%s17160_s22 + $0x23bc] ss:$28 sps:$4 sm:$0xff]  }
 0x4f3   : > { %9592 = vmatprep.subr.bf16.mxu1 %v15883_v29  ;;  %v15938_v29 = vld [vmem:[%s17160_s22 + $0x280] ss:$28 sps:$4 sm:$0xff]  }
 0x4f5   : > { %9552 = vmatpush1.bf16.msra.mxu0 %v15878_v32  ;;  %v15935_v32 = vld [vmem:[%s17160_s22 + $0x23b8] ss:$28 sps:$4 sm:$0xff]  }
 0x4f6   : > { %9593 = vmatpush1.bf16.msra.mxu1 %v15881_v33  ;;  %9553 = vmatprep.subr.bf16.mxu0 %v15886_v28  ;;  %v15942_v33 = vld [vmem:[%s17160_s22 + $0x23f4] ss:$28 sps:$4 sm:$0xff]  }
 0x4f7   : > { %9594 = vmatprep.subr.bf16.mxu1 %v15889_v45  ;;  %v15943_v28 = vld [vmem:[%s17160_s22 + $0x2b8] ss:$28 sps:$4 sm:$0xff]   ;;  %v15940_v45 = vld [vmem:[%s17160_s22 + $0x23f0] ss:$28 sps:$4 sm:$0xff]  }
 0x4f9   : > { %9554 = vmatpush1.bf16.msra.mxu0 %v15884_v37  ;;  %v15944_v37 = vld [vmem:[%s17160_s22 + $0xf8] ss:$28 sps:$4 sm:$0xff]  }
 0x4fa   : > { %9595 = vmatpush1.bf16.msra.mxu1 %v15887_v31  ;;  %9555 = vmatprep.subr.bf16.mxu0 %v15892_v36  ;;  %v15947_v31 = vld [vmem:[%s17160_s22 + $0x242c] ss:$28 sps:$4 sm:$0xff]  }
 0x4fb   : > { %9596 = vmatprep.subr.bf16.mxu1 %v15895_v47  ;;  %v15948_v36 = vld [vmem:[%s17160_s22 + $0x2f0] ss:$28 sps:$4 sm:$0xff]   ;;  %v15945_v47 = vld [vmem:[%s17160_s22 + $0x2428] ss:$28 sps:$4 sm:$0xff]  }
 0x4fd   : > { %9556 = vmatpush1.bf16.msra.mxu0 %v15890_v35  ;;  %v15949_v35 = vld [vmem:[%s17160_s22 + $0x130] ss:$28 sps:$4 sm:$0xff]  }
 0x4fe   : > { %9597 = vmatpush1.bf16.msra.mxu1 %v15893_v60  ;;  %9557 = vmatprep.subr.bf16.mxu0 %v15898_v44  ;;  %v15952_v60 = vld [vmem:[%s17160_s22 + $0x2464] ss:$28 sps:$4 sm:$0xff]  }
 0x4ff   : > { %9598 = vmatprep.subr.bf16.mxu1 %v15901_v46  ;;  %v15953_v44 = vld [vmem:[%s17160_s22 + $0x328] ss:$28 sps:$4 sm:$0xff]  }
 0x501   : > { %9558 = vmatpush1.bf16.msra.mxu0 %v15896_v48 }
 0x502   : > { %9599 = vmatpush1.bf16.msra.mxu1 %v15899_v57  ;;  %9559 = vmatprep.subr.bf16.mxu0 %v15904_v52 }
 0x503   : > { %9600 = vmatprep.subr.bf16.mxu1 %v15907_v54 }
 0x505   : > { %9560 = vmatpush1.bf16.msra.mxu0 %v15902_v2 }
 0x506   : > { %9601 = vmatpush1.bf16.msra.mxu1 %v15905_v56  ;;  %9561 = vmatprep.subr.bf16.mxu0 %v15910_v59  ;;  %v15950_v59 = vld [vmem:[%s17160_s22 + $0x2460] ss:$28 sps:$4 sm:$0xff]  }
 0x507   : > { %9602 = vmatprep.subr.bf16.mxu1 %v15913_v63  ;;  %v15954_v63 = vld [vmem:[%s17160_s22 + $0x168] ss:$28 sps:$4 sm:$0xff]  }
 0x509   : > { %9562 = vmatpush1.bf16.msra.mxu0 %v15908_v0 }
 0x50a   : > { %9603 = vmatpush1.bf16.msra.mxu1 %v15911_v1  ;;  %9563 = vmatprep.subr.bf16.mxu0 %v15916_v3 }
 0x50b   : > { %9604 = vmatprep.subr.bf16.mxu1 %v15919_v4  ;;  %v15958_v4 = vld [vmem:[%s17160_s22 + $0x360] ss:$28 sps:$4 sm:$0xff]  }
 0x50d   : > { %9564 = vmatpush1.bf16.msra.mxu0 %v15914_v5 }
 0x50e   : > { %9605 = vmatpush1.bf16.msra.mxu1 %v15917_v7  ;;  %9615 = vmatprep.subr.bf16.mxu0 %v15922_v12  ;;  %v15955_v7 = vld [vmem:[%s17160_s22 + $0x2498] ss:$28 sps:$4 sm:$0xff]   ;;  %v15959_v12 = vld [vmem:[%s17160_s22 + $0x1a0] ss:$28 sps:$4 sm:$0xff]  }
 0x50f   : > { %13922 = vmatprep.subr.bf16.mxu1 %v15923_v15  ;;  %v15962_v15 = vld [vmem:[%s17160_s22 + $0x24d4] ss:$28 sps:$4 sm:$0xff]  }
 0x510   : > { %9566 = vmatmul.mubr.bf16.vlgmr.msra.gmra.mrb[60].mxu0 %v17636_v50 }
 0x511   : > { %9607 = vmatmul.mubr.bf16.vlgmr.msra.gmra.mrb[60].mxu1 %v17640_v51  ;;  %9616 = vmatpush1.bf16.msra.mxu0 %v15920_v10  ;;  %v15963_v10 = vld [vmem:[%s17160_s22 + $0x558] ss:$28 sps:$4 sm:$0xff]  }
 0x512   : > { %13923 = vmatpush3.bf16.msra.mxu1 %v15924_v11  ;;  %9617 = vmatprep.subr.bf16.mxu0 %v15927_v19  ;;  %v15960_v11 = vld [vmem:[%s17160_s22 + $0x24d0] ss:$28 sps:$4 sm:$0xff]   ;;  %v15964_v19 = vld [vmem:[%s17160_s22 + $0x398] ss:$28 sps:$4 sm:$0xff]  }
 0x513   : > { %13924 = vmatprep.subr.bf16.mxu1 %v15928_v13  ;;  %9688 = vmatprep.mubr.bf16.mxu1 %v17242_v49  ;;  %v15939_v49 = vld [vmem:[%s17160_s22 + $0xc0] ss:$28 sps:$4 sm:$0xff]   ;;  %v15967_v13 = vld [vmem:[%s17160_s22 + $0x250c] ss:$28 sps:$4 sm:$0xff]  }
 0x514   : > { %9647 = vmatprep.mubr.bf16.mxu0 %v17646_v55 }
 0x515   : > { %9618 = vmatpush1.bf16.msra.mxu0 %v15925_v14  ;;  %v15968_v14 = vld [vmem:[%s17160_s22 + $0x590] ss:$28 sps:$4 sm:$0xff]  }
 0x516   : > { %13925 = vmatpush3.bf16.msra.mxu1 %v15929_v16  ;;  %9619 = vmatprep.subr.bf16.mxu0 %v15932_v22  ;;  %v15965_v16 = vld [vmem:[%s17160_s22 + $0x2508] ss:$28 sps:$4 sm:$0xff]   ;;  %v15969_v22 = vld [vmem:[%s17160_s22 + $0x3d0] ss:$28 sps:$4 sm:$0xff]  }
 0x517   : > { %13926 = vmatprep.subr.bf16.mxu1 %v15933_v17  ;;  %v15972_v17 = vld [vmem:[%s17160_s22 + $0x2544] ss:$28 sps:$4 sm:$0xff]  }
 0x519   : > { %9620 = vmatpush1.bf16.msra.mxu0 %v15930_v23  ;;  %v15973_v23 = vld [vmem:[%s17160_s22 + $0x5c8] ss:$28 sps:$4 sm:$0xff]  }
 0x51a   : > { %13927 = vmatpush3.bf16.msra.mxu1 %v15934_v30  ;;  %9621 = vmatprep.subr.bf16.mxu0 %v15937_v20  ;;  %v15970_v30 = vld [vmem:[%s17160_s22 + $0x2540] ss:$28 sps:$4 sm:$0xff]  }
 0x51b   : > { %13928 = vmatprep.subr.bf16.mxu1 %v15938_v29  ;;  %v15977_v20 = vld [vmem:[%s17160_s22 + $0x257c] ss:$28 sps:$4 sm:$0xff]  }
 0x51c   : > { %v15978_v29 = vld [vmem:[%s17160_s22 + $0x600] ss:$28 sps:$4 sm:$0xff]  }
 0x51d   : > { %9622 = vmatpush1.bf16.msra.mxu0 %v15935_v32  ;;  %v15975_v32 = vld [vmem:[%s17160_s22 + $0x2578] ss:$28 sps:$4 sm:$0xff]  }
 0x51e   : > { %13929 = vmatpush3.bf16.msra.mxu1 %v15939_v49  ;;  %9623 = vmatprep.subr.bf16.mxu0 %v15942_v33  ;;  %v15979_v49 = vld [vmem:[%s17160_s22 + $0x440] ss:$28 sps:$4 sm:$0xff]   ;;  %v15983_v33 = vld [vmem:[%s17160_s22 + $0x638] ss:$28 sps:$4 sm:$0xff]  }
 0x51f   : > { %13930 = vmatprep.subr.bf16.mxu1 %v15943_v28  ;;  %v15980_v28 = vld [vmem:[%s17160_s22 + $0x25b0] ss:$28 sps:$4 sm:$0xff]  }
 0x521   : > { %9624 = vmatpush1.bf16.msra.mxu0 %v15940_v45  ;;  %v15984_v45 = vld [vmem:[%s17160_s22 + $0x478] ss:$28 sps:$4 sm:$0xff]  }
 0x522   : > { %13931 = vmatpush3.bf16.msra.mxu1 %v15944_v37  ;;  %9625 = vmatprep.subr.bf16.mxu0 %v15947_v31  ;;  %v15987_v37 = vld [vmem:[%s17160_s22 + $0x25ec] ss:$28 sps:$4 sm:$0xff]  }
 0x523   : > { %13932 = vmatprep.subr.bf16.mxu1 %v15948_v36  ;;  %v9321_v46 = vpop.f32.mrb[48].mxu0  ;;  %v15988_v31 = vld [vmem:[%s17160_s22 + $0x670] ss:$28 sps:$4 sm:$0xff]   ;;  %v15985_v36 = vld [vmem:[%s17160_s22 + $0x25e8] ss:$28 sps:$4 sm:$0xff]  }
 0x524   : > { %v9362_v48 = vpop.f32.mrb[48].mxu1  ;;  %v9322_v57 = vadd.f32 %v9321_v46, %v18412_v58  ;;  %v9323_v52 = vpop.f32.mrb[49].mxu0  ;;  %v15957_v58 = vld [vmem:[%s17160_s22 + $0x249c] ss:$28 sps:$4 sm:$0xff]   ;;  %v15994_v46 = vld [vmem:[%s17160_s22 + $0x4e8] ss:$28 sps:$4 sm:$0xff]  }
 0x525   : > { %v9364_v54 = vpop.f32.mrb[49].mxu1  ;;  %v9324_v2 = vadd.f32 %v9323_v52, %v18414_v6  ;;  %v9325_v56 = vpop.f32.mrb[50].mxu0  ;;  %9626 = vmatpush1.bf16.msra.mxu0 %v15945_v47  ;;  %v15989_v47 = vld [vmem:[%s17160_s22 + $0x4b0] ss:$28 sps:$4 sm:$0xff]   ;;  %v15995_v52 = vld [vmem:[%s17160_s22 + $0x2658] ss:$28 sps:$4 sm:$0xff]  }
 0x526   : > { %13933 = vmatpush3.bf16.msra.mxu1 %v15949_v35  ;;  %v9366_v0 = vpop.f32.mrb[50].mxu1  ;;  %v18488_v1 = vadd.f32 %v9362_v48, %v9322_v57  ;;  %v9326_v3 = vpop.f32.mrb[51].mxu0  ;;  %9627 = vmatprep.subr.bf16.mxu0 %v15952_v60  ;;  %v15992_v35 = vld [vmem:[%s17160_s22 + $0x2624] ss:$28 sps:$4 sm:$0xff]   ;;  %v15997_v48 = vld [vmem:[%s17160_s22 + $0x265c] ss:$28 sps:$4 sm:$0xff]  }
 0x527   : > { %13934 = vmatprep.subr.bf16.mxu1 %v15953_v44  ;;  %v9367_v6 = vpop.f32.mrb[51].mxu1  ;;  %v18492_v5 = vadd.f32 %v9364_v54, %v9324_v2  ;;  %v15993_v60 = vld [vmem:[%s17160_s22 + $0x6a8] ss:$28 sps:$4 sm:$0xff]   ;;  %v15990_v44 = vld [vmem:[%s17160_s22 + $0x2620] ss:$28 sps:$4 sm:$0xff]  }
 0x528   : > { %v15998_v57 = vld [vmem:[%s17160_s22 + $0x6e0] ss:$28 sps:$4 sm:$0xff]   ;;  %v16000_v2 = vld [vmem:[%s17160_s22 + $0x8d8] ss:$28 sps:$4 sm:$0xff]   ;;  %v16004_v0 = vld [vmem:[%s17160_s22 + $0x910] ss:$28 sps:$4 sm:$0xff]  }
 0x529   : > { %9628 = vmatpush1.bf16.msra.mxu0 %v15950_v59  ;;  %v15999_v54 = vld [vmem:[%s17160_s22 + $0x520] ss:$28 sps:$4 sm:$0xff]   ;;  %v16002_v56 = vld [vmem:[%s17160_s22 + $0xc58] ss:$28 sps:$4 sm:$0xff]   ;;  %v16006_v3 = vld [vmem:[%s17160_s22 + $0xc90] ss:$28 sps:$4 sm:$0xff]  }
 0x52a   : > { %13935 = vmatpush3.bf16.msra.mxu1 %v15954_v63  ;;  %9629 = vmatprep.subr.bf16.mxu0 %v15957_v58  ;;  %v16001_v59 = vld [vmem:[%s17160_s22 + $0x718] ss:$28 sps:$4 sm:$0xff]   ;;  %v16005_v58 = vld [vmem:[%s17160_s22 + $0x750] ss:$28 sps:$4 sm:$0xff]   ;;  %v16008_v6 = vld [vmem:[%s17160_s22 + $0x948] ss:$28 sps:$4 sm:$0xff]  }
 0x52b   : > { %13936 = vmatprep.subr.bf16.mxu1 %v15958_v4  ;;  %v16003_v63 = vld [vmem:[%s17160_s22 + $0xa98] ss:$28 sps:$4 sm:$0xff]   ;;  %v16007_v4 = vld [vmem:[%s17160_s22 + $0xad0] ss:$28 sps:$4 sm:$0xff]  }
 0x52d   : > { %9630 = vmatpush1.bf16.msra.mxu0 %v15955_v7  ;;  %v16010_v7 = vld [vmem:[%s17160_s22 + $0xcc8] ss:$28 sps:$4 sm:$0xff]  }
 0x52e   : > { %13937 = vmatpush3.bf16.msra.mxu1 %v15959_v12  ;;  %9631 = vmatprep.subr.bf16.mxu0 %v15962_v15  ;;  %v16011_v12 = vld [vmem:[%s17160_s22 + $0xb08] ss:$28 sps:$4 sm:$0xff]   ;;  %v16012_v15 = vld [vmem:[%s17160_s22 + $0x980] ss:$28 sps:$4 sm:$0xff]  }
 0x52f   : > { %13944 = vmatprep.subr.bf16.mxu1 %v15963_v10  ;;  %v16014_v10 = vld [vmem:[%s17160_s22 + $0xd00] ss:$28 sps:$4 sm:$0xff]  }
 0x531   : > { %9689 = vmatmul.mubr.bf16.vlgmr.msra.gmra.mrb[64].mxu1 %v17269_v8  ;;  %9632 = vmatpush1.bf16.msra.mxu0 %v15960_v11  ;;  %v15974_v8 = vld [vmem:[%s17160_s22 + $0x408] ss:$28 sps:$4 sm:$0xff]   ;;  %v16013_v11 = vld [vmem:[%s17160_s22 + $0x7c0] ss:$28 sps:$4 sm:$0xff]  }
 0x532   : > { %13945 = vmatpush3.bf16.msra.mxu1 %v15964_v19  ;;  %9633 = vmatprep.subr.bf16.mxu0 %v15967_v13  ;;  %v16018_v19 = vld [vmem:[%s17160_s22 + $0xd38] ss:$28 sps:$4 sm:$0xff]  }
 0x533   : > { %13946 = vmatprep.subr.bf16.mxu1 %v15968_v14  ;;  %9728 = vmatprep.mubr.bf16.mxu1 %v17247_v53  ;;  %v15982_v53 = vld [vmem:[%s17160_s22 + $0x25b4] ss:$28 sps:$4 sm:$0xff]  }
 0x534   : > { %v16017_v13 = vld [vmem:[%s17160_s22 + $0x7f8] ss:$28 sps:$4 sm:$0xff]  }
 0x535   : > { %9634 = vmatpush1.bf16.msra.mxu0 %v15965_v16  ;;  %v16019_v14 = vld [vmem:[%s17160_s22 + $0xb78] ss:$28 sps:$4 sm:$0xff]   ;;  %v16020_v16 = vld [vmem:[%s17160_s22 + $0x9f0] ss:$28 sps:$4 sm:$0xff]  }
 0x536   : > { %13947 = vmatpush3.bf16.msra.mxu1 %v15969_v22  ;;  %9635 = vmatprep.subr.bf16.mxu0 %v15972_v17  ;;  %v16022_v22 = vld [vmem:[%s17160_s22 + $0xd70] ss:$28 sps:$4 sm:$0xff]  }
 0x537   : > { %13948 = vmatprep.subr.bf16.mxu1 %v15973_v23  ;;  %v16021_v17 = vld [vmem:[%s17160_s22 + $0x830] ss:$28 sps:$4 sm:$0xff]  }
 0x538   : > { %v16023_v23 = vld [vmem:[%s17160_s22 + $0xbb0] ss:$28 sps:$4 sm:$0xff]  }
 0x539   : > { %9636 = vmatpush1.bf16.msra.mxu0 %v15970_v30  ;;  %v16024_v30 = vld [vmem:[%s17160_s22 + $0xa28] ss:$28 sps:$4 sm:$0xff]  }
 0x53a   : > { %13949 = vmatpush3.bf16.msra.mxu1 %v15974_v8  ;;  %9637 = vmatprep.subr.bf16.mxu0 %v15977_v20  ;;  %v16026_v8 = vld [vmem:[%s17160_s22 + $0xda8] ss:$28 sps:$4 sm:$0xff]  }
 0x53b   : > { %13950 = vmatprep.subr.bf16.mxu1 %v15978_v29 }
 0x53d   : > { %9638 = vmatpush1.bf16.msra.mxu0 %v15975_v32 }
 0x53e   : > { %13951 = vmatpush3.bf16.msra.mxu1 %v15979_v49  ;;  %9639 = vmatprep.subr.bf16.mxu0 %v15982_v53 }
 0x53f   : > { %13952 = vmatprep.subr.bf16.mxu1 %v15983_v33 }
 0x541   : > { %9640 = vmatpush1.bf16.msra.mxu0 %v15980_v28 }
 0x542   : > { %13953 = vmatpush3.bf16.msra.mxu1 %v15984_v45  ;;  %9641 = vmatprep.subr.bf16.mxu0 %v15987_v37  ;;  %v16025_v45 = vld [vmem:[%s17160_s22 + $0x868] ss:$28 sps:$4 sm:$0xff]  }
 0x543   : > { %13954 = vmatprep.subr.bf16.mxu1 %v15988_v31  ;;  %v16027_v37 = vld [vmem:[%s17160_s22 + $0xbe8] ss:$28 sps:$4 sm:$0xff]  }
 0x545   : > { %9642 = vmatpush1.bf16.msra.mxu0 %v15985_v36 }
 0x546   : > { %13955 = vmatpush3.bf16.msra.mxu1 %v15989_v47  ;;  %9643 = vmatprep.subr.bf16.mxu0 %v15992_v35  ;;  %v16030_v35 = vld [vmem:[%s17160_s22 + $0xde0] ss:$28 sps:$4 sm:$0xff]  }
 0x547   : > { %13956 = vmatprep.subr.bf16.mxu1 %v15993_v60 }
 0x549   : > { %9644 = vmatpush1.bf16.msra.mxu0 %v15990_v44  ;;  %v16029_v44 = vld [vmem:[%s17160_s22 + $0x8a0] ss:$28 sps:$4 sm:$0xff]  }
 0x54a   : > { %13957 = vmatpush3.bf16.msra.mxu1 %v15994_v46  ;;  %9645 = vmatprep.subr.bf16.mxu0 %v15997_v48  ;;  %v16031_v46 = vld [vmem:[%s17160_s22 + $0xc20] ss:$28 sps:$4 sm:$0xff]   ;;  %v16032_v48 = vld [vmem:[%s17160_s22 + $0xfd8] ss:$28 sps:$4 sm:$0xff]  }
 0x54b   : > { %13958 = vmatprep.subr.bf16.mxu1 %v15998_v57  ;;  %v16034_v57 = vld [vmem:[%s17160_s22 + $0x1358] ss:$28 sps:$4 sm:$0xff]  }
 0x54d   : > { %9646 = vmatpush1.bf16.msra.mxu0 %v15995_v52  ;;  %v16033_v52 = vld [vmem:[%s17160_s22 + $0xe18] ss:$28 sps:$4 sm:$0xff]  }
 0x54e   : > { %13959 = vmatpush3.bf16.msra.mxu1 %v15999_v54  ;;  %13966 = vmatprep.subr.bf16.mxu0 %v16000_v2  ;;  %v16035_v54 = vld [vmem:[%s17160_s22 + $0x1198] ss:$28 sps:$4 sm:$0xff]   ;;  %v16036_v2 = vld [vmem:[%s17160_s22 + $0x1010] ss:$28 sps:$4 sm:$0xff]  }
 0x54f   : > { %13988 = vmatprep.subr.bf16.mxu1 %v16002_v56  ;;  %v16038_v56 = vld [vmem:[%s17160_s22 + $0x1390] ss:$28 sps:$4 sm:$0xff]  }
 0x550   : > { %9648 = vmatmul.mubr.bf16.vlgmr.msra.gmra.mrb[64].mxu0 %v17722_v34 }
 0x551   : > { %9729 = vmatmul.mubr.bf16.vlgmr.msra.gmra.mrb[68].mxu1 %v17271_v9  ;;  %13967 = vmatpush3.bf16.msra.mxu0 %v16001_v59  ;;  %v16009_v9 = vld [vmem:[%s17160_s22 + $0x788] ss:$28 sps:$4 sm:$0xff]   ;;  %v16037_v59 = vld [vmem:[%s17160_s22 + $0xe50] ss:$28 sps:$4 sm:$0xff]  }
 0x552   : > { %13989 = vmatpush3.bf16.msra.mxu1 %v16003_v63  ;;  %13968 = vmatprep.subr.bf16.mxu0 %v16004_v0  ;;  %v16039_v63 = vld [vmem:[%s17160_s22 + $0x11d0] ss:$28 sps:$4 sm:$0xff]   ;;  %v16040_v0 = vld [vmem:[%s17160_s22 + $0x1048] ss:$28 sps:$4 sm:$0xff]  }
 0x553   : > { %13990 = vmatprep.subr.bf16.mxu1 %v16006_v3  ;;  %9768 = vmatprep.mubr.bf16.mxu0 %v17309_v38  ;;  %v16015_v38 = vld [vmem:[%s17160_s22 + $0xb40] ss:$28 sps:$4 sm:$0xff]   ;;  %v16042_v3 = vld [vmem:[%s17160_s22 + $0x13c8] ss:$28 sps:$4 sm:$0xff]  }
 0x554   : > { %9808 = vmatprep.mubr.bf16.mxu1 %v17313_v39  ;;  %v16016_v39 = vld [vmem:[%s17160_s22 + $0x9b8] ss:$28 sps:$4 sm:$0xff]  }
 0x555   : > { %13969 = vmatpush3.bf16.msra.mxu0 %v16005_v58  ;;  %v16044_v58 = vld [vmem:[%s17160_s22 + $0x1080] ss:$28 sps:$4 sm:$0xff]  }
 0x556   : > { %13991 = vmatpush3.bf16.msra.mxu1 %v16007_v4  ;;  %13970 = vmatprep.subr.bf16.mxu0 %v16008_v6  ;;  %v16046_v4 = vld [vmem:[%s17160_s22 + $0x1400] ss:$28 sps:$4 sm:$0xff]  }
 0x557   : > { %13992 = vmatprep.subr.bf16.mxu1 %v16010_v7  ;;  %v16045_v6 = vld [vmem:[%s17160_s22 + $0xec0] ss:$28 sps:$4 sm:$0xff]   ;;  %v16050_v7 = vld [vmem:[%s17160_s22 + $0x1438] ss:$28 sps:$4 sm:$0xff]  }
 0x559   : > { %13971 = vmatpush3.bf16.msra.mxu0 %v16009_v9  ;;  %v16049_v9 = vld [vmem:[%s17160_s22 + $0xef8] ss:$28 sps:$4 sm:$0xff]  }
 0x55a   : > { %13993 = vmatpush3.bf16.msra.mxu1 %v16011_v12  ;;  %13972 = vmatprep.subr.bf16.mxu0 %v16012_v15  ;;  %v16051_v12 = vld [vmem:[%s17160_s22 + $0x1278] ss:$28 sps:$4 sm:$0xff]   ;;  %v16052_v15 = vld [vmem:[%s17160_s22 + $0x10f0] ss:$28 sps:$4 sm:$0xff]  }
 0x55b   : > { %13994 = vmatprep.subr.bf16.mxu1 %v16014_v10  ;;  %v16054_v10 = vld [vmem:[%s17160_s22 + $0x1470] ss:$28 sps:$4 sm:$0xff]  }
 0x55d   : > { %13973 = vmatpush3.bf16.msra.mxu0 %v16013_v11  ;;  %v16053_v11 = vld [vmem:[%s17160_s22 + $0xf30] ss:$28 sps:$4 sm:$0xff]  }
 0x55e   : > { %13995 = vmatpush3.bf16.msra.mxu1 %v16015_v38  ;;  %13974 = vmatprep.subr.bf16.mxu0 %v16016_v39  ;;  %v16055_v38 = vld [vmem:[%s17160_s22 + $0x12b0] ss:$28 sps:$4 sm:$0xff]   ;;  %v16056_v39 = vld [vmem:[%s17160_s22 + $0x1128] ss:$28 sps:$4 sm:$0xff]  }
 0x55f   : > { %13996 = vmatprep.subr.bf16.mxu1 %v16018_v19  ;;  %v16058_v19 = vld [vmem:[%s17160_s22 + $0x14a8] ss:$28 sps:$4 sm:$0xff]  }
 0x561   : > { %13975 = vmatpush3.bf16.msra.mxu0 %v16017_v13  ;;  %v16057_v13 = vld [vmem:[%s17160_s22 + $0xf68] ss:$28 sps:$4 sm:$0xff]  }
 0x562   : > { %13997 = vmatpush3.bf16.msra.mxu1 %v16019_v14  ;;  %13976 = vmatprep.subr.bf16.mxu0 %v16020_v16  ;;  %v16059_v14 = vld [vmem:[%s17160_s22 + $0x12e8] ss:$28 sps:$4 sm:$0xff]   ;;  %v16060_v16 = vld [vmem:[%s17160_s22 + $0x1160] ss:$28 sps:$4 sm:$0xff]  }
 0x563   : > { %13998 = vmatprep.subr.bf16.mxu1 %v16022_v22  ;;  %v9403_v20 = vpop.f32.mrb[52].mxu0  ;;  %v16062_v22 = vld [vmem:[%s17160_s22 + $0x14e0] ss:$28 sps:$4 sm:$0xff]  }
 0x564   : > { %v9444_v29 = vpop.f32.mrb[52].mxu1  ;;  %v9404_v32 = vadd.f32 %v9403_v20, %v18488_v1  ;;  %v9405_v49 = vpop.f32.mrb[53].mxu0  ;;  %v16028_v1 = vld [vmem:[%s17160_s22 + $0xa60] ss:$28 sps:$4 sm:$0xff]   ;;  %v16065_v20 = vld [vmem:[%s17160_s22 + $0x1518] ss:$28 sps:$4 sm:$0xff]  }
 0x565   : > { %v9446_v53 = vpop.f32.mrb[53].mxu1  ;;  %v9406_v33 = vadd.f32 %v9405_v49, %v18492_v5  ;;  %v9407_v28 = vpop.f32.mrb[54].mxu0  ;;  %13977 = vmatpush3.bf16.msra.mxu0 %v16021_v17  ;;  %v16061_v17 = vld [vmem:[%s17160_s22 + $0xfa0] ss:$28 sps:$4 sm:$0xff]   ;;  %v16070_v49 = vld [vmem:[%s17160_s22 + $0x1a90] ss:$28 sps:$4 sm:$0xff]  }
 0x566   : > { %13999 = vmatpush3.bf16.msra.mxu1 %v16023_v23  ;;  %v9448_v31 = vpop.f32.mrb[54].mxu1  ;;  %v18564_v36 = vadd.f32 %v9444_v29, %v9404_v32  ;;  %v9408_v47 = vpop.f32.mrb[55].mxu0  ;;  %13978 = vmatprep.subr.bf16.mxu0 %v16024_v30  ;;  %v16063_v23 = vld [vmem:[%s17160_s22 + $0x1320] ss:$28 sps:$4 sm:$0xff]   ;;  %v16064_v30 = vld [vmem:[%s17160_s22 + $0x16d8] ss:$28 sps:$4 sm:$0xff]  }
 0x567   : > { %14000 = vmatprep.subr.bf16.mxu1 %v16026_v8  ;;  %v9449_v5 = vpop.f32.mrb[55].mxu1  ;;  %v18568_v60 = vadd.f32 %v9446_v53, %v9406_v33  ;;  %v16066_v8 = vld [vmem:[%s17160_s22 + $0x1a58] ss:$28 sps:$4 sm:$0xff]   ;;  %v16068_v32 = vld [vmem:[%s17160_s22 + $0x1710] ss:$28 sps:$4 sm:$0xff]  }
 0x568   : > { %v16067_v29 = vld [vmem:[%s17160_s22 + $0x1898] ss:$28 sps:$4 sm:$0xff]   ;;  %v16069_v53 = vld [vmem:[%s17160_s22 + $0x1550] ss:$28 sps:$4 sm:$0xff]   ;;  %v16072_v28 = vld [vmem:[%s17160_s22 + $0x1748] ss:$28 sps:$4 sm:$0xff]  }
 0x569   : > { %13979 = vmatpush3.bf16.msra.mxu0 %v16025_v45  ;;  %v16071_v33 = vld [vmem:[%s17160_s22 + $0x18d0] ss:$28 sps:$4 sm:$0xff]   ;;  %v16074_v45 = vld [vmem:[%s17160_s22 + $0x1ac8] ss:$28 sps:$4 sm:$0xff]   ;;  %v16078_v31 = vld [vmem:[%s17160_s22 + $0x1b00] ss:$28 sps:$4 sm:$0xff]  }
 0x56a   : > { %14001 = vmatpush3.bf16.msra.mxu1 %v16027_v37  ;;  %13980 = vmatprep.subr.bf16.mxu0 %v16028_v1  ;;  %v16076_v37 = vld [vmem:[%s17160_s22 + $0x1780] ss:$28 sps:$4 sm:$0xff]   ;;  %v16082_v1 = vld [vmem:[%s17160_s22 + $0x1b38] ss:$28 sps:$4 sm:$0xff]  }
 0x56b   : > { %14002 = vmatprep.subr.bf16.mxu1 %v16030_v35  ;;  %v16077_v47 = vld [vmem:[%s17160_s22 + $0x15c0] ss:$28 sps:$4 sm:$0xff]   ;;  %v16081_v35 = vld [vmem:[%s17160_s22 + $0x15f8] ss:$28 sps:$4 sm:$0xff]  }
 0x56c   : > { %v16083_v5 = vld [vmem:[%s17160_s22 + $0x1978] ss:$28 sps:$4 sm:$0xff]  }
 0x56d   : > { %13981 = vmatpush3.bf16.msra.mxu0 %v16029_v44  ;;  %v16084_v44 = vld [vmem:[%s17160_s22 + $0x17f0] ss:$28 sps:$4 sm:$0xff]  }
 0x56e   : > { %14003 = vmatpush3.bf16.msra.mxu1 %v16031_v46  ;;  %14010 = vmatprep.subr.bf16.mxu0 %v16032_v48  ;;  %v16086_v46 = vld [vmem:[%s17160_s22 + $0x1b70] ss:$28 sps:$4 sm:$0xff]  }
 0x56f   : > { %14032 = vmatprep.subr.bf16.mxu1 %v16034_v57  ;;  %v16085_v48 = vld [vmem:[%s17160_s22 + $0x1630] ss:$28 sps:$4 sm:$0xff]  }
 0x570   : > { %9769 = vmatmul.mubr.bf16.vlgmr.msra.gmra.mrb[68].mxu0 %v17357_v18  ;;  %v16041_v18 = vld [vmem:[%s17160_s22 + $0xe88] ss:$28 sps:$4 sm:$0xff]   ;;  %v16087_v57 = vld [vmem:[%s17160_s22 + $0x19b0] ss:$28 sps:$4 sm:$0xff]  }
 0x571   : > { %9809 = vmatmul.mubr.bf16.vlgmr.msra.gmra.mrb[72].mxu1 %v17363_v21  ;;  %14011 = vmatpush3.bf16.msra.mxu0 %v16033_v52  ;;  %v16043_v21 = vld [vmem:[%s17160_s22 + $0x1208] ss:$28 sps:$4 sm:$0xff]  }
 0x572   : > { %14033 = vmatpush3.bf16.msra.mxu1 %v16035_v54  ;;  %14012 = vmatprep.subr.bf16.mxu0 %v16036_v2  ;;  %v16088_v52 = vld [vmem:[%s17160_s22 + $0x1828] ss:$28 sps:$4 sm:$0xff]  }
 0x573   : > { %14034 = vmatprep.subr.bf16.mxu1 %v16038_v56  ;;  %9848 = vmatprep.mubr.bf16.mxu0 %v17375_v26  ;;  %v16047_v26 = vld [vmem:[%s17160_s22 + $0x1240] ss:$28 sps:$4 sm:$0xff]   ;;  %v16090_v54 = vld [vmem:[%s17160_s22 + $0x1ba8] ss:$28 sps:$4 sm:$0xff]  }
 0x574   : > { %9888 = vmatprep.mubr.bf16.mxu1 %v17379_v27  ;;  %v16048_v27 = vld [vmem:[%s17160_s22 + $0x10b8] ss:$28 sps:$4 sm:$0xff]  }
 0x575   : > { %14013 = vmatpush3.bf16.msra.mxu0 %v16037_v59 }
 0x576   : > { %14035 = vmatpush3.bf16.msra.mxu1 %v16039_v63  ;;  %14014 = vmatprep.subr.bf16.mxu0 %v16040_v0 }
 0x577   : > { %14036 = vmatprep.subr.bf16.mxu1 %v16042_v3 }
 0x579   : > { %14015 = vmatpush3.bf16.msra.mxu0 %v16041_v18 }
 0x57a   : > { %14037 = vmatpush3.bf16.msra.mxu1 %v16043_v21  ;;  %14016 = vmatprep.subr.bf16.mxu0 %v16044_v58  ;;  %v16089_v21 = vld [vmem:[%s17160_s22 + $0x1668] ss:$28 sps:$4 sm:$0xff]  }
 0x57b   : > { %14038 = vmatprep.subr.bf16.mxu1 %v16046_v4  ;;  %v16091_v58 = vld [vmem:[%s17160_s22 + $0x19e8] ss:$28 sps:$4 sm:$0xff]  }
 0x57d   : > { %14017 = vmatpush3.bf16.msra.mxu0 %v16045_v6 }
 0x57e   : > { %14039 = vmatpush3.bf16.msra.mxu1 %v16047_v26  ;;  %14018 = vmatprep.subr.bf16.mxu0 %v16048_v27  ;;  %v16094_v27 = vld [vmem:[%s17160_s22 + $0x1be0] ss:$28 sps:$4 sm:$0xff]  }
 0x57f   : > { %14040 = vmatprep.subr.bf16.mxu1 %v16050_v7 }
 0x581   : > { %14019 = vmatpush3.bf16.msra.mxu0 %v16049_v9  ;;  %v16093_v9 = vld [vmem:[%s17160_s22 + $0x16a0] ss:$28 sps:$4 sm:$0xff]  }
 0x582   : > { %14041 = vmatpush3.bf16.msra.mxu1 %v16051_v12  ;;  %14020 = vmatprep.subr.bf16.mxu0 %v16052_v15  ;;  %v16095_v12 = vld [vmem:[%s17160_s22 + $0x1a20] ss:$28 sps:$4 sm:$0xff]   ;;  %v16096_v15 = vld [vmem:[%s17160_s22 + $0x1dd8] ss:$28 sps:$4 sm:$0xff]  }
 0x583   : > { %14042 = vmatprep.subr.bf16.mxu1 %v16054_v10  ;;  %v16098_v10 = vld [vmem:[%s17160_s22 + $0x2158] ss:$28 sps:$4 sm:$0xff]  }
 0x585   : > { %14021 = vmatpush3.bf16.msra.mxu0 %v16053_v11  ;;  %v16097_v11 = vld [vmem:[%s17160_s22 + $0x1c18] ss:$28 sps:$4 sm:$0xff]  }
 0x586   : > { %14043 = vmatpush3.bf16.msra.mxu1 %v16055_v38  ;;  %14022 = vmatprep.subr.bf16.mxu0 %v16056_v39  ;;  %v16099_v38 = vld [vmem:[%s17160_s22 + $0x1f98] ss:$28 sps:$4 sm:$0xff]   ;;  %v16100_v39 = vld [vmem:[%s17160_s22 + $0x1e10] ss:$28 sps:$4 sm:$0xff]  }
 0x587   : > { %14044 = vmatprep.subr.bf16.mxu1 %v16058_v19  ;;  %v16102_v19 = vld [vmem:[%s17160_s22 + $0x2190] ss:$28 sps:$4 sm:$0xff]  }
 0x589   : > { %14023 = vmatpush3.bf16.msra.mxu0 %v16057_v13  ;;  %v16101_v13 = vld [vmem:[%s17160_s22 + $0x1c50] ss:$28 sps:$4 sm:$0xff]  }
 0x58a   : > { %14045 = vmatpush3.bf16.msra.mxu1 %v16059_v14  ;;  %14024 = vmatprep.subr.bf16.mxu0 %v16060_v16  ;;  %v16103_v14 = vld [vmem:[%s17160_s22 + $0x1fd0] ss:$28 sps:$4 sm:$0xff]   ;;  %v16104_v16 = vld [vmem:[%s17160_s22 + $0x1e48] ss:$28 sps:$4 sm:$0xff]  }
 0x58b   : > { %14046 = vmatprep.subr.bf16.mxu1 %v16062_v22  ;;  %v16106_v22 = vld [vmem:[%s17160_s22 + $0x21c8] ss:$28 sps:$4 sm:$0xff]  }
 0x58d   : > { %14025 = vmatpush3.bf16.msra.mxu0 %v16061_v17  ;;  %v16108_v17 = vld [vmem:[%s17160_s22 + $0x1e80] ss:$28 sps:$4 sm:$0xff]  }
 0x58e   : > { %14047 = vmatpush3.bf16.msra.mxu1 %v16063_v23  ;;  %14054 = vmatprep.subr.bf16.mxu0 %v16064_v30  ;;  %v16110_v23 = vld [vmem:[%s17160_s22 + $0x2200] ss:$28 sps:$4 sm:$0xff]  }
 0x58f   : > { %14076 = vmatprep.subr.bf16.mxu1 %v16066_v8  ;;  %v16109_v30 = vld [vmem:[%s17160_s22 + $0x1cc0] ss:$28 sps:$4 sm:$0xff]   ;;  %v16114_v8 = vld [vmem:[%s17160_s22 + $0x2238] ss:$28 sps:$4 sm:$0xff]  }
 0x590   : > { %9849 = vmatmul.mubr.bf16.vlgmr.msra.gmra.mrb[72].mxu0 %v17449_v40  ;;  %v16073_v40 = vld [vmem:[%s17160_s22 + $0x1588] ss:$28 sps:$4 sm:$0xff]  }
 0x591   : > { %9889 = vmatmul.mubr.bf16.vlgmr.msra.gmra.mrb[76].mxu1 %v17453_v41  ;;  %14055 = vmatpush3.bf16.msra.mxu0 %v16065_v20  ;;  %v16075_v41 = vld [vmem:[%s17160_s22 + $0x1908] ss:$28 sps:$4 sm:$0xff]   ;;  %v16113_v20 = vld [vmem:[%s17160_s22 + $0x1cf8] ss:$28 sps:$4 sm:$0xff]  }
 0x592   : > { %14077 = vmatpush3.bf16.msra.mxu1 %v16067_v29  ;;  %14056 = vmatprep.subr.bf16.mxu0 %v16068_v32  ;;  %v16115_v29 = vld [vmem:[%s17160_s22 + $0x2078] ss:$28 sps:$4 sm:$0xff]   ;;  %v16116_v32 = vld [vmem:[%s17160_s22 + $0x1ef0] ss:$28 sps:$4 sm:$0xff]  }
 0x593   : > { %14078 = vmatprep.subr.bf16.mxu1 %v16070_v49  ;;  %9928 = vmatprep.mubr.bf16.mxu0 %v17465_v24  ;;  %v16079_v24 = vld [vmem:[%s17160_s22 + $0x1940] ss:$28 sps:$4 sm:$0xff]   ;;  %v16118_v49 = vld [vmem:[%s17160_s22 + $0x2270] ss:$28 sps:$4 sm:$0xff]  }
 0x594   : > { %9968 = vmatprep.mubr.bf16.mxu1 %v17469_v25  ;;  %v16080_v25 = vld [vmem:[%s17160_s22 + $0x17b8] ss:$28 sps:$4 sm:$0xff]  }
 0x595   : > { %14057 = vmatpush3.bf16.msra.mxu0 %v16069_v53  ;;  %v16117_v53 = vld [vmem:[%s17160_s22 + $0x1d30] ss:$28 sps:$4 sm:$0xff]  }
 0x596   : > { %14079 = vmatpush3.bf16.msra.mxu1 %v16071_v33  ;;  %14058 = vmatprep.subr.bf16.mxu0 %v16072_v28  ;;  %v16119_v33 = vld [vmem:[%s17160_s22 + $0x20b0] ss:$28 sps:$4 sm:$0xff]   ;;  %v16120_v28 = vld [vmem:[%s17160_s22 + $0x1f28] ss:$28 sps:$4 sm:$0xff]  }
 0x597   : > { %14080 = vmatprep.subr.bf16.mxu1 %v16074_v45  ;;  %v16122_v45 = vld [vmem:[%s17160_s22 + $0x22a8] ss:$28 sps:$4 sm:$0xff]  }
 0x599   : > { %14059 = vmatpush3.bf16.msra.mxu0 %v16073_v40  ;;  %v16121_v40 = vld [vmem:[%s17160_s22 + $0x1d68] ss:$28 sps:$4 sm:$0xff]  }
 0x59a   : > { %14081 = vmatpush3.bf16.msra.mxu1 %v16075_v41  ;;  %14060 = vmatprep.subr.bf16.mxu0 %v16076_v37  ;;  %v16123_v41 = vld [vmem:[%s17160_s22 + $0x20e8] ss:$28 sps:$4 sm:$0xff]   ;;  %v16124_v37 = vld [vmem:[%s17160_s22 + $0x1f60] ss:$28 sps:$4 sm:$0xff]  }
 0x59b   : > { %14082 = vmatprep.subr.bf16.mxu1 %v16078_v31  ;;  %v16126_v31 = vld [vmem:[%s17160_s22 + $0x22e0] ss:$28 sps:$4 sm:$0xff]  }
 0x59d   : > { %14061 = vmatpush3.bf16.msra.mxu0 %v16077_v47  ;;  %v16125_v47 = vld [vmem:[%s17160_s22 + $0x1da0] ss:$28 sps:$4 sm:$0xff]  }
 0x59e   : > { %14083 = vmatpush3.bf16.msra.mxu1 %v16079_v24  ;;  %14062 = vmatprep.subr.bf16.mxu0 %v16080_v25  ;;  %v16127_v24 = vld [vmem:[%s17160_s22 + $0x2120] ss:$28 sps:$4 sm:$0xff]   ;;  %v16128_v25 = vld [vmem:[%s17160_s22 + $0x24d8] ss:$28 sps:$4 sm:$0xff]  }
 0x59f   : > { %14084 = vmatprep.subr.bf16.mxu1 %v16082_v1  ;;  %v16129_v1 = vld [vmem:[%s17160_s22 + $0x2318] ss:$28 sps:$4 sm:$0xff]  }
 0x5a1   : > { %14063 = vmatpush3.bf16.msra.mxu0 %v16081_v35  ;;  %v16130_v35 = vld [vmem:[%s17160_s22 + $0x2510] ss:$28 sps:$4 sm:$0xff]  }
 0x5a2   : > { %14085 = vmatpush3.bf16.msra.mxu1 %v16083_v5  ;;  %14064 = vmatprep.subr.bf16.mxu0 %v16084_v44  ;;  %v16131_v5 = vld [vmem:[%s17160_s22 + $0x2350] ss:$28 sps:$4 sm:$0xff]   ;;  %v16132_v44 = vld [vmem:[%s17160_s22 + $0x2548] ss:$28 sps:$4 sm:$0xff]  }
 0x5a3   : > { %14086 = vmatprep.subr.bf16.mxu1 %v16086_v46  ;;  %v9485_v2 = vpop.f32.mrb[56].mxu0  ;;  %v16133_v46 = vld [vmem:[%s17160_s22 + $0x2388] ss:$28 sps:$4 sm:$0xff]  }
 0x5a4   : > { %v9526_v56 = vpop.f32.mrb[56].mxu1  ;;  %v9486_v59 = vadd.f32 %v9485_v2, %v18564_v36  ;;  %v9487_v63 = vpop.f32.mrb[57].mxu0  ;;  %v16092_v36 = vld [vmem:[%s17160_s22 + $0x1860] ss:$28 sps:$4 sm:$0xff]  }
 0x5a5   : > { %v9528_v0 = vpop.f32.mrb[57].mxu1  ;;  %v9488_v3 = vadd.f32 %v9487_v63, %v18568_v60  ;;  %v9489_v18 = vpop.f32.mrb[58].mxu0  ;;  %14065 = vmatpush3.bf16.msra.mxu0 %v16085_v48  ;;  %v16134_v48 = vld [vmem:[%s17160_s22 + $0x2580] ss:$28 sps:$4 sm:$0xff]  }
 0x5a6   : > { %14087 = vmatpush3.bf16.msra.mxu1 %v16087_v57  ;;  %v9530_v4 = vpop.f32.mrb[58].mxu1  ;;  %v18642_v6 = vadd.f32 %v9526_v56, %v9486_v59  ;;  %v9490_v26 = vpop.f32.mrb[59].mxu0  ;;  %14066 = vmatprep.subr.bf16.mxu0 %v16088_v52  ;;  %v16135_v57 = vld [vmem:[%s17160_s22 + $0x23c0] ss:$28 sps:$4 sm:$0xff]   ;;  %v16138_v52 = vld [vmem:[%s17160_s22 + $0x25f0] ss:$28 sps:$4 sm:$0xff]  }
 0x5a7   : > { %14088 = vmatprep.subr.bf16.mxu1 %v16090_v54  ;;  %v9531_v60 = vpop.f32.mrb[59].mxu1  ;;  %v18646_v7 = vadd.f32 %v9528_v0, %v9488_v3  ;;  %v16139_v54 = vld [vmem:[%s17160_s22 + $0x2430] ss:$28 sps:$4 sm:$0xff]  }
 0x5a9   : > { %14067 = vmatpush3.bf16.msra.mxu0 %v16089_v21  ;;  %v16141_v21 = vld [vmem:[%s17160_s22 + $0x2468] ss:$28 sps:$4 sm:$0xff]  }
 0x5aa   : > { %14089 = vmatpush3.bf16.msra.mxu1 %v16091_v58  ;;  %14068 = vmatprep.subr.bf16.mxu0 %v16092_v36  ;;  %v16142_v36 = vld [vmem:[%s17160_s22 + $0x2660] ss:$28 sps:$4 sm:$0xff]  }
 0x5ab   : > { %14090 = vmatprep.subr.bf16.mxu1 %v16094_v27 }
 0x5ad   : > { %14069 = vmatpush3.bf16.msra.mxu0 %v16093_v9  ;;  %v16143_v9 = vld [vmem:[%s17160_s22 + $0x24a0] ss:$28 sps:$4 sm:$0xff]  }
 0x5ae   : > { %14091 = vmatpush3.bf16.msra.mxu1 %v16095_v12  ;;  %14098 = vmatprep.subr.bf16.mxu0 %v16096_v15 }
 0x5af   : > { %14120 = vmatprep.subr.bf16.mxu1 %v16098_v10 }
 0x5b0   : > { %9929 = vmatmul.mubr.bf16.vlgmr.msra.gmra.mrb[76].mxu0 %v17540_v61  ;;  %v16105_v61 = vld [vmem:[%s17160_s22 + $0x1c88] ss:$28 sps:$4 sm:$0xff]  }
 0x5b1   : > { %9969 = vmatmul.mubr.bf16.vlgmr.msra.gmra.mrb[80].mxu1 %v17544_v62  ;;  %14099 = vmatpush3.bf16.msra.mxu0 %v16097_v11  ;;  %v16107_v62 = vld [vmem:[%s17160_s22 + $0x2008] ss:$28 sps:$4 sm:$0xff]  }
 0x5b2   : > { %14121 = vmatpush3.bf16.msra.mxu1 %v16099_v38  ;;  %14100 = vmatprep.subr.bf16.mxu0 %v16100_v39  ;;  %v468_v11 = vld [vmem:[#allocation2 + $0x20] sm:$0xff] }
 0x5b3   : > { %14122 = vmatprep.subr.bf16.mxu1 %v16102_v19  ;;  %10008 = vmatprep.mubr.bf16.mxu0 %v17555_v42  ;;  %v16111_v42 = vld [vmem:[%s17160_s22 + $0x2040] ss:$28 sps:$4 sm:$0xff]  }
 0x5b4   : > { %10048 = vmatprep.mubr.bf16.mxu1 %v17559_v43  ;;  %v16112_v43 = vld [vmem:[%s17160_s22 + $0x1eb8] ss:$28 sps:$4 sm:$0xff]  }
 0x5b5   : > { %14101 = vmatpush3.bf16.msra.mxu0 %v16101_v13  ;;  %v469_v13 = vld [vmem:[#allocation2 + $0x28] sm:$0xff] }
 0x5b6   : > { %14123 = vmatpush3.bf16.msra.mxu1 %v16103_v14  ;;  %14102 = vmatprep.subr.bf16.mxu0 %v16104_v16 }
 0x5b7   : > { %14124 = vmatprep.subr.bf16.mxu1 %v16106_v22 }
 0x5b9   : > { %14103 = vmatpush3.bf16.msra.mxu0 %v16105_v61 }
 0x5ba   : > { %14125 = vmatpush3.bf16.msra.mxu1 %v16107_v62  ;;  %14104 = vmatprep.subr.bf16.mxu0 %v16108_v17 }
 0x5bb   : > { %14126 = vmatprep.subr.bf16.mxu1 %v16110_v23 }
 0x5bd   : > { %14105 = vmatpush3.bf16.msra.mxu0 %v16109_v30 }
 0x5be   : > { %14127 = vmatpush3.bf16.msra.mxu1 %v16111_v42  ;;  %14106 = vmatprep.subr.bf16.mxu0 %v16112_v43 }
 0x5bf   : > { %14128 = vmatprep.subr.bf16.mxu1 %v16114_v8 }
 0x5c1   : > { %14107 = vmatpush3.bf16.msra.mxu0 %v16113_v20 }
 0x5c2   : > { %14129 = vmatpush3.bf16.msra.mxu1 %v16115_v29  ;;  %14108 = vmatprep.subr.bf16.mxu0 %v16116_v32 }
 0x5c3   : > { %14130 = vmatprep.subr.bf16.mxu1 %v16118_v49 }
 0x5c5   : > { %14109 = vmatpush3.bf16.msra.mxu0 %v16117_v53 }
 0x5c6   : > { %14131 = vmatpush3.bf16.msra.mxu1 %v16119_v33  ;;  %14110 = vmatprep.subr.bf16.mxu0 %v16120_v28 }
 0x5c7   : > { %14132 = vmatprep.subr.bf16.mxu1 %v16122_v45 }
 0x5c9   : > { %14111 = vmatpush3.bf16.msra.mxu0 %v16121_v40 }
 0x5ca   : > { %14133 = vmatpush3.bf16.msra.mxu1 %v16123_v41  ;;  %14112 = vmatprep.subr.bf16.mxu0 %v16124_v37 }
 0x5cb   : > { %14134 = vmatprep.subr.bf16.mxu1 %v16126_v31 }
 0x5cd   : > { %14113 = vmatpush3.bf16.msra.mxu0 %v16125_v47 }
 0x5ce   : > { %14135 = vmatpush3.bf16.msra.mxu1 %v16127_v24  ;;  %14142 = vmatprep.subr.bf16.mxu0 %v16128_v25 }
 0x5d0   : > { %10009 = vmatmul.mubr.bf16.vlgmr.msra.gmra.mrb[80].mxu0 %v17636_v50  ;;  %v16136_v50 = vld [vmem:[%s17160_s22 + $0x25b8] ss:$28 sps:$4 sm:$0xff]  }
 0x5d1   : > { %10049 = vmatmul.mubr.bf16.vlgmr.msra.gmra.mrb[84].mxu1 %v17640_v51  ;;  %14143 = vmatpush3.bf16.msra.mxu0 %v16129_v1  ;;  %v16137_v51 = vld [vmem:[%s17160_s22 + $0x23f8] ss:$28 sps:$4 sm:$0xff]  }
 0x5d2   : > { %10088 = vmatprep.mubr.bf16.mxu0 %v17646_v55  ;;  %14144 = vmatprep.subr.bf16.mxu0 %v16130_v35  ;;  %v16140_v55 = vld [vmem:[%s17160_s22 + $0x2628] ss:$28 sps:$4 sm:$0xff]  }
 0x5d5   : > { %14145 = vmatpush3.bf16.msra.mxu0 %v16131_v5 }
 0x5d6   : > { %14146 = vmatprep.subr.bf16.mxu0 %v16132_v44 }
 0x5d9   : > { %14147 = vmatpush3.bf16.msra.mxu0 %v16133_v46 }
 0x5da   : > { %14148 = vmatprep.subr.bf16.mxu0 %v16134_v48 }
 0x5dd   : > { %14149 = vmatpush3.bf16.msra.mxu0 %v16135_v57 }
 0x5de   : > { %14150 = vmatprep.subr.bf16.mxu0 %v16136_v50 }
 0x5e1   : > { %14151 = vmatpush3.bf16.msra.mxu0 %v16137_v51 }
 0x5e2   : > { %14152 = vmatprep.subr.bf16.mxu0 %v16138_v52 }
 0x5e3   : > { %v9567_v2 = vpop.f32.mrb[60].mxu0 }
 0x5e4   : > { %v9608_v56 = vpop.f32.mrb[60].mxu1  ;;  %v9568_v59 = vadd.f32 %v9567_v2, %v18642_v6  ;;  %v9569_v63 = vpop.f32.mrb[61].mxu0 }
 0x5e5   : > { %v9610_v0 = vpop.f32.mrb[61].mxu1  ;;  %v9570_v3 = vadd.f32 %v9569_v63, %v18646_v7  ;;  %v9571_v18 = vpop.f32.mrb[62].mxu0  ;;  %14153 = vmatpush3.bf16.msra.mxu0 %v16139_v54 }
 0x5e6   : > { %v9612_v58 = vpop.f32.mrb[62].mxu1  ;;  %v9609_v4 = vadd.f32 %v9608_v56, %v9568_v59  ;;  %v9572_v26 = vpop.f32.mrb[63].mxu0  ;;  %14154 = vmatprep.subr.bf16.mxu0 %v16140_v55 }
 0x5e7   : > { %v9613_v27 = vpop.f32.mrb[63].mxu1  ;;  %v9611_v60 = vadd.f32 %v9610_v0, %v9570_v3 }
 0x5e9   : > { %14155 = vmatpush3.bf16.msra.mxu0 %v16141_v21 }
 0x5ea   : > { %14156 = vmatprep.subr.bf16.mxu0 %v16142_v36 }
 0x5ed   : > { %14157 = vmatpush3.bf16.msra.mxu0 %v16143_v9 }
 0x5f0   : > { %10089 = vmatmul.mubr.bf16.vlgmr.msra.gmra.mrb[84].mxu0 %v17722_v34 }
 0x604   : > { %v13938_v6 = vpop.f32.mrb[64].mxu1 }
 0x605   : > { %v13939_v12 = vpop.f32.mrb[65].mxu1 }
 0x606   : > { %v13940_v15 = vadd.f32 %v13939_v12, %v13938_v6  ;;  %v13941_v7 = vpop.f32.mrb[66].mxu1 }
 0x607   : > { %v13942_v10 = vpop.f32.mrb[67].mxu1 }
 0x623   : > { %v9649_v38 = vpop.f32.mrb[64].mxu0 }
 0x624   : > { %v13960_v39 = vpop.f32.mrb[68].mxu1  ;;  %v9650_v19 = vadd.f32 %v9649_v38, %v9609_v4  ;;  %v9651_v14 = vpop.f32.mrb[65].mxu0 }
 0x625   : > { %v13961_v16 = vpop.f32.mrb[69].mxu1  ;;  %v9652_v22 = vadd.f32 %v9651_v14, %v9611_v60  ;;  %v9653_v62 = vpop.f32.mrb[66].mxu0 }
 0x626   : > { %v13962_v61 = vadd.f32 %v13961_v16, %v13960_v39  ;;  %v13963_v17 = vpop.f32.mrb[70].mxu1  ;;  %v10100_v23 = vadd.f32 %v9650_v19, %v468_v11  ;;  %v9654_v30 = vpop.f32.mrb[67].mxu0  ;;  %v16146_v62 = vld [vmem:[%s17176_s14 + $0x204] ss:$16 sps:$4 sm:$0xff] (!%p13658_p3)  }
 0x627   : > { %v13964_v42 = vpop.f32.mrb[71].mxu1  ;;  %v10101_v34 = vadd.f32 %v9652_v22, %v469_v13  ;;  %v470_v13 = vld [vmem:[#allocation2 + $0x30] sm:$0xff]  ;;  %11568 = vmatprep.subr.bf16.mxu1 (!%p13658_p3), %v16146_v62  ;;  %v16150_v30 = vld [vmem:[%s17176_s14 + $0x24] ss:$16 sps:$4 sm:$0xff] (!%p13658_p3)  }
 0x628   : > { %v9731_v43 = vadd.f32 %v13962_v61, %v13940_v15  ;;  %10107 = vst [vmem:[#allocation2 + $0x20] sm:$0xff] %v10100_v23  ;;  %v16144_v61 = vld [vmem:[%s17176_s14 + $0x4] ss:$16 sps:$4 sm:$0xff] (!%p13658_p3)   ;;  %v16148_v17 = vld [vmem:[%s17176_s14] ss:$16 sps:$4 sm:$0xff] (!%p13658_p3)  }
 0x629   : > { %10108 = vst [vmem:[#allocation2 + $0x28] sm:$0xff] %v10101_v34  ;;  %11527 = vmatprep.subr.bf16.mxu0 (!%p13658_p3), %v16144_v61  ;;  %v16149_v23 = vld [vmem:[%s17176_s14 + $0x200] ss:$16 sps:$4 sm:$0xff] (!%p13658_p3)   ;;  %v16152_v42 = vld [vmem:[%s17176_s14 + $0x224] ss:$16 sps:$4 sm:$0xff] (!%p13658_p3)  }
 0x62a   : > { %11528 = vmatpush1.bf16.msra.mxu0 (!%p13658_p3), %v16148_v17  ;;  %11569 = vmatpush1.bf16.msra.mxu1 (!%p13658_p3), %v16149_v23  ;;  %v16154_v34 = vld [vmem:[%s17176_s14 + $0x20] ss:$16 sps:$4 sm:$0xff] (!%p13658_p3)  }
 0x62b   : > { %11529 = vmatprep.subr.bf16.mxu0 (!%p13658_p3), %v16150_v30  ;;  %11570 = vmatprep.subr.bf16.mxu1 (!%p13658_p3), %v16152_v42  ;;  %v16221_v17 = vld [vmem:[%s17176_s14 + $0x380] ss:$16 sps:$4 sm:$0xff] (!%p13658_p3)   ;;  %v16222_v42 = vld [vmem:[%s17176_s14 + $0x1a4] ss:$16 sps:$4 sm:$0xff] (!%p13658_p3)  }
 0x62e   : > { %11530 = vmatpush1.bf16.msra.mxu0 (!%p13658_p3), %v16154_v34  ;;  %v16224_v34 = vld [vmem:[%s17176_s14 + $0x3a4] ss:$16 sps:$4 sm:$0xff] (!%p13658_p3)  }
 0x643   : > { %v13982_v8 = vpop.f32.mrb[68].mxu0 }
 0x644   : > { %v14004_v20 = vpop.f32.mrb[72].mxu1  ;;  %v13983_v29 = vpop.f32.mrb[69].mxu0 }
 0x645   : > { %v14005_v32 = vpop.f32.mrb[73].mxu1  ;;  %v13984_v49 = vadd.f32 %v13983_v29, %v13982_v8  ;;  %v13985_v53 = vpop.f32.mrb[70].mxu0  ;;  %v16156_v8 = vld [vmem:[%s17176_s14 + $0x44] ss:$16 sps:$4 sm:$0xff] (!%p13658_p3)   ;;  %v16160_v29 = vld [vmem:[%s17176_s14 + $0x40] ss:$16 sps:$4 sm:$0xff] (!%p13658_p3)  }
 0x646   : > { %v14006_v33 = vadd.f32 %v14005_v32, %v14004_v20  ;;  %v14007_v28 = vpop.f32.mrb[74].mxu1  ;;  %v13986_v45 = vpop.f32.mrb[71].mxu0  ;;  %v16158_v20 = vld [vmem:[%s17176_s14 + $0x244] ss:$16 sps:$4 sm:$0xff] (!%p13658_p3)   ;;  %v16161_v32 = vld [vmem:[%s17176_s14 + $0x240] ss:$16 sps:$4 sm:$0xff] (!%p13658_p3)   ;;  %11531 = vmatprep.subr.bf16.mxu0 (!%p13658_p3), %v16156_v8 }
 0x647   : > { %v14008_v40 = vpop.f32.mrb[75].mxu1  ;;  %v9771_v41 = vadd.f32 %v13984_v49, %v9731_v43  ;;  %v16155_v43 = vld [vmem:[%s17176_s14 + $0x220] ss:$16 sps:$4 sm:$0xff] (!%p13658_p3)   ;;  %v16162_v49 = vld [vmem:[%s17176_s14 + $0x64] ss:$16 sps:$4 sm:$0xff] (!%p13658_p3)   ;;  %11532 = vmatpush1.bf16.msra.mxu0 (!%p13658_p3), %v16160_v29 }
 0x648   : > { %11571 = vmatpush1.bf16.msra.mxu1 (!%p13658_p3), %v16155_v43  ;;  %v16164_v53 = vld [vmem:[%s17176_s14 + $0x264] ss:$16 sps:$4 sm:$0xff] (!%p13658_p3)   ;;  %v16167_v28 = vld [vmem:[%s17176_s14 + $0x260] ss:$16 sps:$4 sm:$0xff] (!%p13658_p3)   ;;  %11533 = vmatprep.subr.bf16.mxu0 (!%p13658_p3), %v16162_v49 }
 0x649   : > { %v9811_v37 = vadd.f32 %v14006_v33, %v9771_v41  ;;  %11572 = vmatprep.subr.bf16.mxu1 (!%p13658_p3), %v16158_v20  ;;  %v16166_v33 = vld [vmem:[%s17176_s14 + $0x60] ss:$16 sps:$4 sm:$0xff] (!%p13658_p3)   ;;  %v16168_v45 = vld [vmem:[%s17176_s14 + $0x84] ss:$16 sps:$4 sm:$0xff] (!%p13658_p3)  }
 0x64a   : > { %v16170_v40 = vld [vmem:[%s17176_s14 + $0x284] ss:$16 sps:$4 sm:$0xff] (!%p13658_p3)   ;;  %v16172_v41 = vld [vmem:[%s17176_s14 + $0x80] ss:$16 sps:$4 sm:$0xff] (!%p13658_p3)  }
 0x64b   : > { %11534 = vmatpush1.bf16.msra.mxu0 (!%p13658_p3), %v16166_v33  ;;  %v16226_v43 = vld [vmem:[%s17176_s14 + $0x1a0] ss:$16 sps:$4 sm:$0xff] (!%p13658_p3)  }
 0x64c   : > { %11573 = vmatpush1.bf16.msra.mxu1 (!%p13658_p3), %v16161_v32  ;;  %11535 = vmatprep.subr.bf16.mxu0 (!%p13658_p3), %v16168_v45  ;;  %v16227_v29 = vld [vmem:[%s17176_s14 + $0x3a0] ss:$16 sps:$4 sm:$0xff] (!%p13658_p3)   ;;  %v16230_v45 = vld [vmem:[%s17176_s14 + $0x3c4] ss:$16 sps:$4 sm:$0xff] (!%p13658_p3)  }
 0x64d   : > { %11574 = vmatprep.subr.bf16.mxu1 (!%p13658_p3), %v16164_v53  ;;  %v10114_v53 = vld [vmem:[#allocation2] sm:$0xff] (!%p13658_p3)  ;;  %v10116_v33 = vld [vmem:[#allocation2 + $0x10] sm:$0xff] (!%p13658_p3) }
 0x64f   : > { %11536 = vmatpush1.bf16.msra.mxu0 (!%p13658_p3), %v16172_v41 }
 0x650   : > { %11575 = vmatpush1.bf16.msra.mxu1 (!%p13658_p3), %v16167_v28  ;;  %v16228_v28 = vld [vmem:[%s17176_s14 + $0x1c4] ss:$16 sps:$4 sm:$0xff] (!%p13658_p3)  }
 0x651   : > { %11576 = vmatprep.subr.bf16.mxu1 (!%p13658_p3), %v16170_v40 }
 0x663   : > { %v14026_v31 = vpop.f32.mrb[72].mxu0 }
 0x664   : > { %v14048_v47 = vpop.f32.mrb[76].mxu1  ;;  %v14027_v24 = vpop.f32.mrb[73].mxu0 }
 0x665   : > { %v14049_v25 = vpop.f32.mrb[77].mxu1  ;;  %v14028_v1 = vadd.f32 %v14027_v24, %v14026_v31  ;;  %v14029_v35 = vpop.f32.mrb[74].mxu0  ;;  %v16174_v31 = vld [vmem:[%s17176_s14 + $0xa4] ss:$16 sps:$4 sm:$0xff] (!%p13658_p3)   ;;  %v16178_v24 = vld [vmem:[%s17176_s14 + $0xa0] ss:$16 sps:$4 sm:$0xff] (!%p13658_p3)  }
 0x666   : > { %v14050_v5 = vadd.f32 %v14049_v25, %v14048_v47  ;;  %v14051_v44 = vpop.f32.mrb[78].mxu1  ;;  %v14030_v46 = vpop.f32.mrb[75].mxu0  ;;  %v16176_v47 = vld [vmem:[%s17176_s14 + $0x2a4] ss:$16 sps:$4 sm:$0xff] (!%p13658_p3)   ;;  %v16179_v25 = vld [vmem:[%s17176_s14 + $0x2a0] ss:$16 sps:$4 sm:$0xff] (!%p13658_p3)   ;;  %11537 = vmatprep.subr.bf16.mxu0 (!%p13658_p3), %v16174_v31 }
 0x667   : > { %v14052_v48 = vpop.f32.mrb[79].mxu1  ;;  %v9851_v57 = vadd.f32 %v14028_v1, %v9811_v37  ;;  %v16173_v37 = vld [vmem:[%s17176_s14 + $0x280] ss:$16 sps:$4 sm:$0xff] (!%p13658_p3)   ;;  %v16180_v1 = vld [vmem:[%s17176_s14 + $0xc4] ss:$16 sps:$4 sm:$0xff] (!%p13658_p3)   ;;  %11538 = vmatpush1.bf16.msra.mxu0 (!%p13658_p3), %v16178_v24 }
 0x668   : > { %11577 = vmatpush1.bf16.msra.mxu1 (!%p13658_p3), %v16173_v37  ;;  %v16182_v35 = vld [vmem:[%s17176_s14 + $0x2c4] ss:$16 sps:$4 sm:$0xff] (!%p13658_p3)   ;;  %v16185_v44 = vld [vmem:[%s17176_s14 + $0x2c0] ss:$16 sps:$4 sm:$0xff] (!%p13658_p3)   ;;  %11539 = vmatprep.subr.bf16.mxu0 (!%p13658_p3), %v16180_v1 }
 0x669   : > { %v9891_v50 = vadd.f32 %v14050_v5, %v9851_v57  ;;  %11578 = vmatprep.subr.bf16.mxu1 (!%p13658_p3), %v16176_v47  ;;  %v16184_v5 = vld [vmem:[%s17176_s14 + $0xc0] ss:$16 sps:$4 sm:$0xff] (!%p13658_p3)   ;;  %v16186_v46 = vld [vmem:[%s17176_s14 + $0xe4] ss:$16 sps:$4 sm:$0xff] (!%p13658_p3)  }
 0x66a   : > { %v16188_v48 = vld [vmem:[%s17176_s14 + $0x2e4] ss:$16 sps:$4 sm:$0xff] (!%p13658_p3)   ;;  %v16190_v57 = vld [vmem:[%s17176_s14 + $0xe0] ss:$16 sps:$4 sm:$0xff] (!%p13658_p3)  }
 0x66b   : > { %11540 = vmatpush1.bf16.msra.mxu0 (!%p13658_p3), %v16184_v5  ;;  %v16232_v37 = vld [vmem:[%s17176_s14 + $0x1c0] ss:$16 sps:$4 sm:$0xff] (!%p13658_p3)   ;;  %v16234_v47 = vld [vmem:[%s17176_s14 + $0x1e4] ss:$16 sps:$4 sm:$0xff] (!%p13658_p3)  }
 0x66c   : > { %11579 = vmatpush1.bf16.msra.mxu1 (!%p13658_p3), %v16179_v25  ;;  %11541 = vmatprep.subr.bf16.mxu0 (!%p13658_p3), %v16186_v46  ;;  %v16233_v31 = vld [vmem:[%s17176_s14 + $0x3c0] ss:$16 sps:$4 sm:$0xff] (!%p13658_p3)   ;;  %v16236_v24 = vld [vmem:[%s17176_s14 + $0x3e4] ss:$16 sps:$4 sm:$0xff] (!%p13658_p3)  }
 0x66d   : > { %11580 = vmatprep.subr.bf16.mxu1 (!%p13658_p3), %v16182_v35  ;;  %v16238_v35 = vld [vmem:[%s17176_s14 + $0x1e0] ss:$16 sps:$4 sm:$0xff] (!%p13658_p3)   ;;  %v16245_v46 = vld [vmem:[%s17176_s14 + $0x604] ss:$16 sps:$4 sm:$0xff] (!%p13658_p3)  }
 0x66e   : > { %v16239_v5 = vld [vmem:[%s17176_s14 + $0x3e0] ss:$16 sps:$4 sm:$0xff] (!%p13658_p3)  }
 0x66f   : > { %11542 = vmatpush1.bf16.msra.mxu0 (!%p13658_p3), %v16190_v57 }
 0x670   : > { %11581 = vmatpush1.bf16.msra.mxu1 (!%p13658_p3), %v16185_v44  ;;  %v16242_v44 = vld [vmem:[%s17176_s14 + $0x404] ss:$16 sps:$4 sm:$0xff] (!%p13658_p3)  }
 0x671   : > { %11582 = vmatprep.subr.bf16.mxu1 (!%p13658_p3), %v16188_v48 }
 0x683   : > { %v14070_v51 = vpop.f32.mrb[76].mxu0 }
 0x684   : > { %v14092_v52 = vpop.f32.mrb[80].mxu1  ;;  %v14071_v54 = vpop.f32.mrb[77].mxu0 }
 0x685   : > { %v14093_v55 = vpop.f32.mrb[81].mxu1  ;;  %v14072_v2 = vadd.f32 %v14071_v54, %v14070_v51  ;;  %v14073_v56 = vpop.f32.mrb[78].mxu0  ;;  %v16192_v51 = vld [vmem:[%s17176_s14 + $0x104] ss:$16 sps:$4 sm:$0xff] (!%p13658_p3)   ;;  %v16196_v54 = vld [vmem:[%s17176_s14 + $0x100] ss:$16 sps:$4 sm:$0xff] (!%p13658_p3)  }
 0x686   : > { %v14094_v59 = vadd.f32 %v14093_v55, %v14092_v52  ;;  %v14095_v63 = vpop.f32.mrb[82].mxu1  ;;  %v14074_v0 = vpop.f32.mrb[79].mxu0  ;;  %v16194_v52 = vld [vmem:[%s17176_s14 + $0x304] ss:$16 sps:$4 sm:$0xff] (!%p13658_p3)   ;;  %v16197_v55 = vld [vmem:[%s17176_s14 + $0x300] ss:$16 sps:$4 sm:$0xff] (!%p13658_p3)   ;;  %v10123_v56 = vlaneseq (!%p13658_p3)  ;;  %11543 = vmatprep.subr.bf16.mxu0 (!%p13658_p3), %v16192_v51 }
 0x687   : > { %v14096_v3 = vpop.f32.mrb[83].mxu1  ;;  %v9931_v18 = vadd.f32 %v14072_v2, %v9891_v50  ;;  %v16191_v50 = vld [vmem:[%s17176_s14 + $0x2e0] ss:$16 sps:$4 sm:$0xff] (!%p13658_p3)   ;;  %v16198_v2 = vld [vmem:[%s17176_s14 + $0x124] ss:$16 sps:$4 sm:$0xff] (!%p13658_p3)   ;;  %11544 = vmatpush1.bf16.msra.mxu0 (!%p13658_p3), %v16196_v54 }
 0x688   : > { %11583 = vmatpush1.bf16.msra.mxu1 (!%p13658_p3), %v16191_v50  ;;  %v16202_v63 = vld [vmem:[%s17176_s14 + $0x120] ss:$16 sps:$4 sm:$0xff] (!%p13658_p3)   ;;  %v16204_v3 = vld [vmem:[%s17176_s14 + $0x144] ss:$16 sps:$4 sm:$0xff] (!%p13658_p3)   ;;  %11545 = vmatprep.subr.bf16.mxu0 (!%p13658_p3), %v16198_v2 }
 0x689   : > { %v9971_v21 = vadd.f32 %v14094_v59, %v9931_v18  ;;  %11584 = vmatprep.subr.bf16.mxu1 (!%p13658_p3), %v16194_v52  ;;  %v16200_v59 = vld [vmem:[%s17176_s14 + $0x324] ss:$16 sps:$4 sm:$0xff] (!%p13658_p3)   ;;  %v16203_v0 = vld [vmem:[%s17176_s14 + $0x320] ss:$16 sps:$4 sm:$0xff] (!%p13658_p3)   ;;  %v18751_v18 = vshrl.u32 (!%p13658_p3), %v10123_v56, 7 }
 0x68a   : > { %v16240_v50 = vld [vmem:[%s17176_s14 + $0x400] ss:$16 sps:$4 sm:$0xff] (!%p13658_p3)   ;;  %v16248_v52 = vld [vmem:[%s17176_s14 + $0x424] ss:$16 sps:$4 sm:$0xff] (!%p13658_p3)  }
 0x68b   : > { %11546 = vmatpush1.bf16.msra.mxu0 (!%p13658_p3), %v16202_v63  ;;  %v10125_v61 = vsub.s32 (!%p13658_p3), 0, %v18751_v18  ;;  %v10133_v62 = vsub.s32 (!%p13658_p3), 2, %v18751_v18  ;;  %v16243_v51 = vld [vmem:[%s17176_s14 + $0x600] ss:$16 sps:$4 sm:$0xff] (!%p13658_p3)   ;;  %v16251_v54 = vld [vmem:[%s17176_s14 + $0x624] ss:$16 sps:$4 sm:$0xff] (!%p13658_p3)  }
 0x68c   : > { %11585 = vmatpush1.bf16.msra.mxu1 (!%p13658_p3), %v16197_v55  ;;  %11547 = vmatprep.subr.bf16.mxu0 (!%p13658_p3), %v16204_v3  ;;  %v16246_v55 = vld [vmem:[%s17176_s14 + $0x420] ss:$16 sps:$4 sm:$0xff] (!%p13658_p3)   ;;  %v16254_v56 = vld [vmem:[%s17176_s14 + $0x444] ss:$16 sps:$4 sm:$0xff] (!%p13658_p3)   ;;  %v16805_v63 = vmov (!%p13658_p3), 0  }
 0x68d   : > { %11586 = vmatprep.subr.bf16.mxu1 (!%p13658_p3), %v16200_v59  ;;  %v16249_v2 = vld [vmem:[%s17176_s14 + $0x620] ss:$16 sps:$4 sm:$0xff] (!%p13658_p3)   ;;  %v16257_v59 = vld [vmem:[%s17176_s14 + $0x644] ss:$16 sps:$4 sm:$0xff] (!%p13658_p3)  }
 0x68e   : > { %v16255_v3 = vld [vmem:[%s17176_s14 + $0x640] ss:$16 sps:$4 sm:$0xff] (!%p13658_p3)  }
 0x690   : > { %11587 = vmatpush1.bf16.msra.mxu1 (!%p13658_p3), %v16203_v0  ;;  %v16252_v0 = vld [vmem:[%s17176_s14 + $0x440] ss:$16 sps:$4 sm:$0xff] (!%p13658_p3)  }
 0x6a3   : > { %v14114_v58 = vpop.f32.mrb[80].mxu0 }
 0x6a4   : > { %v14136_v4 = vpop.f32.mrb[84].mxu1  ;;  %v14115_v26 = vpop.f32.mrb[81].mxu0 }
 0x6a5   : > { %v14137_v36 = vpop.f32.mrb[85].mxu1  ;;  %v14116_v27 = vadd.f32 %v14115_v26, %v14114_v58  ;;  %v14117_v60 = vpop.f32.mrb[82].mxu0  ;;  %v16208_v58 = vld [vmem:[%s17176_s14 + $0x140] ss:$16 sps:$4 sm:$0xff] (!%p13658_p3)   ;;  %v16210_v26 = vld [vmem:[%s17176_s14 + $0x164] ss:$16 sps:$4 sm:$0xff] (!%p13658_p3)  }
 0x6a6   : > { %v14138_v9 = vadd.f32 %v14137_v36, %v14136_v4  ;;  %v14139_v6 = vpop.f32.mrb[86].mxu1  ;;  %v14118_v12 = vpop.f32.mrb[83].mxu0  ;;  %v16209_v4 = vld [vmem:[%s17176_s14 + $0x340] ss:$16 sps:$4 sm:$0xff] (!%p13658_p3)   ;;  %v10129_v36 = vsub.s32 (!%p13658_p3), 1, %v18751_v18  ;;  %11548 = vmatpush1.bf16.msra.mxu0 (!%p13658_p3), %v16208_v58 }
 0x6a7   : > { %v14140_v15 = vpop.f32.mrb[87].mxu1  ;;  %v10011_v7 = vadd.f32 %v14116_v27, %v9971_v21  ;;  %v16206_v21 = vld [vmem:[%s17176_s14 + $0x344] ss:$16 sps:$4 sm:$0xff] (!%p13658_p3)   ;;  %v10137_v27 = vsub.s32 (!%p13658_p3), 3, %v18751_v18  ;;  %v10141_v6 = vsub.s32 (!%p13658_p3), 4, %v18751_v18  ;;  %11549 = vmatprep.subr.bf16.mxu0 (!%p13658_p3), %v16210_v26 }
 0x6a8   : > { %11588 = vmatprep.subr.bf16.mxu1 (!%p13658_p3), %v16206_v21  ;;  %v16212_v60 = vld [vmem:[%s17176_s14 + $0x364] ss:$16 sps:$4 sm:$0xff] (!%p13658_p3)   ;;  %v16261_v26 = vld [vmem:[%s17176_s14 + $0x660] ss:$16 sps:$4 sm:$0xff] (!%p13658_p3)  }
 0x6a9   : > { %v10051_v10 = vadd.f32 %v14138_v9, %v10011_v7  ;;  %v16214_v9 = vld [vmem:[%s17176_s14 + $0x160] ss:$16 sps:$4 sm:$0xff] (!%p13658_p3)   ;;  %11589 = vmatpush1.bf16.msra.mxu1 (!%p13658_p3), %v16209_v4  ;;  %v16260_v21 = vld [vmem:[%s17176_s14 + $0x464] ss:$16 sps:$4 sm:$0xff] (!%p13658_p3)  }
 0x6aa   : > { %v10115_v12 = vld [vmem:[#allocation2 + $0x8] sm:$0xff] (!%p13658_p3)  ;;  %v18764_v15 = vld [vmem:[%s371_s11] sm:$0xff] (!%p13658_p3)  ;;  %11590 = vmatprep.subr.bf16.mxu1 (!%p13658_p3), %v16212_v60  ;;  %11550 = vmatpush1.bf16.msra.mxu0 (!%p13658_p3), %v16214_v9  ;;  %v10149_v9 = vsub.s32 (!%p13658_p3), 6, %v18751_v18 }
 0x6ab   : > { %v10117_v7 = vld [vmem:[#allocation2 + $0x18] sm:$0xff] (!%p13658_p3)  ;;  %v10126_v32 = vrot.slane (!%p13658_p3), %v18764_v15, %v10125_v61  ;;  %v10134_v49 = vrot.slane (!%p13658_p3), %v18764_v15, %v10133_v62  ;;  %v10119_v62 = vld [vmem:[#allocation2 + $0x28] sm:$0xff] (!%p13658_p3) }
 0x6ac   : > { %v16263_v58 = vld [vmem:[%s17176_s14 + $0x664] ss:$16 sps:$4 sm:$0xff] (!%p13658_p3)   ;;  %v16258_v4 = vld [vmem:[%s17176_s14 + $0x460] ss:$16 sps:$4 sm:$0xff] (!%p13658_p3)  }
 0x6ad   : > { %v10158_v40 = vadd.f32 (!%p13658_p3), %v10126_v32, %v10114_v53  ;;  %v10160_v41 = vadd.f32 (!%p13658_p3), %v10134_v49, %v10116_v33  ;;  %v16264_v60 = vld [vmem:[%s17176_s14 + $0x480] ss:$16 sps:$4 sm:$0xff] (!%p13658_p3)   ;;  %v16290_v49 = vld [vmem:[%s17176_s14 + $0x504] ss:$16 sps:$4 sm:$0xff] (!%p13658_p3)   ;;  %v16293_v53 = vld [vmem:[%s17176_s14 + $0xc] ss:$16 sps:$4 sm:$0xff] (!%p13658_p3)  }
 0x6ae   : > { %v16288_v33 = vld [vmem:[%s17176_s14 + $0x500] ss:$16 sps:$4 sm:$0xff] (!%p13658_p3)  }
 0x6af   : > { %v10165_v25 = vmax.f32 (!%p13658_p3), %v10158_v40, 0.0  ;;  %v10167_v1 = vmax.f32 (!%p13658_p3), %v10160_v41, 0.0  ;;  %v16296_v40 = vld [vmem:[%s17176_s14 + $0x524] ss:$16 sps:$4 sm:$0xff] (!%p13658_p3)   ;;  %v16299_v41 = vld [vmem:[%s17176_s14 + $0x2c] ss:$16 sps:$4 sm:$0xff] (!%p13658_p3)  }
 0x6b1   : > { %v18800_v48 = vpack.c.bf16 (!%p13658_p3), %v10165_v25, %v10165_v25  ;;  %v18802_v57 = vpack.c.bf16 (!%p13658_p3), %v10167_v1, %v10167_v1  ;;  %v16300_v25 = vld [vmem:[%s17176_s14 + $0x540] ss:$16 sps:$4 sm:$0xff] (!%p13658_p3)   ;;  %v16303_v1 = vld [vmem:[%s17176_s14 + $0x48] ss:$16 sps:$4 sm:$0xff] (!%p13658_p3)  }
 0x6c3   : > { %v14158_v11 = vpop.f32.mrb[84].mxu0 }
 0x6c4   : > { %v14159_v38 = vpop.f32.mrb[85].mxu0 }
 0x6c5   : > { %v14160_v39 = vadd.f32 %v14159_v38, %v14158_v11  ;;  %v14161_v19 = vpop.f32.mrb[86].mxu0  ;;  %10113 = sbr.rel (%p13658_p3) target bundleno = 2135 (0x857), region = 84  ;;  %v10130_v11 = vrot.slane (!%p13658_p3), %v18764_v15, %v10129_v36  ;;  %v10138_v38 = vrot.slane (!%p13658_p3), %v18764_v15, %v10137_v27  ;;  %v16266_v36 = vld [vmem:[%s17176_s14 + $0x484] ss:$16 sps:$4 sm:$0xff] (!%p13658_p3)  }
 0x6c6   : > { %v14162_v14 = vpop.f32.mrb[87].mxu0  ;;  %v16218_v19 = vld [vmem:[%s17176_s14 + $0x384] ss:$16 sps:$4 sm:$0xff] (!%p13658_p3)  }
 0x6c7   : > { %v10091_v16 = vadd.f32 %v14160_v39, %v10051_v10  ;;  %v16215_v10 = vld [vmem:[%s17176_s14 + $0x360] ss:$16 sps:$4 sm:$0xff] (!%p13658_p3)   ;;  %v16216_v39 = vld [vmem:[%s17176_s14 + $0x184] ss:$16 sps:$4 sm:$0xff] (!%p13658_p3)   ;;  %v10161_v14 = vadd.f32 (!%p13658_p3), %v10138_v38, %v10117_v7  ;;  %v10145_v7 = vsub.s32 (!%p13658_p3), 5, %v18751_v18 }
 0x6c8   : > { %11591 = vmatpush1.bf16.msra.mxu1 (!%p13658_p3), %v16215_v10  ;;  %11551 = vmatprep.subr.bf16.mxu0 (!%p13658_p3), %v16216_v39  ;;  %v16269_v27 = vld [vmem:[%s17176_s14 + $0x684] ss:$16 sps:$4 sm:$0xff] (!%p13658_p3)   ;;  %v16273_v38 = vld [vmem:[%s17176_s14 + $0x6a0] ss:$16 sps:$4 sm:$0xff] (!%p13658_p3)   ;;  %v10150_v39 = vrot.slane (!%p13658_p3), %v18764_v15, %v10149_v9  ;;  %v16333_v9 = vld [vmem:[%s17176_s14 + $0xe8] ss:$16 sps:$4 sm:$0xff] (!%p13658_p3)  }
 0x6c9   : > { %v10102_v22 = vadd.f32 %v10091_v16, %v470_v13  ;;  %v10159_v13 = vadd.f32 (!%p13658_p3), %v10130_v11, %v10115_v12  ;;  %v18772_v16 = vrot.slane (!%p13658_p3), %v18764_v15, %v10141_v6  ;;  %v10168_v30 = vmax.f32 (!%p13658_p3), %v10161_v14, 0.0  ;;  %11592 = vmatprep.subr.bf16.mxu1 (!%p13658_p3), %v16218_v19  ;;  %v16267_v6 = vld [vmem:[%s17176_s14 + $0x680] ss:$16 sps:$4 sm:$0xff] (!%p13658_p3)   ;;  %v16272_v12 = vld [vmem:[%s17176_s14 + $0x4a4] ss:$16 sps:$4 sm:$0xff] (!%p13658_p3)  }
 0x6ca   : > { %v16275_v10 = vld [vmem:[%s17176_s14 + $0x6a4] ss:$16 sps:$4 sm:$0xff] (!%p13658_p3)   ;;  %v16270_v11 = vld [vmem:[%s17176_s14 + $0x4a0] ss:$16 sps:$4 sm:$0xff] (!%p13658_p3)   ;;  %v10146_v14 = vrot.slane (!%p13658_p3), %v18764_v15, %v10145_v7  ;;  %v16336_v7 = vld [vmem:[%s17176_s14 + $0x108] ss:$16 sps:$4 sm:$0xff] (!%p13658_p3)  }
 0x6cb   : > { %10109 = vst [vmem:[#allocation2 + $0x30] sm:$0xff] %v10102_v22  ;;  %v16220_v22 = vld [vmem:[%s17176_s14 + $0x180] ss:$16 sps:$4 sm:$0xff] (!%p13658_p3)   ;;  %v10166_v23 = vmax.f32 (!%p13658_p3), %v10159_v13, 0.0  ;;  %v18783_v20 = vpack.c.bf16 (!%p13658_p3), %v10168_v30, %v10168_v30  ;;  %v16278_v19 = vld [vmem:[%s17176_s14 + $0x4c4] ss:$16 sps:$4 sm:$0xff] (!%p13658_p3)  }
 0x6cc   : > { %11552 = vmatpush1.bf16.msra.mxu0 %v16220_v22  ;;  %11593 = vmatpush1.bf16.msra.mxu1 %v16221_v17  ;;  %v16281_v18 = vld [vmem:[%s17176_s14 + $0x6c4] ss:$16 sps:$4 sm:$0xff]   ;;  %v16276_v22 = vld [vmem:[%s17176_s14 + $0x4c0] ss:$16 sps:$4 sm:$0xff]  }
 0x6cd   : > { %v18781_v8 = vpack.c.bf16 %v10166_v23, %v10166_v23  ;;  %11553 = vmatprep.subr.bf16.mxu0 %v16222_v42  ;;  %11594 = vmatprep.subr.bf16.mxu1 %v16224_v34  ;;  %v16279_v17 = vld [vmem:[%s17176_s14 + $0x6c0] ss:$16 sps:$4 sm:$0xff]   ;;  %v10163_v23 = vadd.f32 %v10146_v14, %v10119_v62  ;;  %v16284_v30 = vld [vmem:[%s17176_s14 + $0x4e4] ss:$16 sps:$4 sm:$0xff]   ;;  %v16353_v14 = vld [vmem:[%s17176_s14 + $0x24c] ss:$16 sps:$4 sm:$0xff]  }
 0x6ce   : > { %11600 = vmatprep.mubr.bf16.mxu1 %v18783_v20  ;;  %v16287_v42 = vld [vmem:[%s17176_s14 + $0x6e4] ss:$16 sps:$4 sm:$0xff]   ;;  %v16282_v34 = vld [vmem:[%s17176_s14 + $0x4e0] ss:$16 sps:$4 sm:$0xff]   ;;  %v16359_v62 = vld [vmem:[%s17176_s14 + $0x26c] ss:$16 sps:$4 sm:$0xff]  }
 0x6cf   : > { %11559 = vmatprep.mubr.bf16.mxu0 %v18781_v8  ;;  %v10170_v15 = vmax.f32 %v10163_v23, 0.0  ;;  %v16357_v23 = vld [vmem:[%s17176_s14 + $0x268] ss:$16 sps:$4 sm:$0xff]  }
 0x6d0   : > { %11554 = vmatpush1.bf16.msra.mxu0 %v16226_v43  ;;  %11595 = vmatpush1.bf16.msra.mxu1 %v16227_v29  ;;  %v16285_v29 = vld [vmem:[%s17176_s14 + $0x6e0] ss:$16 sps:$4 sm:$0xff]  }
 0x6d1   : > { %11555 = vmatprep.subr.bf16.mxu0 %v16228_v28  ;;  %11596 = vmatprep.subr.bf16.mxu1 %v16230_v45  ;;  %v18841_v32 = vpack.c.bf16 %v10170_v15, %v10170_v15  ;;  %v16291_v45 = vld [vmem:[%s17176_s14 + $0x8] ss:$16 sps:$4 sm:$0xff]  }
 0x6d2   : > { %v10120_v13 = vld [vmem:[#allocation2 + $0x30] sm:$0xff] }
 0x6d3   : > { %v10164_v61 = vadd.f32 %v10150_v39, %v10120_v13  ;;  %v16342_v39 = vld [vmem:[%s17176_s14 + $0x128] ss:$16 sps:$4 sm:$0xff]   ;;  %v16350_v13 = vld [vmem:[%s17176_s14 + $0x14c] ss:$16 sps:$4 sm:$0xff]  }
 0x6d4   : > { %11556 = vmatpush1.bf16.msra.mxu0 %v16232_v37  ;;  %11597 = vmatpush1.bf16.msra.mxu1 %v16233_v31  ;;  %v16294_v37 = vld [vmem:[%s17176_s14 + $0x520] ss:$16 sps:$4 sm:$0xff]   ;;  %v16297_v31 = vld [vmem:[%s17176_s14 + $0x28] ss:$16 sps:$4 sm:$0xff]  }
 0x6d5   : > { %11557 = vmatprep.subr.bf16.mxu0 %v16234_v47  ;;  %11598 = vmatprep.subr.bf16.mxu1 %v16236_v24  ;;  %v10171_v43 = vmax.f32 %v10164_v61, 0.0  ;;  %v16302_v47 = vld [vmem:[%s17176_s14 + $0x544] ss:$16 sps:$4 sm:$0xff]   ;;  %v16305_v24 = vld [vmem:[%s17176_s14 + $0x4c] ss:$16 sps:$4 sm:$0xff]  }
 0x6d6   : > { %v16356_v61 = vld [vmem:[%s17176_s14 + $0x16c] ss:$16 sps:$4 sm:$0xff]   ;;  %v16363_v15 = vld [vmem:[%s17176_s14 + $0x288] ss:$16 sps:$4 sm:$0xff]  }
 0x6d7   : > { %v18847_v28 = vpack.c.bf16 %v10171_v43, %v10171_v43  ;;  %v16371_v43 = vld [vmem:[%s17176_s14 + $0x2ac] ss:$16 sps:$4 sm:$0xff]  }
 0x6d8   : > { %11558 = vmatpush1.bf16.msra.mxu0 %v16238_v35  ;;  %11599 = vmatpush1.bf16.msra.mxu1 %v16239_v5  ;;  %v16308_v35 = vld [vmem:[%s17176_s14 + $0x564] ss:$16 sps:$4 sm:$0xff]   ;;  %v16311_v5 = vld [vmem:[%s17176_s14 + $0x6c] ss:$16 sps:$4 sm:$0xff]  }
 0x6d9   : > { %11609 = vmatprep.subr.bf16.mxu0 %v16242_v44  ;;  %11650 = vmatprep.subr.bf16.mxu1 %v16245_v46  ;;  %v16306_v44 = vld [vmem:[%s17176_s14 + $0x560] ss:$16 sps:$4 sm:$0xff]   ;;  %v16309_v46 = vld [vmem:[%s17176_s14 + $0x68] ss:$16 sps:$4 sm:$0xff]  }
 0x6db   : > { %11560 = vmatmul.mubr.bf16.vlgmr.msra.gmra.mrb[0].mxu0 %v18800_v48  ;;  %11601 = vmatmul.mubr.bf16.vlgmr.msra.gmra.mrb[0].mxu1 %v18802_v57 }
 0x6dc   : > { %11610 = vmatpush1.bf16.msra.mxu0 %v16240_v50  ;;  %11651 = vmatpush1.bf16.msra.mxu1 %v16243_v51  ;;  %v16317_v50 = vld [vmem:[%s17176_s14 + $0x8c] ss:$16 sps:$4 sm:$0xff]   ;;  %v16312_v51 = vld [vmem:[%s17176_s14 + $0x580] ss:$16 sps:$4 sm:$0xff]  }
 0x6dd   : > { %11611 = vmatprep.subr.bf16.mxu0 %v16248_v52  ;;  %11652 = vmatprep.subr.bf16.mxu1 %v16251_v54  ;;  %v16315_v52 = vld [vmem:[%s17176_s14 + $0x88] ss:$16 sps:$4 sm:$0xff]   ;;  %v16320_v54 = vld [vmem:[%s17176_s14 + $0x5a4] ss:$16 sps:$4 sm:$0xff]  }
 0x6de   : > { %11682 = vmatprep.mubr.bf16.mxu1 %v16805_v63  ;;  %11641 = vmatprep.mubr.bf16.mxu0 %v18841_v32 }
 0x6e0   : > { %11612 = vmatpush1.bf16.msra.mxu0 %v16246_v55  ;;  %11653 = vmatpush1.bf16.msra.mxu1 %v16249_v2  ;;  %v16323_v55 = vld [vmem:[%s17176_s14 + $0xac] ss:$16 sps:$4 sm:$0xff]   ;;  %v16318_v2 = vld [vmem:[%s17176_s14 + $0x5a0] ss:$16 sps:$4 sm:$0xff]  }
 0x6e1   : > { %11613 = vmatprep.subr.bf16.mxu0 %v16254_v56  ;;  %11654 = vmatprep.subr.bf16.mxu1 %v16257_v59  ;;  %v16321_v56 = vld [vmem:[%s17176_s14 + $0xa8] ss:$16 sps:$4 sm:$0xff]  }
 0x6e2   : > { %v10118_v59 = vld [vmem:[#allocation2 + $0x20] sm:$0xff] }
 0x6e4   : > { %11614 = vmatpush1.bf16.msra.mxu0 %v16252_v0  ;;  %11655 = vmatpush1.bf16.msra.mxu1 %v16255_v3  ;;  %v16326_v0 = vld [vmem:[%s17176_s14 + $0x5c4] ss:$16 sps:$4 sm:$0xff]   ;;  %v16329_v3 = vld [vmem:[%s17176_s14 + $0xcc] ss:$16 sps:$4 sm:$0xff]  }
 0x6e5   : > { %11615 = vmatprep.subr.bf16.mxu0 %v16260_v21  ;;  %11656 = vmatprep.subr.bf16.mxu1 %v16263_v58  ;;  %v16324_v21 = vld [vmem:[%s17176_s14 + $0x5c0] ss:$16 sps:$4 sm:$0xff]   ;;  %v10162_v58 = vadd.f32 %v18772_v16, %v10118_v59  ;;  %v16338_v16 = vld [vmem:[%s17176_s14 + $0x10c] ss:$16 sps:$4 sm:$0xff]  }
 0x6e6   : > { %v16413_v59 = vld [vmem:[%s17176_s14 + $0x48c] ss:$16 sps:$4 sm:$0xff]  }
 0x6e8   : > { %11616 = vmatpush1.bf16.msra.mxu0 %v16258_v4  ;;  %11657 = vmatpush1.bf16.msra.mxu1 %v16261_v26  ;;  %v16327_v4 = vld [vmem:[%s17176_s14 + $0xc8] ss:$16 sps:$4 sm:$0xff]   ;;  %v16332_v26 = vld [vmem:[%s17176_s14 + $0x5e4] ss:$16 sps:$4 sm:$0xff]  }
 0x6e9   : > { %11617 = vmatprep.subr.bf16.mxu0 %v16266_v36  ;;  %11658 = vmatprep.subr.bf16.mxu1 %v16269_v27  ;;  %v16335_v36 = vld [vmem:[%s17176_s14 + $0xec] ss:$16 sps:$4 sm:$0xff]   ;;  %v16330_v27 = vld [vmem:[%s17176_s14 + $0x5e0] ss:$16 sps:$4 sm:$0xff]  }
 0x6ec   : > { %11618 = vmatpush1.bf16.msra.mxu0 %v16264_v60  ;;  %11659 = vmatpush1.bf16.msra.mxu1 %v16267_v6  ;;  %v10169_v60 = vmax.f32 %v10162_v58, 0.0  ;;  %v16341_v6 = vld [vmem:[%s17176_s14 + $0x20c] ss:$16 sps:$4 sm:$0xff]  }
 0x6ed   : > { %11619 = vmatprep.subr.bf16.mxu0 %v16272_v12  ;;  %11660 = vmatprep.subr.bf16.mxu1 %v16275_v10  ;;  %v16339_v10 = vld [vmem:[%s17176_s14 + $0x208] ss:$16 sps:$4 sm:$0xff]   ;;  %v16419_v58 = vld [vmem:[%s17176_s14 + $0x4ac] ss:$16 sps:$4 sm:$0xff]  }
 0x6ee   : > { %v18883_v12 = vpack.c.bf16 %v10169_v60, %v10169_v60  ;;  %v16420_v60 = vld [vmem:[%s17176_s14 + $0x3c8] ss:$16 sps:$4 sm:$0xff]  }
 0x6f0   : > { %11620 = vmatpush1.bf16.msra.mxu0 %v16270_v11  ;;  %11661 = vmatpush1.bf16.msra.mxu1 %v16273_v38  ;;  %v16344_v11 = vld [vmem:[%s17176_s14 + $0x12c] ss:$16 sps:$4 sm:$0xff]  }
 0x6f1   : > { %11621 = vmatprep.subr.bf16.mxu0 %v16278_v19  ;;  %11662 = vmatprep.subr.bf16.mxu1 %v16281_v18  ;;  %v16347_v38 = vld [vmem:[%s17176_s14 + $0x22c] ss:$16 sps:$4 sm:$0xff]   ;;  %v16345_v19 = vld [vmem:[%s17176_s14 + $0x228] ss:$16 sps:$4 sm:$0xff]  }
 0x6f2   : > { %v16348_v18 = vld [vmem:[%s17176_s14 + $0x148] ss:$16 sps:$4 sm:$0xff]  }
 0x6f4   : > { %11622 = vmatpush1.bf16.msra.mxu0 %v16276_v22  ;;  %11663 = vmatpush1.bf16.msra.mxu1 %v16279_v17  ;;  %v16351_v22 = vld [vmem:[%s17176_s14 + $0x248] ss:$16 sps:$4 sm:$0xff]  }
 0x6f5   : > { %11623 = vmatprep.subr.bf16.mxu0 %v16284_v30  ;;  %11664 = vmatprep.subr.bf16.mxu1 %v16287_v42  ;;  %v16354_v17 = vld [vmem:[%s17176_s14 + $0x168] ss:$16 sps:$4 sm:$0xff]   ;;  %v16365_v30 = vld [vmem:[%s17176_s14 + $0x28c] ss:$16 sps:$4 sm:$0xff]  }
 0x6f6   : > { %v16360_v42 = vld [vmem:[%s17176_s14 + $0x188] ss:$16 sps:$4 sm:$0xff]  }
 0x6f8   : > { %11624 = vmatpush1.bf16.msra.mxu0 %v16282_v34  ;;  %11665 = vmatpush1.bf16.msra.mxu1 %v16285_v29  ;;  %v16368_v34 = vld [vmem:[%s17176_s14 + $0x1ac] ss:$16 sps:$4 sm:$0xff]   ;;  %v16366_v29 = vld [vmem:[%s17176_s14 + $0x1a8] ss:$16 sps:$4 sm:$0xff]  }
 0x6f9   : > { %11625 = vmatprep.subr.bf16.mxu0 %v16290_v49  ;;  %11691 = vmatprep.subr.bf16.mxu1 %v16293_v53  ;;  %v16369_v49 = vld [vmem:[%s17176_s14 + $0x2a8] ss:$16 sps:$4 sm:$0xff]   ;;  %v16374_v53 = vld [vmem:[%s17176_s14 + $0x1cc] ss:$16 sps:$4 sm:$0xff]  }
 0x6fb   : > { %11683 = vmatmul.mubr.bf16.vlgmr.msra.gmra.mrb[4].mxu1 %v18847_v28 }
 0x6fc   : > { %11626 = vmatpush1.bf16.msra.mxu0 %v16288_v33  ;;  %11692 = vmatpush1.bf16.msra.mxu1 %v16291_v45  ;;  %v16377_v33 = vld [vmem:[%s17176_s14 + $0x2cc] ss:$16 sps:$4 sm:$0xff]   ;;  %v16372_v45 = vld [vmem:[%s17176_s14 + $0x1c8] ss:$16 sps:$4 sm:$0xff]  }
 0x6fd   : > { %11627 = vmatprep.subr.bf16.mxu0 %v16296_v40  ;;  %11693 = vmatprep.subr.bf16.mxu1 %v16299_v41  ;;  %v16375_v40 = vld [vmem:[%s17176_s14 + $0x2c8] ss:$16 sps:$4 sm:$0xff]   ;;  %v16380_v41 = vld [vmem:[%s17176_s14 + $0x1ec] ss:$16 sps:$4 sm:$0xff]  }
 0x6fe   : > { %11723 = vmatprep.mubr.bf16.mxu1 %v18781_v8  ;;  %v16314_v8 = vld [vmem:[%s17176_s14 + $0x584] ss:$16 sps:$4 sm:$0xff]  }
 0x700   : > { %11628 = vmatpush1.bf16.msra.mxu0 %v16294_v37  ;;  %11694 = vmatpush1.bf16.msra.mxu1 %v16297_v31  ;;  %v16383_v37 = vld [vmem:[%s17176_s14 + $0x2ec] ss:$16 sps:$4 sm:$0xff]   ;;  %v16378_v31 = vld [vmem:[%s17176_s14 + $0x1e8] ss:$16 sps:$4 sm:$0xff]  }
 0x701   : > { %11629 = vmatprep.subr.bf16.mxu0 %v16302_v47  ;;  %11695 = vmatprep.subr.bf16.mxu1 %v16305_v24  ;;  %v16381_v47 = vld [vmem:[%s17176_s14 + $0x2e8] ss:$16 sps:$4 sm:$0xff]   ;;  %v16386_v24 = vld [vmem:[%s17176_s14 + $0x30c] ss:$16 sps:$4 sm:$0xff]  }
 0x704   : > { %11630 = vmatpush1.bf16.msra.mxu0 %v16300_v25  ;;  %11696 = vmatpush1.bf16.msra.mxu1 %v16303_v1  ;;  %v16389_v25 = vld [vmem:[%s17176_s14 + $0x40c] ss:$16 sps:$4 sm:$0xff]   ;;  %v16384_v1 = vld [vmem:[%s17176_s14 + $0x308] ss:$16 sps:$4 sm:$0xff]  }
 0x705   : > { %11631 = vmatprep.subr.bf16.mxu0 %v16308_v35  ;;  %11697 = vmatprep.subr.bf16.mxu1 %v16311_v5  ;;  %v16387_v35 = vld [vmem:[%s17176_s14 + $0x408] ss:$16 sps:$4 sm:$0xff]   ;;  %v16392_v5 = vld [vmem:[%s17176_s14 + $0x32c] ss:$16 sps:$4 sm:$0xff]  }
 0x708   : > { %11632 = vmatpush1.bf16.msra.mxu0 %v16306_v44  ;;  %11698 = vmatpush1.bf16.msra.mxu1 %v16309_v46  ;;  %v16395_v44 = vld [vmem:[%s17176_s14 + $0x42c] ss:$16 sps:$4 sm:$0xff]   ;;  %v16390_v46 = vld [vmem:[%s17176_s14 + $0x328] ss:$16 sps:$4 sm:$0xff]  }
 0x709   : > { %11633 = vmatprep.subr.bf16.mxu0 %v16314_v8  ;;  %11699 = vmatprep.subr.bf16.mxu1 %v16317_v50  ;;  %v16393_v8 = vld [vmem:[%s17176_s14 + $0x428] ss:$16 sps:$4 sm:$0xff]   ;;  %v16398_v50 = vld [vmem:[%s17176_s14 + $0x34c] ss:$16 sps:$4 sm:$0xff]  }
 0x70c   : > { %11634 = vmatpush1.bf16.msra.mxu0 %v16312_v51  ;;  %11700 = vmatpush1.bf16.msra.mxu1 %v16315_v52  ;;  %v16401_v51 = vld [vmem:[%s17176_s14 + $0x44c] ss:$16 sps:$4 sm:$0xff]   ;;  %v16396_v52 = vld [vmem:[%s17176_s14 + $0x348] ss:$16 sps:$4 sm:$0xff]  }
 0x70d   : > { %11635 = vmatprep.subr.bf16.mxu0 %v16320_v54  ;;  %11701 = vmatprep.subr.bf16.mxu1 %v16323_v55  ;;  %v16404_v54 = vld [vmem:[%s17176_s14 + $0x36c] ss:$16 sps:$4 sm:$0xff]  }
 0x70e   : > { %v16407_v55 = vld [vmem:[%s17176_s14 + $0x46c] ss:$16 sps:$4 sm:$0xff]  }
 0x710   : > { %11636 = vmatpush1.bf16.msra.mxu0 %v16318_v2  ;;  %11702 = vmatpush1.bf16.msra.mxu1 %v16321_v56  ;;  %v16402_v2 = vld [vmem:[%s17176_s14 + $0x368] ss:$16 sps:$4 sm:$0xff]  }
 0x711   : > { %11637 = vmatprep.subr.bf16.mxu0 %v16326_v0  ;;  %11703 = vmatprep.subr.bf16.mxu1 %v16329_v3  ;;  %v16405_v56 = vld [vmem:[%s17176_s14 + $0x468] ss:$16 sps:$4 sm:$0xff]  }
 0x712   : > { %v16408_v0 = vld [vmem:[%s17176_s14 + $0x388] ss:$16 sps:$4 sm:$0xff]  }
 0x713   : > { %v16411_v3 = vld [vmem:[%s17176_s14 + $0x488] ss:$16 sps:$4 sm:$0xff]  }
 0x714   : > { %11638 = vmatpush1.bf16.msra.mxu0 %v16324_v21  ;;  %11704 = vmatpush1.bf16.msra.mxu1 %v16327_v4  ;;  %v16416_v21 = vld [vmem:[%s17176_s14 + $0x3ac] ss:$16 sps:$4 sm:$0xff]   ;;  %v16414_v4 = vld [vmem:[%s17176_s14 + $0x3a8] ss:$16 sps:$4 sm:$0xff]  }
 0x715   : > { %11639 = vmatprep.subr.bf16.mxu0 %v16332_v26  ;;  %11705 = vmatprep.subr.bf16.mxu1 %v16335_v36  ;;  %v16417_v26 = vld [vmem:[%s17176_s14 + $0x4a8] ss:$16 sps:$4 sm:$0xff]   ;;  %v16422_v36 = vld [vmem:[%s17176_s14 + $0x3cc] ss:$16 sps:$4 sm:$0xff]  }
 0x718   : > { %11640 = vmatpush1.bf16.msra.mxu0 %v16330_v27  ;;  %11706 = vmatpush1.bf16.msra.mxu1 %v16333_v9  ;;  %v16425_v27 = vld [vmem:[%s17176_s14 + $0x4cc] ss:$16 sps:$4 sm:$0xff]   ;;  %v16423_v9 = vld [vmem:[%s17176_s14 + $0x4c8] ss:$16 sps:$4 sm:$0xff]  }
 0x719   : > { %11707 = vmatprep.subr.bf16.mxu1 %v16338_v16  ;;  %11732 = vmatprep.subr.bf16.mxu0 %v16341_v6  ;;  %v16428_v16 = vld [vmem:[%s17176_s14 + $0x3ec] ss:$16 sps:$4 sm:$0xff]  }
 0x71a   : > { %v16431_v6 = vld [vmem:[%s17176_s14 + $0x4ec] ss:$16 sps:$4 sm:$0xff]  }
 0x71b   : > { %11642 = vmatmul.mubr.bf16.vlgmr.msra.gmra.mrb[4].mxu0 %v18883_v12 }
 0x71c   : > { %11708 = vmatpush1.bf16.msra.mxu1 %v16336_v7  ;;  %11733 = vmatpush1.bf16.msra.mxu0 %v16339_v10  ;;  %v16426_v7 = vld [vmem:[%s17176_s14 + $0x3e8] ss:$16 sps:$4 sm:$0xff]  }
 0x71d   : > { %11709 = vmatprep.subr.bf16.mxu1 %v16344_v11  ;;  %11734 = vmatprep.subr.bf16.mxu0 %v16347_v38  ;;  %v16429_v10 = vld [vmem:[%s17176_s14 + $0x4e8] ss:$16 sps:$4 sm:$0xff]   ;;  %v16434_v11 = vld [vmem:[%s17176_s14 + $0x50c] ss:$16 sps:$4 sm:$0xff]  }
 0x71e   : > { %11764 = vmatprep.mubr.bf16.mxu0 %v18783_v20  ;;  %v16362_v20 = vld [vmem:[%s17176_s14 + $0x18c] ss:$16 sps:$4 sm:$0xff]  }
 0x71f   : > { %v16437_v38 = vld [vmem:[%s17176_s14 + $0x60c] ss:$16 sps:$4 sm:$0xff]  }
 0x720   : > { %11710 = vmatpush1.bf16.msra.mxu1 %v16342_v39  ;;  %11735 = vmatpush1.bf16.msra.mxu0 %v16345_v19  ;;  %v16432_v39 = vld [vmem:[%s17176_s14 + $0x508] ss:$16 sps:$4 sm:$0xff]  }
 0x721   : > { %11711 = vmatprep.subr.bf16.mxu1 %v16350_v13  ;;  %11736 = vmatprep.subr.bf16.mxu0 %v16353_v14  ;;  %v16435_v19 = vld [vmem:[%s17176_s14 + $0x608] ss:$16 sps:$4 sm:$0xff]   ;;  %v16440_v13 = vld [vmem:[%s17176_s14 + $0x52c] ss:$16 sps:$4 sm:$0xff]  }
 0x722   : > { %v16443_v14 = vld [vmem:[%s17176_s14 + $0x62c] ss:$16 sps:$4 sm:$0xff]  }
 0x724   : > { %11712 = vmatpush1.bf16.msra.mxu1 %v16348_v18  ;;  %11737 = vmatpush1.bf16.msra.mxu0 %v16351_v22  ;;  %v16438_v18 = vld [vmem:[%s17176_s14 + $0x528] ss:$16 sps:$4 sm:$0xff]  }
 0x725   : > { %11713 = vmatprep.subr.bf16.mxu1 %v16356_v61  ;;  %11738 = vmatprep.subr.bf16.mxu0 %v16359_v62  ;;  %v16441_v22 = vld [vmem:[%s17176_s14 + $0x628] ss:$16 sps:$4 sm:$0xff]   ;;  %v16446_v61 = vld [vmem:[%s17176_s14 + $0x54c] ss:$16 sps:$4 sm:$0xff]  }
 0x726   : > { %v16449_v62 = vld [vmem:[%s17176_s14 + $0x64c] ss:$16 sps:$4 sm:$0xff]  }
 0x728   : > { %11714 = vmatpush1.bf16.msra.mxu1 %v16354_v17  ;;  %11739 = vmatpush1.bf16.msra.mxu0 %v16357_v23  ;;  %v16444_v17 = vld [vmem:[%s17176_s14 + $0x548] ss:$16 sps:$4 sm:$0xff]   ;;  %v16452_v23 = vld [vmem:[%s17176_s14 + $0x56c] ss:$16 sps:$4 sm:$0xff]  }
 0x729   : > { %11715 = vmatprep.subr.bf16.mxu1 %v16362_v20  ;;  %11740 = vmatprep.subr.bf16.mxu0 %v16365_v30  ;;  %v16455_v20 = vld [vmem:[%s17176_s14 + $0x66c] ss:$16 sps:$4 sm:$0xff]   ;;  %v16450_v30 = vld [vmem:[%s17176_s14 + $0x568] ss:$16 sps:$4 sm:$0xff]  }
 0x72c   : > { %11716 = vmatpush1.bf16.msra.mxu1 %v16360_v42  ;;  %11741 = vmatpush1.bf16.msra.mxu0 %v16363_v15  ;;  %v16453_v42 = vld [vmem:[%s17176_s14 + $0x668] ss:$16 sps:$4 sm:$0xff]   ;;  %v16461_v15 = vld [vmem:[%s17176_s14 + $0x68c] ss:$16 sps:$4 sm:$0xff]  }
 0x72d   : > { %11717 = vmatprep.subr.bf16.mxu1 %v16368_v34  ;;  %11742 = vmatprep.subr.bf16.mxu0 %v16371_v43  ;;  %v16456_v34 = vld [vmem:[%s17176_s14 + $0x588] ss:$16 sps:$4 sm:$0xff]  }
 0x72e   : > { %v16459_v43 = vld [vmem:[%s17176_s14 + $0x688] ss:$16 sps:$4 sm:$0xff]  }
 0x730   : > { %11718 = vmatpush1.bf16.msra.mxu1 %v16366_v29  ;;  %11743 = vmatpush1.bf16.msra.mxu0 %v16369_v49  ;;  %v16464_v29 = vld [vmem:[%s17176_s14 + $0x5ac] ss:$16 sps:$4 sm:$0xff]  }
 0x731   : > { %11719 = vmatprep.subr.bf16.mxu1 %v16374_v53  ;;  %11744 = vmatprep.subr.bf16.mxu0 %v16377_v33  ;;  %v16467_v49 = vld [vmem:[%s17176_s14 + $0x6ac] ss:$16 sps:$4 sm:$0xff]   ;;  %v16462_v53 = vld [vmem:[%s17176_s14 + $0x5a8] ss:$16 sps:$4 sm:$0xff]  }
 0x732   : > { %v16465_v33 = vld [vmem:[%s17176_s14 + $0x6a8] ss:$16 sps:$4 sm:$0xff]  }
 0x734   : > { %11720 = vmatpush1.bf16.msra.mxu1 %v16372_v45  ;;  %11745 = vmatpush1.bf16.msra.mxu0 %v16375_v40  ;;  %v16470_v45 = vld [vmem:[%s17176_s14 + $0x5cc] ss:$16 sps:$4 sm:$0xff]  }
 0x735   : > { %11721 = vmatprep.subr.bf16.mxu1 %v16380_v41  ;;  %11746 = vmatprep.subr.bf16.mxu0 %v16383_v37  ;;  %v16473_v40 = vld [vmem:[%s17176_s14 + $0x6cc] ss:$16 sps:$4 sm:$0xff]   ;;  %v16468_v41 = vld [vmem:[%s17176_s14 + $0x5c8] ss:$16 sps:$4 sm:$0xff]  }
 0x736   : > { %v16471_v37 = vld [vmem:[%s17176_s14 + $0x6c8] ss:$16 sps:$4 sm:$0xff]  }
 0x738   : > { %11722 = vmatpush1.bf16.msra.mxu1 %v16378_v31  ;;  %11747 = vmatpush1.bf16.msra.mxu0 %v16381_v47  ;;  %v16476_v31 = vld [vmem:[%s17176_s14 + $0x5ec] ss:$16 sps:$4 sm:$0xff]  }
 0x739   : > { %11748 = vmatprep.subr.bf16.mxu0 %v16386_v24  ;;  %11773 = vmatprep.subr.bf16.mxu1 %v16389_v25  ;;  %v16479_v47 = vld [vmem:[%s17176_s14 + $0x6ec] ss:$16 sps:$4 sm:$0xff]   ;;  %v16474_v24 = vld [vmem:[%s17176_s14 + $0x5e8] ss:$16 sps:$4 sm:$0xff]  }
 0x73a   : > { %v16477_v25 = vld [vmem:[%s17176_s14 + $0x6e8] ss:$16 sps:$4 sm:$0xff]  }
 0x73b   : > { %11724 = vmatmul.mubr.bf16.vlgmr.msra.gmra.mrb[8].mxu1 %v18800_v48  ;;  %v16399_v48 = vld [vmem:[%s17176_s14 + $0x448] ss:$16 sps:$4 sm:$0xff]  }
 0x73c   : > { %11749 = vmatpush1.bf16.msra.mxu0 %v16384_v1  ;;  %11774 = vmatpush1.bf16.msra.mxu1 %v16387_v35 }
 0x73d   : > { %11750 = vmatprep.subr.bf16.mxu0 %v16392_v5  ;;  %11775 = vmatprep.subr.bf16.mxu1 %v16395_v44 }
 0x73e   : > { %11805 = vmatprep.mubr.bf16.mxu1 %v18841_v32  ;;  %v16410_v32 = vld [vmem:[%s17176_s14 + $0x38c] ss:$16 sps:$4 sm:$0xff]  }
 0x740   : > { %11751 = vmatpush1.bf16.msra.mxu0 %v16390_v46  ;;  %11776 = vmatpush1.bf16.msra.mxu1 %v16393_v8 }
 0x741   : > { %11752 = vmatprep.subr.bf16.mxu0 %v16398_v50  ;;  %11777 = vmatprep.subr.bf16.mxu1 %v16401_v51 }
 0x744   : > { %11753 = vmatpush1.bf16.msra.mxu0 %v16396_v52  ;;  %11778 = vmatpush1.bf16.msra.mxu1 %v16399_v48 }
 0x745   : > { %11754 = vmatprep.subr.bf16.mxu0 %v16404_v54  ;;  %11779 = vmatprep.subr.bf16.mxu1 %v16407_v55 }
 0x748   : > { %11755 = vmatpush1.bf16.msra.mxu0 %v16402_v2  ;;  %11780 = vmatpush1.bf16.msra.mxu1 %v16405_v56 }
 0x749   : > { %11756 = vmatprep.subr.bf16.mxu0 %v16410_v32  ;;  %11781 = vmatprep.subr.bf16.mxu1 %v16413_v59 }
 0x74c   : > { %11757 = vmatpush1.bf16.msra.mxu0 %v16408_v0  ;;  %11782 = vmatpush1.bf16.msra.mxu1 %v16411_v3 }
 0x74d   : > { %11758 = vmatprep.subr.bf16.mxu0 %v16416_v21  ;;  %11783 = vmatprep.subr.bf16.mxu1 %v16419_v58  ;;  %v10173_v58 = vld [vmem:[#allocation3 + $0x8] sm:$0xff] }
 0x750   : > { %11759 = vmatpush1.bf16.msra.mxu0 %v16414_v4  ;;  %11784 = vmatpush1.bf16.msra.mxu1 %v16417_v26 }
 0x751   : > { %11760 = vmatprep.subr.bf16.mxu0 %v16422_v36  ;;  %11785 = vmatprep.subr.bf16.mxu1 %v16425_v27 }
 0x754   : > { %11761 = vmatpush1.bf16.msra.mxu0 %v16420_v60  ;;  %11786 = vmatpush1.bf16.msra.mxu1 %v16423_v9 }
 0x755   : > { %11762 = vmatprep.subr.bf16.mxu0 %v16428_v16  ;;  %11787 = vmatprep.subr.bf16.mxu1 %v16431_v6 }
 0x758   : > { %11763 = vmatpush1.bf16.msra.mxu0 %v16426_v7  ;;  %11788 = vmatpush1.bf16.msra.mxu1 %v16429_v10 }
 0x759   : > { %11789 = vmatprep.subr.bf16.mxu1 %v16434_v11  ;;  %11814 = vmatprep.subr.bf16.mxu0 %v16437_v38 }
 0x75b   : > { %11765 = vmatmul.mubr.bf16.vlgmr.msra.gmra.mrb[8].mxu0 %v18802_v57  ;;  %v16447_v57 = vld [vmem:[%s17176_s14 + $0x648] ss:$16 sps:$4 sm:$0xff]  }
 0x75c   : > { %11790 = vmatpush1.bf16.msra.mxu1 %v16432_v39  ;;  %11815 = vmatpush1.bf16.msra.mxu0 %v16435_v19 }
 0x75d   : > { %11791 = vmatprep.subr.bf16.mxu1 %v16440_v13  ;;  %11816 = vmatprep.subr.bf16.mxu0 %v16443_v14 }
 0x75e   : > { %11846 = vmatprep.mubr.bf16.mxu0 %v16805_v63  ;;  %v16458_v63 = vld [vmem:[%s17176_s14 + $0x58c] ss:$16 sps:$4 sm:$0xff]  }
 0x760   : > { %11792 = vmatpush1.bf16.msra.mxu1 %v16438_v18  ;;  %11817 = vmatpush1.bf16.msra.mxu0 %v16441_v22 }
 0x761   : > { %11793 = vmatprep.subr.bf16.mxu1 %v16446_v61  ;;  %11818 = vmatprep.subr.bf16.mxu0 %v16449_v62  ;;  %v10174_v62 = vld [vmem:[#allocation3 + $0x10] sm:$0xff] }
 0x764   : > { %11794 = vmatpush1.bf16.msra.mxu1 %v16444_v17  ;;  %11819 = vmatpush1.bf16.msra.mxu0 %v16447_v57 }
 0x765   : > { %11795 = vmatprep.subr.bf16.mxu1 %v16452_v23  ;;  %11820 = vmatprep.subr.bf16.mxu0 %v16455_v20 }
 0x768   : > { %11796 = vmatpush1.bf16.msra.mxu1 %v16450_v30  ;;  %11821 = vmatpush1.bf16.msra.mxu0 %v16453_v42  ;;  %v10175_v30 = vld [vmem:[#allocation3 + $0x18] sm:$0xff] }
 0x769   : > { %11797 = vmatprep.subr.bf16.mxu1 %v16458_v63  ;;  %11822 = vmatprep.subr.bf16.mxu0 %v16461_v15 }
 0x76c   : > { %11798 = vmatpush1.bf16.msra.mxu1 %v16456_v34  ;;  %11823 = vmatpush1.bf16.msra.mxu0 %v16459_v43 }
 0x76d   : > { %11799 = vmatprep.subr.bf16.mxu1 %v16464_v29  ;;  %11824 = vmatprep.subr.bf16.mxu0 %v16467_v49 }
 0x770   : > { %11800 = vmatpush1.bf16.msra.mxu1 %v16462_v53  ;;  %11825 = vmatpush1.bf16.msra.mxu0 %v16465_v33 }
 0x771   : > { %11801 = vmatprep.subr.bf16.mxu1 %v16470_v45  ;;  %11826 = vmatprep.subr.bf16.mxu0 %v16473_v40 }
 0x774   : > { %11802 = vmatpush1.bf16.msra.mxu1 %v16468_v41  ;;  %11827 = vmatpush1.bf16.msra.mxu0 %v16471_v37 }
 0x775   : > { %11803 = vmatprep.subr.bf16.mxu1 %v16476_v31  ;;  %11828 = vmatprep.subr.bf16.mxu0 %v16479_v47 }
 0x778   : > { %11804 = vmatpush1.bf16.msra.mxu1 %v16474_v24  ;;  %11829 = vmatpush1.bf16.msra.mxu0 %v16477_v25 }
 0x77b   : > { %11806 = vmatmul.mubr.bf16.vlgmr.msra.gmra.mrb[12].mxu1 %v18883_v12  ;;  %11847 = vmatmul.mubr.bf16.vlgmr.msra.gmra.mrb[12].mxu0 %v18847_v28  ;;  %v10172_v12 = vld [vmem:[#allocation3] sm:$0xff] }
 0x7ae   : > { %v11561_v1 = vpop.f32.mrb[0].mxu0  ;;  %v11602_v35 = vpop.f32.mrb[0].mxu1 }
 0x7af   : > { %v11603_v5 = vadd.f32 %v11602_v35, %v11561_v1  ;;  %v11563_v44 = vpop.f32.mrb[1].mxu0  ;;  %v11604_v46 = vpop.f32.mrb[1].mxu1 }
 0x7b0   : > { %v11605_v8 = vadd.f32 %v11604_v46, %v11563_v44  ;;  %v11565_v50 = vpop.f32.mrb[2].mxu0  ;;  %v11606_v51 = vpop.f32.mrb[2].mxu1 }
 0x7b1   : > { %v11566_v52 = vpop.f32.mrb[3].mxu0  ;;  %v11607_v48 = vpop.f32.mrb[3].mxu1 }
 0x7ce   : > { %v11684_v54 = vpop.f32.mrb[4].mxu1 }
 0x7cf   : > { %v11686_v55 = vpop.f32.mrb[5].mxu1 }
 0x7d0   : > { %v11688_v2 = vpop.f32.mrb[6].mxu1 }
 0x7d1   : > { %v11689_v56 = vpop.f32.mrb[7].mxu1 }
 0x7ee   : > { %v11643_v32 = vpop.f32.mrb[4].mxu0 }
 0x7ef   : > { %v11644_v59 = vadd.f32 %v11643_v32, %v11603_v5  ;;  %v11645_v0 = vpop.f32.mrb[5].mxu0 }
 0x7f0   : > { %v11646_v3 = vadd.f32 %v11645_v0, %v11605_v8  ;;  %v11647_v28 = vpop.f32.mrb[6].mxu0 }
 0x7f1   : > { %v11685_v21 = vadd.f32 %v11684_v54, %v11644_v59  ;;  %v11648_v4 = vpop.f32.mrb[7].mxu0 }
 0x7f2   : > { %v11687_v26 = vadd.f32 %v11686_v55, %v11646_v3 }
 0x7f3   : > { %v11855_v36 = vadd.f32 %v11685_v21, %v10172_v12 }
 0x7f4   : > { %v11856_v27 = vadd.f32 %v11687_v26, %v10173_v58 }
 0x7f5   : > { %11859 = vst [vmem:[#allocation3] sm:$0xff] %v11855_v36 }
 0x7f6   : > { %11860 = vst [vmem:[#allocation3 + $0x8] sm:$0xff] %v11856_v27 }
 0x80e   : > { %v11725_v60 = vpop.f32.mrb[8].mxu1 }
 0x80f   : > { %v11727_v9 = vpop.f32.mrb[9].mxu1 }
 0x810   : > { %v11729_v16 = vpop.f32.mrb[10].mxu1 }
 0x811   : > { %v11730_v6 = vpop.f32.mrb[11].mxu1 }
 0x82e   : > { %v11766_v7 = vpop.f32.mrb[8].mxu0 }
 0x82f   : > { %v11767_v10 = vadd.f32 %v11766_v7, %v11725_v60  ;;  %v11768_v11 = vpop.f32.mrb[9].mxu0 }
 0x830   : > { %v11769_v38 = vadd.f32 %v11768_v11, %v11727_v9  ;;  %v11770_v39 = vpop.f32.mrb[10].mxu0 }
 0x831   : > { %v11771_v19 = vpop.f32.mrb[11].mxu0 }
 0x84e   : > { %v11807_v13 = vpop.f32.mrb[12].mxu1  ;;  %v11848_v14 = vpop.f32.mrb[12].mxu0 }
 0x84f   : > { %v11808_v18 = vadd.f32 %v11807_v13, %v11767_v10  ;;  %v11809_v22 = vpop.f32.mrb[13].mxu1  ;;  %v11850_v61 = vpop.f32.mrb[13].mxu0 }
 0x850   : > { %v11810_v17 = vadd.f32 %v11809_v22, %v11769_v38  ;;  %v11811_v57 = vpop.f32.mrb[14].mxu1  ;;  %v11852_v23 = vpop.f32.mrb[14].mxu0 }
 0x851   : > { %v11849_v20 = vadd.f32 %v11848_v14, %v11808_v18  ;;  %v11812_v42 = vpop.f32.mrb[15].mxu1  ;;  %v11853_v63 = vpop.f32.mrb[15].mxu0 }
 0x852   : > { %v11851_v15 = vadd.f32 %v11850_v61, %v11810_v17 }
 0x853   : > { %v11857_v34 = vadd.f32 %v11849_v20, %v10174_v62 }
 0x854   : > { %v11858_v43 = vadd.f32 %v11851_v15, %v10175_v30 }
 0x855   : > { %11861 = vst [vmem:[#allocation3 + $0x10] sm:$0xff] %v11857_v34 }
 0x856   : > { %11862 = vst [vmem:[#allocation3 + $0x18] sm:$0xff] %v11858_v43 }
 0x857 PF: > { %s19104_s22 = sld [smem:[#allocation21_spill]] }
 0x85d   : > { %p11863_p6 = scmp.eq.s32.totalorder %s19104_s22, 1 }
 0x85f   : > { %p11864_p5 = pnand %p11863_p6, %p10110_p7 }
 0x860   : > { %v16480_v29 = vld [vmem:[#allocation11 + $0x40] sm:$0xff] (!%p11864_p5)   ;;  %v16484_v45 = vld [vmem:[#allocation11 + $0x48] sm:$0xff] (!%p11864_p5)   ;;  %v16488_v31 = vld [vmem:[#allocation11 + $0x50] sm:$0xff] (!%p11864_p5)   ;;  %v11874_v51 = vlaneseq (!%p11864_p5)  ;;  %s19106_s4 = sld [smem:[#allocation32_spill]] (!%p11864_p5) }
 0x861   : > { %11867 = sbr.rel (%p11864_p5) target bundleno = 2398 (0x95e), region = 88  ;;  %v16481_v49 = vld [vmem:[#allocation11 + $0xc0] sm:$0xff] (!%p11864_p5)   ;;  %14164 = vmatprep.subr.bf16.mxu0 (!%p11864_p5), %v16480_v29  ;;  %v16485_v40 = vld [vmem:[#allocation11 + $0xc8] sm:$0xff] (!%p11864_p5)   ;;  %v16489_v47 = vld [vmem:[#allocation11 + $0xd0] sm:$0xff] (!%p11864_p5)  }
 0x862   : > { %v16482_v53 = vld [vmem:[#allocation11] sm:$0xff] (!%p11864_p5)   ;;  %14186 = vmatprep.subr.bf16.mxu1 (!%p11864_p5), %v16481_v49  ;;  %v16486_v41 = vld [vmem:[#allocation11 + $0x8] sm:$0xff] (!%p11864_p5)   ;;  %v16490_v24 = vld [vmem:[#allocation11 + $0x10] sm:$0xff] (!%p11864_p5)   ;;  %v11875_v2 = vshrl.u32 (!%p11864_p5), %v11874_v51, 7 }
 0x863   : > { %v16483_v33 = vld [vmem:[#allocation11 + $0x80] sm:$0xff] (!%p11864_p5)   ;;  %14165 = vmatpush3.bf16.msra.mxu0 (!%p11864_p5), %v16482_v53  ;;  %v16487_v37 = vld [vmem:[#allocation11 + $0x88] sm:$0xff] (!%p11864_p5)   ;;  %v16491_v25 = vld [vmem:[#allocation11 + $0x90] sm:$0xff] (!%p11864_p5)  }
 0x864   : > { %14187 = vmatpush3.bf16.msra.mxu1 (!%p11864_p5), %v16483_v33  ;;  %14166 = vmatprep.subr.bf16.mxu0 (!%p11864_p5), %v16484_v45  ;;  %v16492_v1 = vld [vmem:[#allocation11 + $0x58] sm:$0xff] (!%p11864_p5)   ;;  %v16496_v46 = vld [vmem:[#allocation11 + $0x60] sm:$0xff] (!%p11864_p5)   ;;  %v16500_v48 = vld [vmem:[#allocation11 + $0x68] sm:$0xff] (!%p11864_p5)   ;;  %v11880_v12 = vsub.s32 (!%p11864_p5), 1, %v11875_v2  ;;  %v11888_v28 = vsub.s32 (!%p11864_p5), 3, %v11875_v2  ;;  %v11876_v58 = vsub.s32 (!%p11864_p5), 0, %v11875_v2 }
 0x865   : > { %14188 = vmatprep.subr.bf16.mxu1 (!%p11864_p5), %v16485_v40  ;;  %v16493_v35 = vld [vmem:[#allocation11 + $0xd8] sm:$0xff] (!%p11864_p5)   ;;  %v16497_v8 = vld [vmem:[#allocation11 + $0xe0] sm:$0xff] (!%p11864_p5)   ;;  %v16501_v54 = vld [vmem:[#allocation11 + $0xe8] sm:$0xff] (!%p11864_p5)   ;;  %v11884_v26 = vsub.s32 (!%p11864_p5), 2, %v11875_v2 }
 0x866   : > { %v16494_v5 = vld [vmem:[#allocation11 + $0x18] sm:$0xff] (!%p11864_p5)   ;;  %v16498_v50 = vld [vmem:[#allocation11 + $0x20] sm:$0xff] (!%p11864_p5)   ;;  %v16502_v55 = vld [vmem:[#allocation11 + $0x28] sm:$0xff] (!%p11864_p5)  }
 0x867   : > { %14167 = vmatpush3.bf16.msra.mxu0 (!%p11864_p5), %v16486_v41  ;;  %v16495_v44 = vld [vmem:[#allocation11 + $0x98] sm:$0xff] (!%p11864_p5)   ;;  %v16499_v52 = vld [vmem:[#allocation11 + $0xa0] sm:$0xff] (!%p11864_p5)   ;;  %v16503_v56 = vld [vmem:[#allocation11 + $0xa8] sm:$0xff] (!%p11864_p5)  }
 0x868   : > { %14189 = vmatpush3.bf16.msra.mxu1 %v16487_v37  ;;  %14168 = vmatprep.subr.bf16.mxu0 %v16488_v31  ;;  %v16504_v32 = vld [vmem:[#allocation11 + $0x70] sm:$0xff]   ;;  %v16508_v21 = vld [vmem:[#allocation11 + $0x78] sm:$0xff]   ;;  %v11871_v16 = vld [vmem:[#allocation3 + $0x18] sm:$0xff] }
 0x869   : > { %14190 = vmatprep.subr.bf16.mxu1 %v16489_v47  ;;  %v16505_v59 = vld [vmem:[#allocation11 + $0xf0] sm:$0xff]   ;;  %v16509_v4 = vld [vmem:[#allocation11 + $0xf8] sm:$0xff]   ;;  %v13883_v15 = vld [vmem:[#allocation12] ss:$0 sm:$0xff] }
 0x86a   : > { %v16506_v0 = vld [vmem:[#allocation11 + $0x30] sm:$0xff]   ;;  %v16510_v36 = vld [vmem:[#allocation11 + $0x38] sm:$0xff]  }
 0x86b   : > { %14169 = vmatpush3.bf16.msra.mxu0 %v16490_v24  ;;  %v16507_v3 = vld [vmem:[#allocation11 + $0xb0] sm:$0xff]   ;;  %v16511_v27 = vld [vmem:[#allocation11 + $0xb8] sm:$0xff]  }
 0x86c   : > { %14191 = vmatpush3.bf16.msra.mxu1 %v16491_v25  ;;  %14170 = vmatprep.subr.bf16.mxu0 %v16492_v1  ;;  %v11869_v60 = vld [vmem:[#allocation3 + $0x8] sm:$0xff]  ;;  %v11868_v10 = vld [vmem:[#allocation3] sm:$0xff]  ;;  %v11870_v38 = vld [vmem:[#allocation3 + $0x10] sm:$0xff] }
 0x86d   : > { %14192 = vmatprep.subr.bf16.mxu1 %v16493_v35  ;;  %v11872_v9 = vld [vmem:[#allocation9] sm:$0xf] }
 0x86e   : > { %v11881_v6 = vrot.slane %v11872_v9, %v11880_v12  ;;  %v11889_v7 = vrot.slane %v11872_v9, %v11888_v28  ;;  %v11877_v11 = vrot.slane %v11872_v9, %v11876_v58  ;;  %v11885_v39 = vrot.slane %v11872_v9, %v11884_v26 }
 0x86f   : > { %14171 = vmatpush3.bf16.msra.mxu0 %v16494_v5 }
 0x870   : > { %14193 = vmatpush3.bf16.msra.mxu1 %v16495_v44  ;;  %14172 = vmatprep.subr.bf16.mxu0 %v16496_v46  ;;  %v11895_v19 = vadd.f32 %v11881_v6, %v11869_v60  ;;  %v11897_v13 = vadd.f32 %v11889_v7, %v11871_v16  ;;  %v11894_v14 = vadd.f32 %v11877_v11, %v11868_v10 }
 0x871   : > { %14194 = vmatprep.subr.bf16.mxu1 %v16497_v8  ;;  %v11896_v18 = vadd.f32 %v11885_v39, %v11870_v38 }
 0x872   : > { %v11899_v22 = vmax.f32 %v11895_v19, 0.0  ;;  %v11901_v61 = vmax.f32 %v11897_v13, 0.0  ;;  %v11898_v62 = vmax.f32 %v11894_v14, 0.0 }
 0x873   : > { %14173 = vmatpush3.bf16.msra.mxu0 %v16498_v50  ;;  %v11900_v17 = vmax.f32 %v11896_v18, 0.0 }
 0x874   : > { %14195 = vmatpush3.bf16.msra.mxu1 %v16499_v52  ;;  %14174 = vmatprep.subr.bf16.mxu0 %v16500_v48  ;;  %v11903_v57 = vpack.c.bf16 %v11899_v22, %v11899_v22  ;;  %v11905_v23 = vpack.c.bf16 %v11901_v61, %v11901_v61  ;;  %v11902_v20 = vpack.c.bf16 %v11898_v62, %v11898_v62 }
 0x875   : > { %14196 = vmatprep.subr.bf16.mxu1 %v16501_v54  ;;  %v11904_v30 = vpack.c.bf16 %v11900_v17, %v11900_v17 }
 0x876   : > { %12201 = vmatprep.mubr.bf16.mxu0 %v11903_v57  ;;  %12241 = vmatprep.mubr.bf16.mxu1 %v11905_v23 }
 0x877   : > { %14175 = vmatpush3.bf16.msra.mxu0 %v16502_v55 }
 0x878   : > { %14197 = vmatpush3.bf16.msra.mxu1 %v16503_v56  ;;  %14176 = vmatprep.subr.bf16.mxu0 %v16504_v32 }
 0x879   : > { %14198 = vmatprep.subr.bf16.mxu1 %v16505_v59 }
 0x87b   : > { %14177 = vmatpush3.bf16.msra.mxu0 %v16506_v0 }
 0x87c   : > { %14199 = vmatpush3.bf16.msra.mxu1 %v16507_v3  ;;  %14178 = vmatprep.subr.bf16.mxu0 %v16508_v21 }
 0x87d   : > { %14200 = vmatprep.subr.bf16.mxu1 %v16509_v4 }
 0x87f   : > { %14179 = vmatpush3.bf16.msra.mxu0 %v16510_v36 }
 0x880   : > { %14201 = vmatpush3.bf16.msra.mxu1 %v16511_v27 }
 0x882   : > { %12202 = vmatmul.mubr.bf16.vlgmr.msra.gmra.mrb[0].mxu0 %v11902_v20 }
 0x883   : > { %12242 = vmatmul.mubr.bf16.vlgmr.msra.gmra.mrb[0].mxu1 %v11904_v30 }
 0x955   : > { %v14180_v42 = vpop.f32.mrb[0].mxu0 }
 0x956   : > { %v14202_v63 = vpop.f32.mrb[0].mxu1  ;;  %v14181_v34 = vpop.f32.mrb[1].mxu0 }
 0x957   : > { %v14203_v43 = vpop.f32.mrb[1].mxu1  ;;  %v14182_v29 = vadd.f32 %v14181_v34, %v14180_v42  ;;  %v14183_v53 = vpop.f32.mrb[2].mxu0 }
 0x958   : > { %v14204_v49 = vadd.f32 %v14203_v43, %v14202_v63  ;;  %v14205_v33 = vpop.f32.mrb[2].mxu1  ;;  %v14184_v45 = vpop.f32.mrb[3].mxu0 }
 0x959   : > { %v14206_v40 = vpop.f32.mrb[3].mxu1  ;;  %v12204_v41 = vadd.f32 %v14182_v29, %v13883_v15 }
 0x95b   : > { %v12244_v37 = vadd.f32 %v14204_v49, %v12204_v41 }
 0x95d   : > { %12249 = vst [vmem:[%s19106_s4] sm:$0xff] %v12244_v37 }
 0x95e PF: > { %s19107_s7 = sld [smem:[#allocation22_spill]]  ;;  %s19108_s24 = sld [smem:[#allocation18_spill]] }
 0x95f   : > { %s19109_s25 = sld [smem:[#allocation19_spill]]  ;;  %s19110_s26 = sld [smem:[#allocation27_spill]] }
 0x960   : > { %s19111_s19 = sld [smem:[#allocation28_spill]]  ;;  %s19112_s15 = sld [smem:[#allocation24_spill]] }
 0x961   : > { %s19113_s12 = sld [smem:[#allocation25_spill]]  ;;  %s19114_s27 = smov %s16764_s28 }
 0x962   : > { %s19115_s28 = smov %s16768_s29  ;;  %s19117_s30 = smov %s16780_s9 }
 0x963   : > { %s19118_s8 = smov %s16784_s10 }
 0x964   : > { %s25_s11 = sadd.s32 1, %s19107_s7  }
 0x965   : > { %p22_p11 = scmp.ge.s32.totalorder %s25_s11, 6  }
 0x966   : > { %s19116_s29 = smov %s19111_s19  ;;  %s19119_s9 = smov %s19112_s15 }
 0x967   : > { %s19120_s10 = smov %s19113_s12  ;;  %24 = sbr.rel (!%p22_p11) target bundleno = 16 (0x10), region = 139 }
 0x96e   :  { %12261 = vsyncpa [#allocation5], 1 }
 0x96f   :  { %12263 = vsyncpa [#allocation5 + $0x1], 1 }
 0x970   :  { %12264 = vsyncpa [#allocation7], 1 }
 0x971   :  { %12266 = vsyncpa [#allocation7 + $0x1], 1 }
 0x972   :  { %12267 = vsyncpa [#allocation10], 1 }
 0x973   :  { %12268 = vsyncpa [#allocation13], 1 }

</bundles_post_ra>
